<compile_context>
chip_gen: v5e
topology: v5e:2x2
jax: 0.10.0
libtpu: 0.0.40
codegen_flags: <defaults>
</compile_context>

<pallas_src>
import math
from functools import partial

import numpy as np
import jax
import jax.numpy as jnp
from jax.experimental import pallas as pl
from jax.experimental.pallas import tpu as pltpu

LN_EPS = 1e-5
SEQ_ALIGN = 128                 # pad the time axis to a multiple of this
ACT_DTYPE = jnp.bfloat16        # inter-kernel (HBM) activation dtype


# ----------------------------- in-kernel helpers -----------------------------

def _round_up(n, m):
    return ((n + m - 1) // m) * m


def _gelu_exact(x):
    # matches torch.nn.functional.gelu (erf form), i.e. HF "gelu"
    return 0.5 * x * (1.0 + jax.lax.erf(x * (1.0 / math.sqrt(2.0))))


def _layer_norm(x, gamma, beta, eps=LN_EPS):
    mu = jnp.mean(x, axis=-1, keepdims=True)
    var = jnp.mean(jnp.square(x - mu), axis=-1, keepdims=True)
    return (x - mu) * jax.lax.rsqrt(var + eps) * gamma + beta


def _weight_spec(shape, index_map):
    """BlockSpec for grid-invariant operands (weights / biases).

    Single-buffered when pipeline_mode is supported, so constant weights do not
    get a useless second pipeline buffer in VMEM.
    """
    if hasattr(pl, "Buffered"):
        try:
            return pl.BlockSpec(shape, index_map,
                                pipeline_mode=pl.Buffered(buffer_count=1))
        except Exception:  # older Pallas without pipeline_mode support
            pass
    return pl.BlockSpec(shape, index_map)


def _vmem_capacity_bytes():
    try:
        info = pltpu.get_tpu_info()
        cap = int(getattr(info, "vmem_capacity_bytes", 0))
        if cap > 0:
            return cap
    except Exception:
        pass
    return 128 << 20          # v5e/v6e default if the query is unavailable


def _cparams(dim_sem, need_bytes):
    """Generation-aware scoped-VMEM request sized from the live-buffer estimate."""
    cap = _vmem_capacity_bytes()
    if cap <= (64 << 20):                       # v7x: 64 MiB per TC
        hard = int(cap * 0.80)                  # ~51 MiB: leave headroom
    else:                                       # v5e / v6e: 128 MiB
        hard = min(int(cap * 0.82), 112 << 20)  # ~105 MiB
    hard = max(hard, 32 << 20)
    want = int(need_bytes) + (6 << 20)          # margin for Mosaic internal scratch
    limit = int(min(max(want, 32 << 20), hard))
    return pltpu.CompilerParams(dimension_semantics=dim_sem,
                                vmem_limit_bytes=limit)


def _choose_t_tile(t_pad, max_tile=512):
    # t_pad is always a multiple of SEQ_ALIGN (128)
    for tt in (512, 256, 128):
        if tt <= max_tile and t_pad % tt == 0:
            return tt
    return min(t_pad, 128)


# --------------------- positional conv embedding + residual -------------------

def _pos_conv_kernel(xpad_ref, w_ref, b_ref, o_ref, *, tile, kernel_size,
                     groups, pad):
    t0 = pl.multiple_of(pl.program_id(1) * tile, tile)
    # halo read: output rows [t0, t0+tile) need padded-input rows [t0, t0+tile+K-1)
    xp = xpad_ref[0, pl.ds(t0, tile + 2 * pad), :]            # (tile+2*pad, H)
    hidden = xp.shape[-1]
    cg = hidden // groups
    xb = xp.astype(jnp.bfloat16)                              # bf16 taps (no f32 slab)
    xres = xp[pad:pad + tile, :].astype(jnp.float32)          # residual rows (f32 math)
    for g in range(groups):                                   # grouped conv stays grouped
        lo = g * cg
        # bf16 im2col over the K taps of this group only:
        # (tile, K*cg) @ (K*cg, cg) -> (tile, cg), f32 accumulate on the MXU
        xg = jnp.concatenate(
            [xb[k:k + tile, lo:lo + cg] for k in range(kernel_size)], axis=-1)
        conv = jnp.dot(xg, w_ref[g], preferred_element_type=jnp.float32)
        conv = conv + b_ref[0, lo:lo + cg]
        # HubertSamePadLayer trim (even kernel) is implicit: only `tile` outputs
        # starting at t0 are produced.  GELU + residual, per-group slice write
        # (no full-(tile,H) concat; only one group's output stays live).
        o_ref[0, :, lo:lo + cg] = (xres[:, lo:lo + cg]
                                   + _gelu_exact(conv)).astype(o_ref.dtype)


def pos_conv_embed_add(x, w_packed, bias, kernel_size, groups):
    B, T_pad, H = x.shape
    pad = kernel_size // 2
    x_cp = jnp.pad(x, ((0, 0), (pad, pad), (0, 0)))
    Tp = T_pad + 2 * pad
    tile = _choose_t_tile(T_pad, max_tile=256)
    G, KC, cg = w_packed.shape
    ab = jnp.dtype(x.dtype).itemsize
    need = (Tp * H * ab * 2                      # padded input block (double-buffered)
            + tile * H * ab * 2                  # output block
            + w_packed.nbytes + bias.nbytes      # weights (single-buffered)
            + (tile + 2 * pad) * H * (ab + 2)    # local slice + bf16 copy
            + tile * H * 4                       # f32 residual rows
            + tile * KC * 2 + tile * cg * 4)     # one group's im2col + conv output
    return pl.pallas_call(
        partial(_pos_conv_kernel, tile=tile, kernel_size=kernel_size,
                groups=groups, pad=pad),
        out_shape=jax.ShapeDtypeStruct((B, T_pad, H), x.dtype),
        grid=(B, T_pad // tile),
        in_specs=[
            pl.BlockSpec((1, Tp, H), lambda b, t: (b, 0, 0)),
            _weight_spec((G, KC, cg), lambda b, t: (0, 0, 0)),
            _weight_spec((1, H), lambda b, t: (0, 0)),
        ],
        out_specs=pl.BlockSpec((1, tile, H), lambda b, t: (b, t, 0)),
        compiler_params=_cparams(("parallel", "parallel"), need),
    )(x_cp, w_packed, bias)


# ------------------------- attention block (pre-LN) ---------------------------

def _attn_block_kernel(x_ref, ln_g_ref, ln_b_ref, wq_ref, bq_ref, wk_ref, wv_ref,
                       bv_ref, wo_ref, bo_ref, o_ref, k_sc, v_sc, ctx_sc,
                       *, num_heads, tq, t_real, causal):
    t_pad, hidden = x_ref.shape[1], x_ref.shape[2]
    hd = hidden // num_heads
    qi = pl.program_id(1)

    # K/V for the whole (padded) sequence: computed once per batch element into
    # bf16 VMEM scratch and reused across the q tiles of that batch.
    @pl.when(qi == 0)
    def _():
        h_full = _layer_norm(x_ref[0].astype(jnp.float32),
                             ln_g_ref[0], ln_b_ref[0]).astype(jnp.bfloat16)
        # k-projection bias dropped (constant per query row -> cancels in softmax)
        k_sc[...] = jnp.dot(h_full, wk_ref[...],
                            preferred_element_type=jnp.float32).astype(jnp.bfloat16)
        v_sc[...] = (jnp.dot(h_full, wv_ref[...],
                             preferred_element_type=jnp.float32)
                     + bv_ref[0]).astype(jnp.bfloat16)

    t0 = pl.multiple_of(qi * tq, tq)
    xq = x_ref[0, pl.ds(t0, tq), :].astype(jnp.float32)        # (tq, H) residual/LN in
    hq = _layer_norm(xq, ln_g_ref[0], ln_b_ref[0]).astype(jnp.bfloat16)
    # q projection with 1/sqrt(head_dim) folded into the weight & bias; one bf16 cast
    q = (jnp.dot(hq, wq_ref[...], preferred_element_type=jnp.float32)
         + bq_ref[0]).astype(jnp.bfloat16)

    # key-side mask built from small iotas (no (T,T) int32 index tensors)
    kmask = None
    col = jax.lax.broadcasted_iota(jnp.int32, (1, t_pad), 1)
    if t_real < t_pad:
        kmask = col < t_real                                   # mask padded keys
    if causal:
        row = t0 + jax.lax.broadcasted_iota(jnp.int32, (tq, 1), 0)
        cm = col <= row
        kmask = cm if kmask is None else jnp.logical_and(kmask, cm)

    qk_dims = (((1,), (1,)), ((), ()))   # q @ k.T without materializing a transpose
    for h_idx in range(num_heads):
        lo = h_idx * hd
        s = jax.lax.dot_general(q[:, lo:lo + hd], k_sc[:, lo:lo + hd], qk_dims,
                                preferred_element_type=jnp.float32)   # (tq, t_pad)
        if kmask is not None:
            s = jnp.where(kmask, s, -1e30)
        s = s - jnp.max(s, axis=-1, keepdims=True)
        p = jnp.exp(s)
        p = p * pl.reciprocal(jnp.sum(p, axis=-1, keepdims=True), approx=True)
        # per-head context written straight into the (tq, H) scratch slice
        ctx_sc[:, lo:lo + hd] = jnp.dot(p.astype(jnp.bfloat16), v_sc[:, lo:lo + hd],
                                        preferred_element_type=jnp.float32)

    attn = jnp.dot(ctx_sc[...].astype(jnp.bfloat16), wo_ref[...],
                   preferred_element_type=jnp.float32) + bo_ref[0]
    o_ref[0] = (xq + attn).astype(o_ref.dtype)


def attention_block(x, lp, num_heads, t_real, causal=False):
    B, T_pad, H = x.shape
    tq = _choose_t_tile(T_pad, max_tile=256)
    ab = jnp.dtype(x.dtype).itemsize
    w_bytes = (lp["wq_s"].nbytes + lp["wk"].nbytes + lp["wv"].nbytes + lp["wo"].nbytes
               + lp["bq_s"].nbytes + lp["bv"].nbytes + lp["bo"].nbytes
               + lp["ln1_g"].nbytes + lp["ln1_b"].nbytes)
    need = (T_pad * H * ab * 2               # x block (double-buffered)
            + tq * H * ab * 2                # output block
            + 2 * T_pad * H * 2              # K/V bf16 scratch
            + tq * H * 4                     # ctx scratch (f32)
            + w_bytes                        # weights (single-buffered)
            + T_pad * H * (4 + 2 + 4)        # q==0 transients: f32 x, bf16 h, one f32 proj
            + 2 * tq * T_pad * 4             # one head's scores + probs
            + tq * H * (4 + 2 + 2))          # xq f32, hq/q bf16
    return pl.pallas_call(
        partial(_attn_block_kernel, num_heads=num_heads, tq=tq, t_real=t_real,
                causal=causal),
        out_shape=jax.ShapeDtypeStruct((B, T_pad, H), x.dtype),
        grid=(B, T_pad // tq),
        in_specs=[
            pl.BlockSpec((1, T_pad, H), lambda b, q: (b, 0, 0)),
            _weight_spec((1, H), lambda b, q: (0, 0)),        # ln1_g
            _weight_spec((1, H), lambda b, q: (0, 0)),        # ln1_b
            _weight_spec((H, H), lambda b, q: (0, 0)),        # wq (scale folded, bf16)
            _weight_spec((1, H), lambda b, q: (0, 0)),        # bq (scale folded)
            _weight_spec((H, H), lambda b, q: (0, 0)),        # wk (bf16, bias dropped)
            _weight_spec((H, H), lambda b, q: (0, 0)),        # wv (bf16)
            _weight_spec((1, H), lambda b, q: (0, 0)),        # bv
            _weight_spec((H, H), lambda b, q: (0, 0)),        # wo (bf16)
            _weight_spec((1, H), lambda b, q: (0, 0)),        # bo
        ],
        out_specs=pl.BlockSpec((1, tq, H), lambda b, q: (b, q, 0)),
        scratch_shapes=[
            pltpu.VMEM((T_pad, H), jnp.bfloat16),   # K (whole seq, once per batch)
            pltpu.VMEM((T_pad, H), jnp.bfloat16),   # V
            pltpu.VMEM((tq, H), jnp.float32),       # per-q-tile head contexts
        ],
        # q axis must be "arbitrary": the K/V scratch written at q==0 is reused
        # across the q tiles of a batch element.
        # TODO(synk): for v7x with B==1, split the K/V projection into its own
        # pallas_call so both grid axes can be "parallel" across the 2 cores.
        compiler_params=_cparams(("parallel", "arbitrary"), need),
    )(x, lp["ln1_g"], lp["ln1_b"], lp["wq_s"], lp["bq_s"], lp["wk"], lp["wv"],
      lp["bv"], lp["wo"], lp["bo"])


# --------------------------- feed-forward block (pre-LN) ----------------------

def _ffn_block_kernel(x_ref, ln_g_ref, ln_b_ref, w1_ref, b1_ref, w2_ref, b2_ref,
                      o_ref):
    x = x_ref[0].astype(jnp.float32)                      # (tt, H)
    h = _layer_norm(x, ln_g_ref[0], ln_b_ref[0]).astype(jnp.bfloat16)
    ff = jnp.dot(h, w1_ref[...], preferred_element_type=jnp.float32) + b1_ref[0]
    ff = _gelu_exact(ff).astype(jnp.bfloat16)
    # TODO(synk): tile w1/w2 over the intermediate dim for HuBERT-large on v7x.
    ff = jnp.dot(ff, w2_ref[...], preferred_element_type=jnp.float32) + b2_ref[0]
    o_ref[0] = (x + ff).astype(o_ref.dtype)


def ffn_block(x, lp):
    B, T_pad, H = x.shape
    inter = lp["w1"].shape[1]
    cap = _vmem_capacity_bytes()
    tt = _choose_t_tile(T_pad, max_tile=256 if cap <= (64 << 20) else 512)
    ab = jnp.dtype(x.dtype).itemsize
    w_bytes = lp["w1"].nbytes + lp["w2"].nbytes + lp["b1"].nbytes + lp["b2"].nbytes
    need = (tt * H * ab * 4 + w_bytes + tt * H * 4 + tt * inter * (4 + 2) + tt * H * 4)
    return pl.pallas_call(
        _ffn_block_kernel,
        out_shape=jax.ShapeDtypeStruct((B, T_pad, H), x.dtype),
        grid=(B, T_pad // tt),
        in_specs=[
            pl.BlockSpec((1, tt, H), lambda b, t: (b, t, 0)),
            _weight_spec((1, H), lambda b, t: (0, 0)),        # ln2_g
            _weight_spec((1, H), lambda b, t: (0, 0)),        # ln2_b
            _weight_spec((H, inter), lambda b, t: (0, 0)),    # w1 (bf16)
            _weight_spec((1, inter), lambda b, t: (0, 0)),    # b1
            _weight_spec((inter, H), lambda b, t: (0, 0)),    # w2 (bf16)
            _weight_spec((1, H), lambda b, t: (0, 0)),        # b2
        ],
        out_specs=pl.BlockSpec((1, tt, H), lambda b, t: (b, t, 0)),
        compiler_params=_cparams(("parallel", "parallel"), need),
    )(x, lp["ln2_g"], lp["ln2_b"], lp["w1"], lp["b1"], lp["w2"], lp["b2"])


# ------------------------------ final layer norm ------------------------------

def _layer_norm_kernel(x_ref, g_ref, b_ref, o_ref):
    o_ref[0] = _layer_norm(x_ref[0].astype(jnp.float32),
                           g_ref[0], b_ref[0]).astype(o_ref.dtype)


def final_layer_norm(x, gamma, beta, out_dtype):
    B, T_pad, H = x.shape
    tt = _choose_t_tile(T_pad, max_tile=512)
    ab = jnp.dtype(x.dtype).itemsize
    ob = jnp.dtype(out_dtype).itemsize
    need = tt * H * (ab * 2 + ob * 2 + 4) + gamma.nbytes + beta.nbytes
    return pl.pallas_call(
        _layer_norm_kernel,
        out_shape=jax.ShapeDtypeStruct((B, T_pad, H), out_dtype),
        grid=(B, T_pad // tt),
        in_specs=[
            pl.BlockSpec((1, tt, H), lambda b, t: (b, t, 0)),
            _weight_spec((1, H), lambda b, t: (0, 0)),
            _weight_spec((1, H), lambda b, t: (0, 0)),
        ],
        out_specs=pl.BlockSpec((1, tt, H), lambda b, t: (b, t, 0)),
        compiler_params=_cparams(("parallel", "parallel"), need),
    )(x, gamma, beta)


# ------------------------------ top-level forward ------------------------------

def normalize_output_layer(output_layer, num_layers):
    if output_layer is not None:
        if isinstance(output_layer, float):
            output_layer = round(output_layer * num_layers)
        if output_layer < 0:
            output_layer += num_layers
        if not 0 <= output_layer < num_layers:
            raise ValueError(
                f"output_layer={output_layer} is outside the range of available layers")
    return output_layer


def hubert_encoder_stable_layer_norm(x, params, *, num_heads, kernel_size, groups,
                                     causal=False, output_layer=None,
                                     act_dtype=ACT_DTYPE):
    # dropout layers are identity (eval mode)
    B, T, H = x.shape
    T_pad = _round_up(T, SEQ_ALIGN)
    h = x.astype(act_dtype)                    # bf16 inter-kernel activation stream
    if T_pad != T:
        # zero-pad the time axis: the conv zero-padding is unchanged, padded keys
        # are masked inside attention, and padded rows are sliced off at the end.
        h = jnp.pad(h, ((0, 0), (0, T_pad - T), (0, 0)))
    h = pos_conv_embed_add(h, params["conv_wp"], params["conv_b"], kernel_size, groups)
    out_idx = normalize_output_layer(output_layer, len(params["layers"]))
    for i, lp in enumerate(params["layers"]):
        h = attention_block(h, lp, num_heads, t_real=T, causal=causal)
        h = ffn_block(h, lp)
        if out_idx is not None and i == out_idx:
            break
    out = final_layer_norm(h, params["ln_g"], params["ln_b"], out_dtype=x.dtype)
    return out[:, :T, :] if T_pad != T else out


# ----------------------------- deterministic params ----------------------------

def init_params(key, hidden, intermediate, num_layers, num_heads, kernel_size, groups):
    cg = hidden // groups
    hd = hidden // num_heads
    scale = 1.0 / math.sqrt(hd)
    keys = jax.random.split(key, 4 + num_layers)

    def nrm(k, shape, s=0.05):
        return jax.random.normal(k, shape, jnp.float32) * s

    # grouped conv weight in PyTorch Conv1d layout (out=H, in_per_group=cg, K);
    # weight_norm g*v/||v|| is assumed pre-folded into this effective weight.
    conv_w = np.asarray(nrm(keys[0], (hidden, cg, kernel_size)))
    conv_b = nrm(keys[1], (1, hidden))
    # per-group im2col weights: wp[g, k*cg + ci, d] = conv_w[g*cg + d, ci, k]
    wp = np.zeros((groups, kernel_size * cg, cg), np.float32)
    for g in range(groups):
        for d in range(cg):
            wp[g, :, d] = conv_w[g * cg + d].T.reshape(-1)

    layers = []
    for li in range(num_layers):
        lk = jax.random.split(keys[4 + li], 16)
        wq = nrm(lk[2], (hidden, hidden)).astype(jnp.bfloat16)
        bq = nrm(lk[3], (1, hidden))
        wk = nrm(lk[4], (hidden, hidden)).astype(jnp.bfloat16)
        bk = nrm(lk[5], (1, hidden))
        wv = nrm(lk[6], (hidden, hidden)).astype(jnp.bfloat16)
        bv = nrm(lk[7], (1, hidden))
        layers.append({
            "ln1_g": 1.0 + nrm(lk[0], (1, hidden)),
            "ln1_b": nrm(lk[1], (1, hidden)),
            # logical (reference) weights, stored as (in, out), bf16
            "wq": wq, "bq": bq, "wk": wk, "bk": bk, "wv": wv, "bv": bv,
            # kernel-side packed forms: 1/sqrt(head_dim) folded into the q
            # projection; the k-projection bias is dropped (softmax-invariant).
            "wq_s": (wq.astype(jnp.float32) * scale).astype(jnp.bfloat16),
            "bq_s": bq * scale,
            "wo": nrm(lk[8], (hidden, hidden)).astype(jnp.bfloat16),
            "bo": nrm(lk[9], (1, hidden)),
            "ln2_g": 1.0 + nrm(lk[10], (1, hidden)),
            "ln2_b": nrm(lk[11], (1, hidden)),
            "w1": nrm(lk[12], (hidden, intermediate)).astype(jnp.bfloat16),
            "b1": nrm(lk[13], (1, intermediate)),
            "w2": nrm(lk[14], (intermediate, hidden)).astype(jnp.bfloat16),
            "b2": nrm(lk[15], (1, hidden)),
        })

    return {
        "conv_w": jnp.asarray(conv_w).astype(jnp.bfloat16),   # reference (O, I/g, K)
        "conv_wp": jnp.asarray(wp).astype(jnp.bfloat16),      # kernel (G, K*cg, cg)
        "conv_b": conv_b,
        "layers": layers,
        "ln_g": 1.0 + nrm(keys[2], (1, hidden)),
        "ln_b": nrm(keys[3], (1, hidden)),
    }


# ------------------------------- pure-JAX reference ----------------------------

def _ref_pos_conv(x, conv_w, conv_b, kernel_size, groups):
    # x: (B, T, H) f32 ; conv_w: (H, cg, K) ; conv_b: (H,)
    xl = jnp.transpose(x, (0, 2, 1))                          # (B, H, T)
    y = jax.lax.conv_general_dilated(
        xl, conv_w.astype(jnp.float32), window_strides=(1,),
        padding=[(kernel_size // 2, kernel_size // 2)],
        dimension_numbers=("NCH", "OIH", "NCH"),
        feature_group_count=groups)
    if kernel_size % 2 == 0:                                  # HubertSamePadLayer
        y = y[:, :, :-1]
    y = y + conv_b[:, None]
    return jnp.transpose(y, (0, 2, 1))


def reference_forward(x, params, *, num_heads, kernel_size, groups, causal=False,
                      output_layer=None):
    B, T, H = x.shape
    conv = _ref_pos_conv(x, params["conv_w"], params["conv_b"][0], kernel_size, groups)
    h = x + _gelu_exact(conv)

    def f32(a):
        return a.astype(jnp.float32)

    hd = H // num_heads
    out_idx = normalize_output_layer(output_layer, len(params["layers"]))
    for i, lp in enumerate(params["layers"]):
        r = h
        y = _layer_norm(h, lp["ln1_g"][0], lp["ln1_b"][0])
        q = y @ f32(lp["wq"]) + lp["bq"][0]
        k_ = y @ f32(lp["wk"]) + lp["bk"][0]
        v = y @ f32(lp["wv"]) + lp["bv"][0]
        q = q.reshape(B, T, num_heads, hd).transpose(0, 2, 1, 3)
        k_ = k_.reshape(B, T, num_heads, hd).transpose(0, 2, 1, 3)
        v = v.reshape(B, T, num_heads, hd).transpose(0, 2, 1, 3)
        s = jnp.einsum("bhqd,bhkd->bhqk", q, k_) / math.sqrt(hd)
        if causal:
            mask = jnp.tril(jnp.ones((T, T), bool))
            s = jnp.where(mask, s, -1e30)
        p = jax.nn.softmax(s, axis=-1)
        ctx = jnp.einsum("bhqk,bhkd->bhqd", p, v).transpose(0, 2, 1, 3).reshape(B, T, H)
        h = r + (ctx @ f32(lp["wo"]) + lp["bo"][0])
        y2 = _layer_norm(h, lp["ln2_g"][0], lp["ln2_b"][0])
        ff = _gelu_exact(y2 @ f32(lp["w1"]) + lp["b1"][0]) @ f32(lp["w2"]) + lp["b2"][0]
        h = h + ff
        if out_idx is not None and i == out_idx:
            break
    return _layer_norm(h, params["ln_g"][0], params["ln_b"][0])


# ------------------------------------ main -------------------------------------

if __name__ == "__main__":
    B, T, H, INTER = 2, 8, 32, 64
    num_layers, num_heads = 2, 4
    kernel_size, groups = 16, 4   # num_conv_pos_embeddings (even -> same-pad trim), groups

    key = jax.random.PRNGKey(0)
    pkey, xkey = jax.random.split(key)
    params = init_params(pkey, H, INTER, num_layers, num_heads, kernel_size, groups)
    x = jax.random.normal(xkey, (B, T, H), jnp.float32)

    out = hubert_encoder_stable_layer_norm(
        x, params, num_heads=num_heads, kernel_size=kernel_size, groups=groups,
        causal=False)
    out = jax.block_until_ready(out)

    ref = reference_forward(x, params, num_heads=num_heads,
                            kernel_size=kernel_size, groups=groups)
    # bf16 matmul inputs / bf16 activation stream (f32 accumulate + f32 LN/softmax)
    # vs. the f32 reference math
    np.testing.assert_allclose(np.asarray(out), np.asarray(ref),
                               rtol=5e-2, atol=3e-2)
    assert out.shape == (B, T, H)
    print("KERNEL_OK")
</pallas_src>

<mosaic_0001>
module attributes {stable_mosaic.version = 11 : i64} {
  func.func @_pos_conv_kernel(%arg0: i32, %arg1: i32, %arg2: memref<1x144x32xbf16, #tpu.memory_space<vmem>>, %arg3: memref<4x128x8xbf16, #tpu.memory_space<vmem>>, %arg4: memref<1x32xf32, #tpu.memory_space<vmem>>, %arg5: memref<1x128x32xbf16, #tpu.memory_space<vmem>>) attributes {dimension_semantics = [#tpu.dimension_semantics<parallel>, #tpu.dimension_semantics<parallel>], iteration_bounds = array<i64: 2, 1>, scalar_prefetch = 0 : i64, scratch_operands = 0 : i64, tpu.core_type = #tpu.core_type<tc>, window_params = [{transform_indices = @transform_0, window_bounds = array<i64: 1, 144, 32>}, {pipeline_mode = #tpu.pipeline_mode<synchronous>, transform_indices = @transform_1, window_bounds = array<i64: 4, 128, 8>}, {pipeline_mode = #tpu.pipeline_mode<synchronous>, transform_indices = @transform_2, window_bounds = array<i64: 1, 32>}, {transform_indices = @transform_3, window_bounds = array<i64: 1, 128, 32>}]} {
    %c128_i32 = arith.constant 128 : i32
    %0 = arith.muli %arg1, %c128_i32 : i32
    %1 = tpu.assume_multiple %0, 128 : i32
    %c0 = arith.constant 0 : index
    %2 = arith.index_cast %1 : i32 to index
    %c0_0 = arith.constant 0 : index
    %3 = vector.load %arg2[%c0, %2, %c0_0] : memref<1x144x32xbf16, #tpu.memory_space<vmem>>, vector<1x144x32xbf16>
    %4 = vector.shape_cast %3 : vector<1x144x32xbf16> to vector<144x32xbf16>
    %5 = vector.extract_strided_slice %4 {offsets = [8, 0], sizes = [128, 32], strides = [1, 1]} : vector<144x32xbf16> to vector<128x32xbf16>
    %6 = arith.extf %5 : vector<128x32xbf16> to vector<128x32xf32>
    %7 = vector.extract_strided_slice %4 {offsets = [0, 0], sizes = [128, 8], strides = [1, 1]} : vector<144x32xbf16> to vector<128x8xbf16>
    %8 = vector.extract_strided_slice %4 {offsets = [1, 0], sizes = [128, 8], strides = [1, 1]} : vector<144x32xbf16> to vector<128x8xbf16>
    %9 = vector.extract_strided_slice %4 {offsets = [2, 0], sizes = [128, 8], strides = [1, 1]} : vector<144x32xbf16> to vector<128x8xbf16>
    %10 = vector.extract_strided_slice %4 {offsets = [3, 0], sizes = [128, 8], strides = [1, 1]} : vector<144x32xbf16> to vector<128x8xbf16>
    %11 = vector.extract_strided_slice %4 {offsets = [4, 0], sizes = [128, 8], strides = [1, 1]} : vector<144x32xbf16> to vector<128x8xbf16>
    %12 = vector.extract_strided_slice %4 {offsets = [5, 0], sizes = [128, 8], strides = [1, 1]} : vector<144x32xbf16> to vector<128x8xbf16>
    %13 = vector.extract_strided_slice %4 {offsets = [6, 0], sizes = [128, 8], strides = [1, 1]} : vector<144x32xbf16> to vector<128x8xbf16>
    %14 = vector.extract_strided_slice %4 {offsets = [7, 0], sizes = [128, 8], strides = [1, 1]} : vector<144x32xbf16> to vector<128x8xbf16>
    %15 = vector.extract_strided_slice %4 {offsets = [8, 0], sizes = [128, 8], strides = [1, 1]} : vector<144x32xbf16> to vector<128x8xbf16>
    %16 = vector.extract_strided_slice %4 {offsets = [9, 0], sizes = [128, 8], strides = [1, 1]} : vector<144x32xbf16> to vector<128x8xbf16>
    %17 = vector.extract_strided_slice %4 {offsets = [10, 0], sizes = [128, 8], strides = [1, 1]} : vector<144x32xbf16> to vector<128x8xbf16>
    %18 = vector.extract_strided_slice %4 {offsets = [11, 0], sizes = [128, 8], strides = [1, 1]} : vector<144x32xbf16> to vector<128x8xbf16>
    %19 = vector.extract_strided_slice %4 {offsets = [12, 0], sizes = [128, 8], strides = [1, 1]} : vector<144x32xbf16> to vector<128x8xbf16>
    %20 = vector.extract_strided_slice %4 {offsets = [13, 0], sizes = [128, 8], strides = [1, 1]} : vector<144x32xbf16> to vector<128x8xbf16>
    %21 = vector.extract_strided_slice %4 {offsets = [14, 0], sizes = [128, 8], strides = [1, 1]} : vector<144x32xbf16> to vector<128x8xbf16>
    %22 = vector.extract_strided_slice %4 {offsets = [15, 0], sizes = [128, 8], strides = [1, 1]} : vector<144x32xbf16> to vector<128x8xbf16>
    %23 = tpu.concatenate %7, %8, %9, %10, %11, %12, %13, %14, %15, %16, %17, %18, %19, %20, %21, %22 in 1 : vector<128x8xbf16>, vector<128x8xbf16>, vector<128x8xbf16>, vector<128x8xbf16>, vector<128x8xbf16>, vector<128x8xbf16>, vector<128x8xbf16>, vector<128x8xbf16>, vector<128x8xbf16>, vector<128x8xbf16>, vector<128x8xbf16>, vector<128x8xbf16>, vector<128x8xbf16>, vector<128x8xbf16>, vector<128x8xbf16>, vector<128x8xbf16> -> vector<128x128xbf16>
    %c0_1 = arith.constant 0 : index
    %c0_2 = arith.constant 0 : index
    %c0_3 = arith.constant 0 : index
    %24 = vector.load %arg3[%c0_1, %c0_2, %c0_3] : memref<4x128x8xbf16, #tpu.memory_space<vmem>>, vector<1x128x8xbf16>
    %25 = vector.shape_cast %24 : vector<1x128x8xbf16> to vector<128x8xbf16>
    %cst = arith.constant dense<0.000000e+00> : vector<128x8xf32>
    %26 = tpu.matmul %23, %25, %cst {dimension_numbers = #tpu.dot_dimension_numbers<[1], [0], [0], [1], [0, 0, 1, 1], [], []>} : vector<128x128xbf16>, vector<128x8xbf16>, vector<128x8xf32> -> vector<128x8xf32>
    %c0_4 = arith.constant 0 : index
    %c0_5 = arith.constant 0 : index
    %27 = vector.load %arg4[%c0_4, %c0_5] : memref<1x32xf32, #tpu.memory_space<vmem>>, vector<1x8xf32>
    %28 = vector.shape_cast %27 : vector<1x8xf32> to vector<8xf32>
    %29 = vector.shape_cast %28 : vector<8xf32> to vector<1x8xf32>
    %30 = vector.broadcast %29 : vector<1x8xf32> to vector<128x8xf32>
    %31 = arith.addf %26, %30 : vector<128x8xf32>
    %32 = vector.extract_strided_slice %6 {offsets = [0, 0], sizes = [128, 8], strides = [1, 1]} : vector<128x32xf32> to vector<128x8xf32>
    %cst_6 = arith.constant 5.000000e-01 : f32
    %33 = vector.broadcast %cst_6 : f32 to vector<128x8xf32>
    %34 = arith.mulf %33, %31 : vector<128x8xf32>
    %cst_7 = arith.constant 0.707106769 : f32
    %35 = vector.broadcast %cst_7 : f32 to vector<128x8xf32>
    %36 = arith.mulf %31, %35 : vector<128x8xf32>
    %37 = math.erf %36 : vector<128x8xf32>
    %cst_8 = arith.constant 1.000000e+00 : f32
    %38 = vector.broadcast %cst_8 : f32 to vector<128x8xf32>
    %39 = arith.addf %38, %37 : vector<128x8xf32>
    %40 = arith.mulf %34, %39 : vector<128x8xf32>
    %41 = arith.addf %32, %40 : vector<128x8xf32>
    %42 = arith.truncf %41 : vector<128x8xf32> to vector<128x8xbf16>
    %c0_9 = arith.constant 0 : index
    %c0_10 = arith.constant 0 : index
    %c0_11 = arith.constant 0 : index
    %43 = vector.load %arg5[%c0_9, %c0_10, %c0_11] : memref<1x128x32xbf16, #tpu.memory_space<vmem>>, vector<1x128x8xbf16>
    %44 = vector.shape_cast %43 : vector<1x128x8xbf16> to vector<128x8xbf16>
    %45 = vector.shape_cast %42 : vector<128x8xbf16> to vector<1x128x8xbf16>
    tpu.vector_store %arg5[%c0_9, %c0_10, %c0_11], %45 {strides = array<i32>} : memref<1x128x32xbf16, #tpu.memory_space<vmem>>, vector<1x128x8xbf16>,
    %46 = vector.extract_strided_slice %4 {offsets = [0, 8], sizes = [128, 8], strides = [1, 1]} : vector<144x32xbf16> to vector<128x8xbf16>
    %47 = vector.extract_strided_slice %4 {offsets = [1, 8], sizes = [128, 8], strides = [1, 1]} : vector<144x32xbf16> to vector<128x8xbf16>
    %48 = vector.extract_strided_slice %4 {offsets = [2, 8], sizes = [128, 8], strides = [1, 1]} : vector<144x32xbf16> to vector<128x8xbf16>
    %49 = vector.extract_strided_slice %4 {offsets = [3, 8], sizes = [128, 8], strides = [1, 1]} : vector<144x32xbf16> to vector<128x8xbf16>
    %50 = vector.extract_strided_slice %4 {offsets = [4, 8], sizes = [128, 8], strides = [1, 1]} : vector<144x32xbf16> to vector<128x8xbf16>
    %51 = vector.extract_strided_slice %4 {offsets = [5, 8], sizes = [128, 8], strides = [1, 1]} : vector<144x32xbf16> to vector<128x8xbf16>
    %52 = vector.extract_strided_slice %4 {offsets = [6, 8], sizes = [128, 8], strides = [1, 1]} : vector<144x32xbf16> to vector<128x8xbf16>
    %53 = vector.extract_strided_slice %4 {offsets = [7, 8], sizes = [128, 8], strides = [1, 1]} : vector<144x32xbf16> to vector<128x8xbf16>
    %54 = vector.extract_strided_slice %4 {offsets = [8, 8], sizes = [128, 8], strides = [1, 1]} : vector<144x32xbf16> to vector<128x8xbf16>
    %55 = vector.extract_strided_slice %4 {offsets = [9, 8], sizes = [128, 8], strides = [1, 1]} : vector<144x32xbf16> to vector<128x8xbf16>
    %56 = vector.extract_strided_slice %4 {offsets = [10, 8], sizes = [128, 8], strides = [1, 1]} : vector<144x32xbf16> to vector<128x8xbf16>
    %57 = vector.extract_strided_slice %4 {offsets = [11, 8], sizes = [128, 8], strides = [1, 1]} : vector<144x32xbf16> to vector<128x8xbf16>
    %58 = vector.extract_strided_slice %4 {offsets = [12, 8], sizes = [128, 8], strides = [1, 1]} : vector<144x32xbf16> to vector<128x8xbf16>
    %59 = vector.extract_strided_slice %4 {offsets = [13, 8], sizes = [128, 8], strides = [1, 1]} : vector<144x32xbf16> to vector<128x8xbf16>
    %60 = vector.extract_strided_slice %4 {offsets = [14, 8], sizes = [128, 8], strides = [1, 1]} : vector<144x32xbf16> to vector<128x8xbf16>
    %61 = vector.extract_strided_slice %4 {offsets = [15, 8], sizes = [128, 8], strides = [1, 1]} : vector<144x32xbf16> to vector<128x8xbf16>
    %62 = tpu.concatenate %46, %47, %48, %49, %50, %51, %52, %53, %54, %55, %56, %57, %58, %59, %60, %61 in 1 : vector<128x8xbf16>, vector<128x8xbf16>, vector<128x8xbf16>, vector<128x8xbf16>, vector<128x8xbf16>, vector<128x8xbf16>, vector<128x8xbf16>, vector<128x8xbf16>, vector<128x8xbf16>, vector<128x8xbf16>, vector<128x8xbf16>, vector<128x8xbf16>, vector<128x8xbf16>, vector<128x8xbf16>, vector<128x8xbf16>, vector<128x8xbf16> -> vector<128x128xbf16>
    %c1 = arith.constant 1 : index
    %c0_12 = arith.constant 0 : index
    %c0_13 = arith.constant 0 : index
    %63 = vector.load %arg3[%c1, %c0_12, %c0_13] : memref<4x128x8xbf16, #tpu.memory_space<vmem>>, vector<1x128x8xbf16>
    %64 = vector.shape_cast %63 : vector<1x128x8xbf16> to vector<128x8xbf16>
    %cst_14 = arith.constant dense<0.000000e+00> : vector<128x8xf32>
    %65 = tpu.matmul %62, %64, %cst_14 {dimension_numbers = #tpu.dot_dimension_numbers<[1], [0], [0], [1], [0, 0, 1, 1], [], []>} : vector<128x128xbf16>, vector<128x8xbf16>, vector<128x8xf32> -> vector<128x8xf32>
    %c0_15 = arith.constant 0 : index
    %c8 = arith.constant 8 : index
    %66 = vector.load %arg4[%c0_15, %c8] : memref<1x32xf32, #tpu.memory_space<vmem>>, vector<1x8xf32>
    %67 = vector.shape_cast %66 : vector<1x8xf32> to vector<8xf32>
    %68 = vector.shape_cast %67 : vector<8xf32> to vector<1x8xf32>
    %69 = vector.broadcast %68 : vector<1x8xf32> to vector<128x8xf32>
    %70 = arith.addf %65, %69 : vector<128x8xf32>
    %71 = vector.extract_strided_slice %6 {offsets = [0, 8], sizes = [128, 8], strides = [1, 1]} : vector<128x32xf32> to vector<128x8xf32>
    %cst_16 = arith.constant 5.000000e-01 : f32
    %72 = vector.broadcast %cst_16 : f32 to vector<128x8xf32>
    %73 = arith.mulf %72, %70 : vector<128x8xf32>
    %cst_17 = arith.constant 0.707106769 : f32
    %74 = vector.broadcast %cst_17 : f32 to vector<128x8xf32>
    %75 = arith.mulf %70, %74 : vector<128x8xf32>
    %76 = math.erf %75 : vector<128x8xf32>
    %cst_18 = arith.constant 1.000000e+00 : f32
    %77 = vector.broadcast %cst_18 : f32 to vector<128x8xf32>
    %78 = arith.addf %77, %76 : vector<128x8xf32>
    %79 = arith.mulf %73, %78 : vector<128x8xf32>
    %80 = arith.addf %71, %79 : vector<128x8xf32>
    %81 = arith.truncf %80 : vector<128x8xf32> to vector<128x8xbf16>
    %c0_19 = arith.constant 0 : index
    %c0_20 = arith.constant 0 : index
    %c8_21 = arith.constant 8 : index
    %82 = vector.load %arg5[%c0_19, %c0_20, %c8_21] : memref<1x128x32xbf16, #tpu.memory_space<vmem>>, vector<1x128x8xbf16>
    %83 = vector.shape_cast %82 : vector<1x128x8xbf16> to vector<128x8xbf16>
    %84 = vector.shape_cast %81 : vector<128x8xbf16> to vector<1x128x8xbf16>
    tpu.vector_store %arg5[%c0_19, %c0_20, %c8_21], %84 {strides = array<i32>} : memref<1x128x32xbf16, #tpu.memory_space<vmem>>, vector<1x128x8xbf16>,
    %85 = vector.extract_strided_slice %4 {offsets = [0, 16], sizes = [128, 8], strides = [1, 1]} : vector<144x32xbf16> to vector<128x8xbf16>
    %86 = vector.extract_strided_slice %4 {offsets = [1, 16], sizes = [128, 8], strides = [1, 1]} : vector<144x32xbf16> to vector<128x8xbf16>
    %87 = vector.extract_strided_slice %4 {offsets = [2, 16], sizes = [128, 8], strides = [1, 1]} : vector<144x32xbf16> to vector<128x8xbf16>
    %88 = vector.extract_strided_slice %4 {offsets = [3, 16], sizes = [128, 8], strides = [1, 1]} : vector<144x32xbf16> to vector<128x8xbf16>
    %89 = vector.extract_strided_slice %4 {offsets = [4, 16], sizes = [128, 8], strides = [1, 1]} : vector<144x32xbf16> to vector<128x8xbf16>
    %90 = vector.extract_strided_slice %4 {offsets = [5, 16], sizes = [128, 8], strides = [1, 1]} : vector<144x32xbf16> to vector<128x8xbf16>
    %91 = vector.extract_strided_slice %4 {offsets = [6, 16], sizes = [128, 8], strides = [1, 1]} : vector<144x32xbf16> to vector<128x8xbf16>
    %92 = vector.extract_strided_slice %4 {offsets = [7, 16], sizes = [128, 8], strides = [1, 1]} : vector<144x32xbf16> to vector<128x8xbf16>
    %93 = vector.extract_strided_slice %4 {offsets = [8, 16], sizes = [128, 8], strides = [1, 1]} : vector<144x32xbf16> to vector<128x8xbf16>
    %94 = vector.extract_strided_slice %4 {offsets = [9, 16], sizes = [128, 8], strides = [1, 1]} : vector<144x32xbf16> to vector<128x8xbf16>
    %95 = vector.extract_strided_slice %4 {offsets = [10, 16], sizes = [128, 8], strides = [1, 1]} : vector<144x32xbf16> to vector<128x8xbf16>
    %96 = vector.extract_strided_slice %4 {offsets = [11, 16], sizes = [128, 8], strides = [1, 1]} : vector<144x32xbf16> to vector<128x8xbf16>
    %97 = vector.extract_strided_slice %4 {offsets = [12, 16], sizes = [128, 8], strides = [1, 1]} : vector<144x32xbf16> to vector<128x8xbf16>
    %98 = vector.extract_strided_slice %4 {offsets = [13, 16], sizes = [128, 8], strides = [1, 1]} : vector<144x32xbf16> to vector<128x8xbf16>
    %99 = vector.extract_strided_slice %4 {offsets = [14, 16], sizes = [128, 8], strides = [1, 1]} : vector<144x32xbf16> to vector<128x8xbf16>
    %100 = vector.extract_strided_slice %4 {offsets = [15, 16], sizes = [128, 8], strides = [1, 1]} : vector<144x32xbf16> to vector<128x8xbf16>
    %101 = tpu.concatenate %85, %86, %87, %88, %89, %90, %91, %92, %93, %94, %95, %96, %97, %98, %99, %100 in 1 : vector<128x8xbf16>, vector<128x8xbf16>, vector<128x8xbf16>, vector<128x8xbf16>, vector<128x8xbf16>, vector<128x8xbf16>, vector<128x8xbf16>, vector<128x8xbf16>, vector<128x8xbf16>, vector<128x8xbf16>, vector<128x8xbf16>, vector<128x8xbf16>, vector<128x8xbf16>, vector<128x8xbf16>, vector<128x8xbf16>, vector<128x8xbf16> -> vector<128x128xbf16>
    %c2 = arith.constant 2 : index
    %c0_22 = arith.constant 0 : index
    %c0_23 = arith.constant 0 : index
    %102 = vector.load %arg3[%c2, %c0_22, %c0_23] : memref<4x128x8xbf16, #tpu.memory_space<vmem>>, vector<1x128x8xbf16>
    %103 = vector.shape_cast %102 : vector<1x128x8xbf16> to vector<128x8xbf16>
    %cst_24 = arith.constant dense<0.000000e+00> : vector<128x8xf32>
    %104 = tpu.matmul %101, %103, %cst_24 {dimension_numbers = #tpu.dot_dimension_numbers<[1], [0], [0], [1], [0, 0, 1, 1], [], []>} : vector<128x128xbf16>, vector<128x8xbf16>, vector<128x8xf32> -> vector<128x8xf32>
    %c0_25 = arith.constant 0 : index
    %c16 = arith.constant 16 : index
    %105 = vector.load %arg4[%c0_25, %c16] : memref<1x32xf32, #tpu.memory_space<vmem>>, vector<1x8xf32>
    %106 = vector.shape_cast %105 : vector<1x8xf32> to vector<8xf32>
    %107 = vector.shape_cast %106 : vector<8xf32> to vector<1x8xf32>
    %108 = vector.broadcast %107 : vector<1x8xf32> to vector<128x8xf32>
    %109 = arith.addf %104, %108 : vector<128x8xf32>
    %110 = vector.extract_strided_slice %6 {offsets = [0, 16], sizes = [128, 8], strides = [1, 1]} : vector<128x32xf32> to vector<128x8xf32>
    %cst_26 = arith.constant 5.000000e-01 : f32
    %111 = vector.broadcast %cst_26 : f32 to vector<128x8xf32>
    %112 = arith.mulf %111, %109 : vector<128x8xf32>
    %cst_27 = arith.constant 0.707106769 : f32
    %113 = vector.broadcast %cst_27 : f32 to vector<128x8xf32>
    %114 = arith.mulf %109, %113 : vector<128x8xf32>
    %115 = math.erf %114 : vector<128x8xf32>
    %cst_28 = arith.constant 1.000000e+00 : f32
    %116 = vector.broadcast %cst_28 : f32 to vector<128x8xf32>
    %117 = arith.addf %116, %115 : vector<128x8xf32>
    %118 = arith.mulf %112, %117 : vector<128x8xf32>
    %119 = arith.addf %110, %118 : vector<128x8xf32>
    %120 = arith.truncf %119 : vector<128x8xf32> to vector<128x8xbf16>
    %c0_29 = arith.constant 0 : index
    %c0_30 = arith.constant 0 : index
    %c16_31 = arith.constant 16 : index
    %121 = vector.load %arg5[%c0_29, %c0_30, %c16_31] : memref<1x128x32xbf16, #tpu.memory_space<vmem>>, vector<1x128x8xbf16>
    %122 = vector.shape_cast %121 : vector<1x128x8xbf16> to vector<128x8xbf16>
    %123 = vector.shape_cast %120 : vector<128x8xbf16> to vector<1x128x8xbf16>
    tpu.vector_store %arg5[%c0_29, %c0_30, %c16_31], %123 {strides = array<i32>} : memref<1x128x32xbf16, #tpu.memory_space<vmem>>, vector<1x128x8xbf16>,
    %124 = vector.extract_strided_slice %4 {offsets = [0, 24], sizes = [128, 8], strides = [1, 1]} : vector<144x32xbf16> to vector<128x8xbf16>
    %125 = vector.extract_strided_slice %4 {offsets = [1, 24], sizes = [128, 8], strides = [1, 1]} : vector<144x32xbf16> to vector<128x8xbf16>
    %126 = vector.extract_strided_slice %4 {offsets = [2, 24], sizes = [128, 8], strides = [1, 1]} : vector<144x32xbf16> to vector<128x8xbf16>
    %127 = vector.extract_strided_slice %4 {offsets = [3, 24], sizes = [128, 8], strides = [1, 1]} : vector<144x32xbf16> to vector<128x8xbf16>
    %128 = vector.extract_strided_slice %4 {offsets = [4, 24], sizes = [128, 8], strides = [1, 1]} : vector<144x32xbf16> to vector<128x8xbf16>
    %129 = vector.extract_strided_slice %4 {offsets = [5, 24], sizes = [128, 8], strides = [1, 1]} : vector<144x32xbf16> to vector<128x8xbf16>
    %130 = vector.extract_strided_slice %4 {offsets = [6, 24], sizes = [128, 8], strides = [1, 1]} : vector<144x32xbf16> to vector<128x8xbf16>
    %131 = vector.extract_strided_slice %4 {offsets = [7, 24], sizes = [128, 8], strides = [1, 1]} : vector<144x32xbf16> to vector<128x8xbf16>
    %132 = vector.extract_strided_slice %4 {offsets = [8, 24], sizes = [128, 8], strides = [1, 1]} : vector<144x32xbf16> to vector<128x8xbf16>
    %133 = vector.extract_strided_slice %4 {offsets = [9, 24], sizes = [128, 8], strides = [1, 1]} : vector<144x32xbf16> to vector<128x8xbf16>
    %134 = vector.extract_strided_slice %4 {offsets = [10, 24], sizes = [128, 8], strides = [1, 1]} : vector<144x32xbf16> to vector<128x8xbf16>
    %135 = vector.extract_strided_slice %4 {offsets = [11, 24], sizes = [128, 8], strides = [1, 1]} : vector<144x32xbf16> to vector<128x8xbf16>
    %136 = vector.extract_strided_slice %4 {offsets = [12, 24], sizes = [128, 8], strides = [1, 1]} : vector<144x32xbf16> to vector<128x8xbf16>
    %137 = vector.extract_strided_slice %4 {offsets = [13, 24], sizes = [128, 8], strides = [1, 1]} : vector<144x32xbf16> to vector<128x8xbf16>
    %138 = vector.extract_strided_slice %4 {offsets = [14, 24], sizes = [128, 8], strides = [1, 1]} : vector<144x32xbf16> to vector<128x8xbf16>
    %139 = vector.extract_strided_slice %4 {offsets = [15, 24], sizes = [128, 8], strides = [1, 1]} : vector<144x32xbf16> to vector<128x8xbf16>
    %140 = tpu.concatenate %124, %125, %126, %127, %128, %129, %130, %131, %132, %133, %134, %135, %136, %137, %138, %139 in 1 : vector<128x8xbf16>, vector<128x8xbf16>, vector<128x8xbf16>, vector<128x8xbf16>, vector<128x8xbf16>, vector<128x8xbf16>, vector<128x8xbf16>, vector<128x8xbf16>, vector<128x8xbf16>, vector<128x8xbf16>, vector<128x8xbf16>, vector<128x8xbf16>, vector<128x8xbf16>, vector<128x8xbf16>, vector<128x8xbf16>, vector<128x8xbf16> -> vector<128x128xbf16>
    %c3 = arith.constant 3 : index
    %c0_32 = arith.constant 0 : index
    %c0_33 = arith.constant 0 : index
    %141 = vector.load %arg3[%c3, %c0_32, %c0_33] : memref<4x128x8xbf16, #tpu.memory_space<vmem>>, vector<1x128x8xbf16>
    %142 = vector.shape_cast %141 : vector<1x128x8xbf16> to vector<128x8xbf16>
    %cst_34 = arith.constant dense<0.000000e+00> : vector<128x8xf32>
    %143 = tpu.matmul %140, %142, %cst_34 {dimension_numbers = #tpu.dot_dimension_numbers<[1], [0], [0], [1], [0, 0, 1, 1], [], []>} : vector<128x128xbf16>, vector<128x8xbf16>, vector<128x8xf32> -> vector<128x8xf32>
    %c0_35 = arith.constant 0 : index
    %c24 = arith.constant 24 : index
    %144 = vector.load %arg4[%c0_35, %c24] : memref<1x32xf32, #tpu.memory_space<vmem>>, vector<1x8xf32>
    %145 = vector.shape_cast %144 : vector<1x8xf32> to vector<8xf32>
    %146 = vector.shape_cast %145 : vector<8xf32> to vector<1x8xf32>
    %147 = vector.broadcast %146 : vector<1x8xf32> to vector<128x8xf32>
    %148 = arith.addf %143, %147 : vector<128x8xf32>
    %149 = vector.extract_strided_slice %6 {offsets = [0, 24], sizes = [128, 8], strides = [1, 1]} : vector<128x32xf32> to vector<128x8xf32>
    %cst_36 = arith.constant 5.000000e-01 : f32
    %150 = vector.broadcast %cst_36 : f32 to vector<128x8xf32>
    %151 = arith.mulf %150, %148 : vector<128x8xf32>
    %cst_37 = arith.constant 0.707106769 : f32
    %152 = vector.broadcast %cst_37 : f32 to vector<128x8xf32>
    %153 = arith.mulf %148, %152 : vector<128x8xf32>
    %154 = math.erf %153 : vector<128x8xf32>
    %cst_38 = arith.constant 1.000000e+00 : f32
    %155 = vector.broadcast %cst_38 : f32 to vector<128x8xf32>
    %156 = arith.addf %155, %154 : vector<128x8xf32>
    %157 = arith.mulf %151, %156 : vector<128x8xf32>
    %158 = arith.addf %149, %157 : vector<128x8xf32>
    %159 = arith.truncf %158 : vector<128x8xf32> to vector<128x8xbf16>
    %c0_39 = arith.constant 0 : index
    %c0_40 = arith.constant 0 : index
    %c24_41 = arith.constant 24 : index
    %160 = vector.load %arg5[%c0_39, %c0_40, %c24_41] : memref<1x128x32xbf16, #tpu.memory_space<vmem>>, vector<1x128x8xbf16>
    %161 = vector.shape_cast %160 : vector<1x128x8xbf16> to vector<128x8xbf16>
    %162 = vector.shape_cast %159 : vector<128x8xbf16> to vector<1x128x8xbf16>
    tpu.vector_store %arg5[%c0_39, %c0_40, %c24_41], %162 {strides = array<i32>} : memref<1x128x32xbf16, #tpu.memory_space<vmem>>, vector<1x128x8xbf16>,
    return
  }
  func.func @transform_0(%arg0: i32, %arg1: i32) -> (i32, i32, i32) {
    %c0_i32 = arith.constant 0 : i32
    %c0_i32_0 = arith.constant 0 : i32
    %c0_i32_1 = arith.constant 0 : i32
    return %arg0, %c0_i32, %c0_i32_0 : i32, i32, i32
  }
  func.func @transform_1(%arg0: i32, %arg1: i32) -> (i32, i32, i32) {
    %c0_i32 = arith.constant 0 : i32
    %c0_i32_0 = arith.constant 0 : i32
    %c0_i32_1 = arith.constant 0 : i32
    %c0_i32_2 = arith.constant 0 : i32
    return %c0_i32, %c0_i32_0, %c0_i32_1 : i32, i32, i32
  }
  func.func @transform_2(%arg0: i32, %arg1: i32) -> (i32, i32) {
    %c0_i32 = arith.constant 0 : i32
    %c0_i32_0 = arith.constant 0 : i32
    %c0_i32_1 = arith.constant 0 : i32
    return %c0_i32, %c0_i32_0 : i32, i32
  }
  func.func @transform_3(%arg0: i32, %arg1: i32) -> (i32, i32, i32) {
    %c0_i32 = arith.constant 0 : i32
    %c0_i32_0 = arith.constant 0 : i32
    return %arg0, %arg1, %c0_i32 : i32, i32, i32
  }
}

</mosaic_0001>

<bundles_post_ra>
// kernel: tpu_custom_call.1
= control target key start
LH: loop header
LB: loop body
LE: loop exit
PB: predicated region body
PF: predicated region fallthrough
CT: control target
= control target key end

     0   :  { %s7032_s12 = smov 0   ;;  %s7034_s13 = smov 0   ;;  %s12759_s0 = inlined_call_operand.vmem [shape: bf16[2,144,32], index: 0, kind: input, shape index: {}]   ;;  %s12760_s1 = inlined_call_operand.vmem [shape: bf16[4,128,8], index: 1, kind: input, shape index: {}]   ;;  %s12761_s2 = inlined_call_operand.vmem [shape: f32[1,32], index: 2, kind: input, shape index: {}]   ;;  %s12762_s3 = inlined_call_operand.vmem [shape: bf16[2,128,32], index: 3, kind: output, shape index: {}]  }
   0x1   :  { %s7036_s14 = smov 0  }
   0x2 LB: > { %s25_s15 = sadd.s32 1, %s6991_s13  ;;  %p6505_p0 = scmp.ge.s32.totalorder %s6995_s14, 1  ;;  %s6995_s14 = sphi %s7036_s14, %s13_s14   ;;  %s6991_s13 = sphi %s7034_s13, %s14215_s13   ;;  %s6987_s12 = sphi %s7032_s12, %s14214_s12  }
   0x3   : > { %p27_p1 = scmp.ge.s32.totalorder %s25_s15, 2  ;;  %p151_p2 = scmp.lt.s32.totalorder %s6995_s14, 3 }
   0x5   : > { %s14217_s15 = smov (%p27_p1, %s25_s15), 0  ;;  %p152_p3 = pnand %p6505_p0, %p151_p2 }
   0x7   : > { %155 = sbr.rel (%p152_p3) target bundleno = 2612 (0xa34), region = 32 }
   0xc   : > { %p179_p4 = scmp.lt.s32.totalorder %s6987_s12, 1  ;;  %vm276_vm0 = vsmask.f32 7424  ;;  %vm361_vm1 = vcmask 1046528   ;;  %s6997_s20 = smov 8   ;;  %vm449_vm3 = vcmask 1045504  }
   0xd   : > { %s6998_s21 = smov 16   ;;  %vm395_vm2 = vsmask.f32 6400  ;;  %s6999_s22 = smov 24   ;;  %vm483_vm4 = vsmask.f32 5376 }
   0xe   : > { %s14219_s12 = smov (!%p179_p4, %s6987_s12), 1  ;;  %s7000_s23 = smov 32   ;;  %vm535_vm5 = vcmask 1044480   ;;  %vm569_vm6 = vsmask.f32 4352  ;;  %vm986_vm7 = vcmask 64512  }
   0xf   : > { %s6784_s16 = smul.u32 72, %s14219_s12  ;;  %s7001_s24 = smov 40   ;;  %vm1003_vm8 = vcmask 130048   ;;  %vm1020_vm9 = vcmask 195584   ;;  %vm1037_vm10 = vcmask 261120   ;;  %vm13061_vm11 = vcmask 326656  }
  0x10   : > { %s7002_s25 = smov 48   ;;  %s7003_s26 = smov 56   ;;  %vm1071_vm12 = vcmask 392192   ;;  %vm13066_vm13 = vcmask 457728   ;;  %vm13065_vm14 = vcmask 523264   ;;  %vm13064_vm15 = vcmask 588800  }
  0x11   : > { %s7056_s19 = scalar_lea.vmem %s12759_s0, %s6784_s16  ;;  %s7004_s27 = smov 64  }
  0x12   : > { %v7059_v0 = vld [vmem:[%s7056_s19 + $0x10] sm:$0xf]  ;;  %v7062_v1 = vld [vmem:[%s7056_s19 + $0x14] sm:$0xf]  ;;  %v7065_v2 = vld [vmem:[%s7056_s19 + $0x18] sm:$0xf] }
  0x13   : > { %v7068_v3 = vld [vmem:[%s7056_s19 + $0x1c] sm:$0xf]  ;;  %v12771_v4 = vunpack.c.l.b16 %v7059_v0  ;;  %v12774_v5 = vunpack.c.l.b16 %v7062_v1  ;;  %v12773_v6 = vunpack.c.l.b16 %v7065_v2  ;;  %v199_v7 = vld [vmem:[%s7056_s19] sm:$0xf]  ;;  %v7075_v8 = vld [vmem:[%s7056_s19 + $0x4] sm:$0xf] }
  0x14   : > { %v12770_v9 = vunpack.c.l.b16 %v7068_v3  ;;  %v7079_v10 = vld [vmem:[%s7056_s19 + $0x8] sm:$0xf]  ;;  %v7082_v11 = vld [vmem:[%s7056_s19 + $0xc] sm:$0xf]  ;;  %v249_v12 = vunpack.c.l.b16 %v199_v7  ;;  %v12776_v13 = vunpack.c.l.b16 %v7075_v8  ;;  %v7086_v14 = vld [vmem:[%s7056_s19 + $0x20] sm:$0xf] }
  0x15   : > { %v7092_v15 = vpack.c.b16 %v12774_v5, %v12771_v4  ;;  %v12775_v16 = vunpack.c.l.b16 %v7079_v10  ;;  %v12772_v17 = vunpack.c.l.b16 %v7082_v11  ;;  %v7097_v18 = vld [vmem:[%s7056_s19 + $0x24] sm:$0xf]  ;;  %v12769_v19 = vunpack.c.l.b16 %v7086_v14  ;;  %v7101_v20 = vld [vmem:[%s7056_s19 + $0x38] sm:$0xf]  ;;  %v214_v21 = vld [vmem:[%s7056_s19 + $0x3c] sm:$0xf] }
  0x16   : > { %v7108_v22 = vpack.c.b16 %v12770_v9, %v12773_v6  ;;  %v7112_v23 = vpack.c.b16 %v12776_v13, %v249_v12  ;;  %v12766_v24 = vunpack.c.l.b16 %v7097_v18  ;;  %v12763_v25 = vunpack.c.l.b16 %v7101_v20  ;;  %v215_v38 = vld [vmem:[%s7056_s19 + $0x40] sm:$0xf]  ;;  %v7169_v49 = vld [vmem:[%s7056_s19 + $0x30] sm:$0xf]  ;;  %v7178_v52 = vld [vmem:[%s7056_s19 + $0x34] sm:$0xf] }
  0x17   : > { %13083 = vst [vmem:[#allocation2_spill] sm:$0xff] %v7092_v15  ;;  %v7117_v26 = vshll.u32 %v7092_v15, 16  ;;  %v7120_v27 = vshrl.u32 %v7092_v15, 16  ;;  %v7126_v28 = vpack.c.b16 %v12772_v17, %v12775_v16  ;;  %v264_v29 = vunpack.c.l.b16 %v214_v21  ;;  %v7181_v53 = vld [vmem:[%s7056_s19 + $0x28] sm:$0xf]  ;;  %s7005_s28 = smov 72  }
  0x18   : > { %13084 = vst [vmem:[#allocation3_spill] sm:$0xff] %v7108_v22  ;;  %v7129_v30 = vshll.u32 %v7108_v22, 16  ;;  %v7132_v31 = vshrl.u32 %v7112_v23, 16  ;;  %v7135_v32 = vshll.u32 %v7112_v23, 16  ;;  %v7141_v33 = vpack.c.b16 %v12766_v24, %v12769_v19  ;;  %v7184_v54 = vld [vmem:[%s7056_s19 + $0x2c] sm:$0xf] }
  0x19   : > { %13085 = vst [vmem:[#allocation4_spill] sm:$0xff] %v7112_v23  ;;  %v295_v34 = vrot.slane %v7117_v26, 1  ;;  %v7145_v35 = vshll.u32 %v7126_v28, 16  ;;  %v7148_v36 = vshrl.u32 %v7108_v22, 16  ;;  %v7151_v37 = vshrl.u32 %v7126_v28, 16  ;;  %s7006_s29 = smov 80  }
  0x1a   : > { %13086 = vst [vmem:[#allocation5_spill] sm:$0xff] %v7126_v28  ;;  %v303_v39 = vrot.slane %v7129_v30, 1  ;;  %v282_v40 = vrot.slane %v7135_v32, 1  ;;  %v7157_v41 = vshll.u32 %v7141_v33, 16  ;;  %v362_v42 = vrot.slane %v7112_v23, 1  ;;  %s7007_s30 = smov 88  }
  0x1b   : > { %13087 = vst [vmem:[#allocation6_spill] sm:$0xff] %v7141_v33  ;;  %v299_v43 = vor.u32 %v7120_v27, %v295_v34  ;;  %v287_v44 = vrot.slane %v7145_v35, 1  ;;  %v363_v45 = vrot.slane %v7126_v28, 1  ;;  %v7165_v46 = vpack.c.b16 %v264_v29, %v12763_v25  ;;  %s7008_s4 = smov 96   ;;  %s7009_s5 = smov 104  }
  0x1c   : > { %v283_v47 = vor.u32 %v282_v40, %v7132_v31  ;;  %v274_v48 = vunpack.c.l.b16 %v215_v38  ;;  %v307_v56 = vor.u32 %v7148_v36, %v303_v39  ;;  %v311_v57 = vrot.slane %v7157_v41, 1  ;;  %s7010_s6 = smov 112   ;;  %s7011_s7 = smov 120  }
  0x1d   : > { %13088 = vst [vmem:[#allocation7_spill] sm:$0xff] %v7165_v46  ;;  %v7172_v50 = vsel %vm276_vm0, %v299_v43, %v303_v39  ;;  %v7175_v51 = vsel %vm361_vm1, %v362_v42, %v363_v45  ;;  %v291_v58 = vor.u32 %v7151_v37, %v287_v44  ;;  %v7201_v60 = vshll.u32 %v7165_v46, 16  ;;  %s6751_s16 = sshll.u32 %s14219_s12, 6 }
  0x1e   : > { %13089 = vst [vmem:[#allocation8_spill] sm:$0xff] %v7172_v50  ;;  %349 = vrot.lane.b32.xlu1 %v7172_v50, %s6997_s20  ;;  %v7189_v55 = vsel %vm276_vm0, %v283_v47, %v287_v44  ;;  %379 = vrot.lane.b32.xlu2 %v7175_v51, %s6998_s21  ;;  %v7198_v59 = vpack.c.b16 %v274_v48, %v274_v48  ;;  %v12767_v62 = vunpack.c.l.b16 %v7169_v49  ;;  %v12764_v63 = vunpack.c.l.b16 %v7178_v52  ;;  %s9037_s18 = scalar_lea.vmem %s12762_s3, %s6751_s16 }
  0x1f   : > { %13090 = vst [vmem:[#allocation9_spill] sm:$0xff] %v7175_v51  ;;  %345 = vrot.lane.b32.xlu0 %v7189_v55, %s6997_s20  ;;  %v7203_v61 = vpack.c.b16 %v274_v48, %v264_v29  ;;  %v12765_v7 = vunpack.c.l.b16 %v7181_v53  ;;  %v12768_v12 = vunpack.c.l.b16 %v7184_v54  ;;  %v7210_v21 = vshrl.u32 %v7141_v33, 16 }
  0x20   : > { %13091 = vst [vmem:[#allocation10_spill] sm:$0xff] %v7189_v55  ;;  %v7213_v38 = vsel %vm276_vm0, %v307_v56, %v311_v57  ;;  %v7219_v29 = vpack.c.b16 %v12764_v63, %v12767_v62  ;;  %v7228_v40 = vsel %vm276_vm0, %v291_v58, %v295_v34  ;;  %v335_v42 = vrot.slane %v7201_v60, 1 }
  0x21   : > { %13092 = vst [vmem:[#allocation11_spill] sm:$0xff] %v7203_v61  ;;  %v7225_v39 = vpack.c.b16 %v12768_v12, %v12765_v7  ;;  %v7232_v43 = vshrl.u32 %v7165_v46, 16  ;;  %v7235_v44 = vshll.u32 %v7198_v59, 16  ;;  %v315_v56 = vor.u32 %v7210_v21, %v311_v57 }
  0x22   : > { %13093 = vst [vmem:[#allocation12_spill] sm:$0xff] %v7213_v38  ;;  %v7238_v47 = vshll.u32 %v7219_v29, 16  ;;  %v7241_v48 = vshrl.u32 %v7219_v29, 16  ;;  %v367_v17 = vrot.slane %v7108_v22, 1  ;;  %v399_v6 = vrot.slane %v7151_v37, 1 }
  0x23   : > { %13094 = vst [vmem:[#allocation13_spill] sm:$0xff] %v7219_v29  ;;  %v7245_v25 = vshll.u32 %v7225_v39, 16  ;;  %v7252_v63 = vshrl.u32 %v7225_v39, 16  ;;  %v339_v7 = vor.u32 %v7232_v43, %v335_v42  ;;  %v343_v57 = vrot.slane %v7235_v44, 1 }
  0x24   : > { %13095 = vst [vmem:[#allocation14_spill] sm:$0xff] %v7225_v39  ;;  %v327_v34 = vrot.slane %v7238_v47, 1  ;;  %v400_v5 = vrot.slane %v7145_v35, 2  ;;  %v412_v50 = vrot.slane %v7157_v41, 2 }
  0x25   : > { %13096 = vst [vmem:[#allocation15_spill] sm:$0xff] %v7228_v40  ;;  %v319_v58 = vrot.slane %v7245_v25, 1  ;;  %v7266_v19 = vsel %vm276_vm0, %v339_v7, %v343_v57  ;;  %v369_v7 = vrot.slane %v7141_v33, 1  ;;  %v396_v57 = vrot.slane %v7132_v31, 1 }
  0x26   : > { %351 = vrot.lane.b32.xlu1 %v7213_v38, %s6997_s20  ;;  %v331_v24 = vor.u32 %v7241_v48, %v327_v34  ;;  %13098 = vst [vmem:[#allocation17_spill] sm:$0xff] %v7266_v19  ;;  %v377_v38 = vrot.slane %v7198_v59, 1 }
  0x27   : > { %347 = vrot.lane.b32.xlu0 %v7228_v40, %s6997_s20  ;;  %v7260_v62 = vsel %vm276_vm0, %v315_v56, %v319_v58  ;;  %v323_v12 = vor.u32 %v7252_v63, %v319_v58  ;;  %v365_v56 = vrot.slane %v7092_v15, 1  ;;  %v373_v58 = vrot.slane %v7219_v29, 1 }
  0x28   : > { %13097 = vst [vmem:[#allocation16_spill] sm:$0xff] %v7260_v62  ;;  %353 = vrot.lane.b32.xlu2 %v7260_v62, %s6997_s20  ;;  %v7269_v9 = vsel %vm276_vm0, %v331_v24, %v335_v42  ;;  %v401_v62 = vor.u32 %v400_v5, %v399_v6 }
  0x29   : > { %13099 = vst [vmem:[#allocation18_spill] sm:$0xff] %v7269_v9  ;;  %v7274_v4 = vsel %vm276_vm0, %v323_v12, %v327_v34  ;;  %v7284_v24 = vsel %vm361_vm1, %v365_v56, %v367_v17  ;;  %v7287_v42 = vsel %vm361_vm1, %v363_v45, %v365_v56  ;;  %v7292_v12 = vsel %vm361_vm1, %v367_v17, %v369_v7 }
  0x2a   : > { %13100 = vst [vmem:[#allocation19_spill] sm:$0xff] %v7274_v4  ;;  %v371_v34 = vrot.slane %v7225_v39, 1  ;;  %v375_v45 = vrot.slane %v7165_v46, 1  ;;  %v397_v17 = vrot.slane %v7135_v32, 2 }
  0x2b   : > { %13101 = vst [vmem:[#allocation20_spill] sm:$0xff] %v7284_v24 }
  0x2c   : > { %13102 = vst [vmem:[#allocation21_spill] sm:$0xff] %v7287_v42  ;;  %v7303_v56 = vsel %vm361_vm1, %v371_v34, %v373_v58  ;;  %v7309_v16 = vsel %vm361_vm1, %v369_v7, %v371_v34  ;;  %v7314_v13 = vsel %vm361_vm1, %v373_v58, %v375_v45  ;;  %v407_v7 = vrot.slane %v7148_v36, 1 }
  0x2d   : > { %13103 = vst [vmem:[#allocation22_spill] sm:$0xff] %v7292_v12  ;;  %v408_v34 = vrot.slane %v7129_v30, 2  ;;  %v411_v58 = vrot.slane %v7210_v21, 1  ;;  %v7331_v5 = vsel %vm361_vm1, %v375_v45, %v377_v38  ;;  %v423_v38 = vrot.slane %v7232_v43, 1 }
  0x2e   : > { %359 = vrot.lane.b32.xlu1 %v7266_v19, %s6997_s20  ;;  %13104 = vst [vmem:[#allocation23_spill] sm:$0xff] %v7303_v56  ;;  %v403_v19 = vrot.slane %v7120_v27, 1  ;;  %v424_v45 = vrot.slane %v7201_v60, 2 }
  0x2f   : > { %357 = vrot.lane.b32.xlu0 %v7269_v9, %s6997_s20  ;;  %13105 = vst [vmem:[#allocation24_spill] sm:$0xff] %v7309_v16  ;;  %v404_v9 = vrot.slane %v7117_v26, 2  ;;  %v409_v6 = vor.u32 %v408_v34, %v407_v7 }
  0x30   : > { %355 = vrot.lane.b32.xlu2 %v7274_v4, %s6997_s20  ;;  %13106 = vst [vmem:[#allocation25_spill] sm:$0xff] %v7314_v13  ;;  %v398_v4 = vor.u32 %v397_v17, %v396_v57  ;;  %v413_v57 = vor.u32 %v412_v50, %v411_v58  ;;  %v419_v50 = vrot.slane %v7241_v48, 1 }
  0x31   : > { %v405_v40 = vor.u32 %v404_v9, %v403_v19  ;;  %13108 = vst [vmem:[#allocation27_spill] sm:$0xff] %v7331_v5  ;;  %v7348_v19 = vshrl.u32 %v7198_v59, 16 }
  0x32   : > { %v7328_v55 = vsel %vm395_vm2, %v398_v4, %v401_v62  ;;  %v7345_v4 = vsel %vm395_vm2, %v409_v6, %v413_v57 }
  0x33   : > { %13107 = vst [vmem:[#allocation26_spill] sm:$0xff] %v7328_v55  ;;  %v7336_v17 = vsel %vm395_vm2, %v401_v62, %v405_v40  ;;  %v420_v62 = vrot.slane %v7238_v47, 2  ;;  %v7355_v7 = vsel %vm395_vm2, %v405_v40, %v409_v6 }
  0x34   : > { %13109 = vst [vmem:[#allocation28_spill] sm:$0xff] %v7336_v17 }
  0x35   : > { %13110 = vst [vmem:[#allocation29_spill] sm:$0xff] %v7345_v4  ;;  %v421_v58 = vor.u32 %v420_v62, %v419_v50  ;;  %v451_v50 = vrot.slane %v7126_v28, 2  ;;  %v453_v62 = vrot.slane %v7092_v15, 2 }
  0x36   : > { %383 = vrot.lane.b32.xlu1 %v7284_v24, %s6998_s21  ;;  %13111 = vst [vmem:[#allocation30_spill] sm:$0xff] %v7355_v7 }
  0x37   : > { %381 = vrot.lane.b32.xlu0 %v7287_v42, %s6998_s21 }
  0x38   : > { %385 = vrot.lane.b32.xlu2 %v7292_v12, %s6998_s21  ;;  %v499_v12 = vrot.slane %v7210_v21, 2 }
  0x3e   : > { %389 = vrot.lane.b32.xlu1 %v7303_v56, %s6998_s21 }
  0x3f   : > { %387 = vrot.lane.b32.xlu0 %v7309_v16, %s6998_s21  ;;  %v416_v16 = vrot.slane %v7245_v25, 2 }
  0x40   : > { %391 = vrot.lane.b32.xlu2 %v7314_v13, %s6998_s21  ;;  %v415_v13 = vrot.slane %v7252_v63, 1 }
  0x42   : > { %v417_v9 = vor.u32 %v416_v16, %v415_v13  ;;  %v429_v13 = vrot.slane %v7348_v19, 1  ;;  %v430_v16 = vrot.slane %v7235_v44, 2 }
  0x44   : > { %v7360_v34 = vsel %vm395_vm2, %v413_v57, %v417_v9  ;;  %v431_v40 = vor.u32 %v430_v16, %v429_v13  ;;  %v457_v16 = vrot.slane %v7141_v33, 2 }
  0x45   : > { %13112 = vst [vmem:[#allocation31_spill] sm:$0xff] %v7360_v34 }
  0x46   : > { %433 = vrot.lane.b32.xlu1 %v7328_v55, %s6999_s22 }
  0x47   : > { %393 = vrot.lane.b32.xlu0 %v7331_v5, %s6998_s21 }
  0x48   : > { %435 = vrot.lane.b32.xlu2 %v7336_v17, %s6999_s22  ;;  %v425_v17 = vor.u32 %v424_v45, %v423_v38  ;;  %v450_v38 = vrot.slane %v7112_v23, 2  ;;  %v7388_v45 = vsel %vm449_vm3, %v451_v50, %v453_v62 }
  0x49   : > { %13116 = vst [vmem:[#allocation35_spill] sm:$0xff] %v7388_v45 }
  0x4a   : > { %v7369_v6 = vsel %vm395_vm2, %v421_v58, %v425_v17  ;;  %v7377_v57 = vsel %vm395_vm2, %v425_v17, %v431_v40  ;;  %v7391_v17 = vsel %vm449_vm3, %v450_v38, %v451_v50  ;;  %v461_v40 = vrot.slane %v7219_v29, 2 }
  0x4b   : > { %13113 = vst [vmem:[#allocation32_spill] sm:$0xff] %v7369_v6 }
  0x4c   : > { %13115 = vst [vmem:[#allocation34_spill] sm:$0xff] %v7377_v57 }
  0x4d   : > { %13117 = vst [vmem:[#allocation36_spill] sm:$0xff] %v7391_v17 }
  0x4e   : > { %439 = vrot.lane.b32.xlu1 %v7345_v4, %s6999_s22  ;;  %v7372_v4 = vsel %vm395_vm2, %v417_v9, %v421_v58  ;;  %v455_v9 = vrot.slane %v7108_v22, 2  ;;  %v459_v58 = vrot.slane %v7225_v39, 2 }
  0x4f   : > { %437 = vrot.lane.b32.xlu0 %v7355_v7, %s6999_s22  ;;  %13114 = vst [vmem:[#allocation33_spill] sm:$0xff] %v7372_v4 }
  0x50   : > { %441 = vrot.lane.b32.xlu2 %v7360_v34, %s6999_s22  ;;  %v7396_v13 = vsel %vm449_vm3, %v453_v62, %v455_v9  ;;  %v7406_v50 = vsel %vm449_vm3, %v457_v16, %v459_v58  ;;  %v7409_v38 = vsel %vm449_vm3, %v455_v9, %v457_v16  ;;  %v7412_v62 = vsel %vm449_vm3, %v459_v58, %v461_v40 }
  0x51   : > { %13118 = vst [vmem:[#allocation37_spill] sm:$0xff] %v7396_v13  ;;  %v463_v9 = vrot.slane %v7165_v46, 2  ;;  %v465_v16 = vrot.slane %v7198_v59, 2  ;;  %v491_v58 = vrot.slane %v7120_v27, 2 }
  0x52   : > { %13119 = vst [vmem:[#allocation38_spill] sm:$0xff] %v7406_v50 }
  0x53   : > { %13120 = vst [vmem:[#allocation39_spill] sm:$0xff] %v7409_v38  ;;  %v7431_v5 = vsel %vm449_vm3, %v463_v9, %v465_v16 }
  0x54   : > { %13121 = vst [vmem:[#allocation40_spill] sm:$0xff] %v7412_v62 }
  0x55   : > { %13122 = vst [vmem:[#allocation41_spill] sm:$0xff] %v7431_v5 }
  0x56   : > { %445 = vrot.lane.b32.xlu1 %v7369_v6, %s6999_s22  ;;  %v496_v6 = vrot.slane %v7129_v30, 3 }
  0x57   : > { %443 = vrot.lane.b32.xlu0 %v7372_v4, %s6999_s22  ;;  %v495_v4 = vrot.slane %v7148_v36, 2 }
  0x58   : > { %447 = vrot.lane.b32.xlu2 %v7377_v57, %s6999_s22  ;;  %v485_v57 = vrot.slane %v7135_v32, 3 }
  0x5e   : > { %469 = vrot.lane.b32.xlu1 %v7388_v45, %s7000_s23  ;;  %v488_v45 = vrot.slane %v7145_v35, 3 }
  0x5f   : > { %467 = vrot.lane.b32.xlu0 %v7391_v17, %s7000_s23  ;;  %v487_v17 = vrot.slane %v7151_v37, 2 }
  0x60   : > { %471 = vrot.lane.b32.xlu2 %v7396_v13, %s7000_s23  ;;  %v484_v13 = vrot.slane %v7132_v31, 2 }
  0x61   : > { %v489_v34 = vor.u32 %v488_v45, %v487_v17  ;;  %v500_v45 = vrot.slane %v7157_v41, 3 }
  0x62   : > { %v486_v7 = vor.u32 %v485_v57, %v484_v13  ;;  %v508_v13 = vrot.slane %v7238_v47, 3 }
  0x63   : > { %v501_v17 = vor.u32 %v500_v45, %v499_v12  ;;  %v512_v12 = vrot.slane %v7201_v60, 3 }
  0x64   : > { %v7439_v56 = vsel %vm483_vm4, %v486_v7, %v489_v34  ;;  %v504_v7 = vrot.slane %v7245_v25, 3 }
  0x65   : > { %13124 = vst [vmem:[#allocation43_spill] sm:$0xff] %v7439_v56 }
  0x66   : > { %475 = vrot.lane.b32.xlu1 %v7406_v50, %s7000_s23  ;;  %v492_v50 = vrot.slane %v7117_v26, 3 }
  0x67   : > { %473 = vrot.lane.b32.xlu0 %v7409_v38, %s7000_s23  ;;  %v7434_v38 = vsel %vm449_vm3, %v461_v40, %v463_v9  ;;  %v511_v9 = vrot.slane %v7232_v43, 2 }
  0x68   : > { %477 = vrot.lane.b32.xlu2 %v7412_v62, %s7000_s23  ;;  %13123 = vst [vmem:[#allocation42_spill] sm:$0xff] %v7434_v38  ;;  %v493_v55 = vor.u32 %v492_v50, %v491_v58  ;;  %v497_v62 = vor.u32 %v496_v6, %v495_v4  ;;  %v503_v4 = vrot.slane %v7252_v63, 2  ;;  %v507_v6 = vrot.slane %v7241_v48, 2 }
  0x6a   : > { %v7448_v57 = vsel %vm483_vm4, %v493_v55, %v497_v62  ;;  %v7455_v40 = vsel %vm483_vm4, %v489_v34, %v493_v55  ;;  %v7460_v50 = vsel %vm483_vm4, %v497_v62, %v501_v17  ;;  %v505_v16 = vor.u32 %v504_v7, %v503_v4 }
  0x6b   : > { %13125 = vst [vmem:[#allocation44_spill] sm:$0xff] %v7448_v57  ;;  %v509_v58 = vor.u32 %v508_v13, %v507_v6  ;;  %v513_v34 = vor.u32 %v512_v12, %v511_v9  ;;  %v536_v7 = vrot.slane %v7112_v23, 3  ;;  %v537_v6 = vrot.slane %v7126_v28, 3 }
  0x6c   : > { %13126 = vst [vmem:[#allocation45_spill] sm:$0xff] %v7455_v40  ;;  %v7474_v62 = vsel %vm483_vm4, %v501_v17, %v505_v16  ;;  %v539_v13 = vrot.slane %v7092_v15, 3 }
  0x6d   : > { %13127 = vst [vmem:[#allocation46_spill] sm:$0xff] %v7460_v50  ;;  %v7471_v45 = vsel %vm483_vm4, %v505_v16, %v509_v58  ;;  %v7481_v4 = vsel %vm483_vm4, %v509_v58, %v513_v34  ;;  %v7491_v9 = vsel %vm535_vm5, %v536_v7, %v537_v6 }
  0x6e   : > { %481 = vrot.lane.b32.xlu1 %v7431_v5, %s7000_s23  ;;  %13128 = vst [vmem:[#allocation47_spill] sm:$0xff] %v7471_v45  ;;  %v7501_v58 = vsel %vm535_vm5, %v537_v6, %v539_v13 }
  0x6f   : > { %479 = vrot.lane.b32.xlu0 %v7434_v38, %s7000_s23  ;;  %13129 = vst [vmem:[#allocation48_spill] sm:$0xff] %v7474_v62 }
  0x70   : > { %519 = vrot.lane.b32.xlu2 %v7439_v56, %s7001_s24  ;;  %v516_v56 = vrot.slane %v7235_v44, 3  ;;  %13130 = vst [vmem:[#allocation49_spill] sm:$0xff] %v7481_v4 }
  0x71   : > { %13131 = vst [vmem:[#allocation50_spill] sm:$0xff] %v7491_v9 }
  0x72   : > { %13134 = vst [vmem:[#allocation53_spill] sm:$0xff] %v7501_v58 }
  0x76   : > { %523 = vrot.lane.b32.xlu1 %v7448_v57, %s7001_s24  ;;  %v515_v57 = vrot.slane %v7348_v19, 2 }
  0x77   : > { %521 = vrot.lane.b32.xlu0 %v7455_v40, %s7001_s24 }
  0x78   : > { %525 = vrot.lane.b32.xlu2 %v7460_v50, %s7001_s24  ;;  %v7468_v55 = vpop.permute.xlu2 %379  ;;  %v517_v17 = vor.u32 %v516_v56, %v515_v57  ;;  %v541_v56 = vrot.slane %v7108_v22, 3  ;;  %v543_v57 = vrot.slane %v7141_v33, 3 }
  0x7a   : > { %v7496_v16 = vsel %vm483_vm4, %v513_v34, %v517_v17  ;;  %v545_v34 = vrot.slane %v7225_v39, 3  ;;  %v7511_v7 = vsel %vm535_vm5, %v541_v56, %v543_v57  ;;  %v7516_v6 = vsel %vm535_vm5, %v539_v13, %v541_v56 }
  0x7b   : > { %13133 = vst [vmem:[#allocation52_spill] sm:$0xff] %v7496_v16  ;;  %v551_v56 = vrot.slane %v7198_v59, 3 }
  0x7c   : > { %13135 = vst [vmem:[#allocation54_spill] sm:$0xff] %v7511_v7 }
  0x7d   : > { %13137 = vst [vmem:[#allocation56_spill] sm:$0xff] %v7516_v6 }
  0x7e   : > { %529 = vrot.lane.b32.xlu1 %v7471_v45, %s7001_s24  ;;  %v571_v45 = vrot.slane %v7135_v32, 4 }
  0x7f   : > { %527 = vrot.lane.b32.xlu0 %v7474_v62, %s7001_s24 }
  0x80   : > { %531 = vrot.lane.b32.xlu2 %v7481_v4, %s7001_s24 }
  0x82   : > { %v7493_v12 = vpop.permute.xlu2 %353 }
  0x83   : > { %13132 = vst [vmem:[#allocation51_spill] sm:$0xff] %v7493_v12  ;;  %v547_v12 = vrot.slane %v7219_v29, 3 }
  0x85   : > { %v7544_v62 = vsel %vm535_vm5, %v545_v34, %v547_v12 }
  0x86   : > { %553 = vrot.lane.b32.xlu1 %v7491_v9, %s7002_s25  ;;  %v7523_v9 = vsel %vm535_vm5, %v543_v57, %v545_v34  ;;  %v573_v57 = vrot.slane %v7151_v37, 3  ;;  %13142 = vst [vmem:[#allocation61_spill] sm:$0xff] %v7544_v62  ;;  %v581_v37 = vrot.slane %v7148_v36, 3  ;;  %v586_v36 = vrot.slane %v7157_v41, 4 }
  0x87   : > { %533 = vrot.lane.b32.xlu0 %v7496_v16, %s7001_s24  ;;  %v549_v16 = vrot.slane %v7165_v46, 3  ;;  %13138 = vst [vmem:[#allocation57_spill] sm:$0xff] %v7523_v9  ;;  %v590_v34 = vrot.slane %v7245_v25, 4  ;;  %v593_v25 = vrot.slane %v7241_v48, 3  ;;  %v597_v48 = vrot.slane %v7232_v43, 3 }
  0x88   : > { %555 = vrot.lane.b32.xlu2 %v7501_v58, %s7002_s25 }
  0x89   : > { %v7534_v13 = vsel %vm535_vm5, %v547_v12, %v549_v16  ;;  %v7551_v59 = vsel %vm535_vm5, %v549_v16, %v551_v56  ;;  %v585_v16 = vrot.slane %v7210_v21, 3 }
  0x8a   : > { %v7513_v17 = vpop.permute.xlu2 %355  ;;  %13140 = vst [vmem:[#allocation59_spill] sm:$0xff] %v7534_v13 }
  0x8b   : > { %13136 = vst [vmem:[#allocation55_spill] sm:$0xff] %v7513_v17 }
  0x8c   : > { %13143 = vst [vmem:[#allocation62_spill] sm:$0xff] %v7551_v59 }
  0x8e   : > { %559 = vrot.lane.b32.xlu1 %v7511_v7, %s7002_s25  ;;  %v574_v7 = vrot.slane %v7145_v35, 4  ;;  %v582_v35 = vrot.slane %v7129_v30, 4  ;;  %v589_v30 = vrot.slane %v7252_v63, 3  ;;  %v594_v63 = vrot.slane %v7238_v47, 4 }
  0x8f   : > { %557 = vrot.lane.b32.xlu0 %v7516_v6, %s7002_s25  ;;  %v577_v6 = vrot.slane %v7120_v27, 3  ;;  %v598_v47 = vrot.slane %v7201_v60, 4 }
  0x90   : > { %v7527_v58 = vpop.permute.xlu1 %349  ;;  %561 = vrot.lane.b32.xlu2 %v7523_v9, %s7002_s25  ;;  %v570_v9 = vrot.slane %v7132_v31, 3  ;;  %v583_v56 = vor.u32 %v582_v35, %v581_v37  ;;  %v591_v21 = vor.u32 %v590_v34, %v589_v30  ;;  %v595_v35 = vor.u32 %v594_v63, %v593_v25 }
  0x91   : > { %13139 = vst [vmem:[#allocation58_spill] sm:$0xff] %v7527_v58  ;;  %v7529_v4 = vpop.permute.xlu0 %345  ;;  %v578_v58 = vrot.slane %v7117_v26, 4  ;;  %v575_v26 = vor.u32 %v574_v7, %v573_v57  ;;  %v599_v30 = vor.u32 %v598_v47, %v597_v48  ;;  %v13169_v47 = vunpack.c.l.b16 %v7082_v11 }
  0x92   : > { %v7537_v17 = vpop.permute.xlu2 %385  ;;  %v572_v31 = vor.u32 %v571_v45, %v570_v9  ;;  %v587_v9 = vor.u32 %v586_v36, %v585_v16  ;;  %v7605_v36 = vsel %vm569_vm6, %v591_v21, %v595_v35  ;;  %v13178_v11 = vunpack.c.l.b16 %v7169_v49 }
  0x93   : > { %13141 = vst [vmem:[#allocation60_spill] sm:$0xff] %v7537_v17  ;;  %v579_v27 = vor.u32 %v578_v58, %v577_v6  ;;  %v13184_v49 = vunpack.c.l.b16 %v7178_v52 }
  0x94   : > { %v7573_v45 = vsel %vm569_vm6, %v572_v31, %v575_v26  ;;  %v7591_v37 = vsel %vm569_vm6, %v587_v9, %v591_v21  ;;  %v602_v31 = vrot.slane %v7235_v44, 4  ;;  %v7600_v16 = vsel %vm569_vm6, %v583_v56, %v587_v9  ;;  %13155 = vst [vmem:[#allocation74_spill] sm:$0xff] %v7605_v36 }
  0x95   : > { %v7568_v58 = vsel %vm569_vm6, %v575_v26, %v579_v27  ;;  %13148 = vst [vmem:[#allocation67_spill] sm:$0xff] %v7573_v45  ;;  %v7578_v41 = vsel %vm569_vm6, %v579_v27, %v583_v56  ;;  %v601_v27 = vrot.slane %v7348_v19, 3  ;;  %v7621_v56 = vsel %vm569_vm6, %v595_v35, %v599_v30 }
  0x96   : > { %565 = vrot.lane.b32.xlu1 %v7534_v13, %s7002_s25  ;;  %13146 = vst [vmem:[#allocation65_spill] sm:$0xff] %v7568_v58  ;;  %v13161_v9 = vunpack.c.l.b16 %v7075_v8  ;;  %v13162_v21 = vunpack.c.l.b16 %v7079_v10  ;;  %v13166_v8 = vunpack.c.l.b16 %v7062_v1  ;;  %v13167_v10 = vunpack.c.l.b16 %v7065_v2 }
  0x97   : > { %563 = vrot.lane.b32.xlu0 %v7544_v62, %s7002_s25  ;;  %13149 = vst [vmem:[#allocation68_spill] sm:$0xff] %v7578_v41  ;;  %v603_v43 = vor.u32 %v602_v31, %v601_v27  ;;  %v13170_v27 = vunpack.c.l.b16 %v7059_v0 }
  0x98   : > { %v7557_v12 = vpop.permute.xlu1 %351  ;;  %567 = vrot.lane.b32.xlu2 %v7551_v59, %s7002_s25  ;;  %13152 = vst [vmem:[#allocation71_spill] sm:$0xff] %v7591_v37  ;;  %v7627_v25 = vpack.c.b16 %v13162_v21, %v13161_v9  ;;  %v7643_v35 = vpack.c.b16 %v13167_v10, %v13166_v8  ;;  %v13174_v9 = vunpack.c.l.b16 %v7086_v14  ;;  %v13180_v8 = vunpack.c.l.b16 %v7097_v18 }
  0x99   : > { %13144 = vst [vmem:[#allocation63_spill] sm:$0xff] %v7557_v12  ;;  %v7559_v32 = vpop.permute.xlu0 %347  ;;  %v7616_v44 = vsel %vm569_vm6, %v599_v30, %v603_v43  ;;  %v7649_v31 = vpack.c.b16 %v13170_v27, %v13169_v47  ;;  %v13173_v43 = vunpack.c.l.b16 %v7068_v3  ;;  %v13177_v3 = vunpack.c.l.b16 %v7184_v54 }
  0x9a   : > { %13145 = vst [vmem:[#allocation64_spill] sm:$0xff] %v7559_v32  ;;  %v7570_v7 = vpop.permute.xlu2 %391  ;;  %v7664_v1 = vshll.u32 %v7627_v25, 16  ;;  %v13181_v10 = vunpack.c.l.b16 %v7181_v53  ;;  %v13185_v54 = vunpack.c.l.b16 %v7101_v20 }
  0x9b   : > { %13147 = vst [vmem:[#allocation66_spill] sm:$0xff] %v7570_v7  ;;  %v7657_v21 = vpack.c.b16 %v13174_v9, %v13173_v43  ;;  %v7676_v14 = vpack.c.b16 %v13178_v11, %v13177_v3  ;;  %v7687_v43 = vshrl.u32 %v7627_v25, 16  ;;  %v7702_v18 = vshrl.u32 %v7649_v31, 16 }
  0x9c   : > { %13154 = vst [vmem:[#allocation73_spill] sm:$0xff] %v7600_v16  ;;  %v7682_v47 = vpack.c.b16 %v13181_v10, %v13180_v8  ;;  %v653_v9 = vrot.slane %v7664_v1, 1  ;;  %v7697_v3 = vpack.c.b16 %v13185_v54, %v13184_v49  ;;  %v7714_v8 = vshll.u32 %v7643_v35, 16 }
  0x9d   : > { %13158 = vst [vmem:[#allocation77_spill] sm:$0xff] %v7616_v44  ;;  %v7709_v52 = vshll.u32 %v7657_v21, 16 }
  0x9e   : > { %607 = vrot.lane.b32.xlu1 %v7568_v58, %s7003_s26  ;;  %13160 = vst [vmem:[#allocation79_spill] sm:$0xff] %v7621_v56  ;;  %v654_v53 = vor.u32 %v653_v9, %v7687_v43  ;;  %v7731_v7 = vshll.u32 %v7682_v47, 16  ;;  %v7776_v58 = vshll.u32 %v7203_v61, 16 }
  0x9f   : > { %605 = vrot.lane.b32.xlu0 %v7573_v45, %s7003_s26  ;;  %13163 = vst [vmem:[#allocation80_spill] sm:$0xff] %v7627_v25  ;;  %v777_v50 = vrot.slane %v7709_v52, 2 }
  0xa0   : > { %v7584_v6 = vpop.permute.xlu1 %359  ;;  %609 = vrot.lane.b32.xlu2 %v7578_v41, %s7003_s26  ;;  %13168 = vst [vmem:[#allocation83_spill] sm:$0xff] %v7643_v35 }
  0xa1   : > { %13150 = vst [vmem:[#allocation69_spill] sm:$0xff] %v7584_v6  ;;  %v7586_v57 = vpop.permute.xlu0 %357  ;;  %v7728_v6 = vshrl.u32 %v7657_v21, 16 }
  0xa2   : > { %13151 = vst [vmem:[#allocation70_spill] sm:$0xff] %v7586_v57  ;;  %v7593_v26 = vpop.permute.xlu2 %435  ;;  %v216_v57 = vld [vmem:[%s7056_s19 + $0x44] sm:$0xf] }
  0xa3   : > { %13153 = vst [vmem:[#allocation72_spill] sm:$0xff] %v7593_v26 }
  0xa4   : > { %13171 = vst [vmem:[#allocation84_spill] sm:$0xff] %v7649_v31 }
  0xa5   : > { %13175 = vst [vmem:[#allocation86_spill] sm:$0xff] %v7657_v21 }
  0xa6   : > { %613 = vrot.lane.b32.xlu1 %v7591_v37, %s7003_s26  ;;  %13179 = vst [vmem:[#allocation88_spill] sm:$0xff] %v7676_v14 }
  0xa7   : > { %611 = vrot.lane.b32.xlu0 %v7600_v16, %s7003_s26  ;;  %13182 = vst [vmem:[#allocation89_spill] sm:$0xff] %v7682_v47  ;;  %v7751_v16 = vshll.u32 %v7697_v3, 16 }
  0xa8   : > { %v7609_v34 = vpop.permute.xlu1 %383  ;;  %615 = vrot.lane.b32.xlu2 %v7605_v36, %s7003_s26  ;;  %13186 = vst [vmem:[#allocation91_spill] sm:$0xff] %v7697_v3  ;;  %v682_v36 = vrot.slane %v7731_v7, 1 }
  0xa9   : > { %13156 = vst [vmem:[#allocation75_spill] sm:$0xff] %v7609_v34  ;;  %v7611_v60 = vpop.permute.xlu0 %381  ;;  %v773_v34 = vrot.slane %v7714_v8, 2 }
  0xaa   : > { %13157 = vst [vmem:[#allocation76_spill] sm:$0xff] %v7611_v60  ;;  %v7618_v19 = vpop.permute.xlu2 %441 }
  0xab   : > { %13159 = vst [vmem:[#allocation78_spill] sm:$0xff] %v7618_v19 }
  0xae   : > { %619 = vrot.lane.b32.xlu1 %v7616_v44, %s7003_s26 }
  0xaf   : > { %617 = vrot.lane.b32.xlu0 %v7621_v56, %s7003_s26  ;;  %v7736_v56 = vshrl.u32 %v7643_v35, 16 }
  0xb0   : > { %v7633_v63 = vpop.permute.xlu1 %389  ;;  %629 = vrot.lane.b32.xlu2 %v7627_v25, %s7004_s27 }
  0xb1   : > { %13164 = vst [vmem:[#allocation81_spill] sm:$0xff] %v7633_v63  ;;  %v7635_v48 = vpop.permute.xlu0 %387  ;;  %v666_v63 = vrot.slane %v7714_v8, 1 }
  0xb2   : > { %13165 = vst [vmem:[#allocation82_spill] sm:$0xff] %v7635_v48  ;;  %v7651_v30 = vpop.permute.xlu2 %447 }
  0xb3   : > { %13172 = vst [vmem:[#allocation85_spill] sm:$0xff] %v7651_v30  ;;  %v7691_v30 = vshll.u32 %v7649_v31, 16 }
  0xb5   : > { %v658_v11 = vrot.slane %v7691_v30, 1 }
  0xb6   : > { %633 = vrot.lane.b32.xlu1 %v7643_v35, %s7004_s27 }
  0xb7   : > { %631 = vrot.lane.b32.xlu0 %v7649_v31, %s7004_s27  ;;  %v662_v49 = vor.u32 %v7702_v18, %v658_v11  ;;  %v7722_v54 = vsel %vm276_vm0, %v654_v53, %v658_v11  ;;  %v7744_v11 = vshrl.u32 %v7682_v47, 16 }
  0xb8   : > { %v7666_v0 = vpop.permute.xlu1 %433  ;;  %635 = vrot.lane.b32.xlu2 %v7657_v21, %s7004_s27  ;;  %13189 = vst [vmem:[#allocation94_spill] sm:$0xff] %v7722_v54 }
  0xb9   : > { %v7668_v2 = vpop.permute.xlu0 %393  ;;  %v7741_v53 = vsel %vm276_vm0, %v662_v49, %v666_v63  ;;  %v7757_v49 = vshll.u32 %v7676_v14, 16  ;;  %v780_v38 = vrot.slane %v7744_v11, 1 }
  0xba   : > { %13176 = vst [vmem:[#allocation87_spill] sm:$0xff] %v7668_v2  ;;  %v7684_v27 = vpop.permute.xlu2 %471  ;;  %v674_v2 = vrot.slane %v7709_v52, 1 }
  0xbb   : > { %13183 = vst [vmem:[#allocation90_spill] sm:$0xff] %v7684_v27  ;;  %v735_v27 = vrot.slane %v7643_v35, 1 }
  0xbc   : > { %13191 = vst [vmem:[#allocation96_spill] sm:$0xff] %v7741_v53  ;;  %v678_v44 = vor.u32 %v7728_v6, %v674_v2 }
  0xbe   : > { %639 = vrot.lane.b32.xlu1 %v7676_v14, %s7004_s27  ;;  %v7767_v41 = vsel %vm276_vm0, %v678_v44, %v682_v36  ;;  %v7791_v44 = vshrl.u32 %v7203_v61, 16 }
  0xbf   : > { %637 = vrot.lane.b32.xlu0 %v7682_v47, %s7004_s27  ;;  %13194 = vst [vmem:[#allocation99_spill] sm:$0xff] %v7767_v41 }
  0xc0   : > { %v7711_v20 = vpop.permute.xlu1 %439  ;;  %641 = vrot.lane.b32.xlu2 %v7697_v3, %s7004_s27 }
  0xc1   : > { %13187 = vst [vmem:[#allocation92_spill] sm:$0xff] %v7711_v20  ;;  %v7716_v10 = vpop.permute.xlu0 %437 }
  0xc2   : > { %13188 = vst [vmem:[#allocation93_spill] sm:$0xff] %v7716_v10  ;;  %v7724_v9 = vpop.permute.xlu2 %477 }
  0xc3   : > { %13190 = vst [vmem:[#allocation95_spill] sm:$0xff] %v7724_v9  ;;  %v646_v9 = vunpack.c.l.b16 %v216_v57  ;;  %v686_v57 = vor.u32 %v7744_v11, %v682_v36 }
  0xc5   : > { %v7764_v48 = vpack.c.b16 %v646_v9, %v646_v9  ;;  %v7783_v9 = vshrl.u32 %v7676_v14, 16 }
  0xc6   : > { %716 = vrot.lane.b32.xlu1 %v7722_v54, %s7005_s28  ;;  %v670_v54 = vor.u32 %v7736_v56, %v666_v63  ;;  %v7773_v63 = vshrl.u32 %v7697_v3, 16 }
  0xc7   : > { %643 = vrot.lane.b32.xlu0 %v7203_v61, %s7004_s27  ;;  %v7794_v59 = vshll.u32 %v7764_v48, 16 }
  0xc8   : > { %v7753_v37 = vpop.permute.xlu1 %445  ;;  %718 = vrot.lane.b32.xlu2 %v7741_v53, %s7005_s28  ;;  %v690_v53 = vrot.slane %v7757_v49, 1 }
  0xc9   : > { %13192 = vst [vmem:[#allocation97_spill] sm:$0xff] %v7753_v37  ;;  %v7759_v19 = vpop.permute.xlu0 %443  ;;  %v698_v37 = vrot.slane %v7751_v16, 1  ;;  %v714_v20 = vrot.slane %v7794_v59, 1 }
  0xca   : > { %13193 = vst [vmem:[#allocation98_spill] sm:$0xff] %v7759_v19  ;;  %v7769_v45 = vpop.permute.xlu2 %519  ;;  %v7779_v19 = vsel %vm276_vm0, %v670_v54, %v674_v2  ;;  %v7788_v36 = vsel %vm276_vm0, %v686_v57, %v690_v53  ;;  %v706_v54 = vrot.slane %v7776_v58, 1 }
  0xcb   : > { %13195 = vst [vmem:[#allocation100_spill] sm:$0xff] %v7779_v19  ;;  %v702_v2 = vor.u32 %v7773_v63, %v698_v37 }
  0xcc   : > { %13196 = vst [vmem:[#allocation101_spill] sm:$0xff] %v7788_v36  ;;  %v710_v57 = vor.u32 %v7791_v44, %v706_v54 }
  0xcd   : > { %v7810_v17 = vsel %vm276_vm0, %v702_v2, %v706_v54  ;;  %v732_v54 = vrot.slane %v7627_v25, 1 }
  0xce   : > { %722 = vrot.lane.b32.xlu1 %v7767_v41, %s7005_s28  ;;  %v694_v41 = vor.u32 %v7783_v9, %v690_v53  ;;  %13198 = vst [vmem:[#allocation103_spill] sm:$0xff] %v7810_v17  ;;  %v7820_v53 = vsel %vm276_vm0, %v710_v57, %v714_v20 }
  0xcf   : > { %720 = vrot.lane.b32.xlu0 %v7779_v19, %s7005_s28  ;;  %13201 = vst [vmem:[#allocation106_spill] sm:$0xff] %v7820_v53 }
  0xd0   : > { %v7800_v62 = vpop.permute.xlu1 %469  ;;  %724 = vrot.lane.b32.xlu2 %v7788_v36, %s7005_s28  ;;  %v7815_v12 = vsel %vm276_vm0, %v694_v41, %v698_v37  ;;  %v733_v36 = vrot.slane %v7649_v31, 1  ;;  %v737_v41 = vrot.slane %v7657_v21, 1  ;;  %vm13063_vm0 = vcmask 654336  }
  0xd1   : > { %13197 = vst [vmem:[#allocation102_spill] sm:$0xff] %v7800_v62  ;;  %v7803_v13 = vpop.permute.xlu0 %467 }
  0xd2   : > { %v7812_v19 = vpop.permute.xlu2 %525  ;;  %13200 = vst [vmem:[#allocation105_spill] sm:$0xff] %v7815_v12  ;;  %v7835_v37 = vsel %vm361_vm1, %v733_v36, %v735_v27  ;;  %v7840_v57 = vsel %vm361_vm1, %v732_v54, %v733_v36  ;;  %v743_v36 = vrot.slane %v7697_v3, 1 }
  0xd3   : > { %13199 = vst [vmem:[#allocation104_spill] sm:$0xff] %v7812_v19 }
  0xd4   : > { %13204 = vst [vmem:[#allocation109_spill] sm:$0xff] %v7835_v37 }
  0xd5   : > { %13206 = vst [vmem:[#allocation111_spill] sm:$0xff] %v7840_v57 }
  0xd6   : > { %728 = vrot.lane.b32.xlu1 %v7810_v17, %s7005_s28  ;;  %v741_v17 = vrot.slane %v7676_v14, 1 }
  0xd7   : > { %726 = vrot.lane.b32.xlu0 %v7815_v12, %s7005_s28  ;;  %v7845_v12 = vsel %vm361_vm1, %v735_v27, %v737_v41 }
  0xd8   : > { %v7826_v2 = vpop.permute.xlu1 %475  ;;  %730 = vrot.lane.b32.xlu2 %v7820_v53, %s7005_s28  ;;  %13207 = vst [vmem:[#allocation112_spill] sm:$0xff] %v7845_v12  ;;  %v739_v53 = vrot.slane %v7682_v47, 1 }
  0xd9   : > { %13202 = vst [vmem:[#allocation107_spill] sm:$0xff] %v7826_v2  ;;  %v7829_v19 = vpop.permute.xlu0 %473 }
  0xda   : > { %13203 = vst [vmem:[#allocation108_spill] sm:$0xff] %v7829_v19  ;;  %v7837_v20 = vpop.permute.xlu2 %531  ;;  %v7859_v54 = vsel %vm361_vm1, %v739_v53, %v741_v17  ;;  %v766_v19 = vrot.slane %v7664_v1, 2 }
  0xdb   : > { %13205 = vst [vmem:[#allocation110_spill] sm:$0xff] %v7837_v20 }
  0xdc   : > { %13210 = vst [vmem:[#allocation115_spill] sm:$0xff] %v7859_v54 }
  0xde   : > { %751 = vrot.lane.b32.xlu1 %v7835_v37, %s7006_s29  ;;  %v7867_v37 = vsel %vm361_vm1, %v741_v17, %v743_v36 }
  0xdf   : > { %749 = vrot.lane.b32.xlu0 %v7840_v57, %s7006_s29  ;;  %v7864_v57 = vsel %vm361_vm1, %v737_v41, %v739_v53  ;;  %13213 = vst [vmem:[#allocation118_spill] sm:$0xff] %v7867_v37  ;;  %v745_v53 = vrot.slane %v7203_v61, 1  ;;  %v747_v41 = vrot.slane %v7764_v48, 1 }
  0xe0   : > { %v7851_v2 = vpop.permute.xlu1 %481  ;;  %753 = vrot.lane.b32.xlu2 %v7845_v12, %s7006_s29  ;;  %13212 = vst [vmem:[#allocation117_spill] sm:$0xff] %v7864_v57  ;;  %v769_v12 = vrot.slane %v7691_v30, 2 }
  0xe1   : > { %13208 = vst [vmem:[#allocation113_spill] sm:$0xff] %v7851_v2  ;;  %v7853_v20 = vpop.permute.xlu0 %479  ;;  %v768_v2 = vrot.slane %v7702_v18, 1  ;;  %v7890_v62 = vsel %vm361_vm1, %v745_v53, %v747_v41 }
  0xe2   : > { %13209 = vst [vmem:[#allocation114_spill] sm:$0xff] %v7853_v20  ;;  %v7861_v27 = vpop.permute.xlu2 %555  ;;  %v765_v20 = vrot.slane %v7687_v43, 1 }
  0xe3   : > { %13211 = vst [vmem:[#allocation116_spill] sm:$0xff] %v7861_v27  ;;  %v776_v27 = vrot.slane %v7728_v6, 1 }
  0xe4   : > { %v767_v40 = vor.u32 %v766_v19, %v765_v20  ;;  %13216 = vst [vmem:[#allocation121_spill] sm:$0xff] %v7890_v62  ;;  %v784_v20 = vrot.slane %v7783_v9, 1 }
  0xe6   : > { %757 = vrot.lane.b32.xlu1 %v7859_v54, %s7006_s29  ;;  %v772_v54 = vrot.slane %v7736_v56, 1 }
  0xe7   : > { %755 = vrot.lane.b32.xlu0 %v7864_v57, %s7006_s29  ;;  %v770_v57 = vor.u32 %v769_v12, %v768_v2  ;;  %v781_v12 = vrot.slane %v7731_v7, 2 }
  0xe8   : > { %v7879_v17 = vpop.permute.xlu1 %523  ;;  %759 = vrot.lane.b32.xlu2 %v7867_v37, %s7006_s29  ;;  %v778_v37 = vor.u32 %v777_v50, %v776_v27  ;;  %v789_v27 = vrot.slane %v7751_v16, 2 }
  0xe9   : > { %13214 = vst [vmem:[#allocation119_spill] sm:$0xff] %v7879_v17  ;;  %v7881_v10 = vpop.permute.xlu0 %521  ;;  %v7895_v17 = vsel %vm361_vm1, %v743_v36, %v745_v53  ;;  %v7900_v60 = vsel %vm395_vm2, %v767_v40, %v770_v57  ;;  %v782_v40 = vor.u32 %v781_v12, %v780_v38  ;;  %v785_v36 = vrot.slane %v7757_v49, 2 }
  0xea   : > { %13215 = vst [vmem:[#allocation120_spill] sm:$0xff] %v7881_v10  ;;  %v7892_v26 = vpop.permute.xlu2 %561  ;;  %v774_v10 = vor.u32 %v773_v34, %v772_v54  ;;  %v788_v54 = vrot.slane %v7773_v63, 1  ;;  %v792_v38 = vrot.slane %v7791_v44, 1  ;;  %v793_v12 = vrot.slane %v7776_v58, 2 }
  0xeb   : > { %13217 = vst [vmem:[#allocation122_spill] sm:$0xff] %v7892_v26  ;;  %v7927_v41 = vsel %vm395_vm2, %v778_v37, %v782_v40  ;;  %v859_v26 = vrot.slane %v7714_v8, 3  ;;  %vm13062_vm1 = vcmask 719872  }
  0xec   : > { %13218 = vst [vmem:[#allocation123_spill] sm:$0xff] %v7895_v17  ;;  %v7913_v50 = vsel %vm395_vm2, %v774_v10, %v778_v37  ;;  %v7922_v53 = vsel %vm395_vm2, %v770_v57, %v774_v10  ;;  %v7936_v10 = vshrl.u32 %v7764_v48, 16  ;;  %v794_v37 = vor.u32 %v793_v12, %v792_v38 }
  0xed   : > { %13219 = vst [vmem:[#allocation124_spill] sm:$0xff] %v7900_v60  ;;  %v819_v38 = vrot.slane %v7649_v31, 2 }
  0xee   : > { %763 = vrot.lane.b32.xlu1 %v7890_v62, %s7006_s29  ;;  %13222 = vst [vmem:[#allocation127_spill] sm:$0xff] %v7913_v50 }
  0xef   : > { %761 = vrot.lane.b32.xlu0 %v7895_v17, %s7006_s29  ;;  %13224 = vst [vmem:[#allocation129_spill] sm:$0xff] %v7922_v53  ;;  %v790_v17 = vor.u32 %v789_v27, %v788_v54  ;;  %v818_v27 = vrot.slane %v7627_v25, 2 }
  0xf0   : > { %v7906_v19 = vpop.permute.xlu1 %529  ;;  %802 = vrot.lane.b32.xlu2 %v7900_v60, %s7007_s30  ;;  %13225 = vst [vmem:[#allocation130_spill] sm:$0xff] %v7927_v41  ;;  %v786_v60 = vor.u32 %v785_v36, %v784_v20  ;;  %v798_v20 = vrot.slane %v7936_v10, 1  ;;  %v799_v36 = vrot.slane %v7794_v59, 2 }
  0xf1   : > { %13220 = vst [vmem:[#allocation125_spill] sm:$0xff] %v7906_v19  ;;  %v7908_v2 = vpop.permute.xlu0 %527  ;;  %v7955_v54 = vsel %vm395_vm2, %v790_v17, %v794_v37  ;;  %v855_v19 = vrot.slane %v7691_v30, 3 }
  0xf2   : > { %13221 = vst [vmem:[#allocation126_spill] sm:$0xff] %v7908_v2  ;;  %v7915_v34 = vpop.permute.xlu2 %567 }
  0xf3   : > { %13223 = vst [vmem:[#allocation128_spill] sm:$0xff] %v7915_v34 }
  0xf4   : > { %13230 = vst [vmem:[#allocation135_spill] sm:$0xff] %v7955_v54 }
  0xf6   : > { %806 = vrot.lane.b32.xlu1 %v7913_v50, %s7007_s30  ;;  %v7943_v50 = vsel %vm395_vm2, %v786_v60, %v790_v17  ;;  %v7969_v17 = vsel %vm449_vm3, %v818_v27, %v819_v38  ;;  %v825_v27 = vrot.slane %v7682_v47, 2 }
  0xf7   : > { %804 = vrot.lane.b32.xlu0 %v7922_v53, %s7007_s30  ;;  %13227 = vst [vmem:[#allocation132_spill] sm:$0xff] %v7943_v50  ;;  %v7948_v53 = vsel %vm395_vm2, %v782_v40, %v786_v60  ;;  %v800_v60 = vor.u32 %v799_v36, %v798_v20  ;;  %v823_v36 = vrot.slane %v7657_v21, 2 }
  0xf8   : > { %v7933_v62 = vpop.permute.xlu1 %553  ;;  %808 = vrot.lane.b32.xlu2 %v7927_v41, %s7007_s30  ;;  %13229 = vst [vmem:[#allocation134_spill] sm:$0xff] %v7948_v53 }
  0xf9   : > { %v7938_v57 = vpop.permute.xlu0 %533  ;;  %13233 = vst [vmem:[#allocation138_spill] sm:$0xff] %v7969_v17 }
  0xfa   : > { %13226 = vst [vmem:[#allocation131_spill] sm:$0xff] %v7938_v57  ;;  %v7945_v34 = vpop.permute.xlu2 %609 }
  0xfb   : > { %13228 = vst [vmem:[#allocation133_spill] sm:$0xff] %v7945_v34  ;;  %v862_v34 = vrot.slane %v7728_v6, 2 }
  0xfe   : > { %812 = vrot.lane.b32.xlu1 %v7943_v50, %s7007_s30  ;;  %v821_v50 = vrot.slane %v7643_v35, 2 }
  0xff   : > { %810 = vrot.lane.b32.xlu0 %v7948_v53, %s7007_s30  ;;  %v7974_v53 = vsel %vm395_vm2, %v794_v37, %v800_v60  ;;  %v827_v37 = vrot.slane %v7676_v14, 2  ;;  %v7993_v60 = vsel %vm449_vm3, %v823_v36, %v825_v27  ;;  %vm13038_vm2 = vcmask 785408  }
 0x100   : > { %v7961_v12 = vpop.permute.xlu1 %559  ;;  %814 = vrot.lane.b32.xlu2 %v7955_v54, %s7007_s30  ;;  %13235 = vst [vmem:[#allocation140_spill] sm:$0xff] %v7974_v53  ;;  %v7979_v20 = vsel %vm449_vm3, %v819_v38, %v821_v50 }
 0x101   : > { %13231 = vst [vmem:[#allocation136_spill] sm:$0xff] %v7961_v12  ;;  %v7963_v40 = vpop.permute.xlu0 %557  ;;  %v852_v12 = vrot.slane %v7664_v1, 3 }
 0x102   : > { %13232 = vst [vmem:[#allocation137_spill] sm:$0xff] %v7963_v40  ;;  %v7971_v41 = vpop.permute.xlu2 %615  ;;  %v863_v40 = vrot.slane %v7709_v52, 3 }
 0x103   : > { %13234 = vst [vmem:[#allocation139_spill] sm:$0xff] %v7971_v41  ;;  %v8005_v41 = vsel %vm449_vm3, %v825_v27, %v827_v37  ;;  %v854_v27 = vrot.slane %v7702_v18, 2 }
 0x104   : > { %13236 = vst [vmem:[#allocation141_spill] sm:$0xff] %v7979_v20 }
 0x105   : > { %13239 = vst [vmem:[#allocation144_spill] sm:$0xff] %v7993_v60 }
 0x106   : > { %835 = vrot.lane.b32.xlu1 %v7969_v17, %s7008_s4  ;;  %v829_v17 = vrot.slane %v7697_v3, 2  ;;  %13242 = vst [vmem:[#allocation147_spill] sm:$0xff] %v8005_v41 }
 0x107   : > { %816 = vrot.lane.b32.xlu0 %v7974_v53, %s7007_s30  ;;  %v7998_v53 = vsel %vm449_vm3, %v821_v50, %v823_v36  ;;  %v833_v36 = vrot.slane %v7764_v48, 2 }
 0x108   : > { %v7985_v54 = vpop.permute.xlu1 %565  ;;  %837 = vrot.lane.b32.xlu2 %v7979_v20, %s7008_s4  ;;  %13241 = vst [vmem:[#allocation146_spill] sm:$0xff] %v7998_v53  ;;  %v8026_v2 = vsel %vm449_vm3, %v827_v37, %v829_v17 }
 0x109   : > { %13237 = vst [vmem:[#allocation142_spill] sm:$0xff] %v7985_v54  ;;  %v7987_v57 = vpop.permute.xlu0 %563  ;;  %v831_v54 = vrot.slane %v7203_v61, 2 }
 0x10a   : > { %13238 = vst [vmem:[#allocation143_spill] sm:$0xff] %v7987_v57  ;;  %v7995_v38 = vpop.permute.xlu2 %629 }
 0x10b   : > { %13240 = vst [vmem:[#allocation145_spill] sm:$0xff] %v7995_v38  ;;  %v8016_v50 = vsel %vm449_vm3, %v829_v17, %v831_v54  ;;  %v871_v38 = vrot.slane %v7757_v49, 3 }
 0x10c   : > { %13245 = vst [vmem:[#allocation150_spill] sm:$0xff] %v8016_v50 }
 0x10d   : > { %13247 = vst [vmem:[#allocation152_spill] sm:$0xff] %v8026_v2 }
 0x10e   : > { %841 = vrot.lane.b32.xlu1 %v7993_v60, %s7008_s4 }
 0x10f   : > { %839 = vrot.lane.b32.xlu0 %v7998_v53, %s7008_s4  ;;  %v858_v53 = vrot.slane %v7736_v56, 2 }
 0x110   : > { %v8009_v20 = vpop.permute.xlu1 %607  ;;  %843 = vrot.lane.b32.xlu2 %v8005_v41, %s7008_s4  ;;  %v851_v41 = vrot.slane %v7687_v43, 2 }
 0x111   : > { %13243 = vst [vmem:[#allocation148_spill] sm:$0xff] %v8009_v20  ;;  %v8011_v57 = vpop.permute.xlu0 %605  ;;  %v856_v20 = vor.u32 %v855_v19, %v854_v27  ;;  %v860_v17 = vor.u32 %v859_v26, %v858_v53 }
 0x112   : > { %13244 = vst [vmem:[#allocation149_spill] sm:$0xff] %v8011_v57  ;;  %v8019_v60 = vpop.permute.xlu2 %635  ;;  %v853_v32 = vor.u32 %v852_v12, %v851_v41  ;;  %v864_v57 = vor.u32 %v863_v40, %v862_v34  ;;  %v875_v34 = vrot.slane %v7751_v16, 3 }
 0x113   : > { %13246 = vst [vmem:[#allocation151_spill] sm:$0xff] %v8019_v60  ;;  %v8033_v60 = vsel %vm449_vm3, %v831_v54, %v833_v36  ;;  %v866_v54 = vrot.slane %v7744_v11, 2  ;;  %v867_v36 = vrot.slane %v7731_v7, 3  ;;  %v8050_v19 = vsel %vm483_vm4, %v856_v20, %v860_v17 }
 0x114   : > { %13248 = vst [vmem:[#allocation153_spill] sm:$0xff] %v8033_v60  ;;  %v8055_v53 = vsel %vm483_vm4, %v853_v32, %v856_v20  ;;  %v8060_v27 = vsel %vm483_vm4, %v860_v17, %v864_v57  ;;  %v878_v17 = vrot.slane %v7791_v44, 2  ;;  %vm13035_vm3 = vcmask 850944  }
 0x115   : > { %13249 = vst [vmem:[#allocation154_spill] sm:$0xff] %v8050_v19  ;;  %v868_v41 = vor.u32 %v867_v36, %v866_v54  ;;  %v879_v54 = vrot.slane %v7776_v58, 3  ;;  %v882_v36 = vrot.slane %v7936_v10, 2 }
 0x116   : > { %847 = vrot.lane.b32.xlu1 %v8016_v50, %s7008_s4  ;;  %v870_v50 = vrot.slane %v7783_v9, 2  ;;  %13251 = vst [vmem:[#allocation156_spill] sm:$0xff] %v8055_v53 }
 0x117   : > { %845 = vrot.lane.b32.xlu0 %v8026_v2, %s7008_s4  ;;  %13252 = vst [vmem:[#allocation157_spill] sm:$0xff] %v8060_v27 }
 0x118   : > { %v8039_v37 = vpop.permute.xlu1 %613  ;;  %849 = vrot.lane.b32.xlu2 %v8033_v60, %s7008_s4  ;;  %v872_v12 = vor.u32 %v871_v38, %v870_v50  ;;  %v874_v60 = vrot.slane %v7773_v63, 2 }
 0x119   : > { %v8041_v5 = vpop.permute.xlu0 %611 }
 0x11a   : > { %v8052_v26 = vpop.permute.xlu2 %641  ;;  %v8073_v20 = vsel %vm483_vm4, %v868_v41, %v872_v12  ;;  %v876_v38 = vor.u32 %v875_v34, %v874_v60  ;;  %v880_v60 = vor.u32 %v879_v54, %v878_v17  ;;  %v905_v17 = vrot.slane %v7643_v35, 3 }
 0x11b   : > { %13250 = vst [vmem:[#allocation155_spill] sm:$0xff] %v8052_v26  ;;  %v907_v54 = vrot.slane %v7657_v21, 3 }
 0x11c   : > { %13255 = vst [vmem:[#allocation160_spill] sm:$0xff] %v8073_v20 }
 0x11e   : > { %888 = vrot.lane.b32.xlu1 %v8050_v19, %s7009_s5  ;;  %v8082_v19 = vsel %vm483_vm4, %v864_v57, %v868_v41  ;;  %v903_v57 = vrot.slane %v7649_v31, 3  ;;  %v902_v41 = vrot.slane %v7627_v25, 3 }
 0x11f   : > { %886 = vrot.lane.b32.xlu0 %v8055_v53, %s7009_s5  ;;  %v883_v53 = vrot.slane %v7794_v59, 3  ;;  %13256 = vst [vmem:[#allocation161_spill] sm:$0xff] %v8082_v19 }
 0x120   : > { %v8066_v40 = vpop.permute.xlu1 %619  ;;  %890 = vrot.lane.b32.xlu2 %v8060_v27, %s7009_s5  ;;  %v8087_v27 = vsel %vm483_vm4, %v872_v12, %v876_v38 }
 0x121   : > { %13253 = vst [vmem:[#allocation158_spill] sm:$0xff] %v8066_v40  ;;  %v8068_v32 = vpop.permute.xlu0 %617  ;;  %v884_v34 = vor.u32 %v883_v53, %v882_v36  ;;  %v8110_v53 = vsel %vm535_vm5, %v902_v41, %v903_v57 }
 0x122   : > { %13254 = vst [vmem:[#allocation159_spill] sm:$0xff] %v8068_v32  ;;  %v8075_v50 = vpop.permute.xlu2 %718 }
 0x123   : > { %13257 = vst [vmem:[#allocation162_spill] sm:$0xff] %v8087_v27 }
 0x124   : > { %13260 = vst [vmem:[#allocation165_spill] sm:$0xff] %v8110_v53 }
 0x126   : > { %894 = vrot.lane.b32.xlu1 %v8073_v20, %s7009_s5  ;;  %v8100_v20 = vsel %vm483_vm4, %v880_v60, %v884_v34 }
 0x127   : > { %892 = vrot.lane.b32.xlu0 %v8082_v19, %s7009_s5  ;;  %13258 = vst [vmem:[#allocation163_spill] sm:$0xff] %v8100_v20  ;;  %v8105_v19 = vsel %vm483_vm4, %v876_v38, %v880_v60  ;;  %v909_v38 = vrot.slane %v7682_v47, 3  ;;  %v8124_v60 = vsel %vm535_vm5, %v905_v17, %v907_v54  ;;  %v943_v47 = vrot.slane %v7714_v8, 4 }
 0x128   : > { %v8091_v2 = vpop.permute.xlu1 %633  ;;  %896 = vrot.lane.b32.xlu2 %v8087_v27, %s7009_s5  ;;  %13259 = vst [vmem:[#allocation164_spill] sm:$0xff] %v8105_v19  ;;  %v913_v27 = vrot.slane %v7697_v3, 3  ;;  %v939_v3 = vrot.slane %v7691_v30, 4  ;;  %v917_v30 = vrot.slane %v7764_v48, 3  ;;  %v950_v8 = vrot.slane %v7744_v11, 3 }
 0x129   : > { %v8093_v40 = vpop.permute.xlu0 %631  ;;  %13261 = vst [vmem:[#allocation166_spill] sm:$0xff] %v8124_v60  ;;  %v8136_v26 = vsel %vm535_vm5, %v907_v54, %v909_v38  ;;  %v935_v54 = vrot.slane %v7687_v43, 3  ;;  %vm13034_vm4 = vcmask 916480  }
 0x12a   : > { %v8102_v12 = vpop.permute.xlu2 %724  ;;  %13264 = vst [vmem:[#allocation169_spill] sm:$0xff] %v8136_v26 }
 0x12e   : > { %900 = vrot.lane.b32.xlu1 %v8100_v20, %s7009_s5  ;;  %v911_v20 = vrot.slane %v7676_v14, 3 }
 0x12f   : > { %898 = vrot.lane.b32.xlu0 %v8105_v19, %s7009_s5  ;;  %v8129_v19 = vsel %vm535_vm5, %v903_v57, %v905_v17  ;;  %v915_v17 = vrot.slane %v7203_v61, 3  ;;  %v942_v61 = vrot.slane %v7736_v56, 3  ;;  %v947_v56 = vrot.slane %v7709_v52, 4 }
 0x130   : > { %v8116_v36 = vpop.permute.xlu1 %639  ;;  %919 = vrot.lane.b32.xlu2 %v8110_v53, %s7010_s6  ;;  %13263 = vst [vmem:[#allocation168_spill] sm:$0xff] %v8129_v19  ;;  %v8147_v57 = vsel %vm535_vm5, %v911_v20, %v913_v27 }
 0x131   : > { %v8118_v34 = vpop.permute.xlu0 %637  ;;  %13266 = vst [vmem:[#allocation171_spill] sm:$0xff] %v8147_v57  ;;  %v8185_v48 = vsel %vm535_vm5, %v915_v17, %v917_v30  ;;  %v963_v30 = vrot.slane %v7776_v58, 4 }
 0x132   : > { %v8126_v41 = vpop.permute.xlu2 %730  ;;  %13270 = vst [vmem:[#allocation175_spill] sm:$0xff] %v8185_v48 }
 0x133   : > { %13262 = vst [vmem:[#allocation167_spill] sm:$0xff] %v8126_v41  ;;  %v936_v41 = vrot.slane %v7664_v1, 4 }
 0x135   : > { %v937_v1 = vor.u32 %v936_v41, %v935_v54 }
 0x136   : > { %923 = vrot.lane.b32.xlu1 %v8124_v60, %s7010_s6 }
 0x137   : > { %921 = vrot.lane.b32.xlu0 %v8129_v19, %s7010_s6  ;;  %v938_v19 = vrot.slane %v7702_v18, 3 }
 0x138   : > { %v8140_v53 = vpop.permute.xlu1 %716  ;;  %925 = vrot.lane.b32.xlu2 %v8136_v26, %s7010_s6  ;;  %v8162_v26 = vsel %vm535_vm5, %v913_v27, %v915_v17  ;;  %v946_v27 = vrot.slane %v7728_v6, 3 }
 0x139   : > { %v8142_v32 = vpop.permute.xlu0 %643  ;;  %13268 = vst [vmem:[#allocation173_spill] sm:$0xff] %v8162_v26  ;;  %v940_v43 = vor.u32 %v939_v3, %v938_v19 }
 0x13a   : > { %13265 = vst [vmem:[#allocation170_spill] sm:$0xff] %v8142_v32  ;;  %v8150_v60 = vpop.permute.xlu2 %753  ;;  %v8157_v32 = vsel %vm535_vm5, %v909_v38, %v911_v20  ;;  %v951_v38 = vrot.slane %v7731_v7, 4  ;;  %v948_v41 = vor.u32 %v947_v56, %v946_v27  ;;  %v954_v7 = vrot.slane %v7783_v9, 3 }
 0x13b   : > { %13267 = vst [vmem:[#allocation172_spill] sm:$0xff] %v8157_v32  ;;  %v8180_v3 = vsel %vm569_vm6, %v937_v1, %v940_v43  ;;  %v958_v9 = vrot.slane %v7773_v63, 3  ;;  %vm13033_vm5 = vcmask 982016  }
 0x13c   : > { %13269 = vst [vmem:[#allocation174_spill] sm:$0xff] %v8180_v3  ;;  %v952_v6 = vor.u32 %v951_v38, %v950_v8  ;;  %v966_v8 = vrot.slane %v7936_v10, 3  ;;  %v967_v38 = vrot.slane %v7794_v59, 4 }
 0x13e   : > { %929 = vrot.lane.b32.xlu1 %v8147_v57, %s7010_s6  ;;  %v8203_v17 = vsel %vm569_vm6, %v948_v41, %v952_v6  ;;  %v13292_v57 = vld [vmem:[#allocation29_spill] sm:$0xff] }
 0x13f   : > { %927 = vrot.lane.b32.xlu0 %v8157_v32, %s7010_s6  ;;  %v944_v32 = vor.u32 %v943_v47, %v942_v61  ;;  %v955_v61 = vrot.slane %v7757_v49, 4  ;;  %13273 = vst [vmem:[#allocation178_spill] sm:$0xff] %v8203_v17  ;;  %v959_v49 = vrot.slane %v7751_v16, 4 }
 0x140   : > { %v8168_v18 = vpop.permute.xlu1 %722  ;;  %931 = vrot.lane.b32.xlu2 %v8162_v26, %s7010_s6  ;;  %v13291_v26 = vld [vmem:[#allocation28_spill] sm:$0xff] }
 0x141   : > { %v8171_v20 = vpop.permute.xlu0 %720  ;;  %v8190_v52 = vsel %vm569_vm6, %v940_v43, %v944_v32  ;;  %v956_v54 = vor.u32 %v955_v61, %v954_v7  ;;  %v962_v43 = vrot.slane %v7791_v44, 3  ;;  %v8212_v27 = vsel %vm569_vm6, %v944_v32, %v948_v41 }
 0x142   : > { %v8182_v19 = vpop.permute.xlu2 %759  ;;  %13271 = vst [vmem:[#allocation176_spill] sm:$0xff] %v8190_v52  ;;  %v960_v16 = vor.u32 %v959_v49, %v958_v9  ;;  %v968_v32 = vor.u32 %v967_v38, %v966_v8 }
 0x143   : > { %13274 = vst [vmem:[#allocation179_spill] sm:$0xff] %v8212_v27  ;;  %v8217_v56 = vsel %vm569_vm6, %v952_v6, %v956_v54  ;;  %v964_v63 = vor.u32 %v963_v30, %v962_v43 }
 0x144   : > { %13275 = vst [vmem:[#allocation180_spill] sm:$0xff] %v8217_v56  ;;  %v8235_v59 = vsel %vm569_vm6, %v956_v54, %v960_v16 }
 0x145   : > { %v8230_v41 = vsel %vm569_vm6, %v960_v16, %v964_v63  ;;  %13277 = vst [vmem:[#allocation182_spill] sm:$0xff] %v8235_v59  ;;  %v8240_v10 = vsel %vm569_vm6, %v964_v63, %v968_v32 }
 0x146   : > { %970 = vrot.lane.b32.xlu1 %v8180_v3, %s7011_s7  ;;  %13276 = vst [vmem:[#allocation181_spill] sm:$0xff] %v8230_v41 }
 0x147   : > { %933 = vrot.lane.b32.xlu0 %v8185_v48, %s7010_s6  ;;  %13278 = vst [vmem:[#allocation183_spill] sm:$0xff] %v8240_v10  ;;  %v13288_v48 = vld [vmem:[#allocation26_spill] sm:$0xff] }
 0x148   : > { %v8196_v47 = vpop.permute.xlu1 %728  ;;  %972 = vrot.lane.b32.xlu2 %v8190_v52, %s7011_s7  ;;  %v13287_v52 = vld [vmem:[#allocation25_spill] sm:$0xff] }
 0x149   : > { %13272 = vst [vmem:[#allocation177_spill] sm:$0xff] %v8196_v47  ;;  %v8198_v11 = vpop.permute.xlu0 %726  ;;  %v13303_v47 = vld [vmem:[#allocation37_spill] sm:$0xff] }
 0x14a   : > { %v8205_v1 = vpop.permute.xlu2 %802 }
 0x14e   : > { %976 = vrot.lane.b32.xlu1 %v8203_v17, %s7011_s7 }
 0x14f   : > { %974 = vrot.lane.b32.xlu0 %v8212_v27, %s7011_s7  ;;  %v13285_v27 = vld [vmem:[#allocation23_spill] sm:$0xff] }
 0x150   : > { %v8223_v44 = vpop.permute.xlu1 %751  ;;  %978 = vrot.lane.b32.xlu2 %v8217_v56, %s7011_s7  ;;  %v6759_v56 = vld [vmem:[%s12760_s1 + $0x38] sm:$0xff] }
 0x151   : > { %v8225_v58 = vpop.permute.xlu0 %749  ;;  %1317 = vmatpush.bf16.msra.mxu0 %v6759_v56  ;;  %v6757_v56 = vld [vmem:[%s12760_s1 + $0x28] sm:$0xff] }
 0x152   : > { %v8232_v6 = vpop.permute.xlu2 %808 }
 0x156   : > { %982 = vrot.lane.b32.xlu1 %v8230_v41, %s7011_s7  ;;  %v13284_v41 = vld [vmem:[#allocation22_spill] sm:$0xff] }
 0x157   : > { %980 = vrot.lane.b32.xlu0 %v8235_v59, %s7011_s7 }
 0x158   : > { %v8244_v7 = vpop.permute.xlu1 %757  ;;  %984 = vrot.lane.b32.xlu2 %v8240_v10, %s7011_s7 }
 0x159   : > { %v8246_v61 = vpop.permute.xlu0 %755 }
 0x15a   : > { %v8250_v9 = vpop.permute.xlu2 %814 }
 0x15b   : > { %13279 = vst [vmem:[#allocation184_spill] sm:$0xff] %v8250_v9  ;;  %v13297_v9 = vld [vmem:[#allocation34_spill] sm:$0xff] }
 0x15e   : > { %2121 = vrot.lane.b32.xlu1 %v7126_v28, %s7011_s7 }
 0x15f   : > { %2119 = vrot.lane.b32.xlu0 %v7112_v23, %s7011_s7 }
 0x160   : > { %v8256_v54 = vpop.permute.xlu1 %763  ;;  %2123 = vrot.lane.b32.xlu2 %v7092_v15, %s7011_s7 }
 0x161   : > { %13280 = vst [vmem:[#allocation185_spill] sm:$0xff] %v8256_v54  ;;  %v8258_v49 = vpop.permute.xlu0 %761 }
 0x162   : > { %13281 = vst [vmem:[#allocation186_spill] sm:$0xff] %v8258_v49  ;;  %v8262_v43 = vpop.permute.xlu2 %837 }
 0x166   : > { %2127 = vrot.lane.b32.xlu1 %v7141_v33, %s7011_s7 }
 0x167   : > { %2125 = vrot.lane.b32.xlu0 %v7108_v22, %s7011_s7 }
 0x168   : > { %v8268_v30 = vpop.permute.xlu1 %806  ;;  %2129 = vrot.lane.b32.xlu2 %v7225_v39, %s7011_s7 }
 0x169   : > { %v8270_v8 = vpop.permute.xlu0 %804 }
 0x16a   : > { %v8274_v38 = vpop.permute.xlu2 %843 }
 0x16e   : > { %2133 = vrot.lane.b32.xlu1 %v7165_v46, %s7011_s7 }
 0x16f   : > { %2131 = vrot.lane.b32.xlu0 %v7219_v29, %s7011_s7 }
 0x170   : > { %v8280_v16 = vpop.permute.xlu1 %812  ;;  %2135 = vrot.lane.b32.xlu2 %v7175_v51, %s6997_s20 }
 0x171   : > { %v8282_v63 = vpop.permute.xlu0 %810 }
 0x172   : > { %v8286_v32 = vpop.permute.xlu2 %849 }
 0x173   : > { %13282 = vst [vmem:[#allocation187_spill] sm:$0xff] %v8286_v32 }
 0x176   : > { %2139 = vrot.lane.b32.xlu1 %v7284_v24, %s6997_s20  ;;  %v6758_v24 = vld [vmem:[%s12760_s1 + $0x30] sm:$0xff] }
 0x177   : > { %2137 = vrot.lane.b32.xlu0 %v7287_v42, %s6997_s20  ;;  %v13286_v42 = vld [vmem:[#allocation24_spill] sm:$0xff]  ;;  %1318 = vmatpush.bf16.msra.mxu0 %v6758_v24  ;;  %v13289_v24 = vld [vmem:[#allocation27_spill] sm:$0xff] }
 0x178   : > { %v8292_v10 = vpop.permute.xlu1 %835  ;;  %2141 = vrot.lane.b32.xlu2 %v13284_v41, %s6997_s20 }
 0x179   : > { %v8294_v59 = vpop.permute.xlu0 %816 }
 0x17a   : > { %13283 = vst [vmem:[#allocation188_spill] sm:$0xff] %v8294_v59  ;;  %v8301_v51 = vpop.permute.xlu2 %890  ;;  %v13294_v59 = vld [vmem:[#allocation31_spill] sm:$0xff] }
 0x17b   : > { %1319 = vmatpush.bf16.msra.mxu0 %v6757_v56  ;;  %v6755_v56 = vld [vmem:[%s12760_s1 + $0x18] sm:$0xff] }
 0x17e   : > { %2145 = vrot.lane.b32.xlu1 %v13285_v27, %s6997_s20 }
 0x17f   : > { %2143 = vrot.lane.b32.xlu0 %v13286_v42, %s6997_s20  ;;  %v6756_v42 = vld [vmem:[%s12760_s1 + $0x20] sm:$0xff] }
 0x180   : > { %v8310_v17 = vpop.permute.xlu1 %841  ;;  %2147 = vrot.lane.b32.xlu2 %v13287_v52, %s6997_s20  ;;  %1320 = vmatpush.bf16.msra.mxu0 %v6756_v42  ;;  %v13293_v42 = vld [vmem:[#allocation30_spill] sm:$0xff] }
 0x181   : > { %v8312_v41 = vpop.permute.xlu0 %839 }
 0x182   : > { %v8319_v27 = vpop.permute.xlu2 %896 }
 0x184   : > { %1321 = vmatpush.bf16.msra.mxu0 %v6755_v56  ;;  %v6753_v56 = vld [vmem:[%s12760_s1 + $0x8] sm:$0xff] }
 0x186   : > { %2151 = vrot.lane.b32.xlu1 %v13288_v48, %s6998_s21 }
 0x187   : > { %2149 = vrot.lane.b32.xlu0 %v13289_v24, %s6997_s20  ;;  %v6754_v24 = vld [vmem:[%s12760_s1 + $0x10] sm:$0xff] }
 0x188   : > { %v8328_v3 = vpop.permute.xlu1 %847  ;;  %2153 = vrot.lane.b32.xlu2 %v13291_v26, %s6998_s21  ;;  %1322 = vmatpush.bf16.msra.mxu0 %v6754_v24  ;;  %v13296_v24 = vld [vmem:[#allocation33_spill] sm:$0xff] }
 0x189   : > { %13290 = vst [vmem:[#allocation189_spill] sm:$0xff] %v8328_v3  ;;  %v8330_v52 = vpop.permute.xlu0 %845 }
 0x18a   : > { %v8337_v48 = vpop.permute.xlu2 %919 }
 0x18c   : > { %1323 = vmatpush.bf16.msra.mxu0 %v6753_v56  ;;  %v13299_v56 = vld [vmem:[#allocation35_spill] sm:$0xff] }
 0x18e   : > { %2157 = vrot.lane.b32.xlu1 %v13292_v57, %s6998_s21  ;;  %v13295_v57 = vld [vmem:[#allocation32_spill] sm:$0xff] }
 0x18f   : > { %2155 = vrot.lane.b32.xlu0 %v13293_v42, %s6998_s21  ;;  %v6752_v42 = vld [vmem:[%s12760_s1] sm:$0xff] }
 0x190   : > { %v8346_v32 = vpop.permute.xlu1 %888  ;;  %2159 = vrot.lane.b32.xlu2 %v13294_v59, %s6998_s21  ;;  %1324 = vmatpush.bf16.msra.mxu0 %v6752_v42  ;;  %v988_v42 = vsel %vm986_vm7, %v7112_v23, %v7529_v4  ;;  %v13304_v4 = vld [vmem:[#allocation38_spill] sm:$0xff] }
 0x191   : > { %v887_v26 = vpop.permute.xlu0 %886 }
 0x192   : > { %v8353_v54 = vpop.permute.xlu2 %925 }
 0x196   : > { %2163 = vrot.lane.b32.xlu1 %v13295_v57, %s6998_s21  ;;  %v13300_v57 = vld [vmem:[#allocation36_spill] sm:$0xff] }
 0x197   : > { %2161 = vrot.lane.b32.xlu0 %v13296_v24, %s6998_s21 }
 0x198   : > { %v8362_v3 = vpop.permute.xlu1 %894  ;;  %2165 = vrot.lane.b32.xlu2 %v13297_v9, %s6998_s21 }
 0x199   : > { %v8364_v59 = vpop.permute.xlu0 %892 }
 0x19a   : > { %v8368_v46 = vpop.permute.xlu2 %931 }
 0x19b   : > { %13298 = vst [vmem:[#allocation190_spill] sm:$0xff] %v8368_v46 }
 0x19e   : > { %2169 = vrot.lane.b32.xlu1 %v13299_v56, %s6999_s22  ;;  %v1005_v56 = vsel %vm1003_vm8, %v988_v42, %v7468_v55 }
 0x19f   : > { %2167 = vrot.lane.b32.xlu0 %v13300_v57, %s6999_s22  ;;  %v1022_v57 = vsel %vm1020_vm9, %v1005_v56, %v7666_v0  ;;  %v13306_v0 = vld [vmem:[#allocation40_spill] sm:$0xff] }
 0x1a0   : > { %v8374_v49 = vpop.permute.xlu1 %900  ;;  %2171 = vrot.lane.b32.xlu2 %v13303_v47, %s6999_s22  ;;  %v13305_v47 = vld [vmem:[#allocation39_spill] sm:$0xff] }
 0x1a1   : > { %13301 = vst [vmem:[#allocation191_spill] sm:$0xff] %v8374_v49  ;;  %v8379_v24 = vpop.permute.xlu0 %898  ;;  %v1039_v49 = vsel %vm1037_vm10, %v1022_v57, %v7803_v13  ;;  %v13307_v57 = vld [vmem:[#allocation149_spill] sm:$0xff] }
 0x1a2   : > { %13302 = vst [vmem:[#allocation192_spill] sm:$0xff] %v8379_v24  ;;  %v8383_v9 = vpop.permute.xlu2 %972  ;;  %v1056_v46 = vsel %vm13061_vm11, %v1039_v49, %v7769_v45  ;;  %v13309_v45 = vld [vmem:[#allocation41_spill] sm:$0xff]  ;;  %v13310_v49 = vld [vmem:[#allocation64_spill] sm:$0xff] }
 0x1a3   : > { %v1073_v13 = vsel %vm1071_vm12, %v1056_v46, %v7933_v62  ;;  %v13311_v62 = vld [vmem:[#allocation42_spill] sm:$0xff] }
 0x1a4   : > { %v1090_v56 = vsel %vm13066_vm13, %v1073_v13, %v13307_v57 }
 0x1a6   : > { %2175 = vrot.lane.b32.xlu1 %v13304_v4, %s6999_s22  ;;  %v13308_v4 = vld [vmem:[#allocation145_spill] sm:$0xff] }
 0x1a7   : > { %2173 = vrot.lane.b32.xlu0 %v13305_v47, %s6999_s22  ;;  %v1107_v47 = vsel %vm13065_vm14, %v1090_v56, %v13308_v4  ;;  %v13312_v56 = vld [vmem:[#allocation43_spill] sm:$0xff] }
 0x1a8   : > { %v8395_v23 = vpop.permute.xlu1 %923  ;;  %2177 = vrot.lane.b32.xlu2 %v13306_v0, %s6999_s22  ;;  %v990_v0 = vsel %vm986_vm7, %v7126_v28, %v13310_v49  ;;  %v1124_v46 = vsel %vm13064_vm15, %v1107_v47, %v8140_v53 }
 0x1a9   : > { %v922_v55 = vpop.permute.xlu0 %921  ;;  %v1141_v13 = vsel %vm13063_vm0, %v1124_v46, %v8225_v58  ;;  %v13314_v46 = vld [vmem:[#allocation72_spill] sm:$0xff] }
 0x1aa   : > { %v8405_v42 = vpop.permute.xlu2 %978  ;;  %v1158_v53 = vsel %vm13062_vm1, %v1141_v13, %v8205_v1  ;;  %v13317_v1 = vld [vmem:[#allocation120_spill] sm:$0xff]  ;;  %v13318_v13 = vld [vmem:[#allocation45_spill] sm:$0xff] }
 0x1ab   : > { %v1175_v58 = vsel %vm13038_vm2, %v1158_v53, %v8292_v10 }
 0x1ac   : > { %v1192_v28 = vsel %vm13035_vm3, %v1175_v58, %v887_v26 }
 0x1ad   : > { %v1209_v10 = vsel %vm13034_vm4, %v1192_v28, %v8337_v48  ;;  %v13322_v48 = vld [vmem:[#allocation47_spill] sm:$0xff] }
 0x1ae   : > { %2181 = vrot.lane.b32.xlu1 %v13309_v45, %s6999_s22  ;;  %v13313_v45 = vld [vmem:[#allocation76_spill] sm:$0xff] }
 0x1af   : > { %2179 = vrot.lane.b32.xlu0 %v13311_v62, %s6999_s22  ;;  %v1007_v49 = vsel %vm1003_vm8, %v990_v0, %v13313_v45  ;;  %v13316_v0 = vld [vmem:[#allocation44_spill] sm:$0xff] }
 0x1b0   : > { %v8420_v4 = vpop.permute.xlu1 %929  ;;  %2183 = vrot.lane.b32.xlu2 %v13312_v56, %s7000_s23  ;;  %v1024_v62 = vsel %vm1020_vm9, %v1007_v49, %v13314_v46  ;;  %v13315_v56 = vld [vmem:[#allocation102_spill] sm:$0xff] }
 0x1b1   : > { %v8422_v57 = vpop.permute.xlu0 %927  ;;  %v1041_v24 = vsel %vm1037_vm10, %v1024_v62, %v13315_v56  ;;  %v13319_v62 = vld [vmem:[#allocation46_spill] sm:$0xff]  ;;  %v13320_v56 = vld [vmem:[#allocation116_spill] sm:$0xff] }
 0x1b2   : > { %v8430_v47 = vpop.permute.xlu2 %984  ;;  %v1058_v45 = vsel %vm13061_vm11, %v1041_v24, %v13317_v1  ;;  %v13321_v24 = vld [vmem:[#allocation148_spill] sm:$0xff] }
 0x1b3   : > { %v1075_v58 = vsel %vm1071_vm12, %v1058_v45, %v13320_v56 }
 0x1b4   : > { %v1092_v46 = vsel %vm13066_vm13, %v1075_v58, %v13321_v24  ;;  %v13325_v24 = vld [vmem:[#allocation58_spill] sm:$0xff] }
 0x1b5   : > { %v1109_v28 = vsel %vm13065_vm14, %v1092_v46, %v8093_v40  ;;  %v13324_v40 = vld [vmem:[#allocation49_spill] sm:$0xff]  ;;  %v992_v46 = vsel %vm986_vm7, %v7092_v15, %v13325_v24  ;;  %v13330_v24 = vld [vmem:[#allocation52_spill] sm:$0xff] }
 0x1b6   : > { %2187 = vrot.lane.b32.xlu1 %v13316_v0, %s7000_s23  ;;  %v13331_v0 = vld [vmem:[#allocation90_spill] sm:$0xff] }
 0x1b7   : > { %2185 = vrot.lane.b32.xlu0 %v13318_v13, %s7000_s23 }
 0x1b8   : > { %v971_v53 = vpop.permute.xlu1 %970  ;;  %2189 = vrot.lane.b32.xlu2 %v13319_v62, %s7000_s23 }
 0x1b9   : > { %v8447_v49 = vpop.permute.xlu0 %933  ;;  %v1226_v26 = vsel %vm13033_vm5, %v1209_v10, %v971_v53  ;;  %v1126_v10 = vsel %vm13064_vm15, %v1109_v28, %v8075_v50  ;;  %v13323_v53 = vld [vmem:[#allocation48_spill] sm:$0xff]  ;;  %v13327_v28 = vld [vmem:[#allocation75_spill] sm:$0xff] }
 0x1ba   : > { %1325 = vmatmul.bf16.vlgmr.msra.gmra.mxu0 %v1226_v26  ;;  %v8456_v1 = vpop.permute.xlu2 %2123  ;;  %v1143_v45 = vsel %vm13063_vm0, %v1126_v10, %v8223_v44  ;;  %v1009_v62 = vsel %vm1003_vm8, %v992_v46, %v13327_v28  ;;  %v13328_v10 = vld [vmem:[#allocation93_spill] sm:$0xff] }
 0x1bb   : > { %v1160_v56 = vsel %vm13062_vm1, %v1143_v45, %v8270_v8 }
 0x1bc   : > { %v1177_v44 = vsel %vm13038_vm2, %v1160_v56, %v8262_v43  ;;  %v13332_v43 = vld [vmem:[#allocation119_spill] sm:$0xff] }
 0x1bd   : > { %v1194_v8 = vsel %vm13035_vm3, %v1177_v44, %v8346_v32  ;;  %v13334_v44 = vld [vmem:[#allocation137_spill] sm:$0xff] }
 0x1be   : > { %2193 = vrot.lane.b32.xlu1 %v13322_v48, %s7000_s23  ;;  %v1026_v48 = vsel %vm1020_vm9, %v1009_v62, %v13328_v10  ;;  %v1211_v45 = vsel %vm13034_vm4, %v1194_v8, %v922_v55  ;;  %v13333_v55 = vld [vmem:[#allocation53_spill] sm:$0xff] }
 0x1bf   : > { %2191 = vrot.lane.b32.xlu0 %v13323_v53, %s7000_s23  ;;  %v1043_v46 = vsel %vm1037_vm10, %v1026_v48, %v13331_v0  ;;  %v1229_v32 = vsel %vm13033_vm5, %v1211_v45, %v8383_v9  ;;  %v13335_v0 = vld [vmem:[#allocation133_spill] sm:$0xff]  ;;  %v13337_v45 = vld [vmem:[#allocation56_spill] sm:$0xff] }
 0x1c0   : > { %v8468_v26 = vpop.permute.xlu1 %976  ;;  %2195 = vrot.lane.b32.xlu2 %v13324_v40, %s7000_s23  ;;  %v13329_v40 = vld [vmem:[#allocation50_spill] sm:$0xff]  ;;  %v1060_v56 = vsel %vm13061_vm11, %v1043_v46, %v13332_v43 }
 0x1c1   : > { %v975_v58 = vpop.permute.xlu0 %974  ;;  %v1077_v10 = vsel %vm1071_vm12, %v1060_v56, %v13334_v44  ;;  %v13336_v43 = vld [vmem:[#allocation54_spill] sm:$0xff]  ;;  %v13338_v56 = vld [vmem:[#allocation63_spill] sm:$0xff] }
 0x1c2   : > { %v8477_v50 = vpop.permute.xlu2 %2129  ;;  %v1094_v48 = vsel %vm13066_vm13, %v1077_v10, %v13335_v0  ;;  %v13339_v10 = vld [vmem:[#allocation57_spill] sm:$0xff] }
 0x1c3   : > { %13326 = vst [vmem:[#allocation149_spill] sm:$0xff] %v8477_v50  ;;  %v1111_v46 = vsel %vm13065_vm14, %v1094_v48, %v8091_v2  ;;  %v13341_v48 = vld [vmem:[#allocation60_spill] sm:$0xff] }
 0x1c4   : > { %v1128_v9 = vsel %vm13064_vm15, %v1111_v46, %v8171_v20 }
 0x1c5   : > { %v1145_v2 = vsel %vm13063_vm0, %v1128_v9, %v8150_v60 }
 0x1c6   : > { %2199 = vrot.lane.b32.xlu1 %v13329_v40, %s7001_s24  ;;  %v1162_v20 = vsel %vm13062_vm1, %v1145_v2, %v8268_v30  ;;  %v13345_v30 = vld [vmem:[#allocation61_spill] sm:$0xff] }
 0x1c7   : > { %2197 = vrot.lane.b32.xlu0 %v13330_v24, %s7000_s23  ;;  %v13344_v24 = vld [vmem:[#allocation59_spill] sm:$0xff] }
 0x1c8   : > { %v8494_v28 = vpop.permute.xlu1 %982  ;;  %2201 = vrot.lane.b32.xlu2 %v13333_v55, %s7001_s24 }
 0x1c9   : > { %v8498_v62 = vpop.permute.xlu0 %980 }
 0x1ca   : > { %1330 = vmatmul.bf16.gmra.mxu0 %v1229_v32  ;;  %v8506_v8 = vpop.permute.xlu2 %2135  ;;  %v994_v32 = vsel %vm986_vm7, %v7108_v22, %v13338_v56  ;;  %v13342_v56 = vld [vmem:[#allocation92_spill] sm:$0xff] }
 0x1cb   : > { %v1011_v46 = vsel %vm1003_vm8, %v994_v32, %v13341_v48  ;;  %v13350_v48 = vld [vmem:[#allocation136_spill] sm:$0xff] }
 0x1cc   : > { %v1028_v40 = vsel %vm1020_vm9, %v1011_v46, %v13342_v56  ;;  %v13352_v46 = vld [vmem:[#allocation151_spill] sm:$0xff] }
 0x1ce   : > { %2205 = vrot.lane.b32.xlu1 %v13336_v43, %s7001_s24  ;;  %v1179_v43 = vsel %vm13038_vm2, %v1162_v20, %v8312_v41  ;;  %v13347_v41 = vld [vmem:[#allocation104_spill] sm:$0xff] }
 0x1cf   : > { %2203 = vrot.lane.b32.xlu0 %v13337_v45, %s7001_s24  ;;  %v13343_v45 = vld [vmem:[#allocation108_spill] sm:$0xff]  ;;  %v1196_v60 = vsel %vm13035_vm3, %v1179_v43, %v8301_v51 }
 0x1d0   : > { %v8518_v55 = vpop.permute.xlu1 %2121  ;;  %2207 = vrot.lane.b32.xlu2 %v13339_v10, %s7001_s24  ;;  %v1045_v10 = vsel %vm1037_vm10, %v1028_v40, %v13343_v45  ;;  %v1213_v9 = vsel %vm13034_vm4, %v1196_v60, %v8395_v23  ;;  %v13349_v45 = vld [vmem:[#allocation62_spill] sm:$0xff]  ;;  %v13354_v60 = vld [vmem:[#allocation67_spill] sm:$0xff] }
 0x1d1   : > { %v8523_v44 = vpop.permute.xlu0 %2119  ;;  %v1062_v2 = vsel %vm13061_vm11, %v1045_v10, %v13347_v41  ;;  %v1232_v40 = vsel %vm13033_vm5, %v1213_v9, %v975_v58  ;;  %v13353_v10 = vld [vmem:[#allocation65_spill] sm:$0xff] }
 0x1d2   : > { %v8531_v0 = vpop.permute.xlu2 %2141  ;;  %v1079_v51 = vsel %vm1071_vm12, %v1062_v2, %v13350_v48  ;;  %v13358_v48 = vld [vmem:[#allocation68_spill] sm:$0xff] }
 0x1d3   : > { %13340 = vst [vmem:[#allocation145_spill] sm:$0xff] %v8531_v0  ;;  %v1096_v43 = vsel %vm13066_vm13, %v1079_v51, %v8041_v5  ;;  %v13356_v5 = vld [vmem:[#allocation51_spill] sm:$0xff]  ;;  %v13359_v51 = vld [vmem:[#allocation82_spill] sm:$0xff] }
 0x1d4   : > { %v1113_v56 = vsel %vm13065_vm14, %v1096_v43, %v13352_v46  ;;  %v996_v2 = vsel %vm986_vm7, %v7141_v33, %v13356_v5  ;;  %v13452_v33 = vld [vmem:[#allocation138_spill] sm:$0xff] }
 0x1d5   : > { %v1130_v58 = vsel %vm13064_vm15, %v1113_v56, %v8168_v18  ;;  %v1013_v18 = vsel %vm1003_vm8, %v996_v2, %v13359_v51  ;;  %v13360_v56 = vld [vmem:[#allocation78_spill] sm:$0xff] }
 0x1d6   : > { %2211 = vrot.lane.b32.xlu1 %v13344_v24, %s7001_s24  ;;  %v1147_v9 = vsel %vm13063_vm0, %v1130_v58, %v8246_v61  ;;  %v1030_v58 = vsel %vm1020_vm9, %v1013_v18, %v13360_v56  ;;  %v13363_v2 = vld [vmem:[#allocation126_spill] sm:$0xff] }
 0x1d7   : > { %2209 = vrot.lane.b32.xlu0 %v13345_v30, %s7001_s24  ;;  %v1164_v43 = vsel %vm13062_vm1, %v1147_v9, %v8232_v6  ;;  %v13364_v9 = vld [vmem:[#allocation73_spill] sm:$0xff]  ;;  %v13450_v30 = vld [vmem:[#allocation135_spill] sm:$0xff]  ;;  %v13509_v0 = vld [vmem:[#allocation182_spill] sm:$0xff] }
 0x1d8   : > { %v8549_v32 = vpop.permute.xlu1 %2127  ;;  %2213 = vrot.lane.b32.xlu2 %v13349_v45, %s7001_s24  ;;  %v1181_v61 = vsel %vm13038_vm2, %v1164_v43, %v8310_v17  ;;  %v13361_v45 = vld [vmem:[#allocation107_spill] sm:$0xff]  ;;  %v13366_v43 = vld [vmem:[#allocation122_spill] sm:$0xff] }
 0x1d9   : > { %13346 = vst [vmem:[#allocation64_spill] sm:$0xff] %v8549_v32  ;;  %v8553_v20 = vpop.permute.xlu0 %2125  ;;  %v1198_v5 = vsel %vm13035_vm3, %v1181_v61, %v8364_v59 }
 0x1da   : > { %13348 = vst [vmem:[#allocation76_spill] sm:$0xff] %v8553_v20  ;;  %1335 = vmatmul.bf16.gmra.mxu0 %v1232_v40  ;;  %v8562_v23 = vpop.permute.xlu2 %2147  ;;  %v1215_v17 = vsel %vm13034_vm4, %v1198_v5, %v8353_v54  ;;  %v13369_v5 = vld [vmem:[#allocation79_spill] sm:$0xff] }
 0x1db   : > { %13351 = vst [vmem:[#allocation72_spill] sm:$0xff] %v8562_v23  ;;  %v1235_v59 = vsel %vm13033_vm5, %v1215_v17, %v8468_v26 }
 0x1de   : > { %2217 = vrot.lane.b32.xlu1 %v13353_v10, %s7002_s25  ;;  %v13362_v10 = vld [vmem:[#allocation71_spill] sm:$0xff] }
 0x1df   : > { %2215 = vrot.lane.b32.xlu0 %v13354_v60, %s7002_s25 }
 0x1e0   : > { %v8574_v41 = vpop.permute.xlu1 %2133  ;;  %2219 = vrot.lane.b32.xlu2 %v13358_v48, %s7002_s25  ;;  %v1047_v48 = vsel %vm1037_vm10, %v1030_v58, %v13361_v45  ;;  %v13365_v45 = vld [vmem:[#allocation74_spill] sm:$0xff]  ;;  %v13368_v58 = vld [vmem:[#allocation77_spill] sm:$0xff] }
 0x1e1   : > { %13355 = vst [vmem:[#allocation102_spill] sm:$0xff] %v8574_v41  ;;  %v8579_v40 = vpop.permute.xlu0 %2131  ;;  %v1064_v6 = vsel %vm13061_vm11, %v1047_v48, %v13363_v2 }
 0x1e2   : > { %13357 = vst [vmem:[#allocation120_spill] sm:$0xff] %v8579_v40  ;;  %v8587_v46 = vpop.permute.xlu2 %2153  ;;  %v1081_v61 = vsel %vm1071_vm12, %v1064_v6, %v13366_v43 }
 0x1e3   : > { %v1098_v48 = vsel %vm13066_vm13, %v1081_v61, %v8039_v37  ;;  %v13371_v37 = vld [vmem:[#allocation55_spill] sm:$0xff]  ;;  %v13374_v61 = vld [vmem:[#allocation98_spill] sm:$0xff] }
 0x1e4   : > { %v1115_v54 = vsel %vm13065_vm14, %v1098_v48, %v8118_v34  ;;  %v998_v34 = vsel %vm986_vm7, %v7225_v39, %v13371_v37 }
 0x1e5   : > { %v1132_v26 = vsel %vm13064_vm15, %v1115_v54, %v8102_v12  ;;  %v13373_v12 = vld [vmem:[#allocation81_spill] sm:$0xff] }
 0x1e6   : > { %2223 = vrot.lane.b32.xlu1 %v13362_v10, %s7002_s25  ;;  %v1149_v2 = vsel %vm13063_vm0, %v1132_v26, %v8244_v7  ;;  %v1015_v43 = vsel %vm1003_vm8, %v998_v34, %v13373_v12  ;;  %v13377_v34 = vld [vmem:[#allocation125_spill] sm:$0xff]  ;;  %v13379_v12 = vld [vmem:[#allocation143_spill] sm:$0xff]  ;;  %v13448_v10 = vld [vmem:[#allocation134_spill] sm:$0xff] }
 0x1e7   : > { %2221 = vrot.lane.b32.xlu0 %v13364_v9, %s7002_s25  ;;  %v1166_v17 = vsel %vm13062_vm1, %v1149_v2, %v8282_v63  ;;  %v1032_v48 = vsel %vm1020_vm9, %v1015_v43, %v13374_v61  ;;  %v13376_v2 = vld [vmem:[#allocation95_spill] sm:$0xff] }
 0x1e8   : > { %v8605_v51 = vpop.permute.xlu1 %2139  ;;  %2225 = vrot.lane.b32.xlu2 %v13365_v45, %s7002_s25  ;;  %v1183_v7 = vsel %vm13038_vm2, %v1166_v17, %v8274_v38  ;;  %v1049_v38 = vsel %vm1037_vm10, %v1032_v48, %v13376_v2  ;;  %v13383_v2 = vld [vmem:[#allocation70_spill] sm:$0xff] }
 0x1e9   : > { %v8607_v18 = vpop.permute.xlu0 %2137  ;;  %v1200_v54 = vsel %vm13035_vm3, %v1183_v7, %v8362_v3  ;;  %v1066_v17 = vsel %vm13061_vm11, %v1049_v38, %v13377_v34  ;;  %v13380_v7 = vld [vmem:[#allocation139_spill] sm:$0xff]  ;;  %v1000_v38 = vsel %vm986_vm7, %v7219_v29, %v13383_v2  ;;  %v13387_v2 = vld [vmem:[#allocation114_spill] sm:$0xff] }
 0x1ea   : > { %1340 = vmatmul.bf16.gmra.mxu0 %v1235_v59  ;;  %v8619_v56 = vpop.permute.xlu2 %2159  ;;  %v1217_v63 = vsel %vm13034_vm4, %v1200_v54, %v8422_v57  ;;  %v1083_v43 = vsel %vm1071_vm12, %v1066_v17, %v13379_v12  ;;  %v13385_v12 = vld [vmem:[#allocation66_spill] sm:$0xff] }
 0x1eb   : > { %13367 = vst [vmem:[#allocation116_spill] sm:$0xff] %v8619_v56  ;;  %v1238_v57 = vsel %vm13033_vm5, %v1217_v63, %v8405_v42  ;;  %v1100_v61 = vsel %vm13066_vm13, %v1083_v43, %v13380_v7  ;;  %v13381_v42 = vld [vmem:[#allocation89_spill] sm:$0xff]  ;;  %v1017_v43 = vsel %vm1003_vm8, %v1000_v38, %v13385_v12  ;;  %v13445_v45 = vld [vmem:[#allocation130_spill] sm:$0xff] }
 0x1ec   : > { %v1117_v48 = vsel %vm13065_vm14, %v1100_v61, %v8116_v36  ;;  %v13384_v36 = vld [vmem:[#allocation91_spill] sm:$0xff]  ;;  %v13386_v61 = vld [vmem:[#allocation97_spill] sm:$0xff] }
 0x1ed   : > { %v1134_v54 = vsel %vm13064_vm15, %v1117_v48, %v8198_v11  ;;  %v1034_v48 = vsel %vm1020_vm9, %v1017_v43, %v13386_v61  ;;  %v13393_v43 = vld [vmem:[#allocation96_spill] sm:$0xff]  ;;  %v13395_v61 = vld [vmem:[#allocation159_spill] sm:$0xff] }
 0x1ee   : > { %2229 = vrot.lane.b32.xlu1 %v13368_v58, %s7002_s25 }
 0x1ef   : > { %2227 = vrot.lane.b32.xlu0 %v13369_v5, %s7002_s25 }
 0x1f0   : > { %v8629_v6 = vpop.permute.xlu1 %2145  ;;  %2231 = vrot.lane.b32.xlu2 %v7627_v25, %s7003_s26 }
 0x1f1   : > { %13370 = vst [vmem:[#allocation148_spill] sm:$0xff] %v8629_v6  ;;  %v8636_v59 = vpop.permute.xlu0 %2143 }
 0x1f2   : > { %13372 = vst [vmem:[#allocation58_spill] sm:$0xff] %v8636_v59  ;;  %v8654_v26 = vpop.permute.xlu2 %2165  ;;  %v13469_v59 = vld [vmem:[#allocation156_spill] sm:$0xff] }
 0x1f3   : > { %13375 = vst [vmem:[#allocation75_spill] sm:$0xff] %v8654_v26 }
 0x1f6   : > { %2235 = vrot.lane.b32.xlu1 %v7643_v35, %s7003_s26  ;;  %v13410_v35 = vld [vmem:[#allocation113_spill] sm:$0xff] }
 0x1f7   : > { %2233 = vrot.lane.b32.xlu0 %v7649_v31, %s7003_s26 }
 0x1f8   : > { %v8658_v37 = vpop.permute.xlu1 %2151  ;;  %2237 = vrot.lane.b32.xlu2 %v7657_v21, %s7003_s26  ;;  %v1051_v21 = vsel %vm1037_vm10, %v1034_v48, %v13387_v2  ;;  %v13397_v2 = vld [vmem:[#allocation155_spill] sm:$0xff] }
 0x1f9   : > { %v8662_v3 = vpop.permute.xlu0 %2149 }
 0x1fa   : > { %13378 = vst [vmem:[#allocation93_spill] sm:$0xff] %v8662_v3  ;;  %1345 = vmatmul.bf16.gmra.mxu0 %v1238_v57  ;;  %v8687_v17 = vpop.permute.xlu2 %2171  ;;  %v1151_v57 = vsel %vm13063_vm0, %v1134_v54, %v8182_v19 }
 0x1fb   : > { %v1168_v11 = vsel %vm13062_vm1, %v1151_v57, %v8280_v16  ;;  %v13389_v16 = vld [vmem:[#allocation11_spill] sm:$0xff] }
 0x1fc   : > { %v1185_v7 = vsel %vm13038_vm2, %v1168_v11, %v8330_v52  ;;  %v13391_v52 = vld [vmem:[#allocation110_spill] sm:$0xff] }
 0x1fd   : > { %v1202_v19 = vsel %vm13035_vm3, %v1185_v7, %v8319_v27  ;;  %v1068_v57 = vsel %vm13061_vm11, %v1051_v21, %v13391_v52  ;;  %v13394_v27 = vld [vmem:[#allocation142_spill] sm:$0xff]  ;;  %v13399_v52 = vld [vmem:[#allocation177_spill] sm:$0xff] }
 0x1fe   : > { %2241 = vrot.lane.b32.xlu1 %v7676_v14, %s7003_s26  ;;  %v1219_v54 = vsel %vm13034_vm4, %v1202_v19, %v8420_v4  ;;  %v1085_v7 = vsel %vm1071_vm12, %v1068_v57, %v13394_v27  ;;  %v13398_v19 = vld [vmem:[#allocation99_spill] sm:$0xff]  ;;  %v13402_v27 = vld [vmem:[#allocation69_spill] sm:$0xff] }
 0x1ff   : > { %2239 = vrot.lane.b32.xlu0 %v13381_v42, %s7003_s26  ;;  %v1241_v12 = vsel %vm13033_vm5, %v1219_v54, %v8498_v62  ;;  %v1102_v4 = vsel %vm13066_vm13, %v1085_v7, %v13395_v61  ;;  %v13400_v54 = vld [vmem:[#allocation100_spill] sm:$0xff]  ;;  %v13403_v7 = vld [vmem:[#allocation7_spill] sm:$0xff] }
 0x200   : > { %v8680_v63 = vpop.permute.xlu1 %2157  ;;  %2243 = vrot.lane.b32.xlu2 %v13384_v36, %s7003_s26  ;;  %v13388_v36 = vld [vmem:[#allocation94_spill] sm:$0xff]  ;;  %v1119_v21 = vsel %vm13065_vm14, %v1102_v4, %v13397_v2  ;;  %v1002_v61 = vsel %vm986_vm7, %v13403_v7, %v13402_v27  ;;  %v13404_v4 = vld [vmem:[#allocation101_spill] sm:$0xff]  ;;  %v13405_v2 = vld [vmem:[#allocation87_spill] sm:$0xff] }
 0x201   : > { %13382 = vst [vmem:[#allocation90_spill] sm:$0xff] %v8680_v63  ;;  %v8685_v34 = vpop.permute.xlu0 %2155  ;;  %v1136_v62 = vsel %vm13064_vm15, %v1119_v21, %v13399_v52  ;;  %v1019_v21 = vsel %vm1003_vm8, %v1002_v61, %v13405_v2  ;;  %v13406_v52 = vld [vmem:[#allocation184_spill] sm:$0xff]  ;;  %v13411_v42 = vld [vmem:[#allocation103_spill] sm:$0xff]  ;;  %v13413_v2 = vld [vmem:[#allocation105_spill] sm:$0xff] }
 0x202   : > { %v8725_v48 = vpop.permute.xlu2 %2177  ;;  %v13412_v61 = vld [vmem:[#allocation131_spill] sm:$0xff] }
 0x203   : > { %13396 = vst [vmem:[#allocation133_spill] sm:$0xff] %v8725_v48 }
 0x206   : > { %2247 = vrot.lane.b32.xlu1 %v13388_v36, %s7004_s27 }
 0x207   : > { %2245 = vrot.lane.b32.xlu0 %v13389_v16, %s7003_s26  ;;  %v13409_v16 = vld [vmem:[#allocation192_spill] sm:$0xff] }
 0x208   : > { %v8711_v38 = vpop.permute.xlu1 %2163  ;;  %2249 = vrot.lane.b32.xlu2 %v13393_v43, %s7004_s27  ;;  %v13401_v43 = vld [vmem:[#allocation186_spill] sm:$0xff] }
 0x209   : > { %13390 = vst [vmem:[#allocation119_spill] sm:$0xff] %v8711_v38  ;;  %v8715_v11 = vpop.permute.xlu0 %2161  ;;  %v1153_v57 = vsel %vm13063_vm0, %v1136_v62, %v13401_v43  ;;  %v13408_v62 = vld [vmem:[#allocation85_spill] sm:$0xff] }
 0x20a   : > { %13392 = vst [vmem:[#allocation137_spill] sm:$0xff] %v8715_v11  ;;  %1350 = vmatmul.bf16.gmra.mxu0 %v1241_v12  ;;  %v1036_v14 = vsel %vm1020_vm9, %v1019_v21, %v13408_v62  ;;  %v8756_v25 = vpop.permute.xlu2 %2183 }
 0x20e   : > { %2253 = vrot.lane.b32.xlu1 %v13398_v19, %s7004_s27  ;;  %v1170_v19 = vsel %vm13062_vm1, %v1153_v57, %v13406_v52 }
 0x20f   : > { %2251 = vrot.lane.b32.xlu0 %v13400_v54, %s7004_s27  ;;  %v13407_v54 = vld [vmem:[#allocation189_spill] sm:$0xff] }
 0x210   : > { %v8737_v12 = vpop.permute.xlu1 %2169  ;;  %2255 = vrot.lane.b32.xlu2 %v13404_v4, %s7004_s27  ;;  %v1187_v43 = vsel %vm13038_vm2, %v1170_v19, %v13407_v54  ;;  %v1053_v4 = vsel %vm1037_vm10, %v1036_v14, %v13410_v35  ;;  %v13414_v19 = vld [vmem:[#allocation190_spill] sm:$0xff]  ;;  %v13418_v14 = vld [vmem:[#allocation128_spill] sm:$0xff] }
 0x211   : > { %v8742_v36 = vpop.permute.xlu0 %2167  ;;  %v1204_v27 = vsel %vm13035_vm3, %v1187_v43, %v13409_v16  ;;  %v1070_v57 = vsel %vm13061_vm11, %v1053_v4, %v13412_v61  ;;  %v13417_v35 = vld [vmem:[#allocation106_spill] sm:$0xff] }
 0x212   : > { %v1221_v54 = vsel %vm13034_vm4, %v1204_v27, %v13414_v19  ;;  %v1087_v43 = vsel %vm1071_vm12, %v1070_v57, %v13418_v14  ;;  %v13419_v4 = vld [vmem:[#allocation158_spill] sm:$0xff]  ;;  %v13421_v19 = vld [vmem:[#allocation109_spill] sm:$0xff]  ;;  %v13427_v14 = vld [vmem:[#allocation188_spill] sm:$0xff] }
 0x213   : > { %v1244_v52 = vsel %vm13033_vm5, %v1221_v54, %v8494_v28  ;;  %v1104_v62 = vsel %vm13066_vm13, %v1087_v43, %v13419_v4  ;;  %v13420_v61 = vld [vmem:[#allocation170_spill] sm:$0xff]  ;;  %v8786_v28 = vpop.permute.xlu2 %2189  ;;  %v13424_v54 = vld [vmem:[#allocation111_spill] sm:$0xff] }
 0x214   : > { %v1121_v27 = vsel %vm13065_vm14, %v1104_v62, %v13420_v61  ;;  %13423 = vst [vmem:[#allocation92_spill] sm:$0xff] %v8786_v28  ;;  %v13429_v62 = vld [vmem:[#allocation112_spill] sm:$0xff]  ;;  %v13430_v61 = vld [vmem:[#allocation187_spill] sm:$0xff] }
 0x216   : > { %2259 = vrot.lane.b32.xlu1 %v13411_v42, %s7004_s27  ;;  %v13422_v42 = vld [vmem:[#allocation167_spill] sm:$0xff] }
 0x217   : > { %2257 = vrot.lane.b32.xlu0 %v13413_v2, %s7004_s27  ;;  %v1138_v2 = vsel %vm13064_vm15, %v1121_v27, %v13422_v42  ;;  %v13431_v27 = vld [vmem:[#allocation191_spill] sm:$0xff] }
 0x218   : > { %v8768_v21 = vpop.permute.xlu1 %2175  ;;  %2261 = vrot.lane.b32.xlu2 %v13417_v35, %s7004_s27  ;;  %v13425_v35 = vld [vmem:[#allocation185_spill] sm:$0xff] }
 0x219   : > { %13415 = vst [vmem:[#allocation63_spill] sm:$0xff] %v8768_v21  ;;  %v8770_v16 = vpop.permute.xlu0 %2173  ;;  %v1155_v57 = vsel %vm13063_vm0, %v1138_v2, %v13425_v35  ;;  %v13432_v2 = vld [vmem:[#allocation115_spill] sm:$0xff]  ;;  %v13433_v35 = vld [vmem:[#allocation117_spill] sm:$0xff] }
 0x21a   : > { %13416 = vst [vmem:[#allocation60_spill] sm:$0xff] %v8770_v16  ;;  %1355 = vmatmul.bf16.gmra.mxu0 %v1244_v52  ;;  %v1172_v43 = vsel %vm13062_vm1, %v1155_v57, %v13427_v14 }
 0x21b   : > { %v1189_v42 = vsel %vm13038_vm2, %v1172_v43, %v13430_v61  ;;  %v8812_v14 = vpop.permute.xlu2 %2195  ;;  %v13436_v61 = vld [vmem:[#allocation118_spill] sm:$0xff] }
 0x21c   : > { %13435 = vst [vmem:[#allocation151_spill] sm:$0xff] %v8812_v14 }
 0x21e   : > { %2265 = vrot.lane.b32.xlu1 %v13421_v19, %s7005_s28  ;;  %v1206_v19 = vsel %vm13035_vm3, %v1189_v42, %v13431_v27 }
 0x21f   : > { %2263 = vrot.lane.b32.xlu0 %v13424_v54, %s7005_s28  ;;  %v1223_v54 = vsel %vm13034_vm4, %v1206_v19, %v8447_v49  ;;  %v13437_v49 = vld [vmem:[#allocation121_spill] sm:$0xff]  ;;  %v13438_v19 = vld [vmem:[#allocation123_spill] sm:$0xff] }
 0x220   : > { %v8792_v52 = vpop.permute.xlu1 %2181  ;;  %2267 = vrot.lane.b32.xlu2 %v13429_v62, %s7005_s28  ;;  %v1247_v43 = vsel %vm13033_vm5, %v1223_v54, %v8430_v47  ;;  %v8835_v47 = vld [vmem:[%s12761_s2] ss:$0 sm:$0xff]  ;;  %v13442_v54 = vld [vmem:[#allocation127_spill] sm:$0xff] }
 0x221   : > { %13426 = vst [vmem:[#allocation108_spill] sm:$0xff] %v8792_v52  ;;  %v8796_v4 = vpop.permute.xlu0 %2179 }
 0x222   : > { %13428 = vst [vmem:[#allocation104_spill] sm:$0xff] %v8796_v4 }
 0x226   : > { %2271 = vrot.lane.b32.xlu1 %v13432_v2, %s7005_s28  ;;  %v13441_v2 = vld [vmem:[#allocation124_spill] sm:$0xff] }
 0x227   : > { %2269 = vrot.lane.b32.xlu0 %v13433_v35, %s7005_s28  ;;  %v8830_v35 = vpop.permute.xlu2 %2201 }
 0x228   : > { %v8810_v57 = vpop.permute.xlu1 %2187  ;;  %2273 = vrot.lane.b32.xlu2 %v13436_v61, %s7005_s28 }
 0x229   : > { %13434 = vst [vmem:[#allocation136_spill] sm:$0xff] %v8810_v57  ;;  %v8814_v62 = vpop.permute.xlu0 %2185 }
 0x22a   : > { %1360 = vmatmul.bf16.gmra.mxu0 %v1247_v43  ;;  %v13443_v43 = vld [vmem:[#allocation129_spill] sm:$0xff] }
 0x22e   : > { %2277 = vrot.lane.b32.xlu1 %v13437_v49, %s7005_s28 }
 0x22f   : > { %2275 = vrot.lane.b32.xlu0 %v13438_v19, %s7005_s28  ;;  %v8855_v31 = vpop.permute.xlu2 %2207 }
 0x230   : > { %v8824_v42 = vpop.permute.xlu1 %2193  ;;  %2279 = vrot.lane.b32.xlu2 %v13441_v2, %s7006_s29  ;;  %13446 = vst [vmem:[#allocation107_spill] sm:$0xff] %v8855_v31 }
 0x231   : > { %13439 = vst [vmem:[#allocation51_spill] sm:$0xff] %v8824_v42  ;;  %v8826_v27 = vpop.permute.xlu0 %2191 }
 0x232   : > { %13440 = vst [vmem:[#allocation82_spill] sm:$0xff] %v8826_v27 }
 0x236   : > { %2283 = vrot.lane.b32.xlu1 %v13442_v54, %s7006_s29 }
 0x237   : > { %2281 = vrot.lane.b32.xlu0 %v13443_v43, %s7006_s29  ;;  %v1326_v61 = vpop.f32.mrf.mxu0 }
 0x238   : > { %v8842_v49 = vadd.f32 %v8835_v47, %v1326_v61  ;;  %v8844_v19 = vpop.permute.xlu1 %2199  ;;  %2285 = vrot.lane.b32.xlu2 %v13445_v45, %s7006_s29  ;;  %v13447_v61 = vld [vmem:[#allocation132_spill] sm:$0xff] }
 0x239   : > { %v8846_v2 = vpop.permute.xlu0 %2197 }
 0x23a   : > { %13444 = vst [vmem:[#allocation78_spill] sm:$0xff] %v8846_v2  ;;  %v8851_v58 = vmul.f32 0.70710677, %v8842_v49 }
 0x23c   : > { %v1398_v54 = vmul.f32 %v8851_v58, %v8851_v58 }
 0x23e   : > { %v8857_v43 = vmin.f32 %v1398_v54, 16.0  ;;  %2289 = vrot.lane.b32.xlu1 %v13447_v61, %s7006_s29 }
 0x23f   : > { %2287 = vrot.lane.b32.xlu0 %v13448_v10, %s7006_s29  ;;  %v1328_v5 = vpop.f32.mrf.mxu0 }
 0x240   : > { %v1400_v9 = vmul.f32 2.1237322e-06, %v8857_v43  ;;  %v1411_v45 = vmul.f32 3.8918573e-05, %v8857_v43  ;;  %v8866_v24 = vadd.f32 %v8835_v47, %v1328_v5  ;;  %v8868_v60 = vpop.permute.xlu1 %2205  ;;  %2291 = vrot.lane.b32.xlu2 %v13450_v30, %s7006_s29  ;;  %v8883_v30 = vpop.permute.xlu2 %2213 }
 0x241   : > { %13449 = vst [vmem:[#allocation126_spill] sm:$0xff] %v8868_v60  ;;  %v8875_v13 = vpop.permute.xlu0 %2203 }
 0x242   : > { %v1401_v54 = vadd.f32 0.00028619796, %v1400_v9  ;;  %v1412_v53 = vadd.f32 0.001143296, %v1411_v45  ;;  %v8873_v61 = vmul.f32 0.70710677, %v8866_v24 }
 0x243   : > { %13451 = vst [vmem:[#allocation122_spill] sm:$0xff] %v8875_v13  ;;  %v13454_v45 = vld [vmem:[#allocation140_spill] sm:$0xff] }
 0x244   : > { %v1402_v10 = vmul.f32 %v1401_v54, %v8857_v43  ;;  %v1413_v39 = vmul.f32 %v1412_v53, %v8857_v43  ;;  %v1438_v5 = vmul.f32 %v8873_v61, %v8873_v61  ;;  %13453 = vst [vmem:[#allocation55_spill] sm:$0xff] %v8883_v30 }
 0x246   : > { %v1403_v7 = vadd.f32 0.0036580483, %v1402_v10  ;;  %v1414_v15 = vadd.f32 0.014752088, %v1413_v39  ;;  %2295 = vrot.lane.b32.xlu1 %v13452_v33, %s7007_s30  ;;  %v8885_v9 = vmin.f32 %v1438_v5, 16.0  ;;  %v13455_v33 = vld [vmem:[#allocation141_spill] sm:$0xff] }
 0x247   : > { %2293 = vrot.lane.b32.xlu0 %v13454_v45, %s7006_s29  ;;  %v1331_v29 = vpop.f32.mrf.mxu0 }
 0x248   : > { %v1404_v54 = vmul.f32 %v1403_v7, %v8857_v43  ;;  %v1415_v53 = vmul.f32 %v1414_v15, %v8857_v43  ;;  %v8892_v22 = vadd.f32 %v8835_v47, %v1331_v29  ;;  %v1440_v39 = vmul.f32 2.1237322e-06, %v8885_v9  ;;  %2297 = vrot.lane.b32.xlu2 %v13455_v33, %s7007_s30  ;;  %v8901_v7 = vpop.permute.xlu1 %2211 }
 0x249   : > { %v1451_v10 = vmul.f32 3.8918573e-05, %v8885_v9  ;;  %13456 = vst [vmem:[#allocation81_spill] sm:$0xff] %v8901_v7  ;;  %v8908_v41 = vpop.permute.xlu0 %2209 }
 0x24a   : > { %v1405_v5 = vadd.f32 0.05243302, %v1404_v54  ;;  %v1416_v30 = vadd.f32 0.112945676, %v1415_v53  ;;  %v1441_v2 = vadd.f32 0.00028619796, %v1440_v39 }
 0x24b   : > { %v1452_v52 = vadd.f32 0.001143296, %v1451_v10  ;;  %v8899_v45 = vmul.f32 0.70710677, %v8892_v22  ;;  %13457 = vst [vmem:[#allocation98_spill] sm:$0xff] %v8908_v41  ;;  %v13458_v53 = vld [vmem:[#allocation144_spill] sm:$0xff] }
 0x24c   : > { %v1417_v15 = vmul.f32 %v1416_v30, %v8857_v43  ;;  %v1442_v29 = vmul.f32 %v1441_v2, %v8885_v9  ;;  %v1406_v39 = vmul.f32 %v1405_v5, %v8857_v43  ;;  %v13459_v30 = vld [vmem:[#allocation146_spill] sm:$0xff]  ;;  %v13461_v5 = vld [vmem:[#allocation147_spill] sm:$0xff] }
 0x24d   : > { %v1453_v26 = vmul.f32 %v1452_v52, %v8885_v9  ;;  %v1478_v3 = vmul.f32 %v8899_v45, %v8899_v45  ;;  %v13462_v41 = vld [vmem:[#allocation150_spill] sm:$0xff] }
 0x24e   : > { %v1418_v54 = vadd.f32 0.4994258, %v1417_v15  ;;  %2301 = vrot.lane.b32.xlu1 %v13458_v53, %s7007_s30  ;;  %v1443_v10 = vadd.f32 0.0036580483, %v1442_v29  ;;  %v8920_v15 = vpop.permute.xlu2 %2219 }
 0x24f   : > { %v1454_v33 = vadd.f32 0.014752088, %v1453_v26  ;;  %v8913_v7 = vmin.f32 %v1478_v3, 16.0  ;;  %2299 = vrot.lane.b32.xlu0 %v13459_v30, %s7007_s30  ;;  %v1333_v2 = vpop.f32.mrf.mxu0  ;;  %13460 = vst [vmem:[#allocation95_spill] sm:$0xff] %v8920_v15  ;;  %v1407_v30 = vadd.f32 0.18741608, %v1406_v39 }
 0x250   : > { %v1419_v52 = vmul.f32 %v1418_v54, %v8857_v43  ;;  %v1444_v14 = vmul.f32 %v1443_v10, %v8885_v9  ;;  %2303 = vrot.lane.b32.xlu2 %v13461_v5, %s7007_s30  ;;  %v8929_v29 = vadd.f32 %v8835_v47, %v1333_v2  ;;  %v8934_v40 = vpop.permute.xlu1 %2217 }
 0x251   : > { %v1455_v4 = vmul.f32 %v1454_v33, %v8885_v9  ;;  %v1480_v53 = vmul.f32 2.1237322e-06, %v8913_v7  ;;  %v1491_v3 = vmul.f32 3.8918573e-05, %v8913_v7  ;;  %v1408_v39 = vmul.f32 %v1407_v30, %v8857_v43 }
 0x252   : > { %v8925_v26 = vadd.f32 1.0, %v1419_v52  ;;  %v1445_v33 = vadd.f32 0.05243302, %v1444_v14  ;;  %v8937_v52 = vmul.f32 0.70710677, %v8929_v29  ;;  %v13463_v14 = vld [vmem:[#allocation152_spill] sm:$0xff] }
 0x253   : > { %v1456_v54 = vadd.f32 0.112945676, %v1455_v4  ;;  %v1481_v38 = vadd.f32 0.00028619796, %v1480_v53  ;;  %v1492_v5 = vadd.f32 0.001143296, %v1491_v3  ;;  %v8942_v53 = vpop.permute.xlu0 %2215 }
 0x254   : > { %6828 = vrcp.f32 %v8925_v26  ;;  %v1446_v2 = vmul.f32 %v1445_v33, %v8885_v9  ;;  %v1518_v3 = vmul.f32 %v8937_v52, %v8937_v52  ;;  %v1409_v33 = vadd.f32 1.1283791, %v1408_v39 }
 0x255   : > { %v1457_v10 = vmul.f32 %v1456_v54, %v8885_v9  ;;  %v1482_v23 = vmul.f32 %v1481_v38, %v8913_v7  ;;  %v1493_v54 = vmul.f32 %v1492_v5, %v8913_v7  ;;  %vm1426_vm5 = vweird.f32 %v8925_v26 }
 0x256   : > { %2307 = vrot.lane.b32.xlu1 %v13462_v41, %s7007_s30  ;;  %v13464_v41 = vld [vmem:[#allocation153_spill] sm:$0xff]  ;;  %v8954_v48 = vmin.f32 %v1518_v3, 16.0  ;;  %v8959_v11 = vpop.permute.xlu2 %2225  ;;  %v1447_v6 = vadd.f32 0.18741608, %v1446_v2  ;;  %v6956_v3 = vld [vmem:[%s7056_s19 + $0x4] sm:$0xf] }
 0x257   : > { %v1458_v4 = vadd.f32 0.4994258, %v1457_v10  ;;  %2305 = vrot.lane.b32.xlu0 %v13463_v14, %s7007_s30  ;;  %v1483_v38 = vadd.f32 0.0036580483, %v1482_v23  ;;  %v1494_v10 = vadd.f32 0.014752088, %v1493_v54  ;;  %v1336_v14 = vpop.f32.mrf.mxu0 }
 0x258   : > { %2309 = vrot.lane.b32.xlu2 %v13464_v41, %s7007_s30  ;;  %13465 = vst [vmem:[#allocation125_spill] sm:$0xff] %v8959_v11  ;;  %v1520_v41 = vmul.f32 2.1237322e-06, %v8954_v48  ;;  %v1531_v50 = vmul.f32 3.8918573e-05, %v8954_v48  ;;  %v8967_v39 = vadd.f32 %v8835_v47, %v1336_v14  ;;  %v1432_v11 = vand.u32 2147483648, %v8925_v26  ;;  %v8975_v56 = vpop.permute.xlu1 %2223 }
 0x259   : > { %v1459_v42 = vmul.f32 %v1458_v4, %v8885_v9  ;;  %v1484_v30 = vmul.f32 %v1483_v38, %v8913_v7  ;;  %v1495_v4 = vmul.f32 %v1494_v10, %v8913_v7  ;;  %v1430_v54 = vand.u32 2147483647, %v8925_v26  ;;  %v13467_v10 = vld [vmem:[#allocation154_spill] sm:$0xff]  ;;  %13468 = vst [vmem:[#allocation139_spill] sm:$0xff] %v8975_v56 }
 0x25a   : > { %v6829_v43 = vpop.eup %6828  ;;  %v1532_v21 = vadd.f32 0.001143296, %v1531_v50  ;;  %v1410_v14 = vmul.f32 %v1409_v33, %v8851_v58  ;;  %v8986_v50 = vmul.f32 0.70710677, %v8967_v39  ;;  %v1433_v58 = vor.u32 1.1754944e-38, %v1432_v11 }
 0x25b   : > { %v1422_v23 = vmul.f32 %v6829_v43, %v8925_v26  ;;  %v8957_v5 = vadd.f32 1.0, %v1459_v42  ;;  %v8970_v42 = vunpack.c.l.bf16 %v6956_v3  ;;  %v1485_v2 = vadd.f32 0.05243302, %v1484_v30 }
 0x25c   : > { %v1496_v31 = vadd.f32 0.112945676, %v1495_v4  ;;  %vm1427_vm6 = vweird.f32 %v6829_v43  ;;  %v1448_v3 = vmul.f32 %v1447_v6, %v8885_v9  ;;  %vm1431_vm3 = vcmp.eq.f32.partialorder %v1430_v54, 8.507059e+37 }
 0x25d   : > { %v1423_v38 = vsub.f32 1.0, %v1422_v23  ;;  %6830 = vrcp.f32 %v8957_v5  ;;  %13466 = vst [vmem:[#allocation143_spill] sm:$0xff] %v8970_v42  ;;  %v1521_v23 = vadd.f32 0.00028619796, %v1520_v41  ;;  %v8988_v41 = vpop.permute.xlu0 %2221  ;;  %vm1428_vm4 = vmor %vm1426_vm5, %vm1427_vm6  ;;  %v1486_v6 = vmul.f32 %v1485_v2, %v8913_v7 }
 0x25e   : > { %2313 = vrot.lane.b32.xlu1 %v13467_v10, %s7008_s4  ;;  %v1497_v30 = vmul.f32 %v1496_v31, %v8913_v7  ;;  %13470 = vst [vmem:[#allocation70_spill] sm:$0xff] %v8988_v41  ;;  %v1449_v32 = vadd.f32 1.1283791, %v1448_v3  ;;  %v1470_v54 = vand.u32 2147483647, %v8957_v5 }
 0x25f   : > { %v1424_v27 = vmul.f32 %v6829_v43, %v1423_v38  ;;  %2311 = vrot.lane.b32.xlu0 %v13469_v59, %s7008_s4  ;;  %v1522_v10 = vmul.f32 %v1521_v23, %v8954_v48  ;;  %v1533_v38 = vmul.f32 %v1532_v21, %v8954_v48  ;;  %v13471_v59 = vld [vmem:[#allocation157_spill] sm:$0xff]  ;;  %v1558_v21 = vmul.f32 %v8986_v50, %v8986_v50 }
 0x260   : > { %2315 = vrot.lane.b32.xlu2 %v13471_v59, %s7008_s4  ;;  %v1498_v31 = vadd.f32 0.4994258, %v1497_v30  ;;  %v1366_v23 = vmul.f32 0.5, %v8842_v49  ;;  %v9001_v30 = vpop.permute.xlu2 %2231  ;;  %v13472_v49 = vld [vmem:[#allocation160_spill] sm:$0xff]  ;;  %v1450_v60 = vmul.f32 %v1449_v32, %v8873_v61  ;;  %vm1471_vm6 = vcmp.eq.f32.partialorder %v1470_v54, 8.507059e+37  ;;  %v13477_v54 = vld [vmem:[#allocation163_spill] sm:$0xff] }
 0x261   : > { %v1425_v4 = vadd.f32 %v6829_v43, %v1424_v27  ;;  %v1523_v26 = vadd.f32 0.0036580483, %v1522_v10  ;;  %v1534_v33 = vadd.f32 0.014752088, %v1533_v38  ;;  %v1472_v10 = vand.u32 2147483648, %v8957_v5 }
 0x262   : > { %v1499_v11 = vmul.f32 %v1498_v31, %v8913_v7  ;;  %v9005_v38 = vmin.f32 %v1558_v21, 16.0  ;;  %v13473_v31 = vld [vmem:[#allocation161_spill] sm:$0xff] }
 0x263   : > { %v6831_v27 = vpop.eup %6830  ;;  %v1429_v9 = vsel %vm1428_vm4, %v6829_v43, %v1425_v4  ;;  %v1535_v2 = vmul.f32 %v1534_v33, %v8954_v48  ;;  %v1524_v4 = vmul.f32 %v1523_v26, %v8954_v48  ;;  %v1338_v33 = vpop.f32.mrf.mxu0  ;;  %vm1466_vm4 = vweird.f32 %v8957_v5 }
 0x264   : > { %v1434_v56 = vsel %vm1431_vm3, %v1433_v58, %v1429_v9  ;;  %v1462_v59 = vmul.f32 %v6831_v27, %v8957_v5  ;;  %vm1467_vm3 = vweird.f32 %v6831_v27  ;;  %v1571_v26 = vmul.f32 3.8918573e-05, %v9005_v38 }
 0x265   : > { %v1435_v41 = vmul.f32 %v1434_v56, %v1410_v14  ;;  %v1487_v56 = vadd.f32 0.18741608, %v1486_v6  ;;  %v9009_v14 = vadd.f32 1.0, %v1499_v11  ;;  %v1536_v58 = vadd.f32 0.112945676, %v1535_v2  ;;  %v13475_v6 = vld [vmem:[#allocation162_spill] sm:$0xff]  ;;  %vm1468_vm5 = vmor %vm1466_vm4, %vm1467_vm3  ;;  %v9028_v5 = vpop.permute.xlu0 %2227 }
 0x266   : > { %v1463_v43 = vsub.f32 1.0, %v1462_v59  ;;  %2319 = vrot.lane.b32.xlu1 %v13472_v49, %s7008_s4  ;;  %v1560_v59 = vmul.f32 2.1237322e-06, %v9005_v38  ;;  %v1473_v2 = vor.u32 1.1754944e-38, %v1472_v10  ;;  %v1572_v32 = vadd.f32 0.001143296, %v1571_v26 }
 0x267   : > { %v6541_v3 = vclamps-f32 %v1435_v41, 1.0  ;;  %2317 = vrot.lane.b32.xlu0 %v13473_v31, %s7008_s4  ;;  %6832 = vrcp.f32 %v9009_v14  ;;  %v9018_v41 = vpop.permute.xlu1 %2229  ;;  %v1537_v49 = vmul.f32 %v1536_v58, %v8954_v48  ;;  %v9026_v61 = vadd.f32 %v8835_v47, %v1338_v33  ;;  %13476 = vst [vmem:[#allocation97_spill] sm:$0xff] %v9028_v5 }
 0x268   : > { %v1464_v9 = vmul.f32 %v6831_v27, %v1463_v43  ;;  %13474 = vst [vmem:[#allocation66_spill] sm:$0xff] %v9018_v41  ;;  %2321 = vrot.lane.b32.xlu2 %v13475_v6, %s7008_s4  ;;  %v1525_v43 = vadd.f32 0.05243302, %v1524_v4  ;;  %v1488_v6 = vmul.f32 %v1487_v56, %v8913_v7  ;;  %v1573_v58 = vmul.f32 %v1572_v32, %v9005_v38  ;;  %v9043_v33 = vpop.permute.xlu2 %2237 }
 0x269   : > { %v2038_v21 = vadd.f32 1.0, %v6541_v3  ;;  %v1561_v3 = vadd.f32 0.00028619796, %v1560_v59  ;;  %vm2102_vm3 = vcmask 60416   ;;  %13478 = vst [vmem:[#allocation114_spill] sm:$0xff] %v9043_v33  ;;  %v13488_v33 = vld [vmem:[#allocation169_spill] sm:$0xff] }
 0x26a   : > { %v1465_v11 = vadd.f32 %v6831_v27, %v1464_v9  ;;  %v1538_v9 = vadd.f32 0.4994258, %v1537_v49  ;;  %v1574_v26 = vadd.f32 0.014752088, %v1573_v58  ;;  %v1489_v32 = vadd.f32 1.1283791, %v1488_v6 }
 0x26b   : > { %v2054_v31 = vmul.f32 %v2038_v21, %v1366_v23  ;;  %v1562_v23 = vmul.f32 %v1561_v3, %v9005_v38  ;;  %v9046_v21 = vmul.f32 0.70710677, %v9026_v61 }
 0x26c   : > { %v1469_v41 = vsel %vm1468_vm5, %v6831_v27, %v1465_v11  ;;  %v1526_v27 = vmul.f32 %v1525_v43, %v8954_v48  ;;  %v1539_v7 = vmul.f32 %v1538_v9, %v8954_v48  ;;  %vm1506_vm5 = vweird.f32 %v9009_v14 }
 0x26d   : > { %v2070_v10 = vadd.f32 %v2054_v31, %v8970_v42  ;;  %v1474_v4 = vsel %vm1471_vm6, %v1473_v2, %v1469_v41  ;;  %v6833_v49 = vpop.eup %6832  ;;  %v1563_v31 = vadd.f32 0.0036580483, %v1562_v23  ;;  %v13479_v41 = vld [vmem:[#allocation164_spill] sm:$0xff]  ;;  %v1367_v2 = vmul.f32 0.5, %v8866_v24  ;;  %v13481_v23 = vld [vmem:[#allocation165_spill] sm:$0xff] }
 0x26e   : > { %v1475_v59 = vmul.f32 %v1474_v4, %v1450_v60  ;;  %2325 = vrot.lane.b32.xlu1 %v13477_v54, %s7008_s4  ;;  %v6957_v60 = vld [vmem:[%s7056_s19 + $0x8] sm:$0xf]  ;;  %v1502_v3 = vmul.f32 %v6833_v49, %v9009_v14  ;;  %v9057_v9 = vadd.f32 1.0, %v1539_v7  ;;  %v1575_v4 = vmul.f32 %v1574_v26, %v9005_v38 }
 0x26f   : > { %v2086_v56 = vpack.c.bf16 %v2070_v10, %v2070_v10  ;;  %2323 = vrot.lane.b32.xlu0 %v13479_v41, %s7008_s4  ;;  %v9051_v11 = vunpack.c.l.bf16 %v6957_v60  ;;  %v1564_v10 = vmul.f32 %v1563_v31, %v9005_v38  ;;  %v1510_v54 = vand.u32 2147483647, %v9009_v14  ;;  %v9068_v7 = vpop.permute.xlu1 %2235 }
 0x270   : > { %v6542_v43 = vclamps-f32 %v1475_v59, 1.0  ;;  %2327 = vrot.lane.b32.xlu2 %v13481_v23, %s7009_s5  ;;  %v1503_v60 = vsub.f32 1.0, %v1502_v3  ;;  %v1598_v24 = vmul.f32 %v9046_v21, %v9046_v21  ;;  %vm1507_vm4 = vweird.f32 %v6833_v49  ;;  %13482 = vst [vmem:[#allocation142_spill] sm:$0xff] %v9068_v7  ;;  %v9074_v23 = vpop.permute.xlu0 %2233 }
 0x271   : > { %13480 = vst [vmem:[#allocation110_spill] sm:$0xff] %v9051_v11  ;;  %v1512_v59 = vand.u32 2147483648, %v9009_v14  ;;  %v1527_v6 = vadd.f32 0.18741608, %v1526_v27  ;;  %6834 = vrcp.f32 %v9057_v9  ;;  %v1565_v26 = vadd.f32 0.05243302, %v1564_v10  ;;  %vm1508_vm2 = vmor %vm1506_vm5, %vm1507_vm4 }
 0x272   : > { %2103 = vst.msk [vmem:[%s9037_s18] sm:$0xf] %vm2102_vm3, %v2086_v56  ;;  %v2039_v58 = vadd.f32 1.0, %v6542_v43  ;;  %v1504_v31 = vmul.f32 %v6833_v49, %v1503_v60  ;;  %v1576_v41 = vadd.f32 0.112945676, %v1575_v4  ;;  %v1490_v43 = vmul.f32 %v1489_v32, %v8899_v45  ;;  %v13485_v10 = vld [vmem:[#allocation166_spill] sm:$0xff] }
 0x273   : > { %v9072_v3 = vmin.f32 %v1598_v24, 16.0  ;;  %vm9077_vm6 = vcmp.eq.f32.partialorder %v1510_v54, 8.507059e+37  ;;  %v1513_v45 = vor.u32 1.1754944e-38, %v1512_v59  ;;  %v1528_v14 = vmul.f32 %v1527_v6, %v8954_v48  ;;  %v13486_v4 = vld [vmem:[#allocation168_spill] sm:$0xff] }
 0x274   : > { %v2055_v56 = vmul.f32 %v2039_v58, %v1367_v2  ;;  %v1505_v5 = vadd.f32 %v6833_v49, %v1504_v31  ;;  %v1577_v2 = vmul.f32 %v1576_v41, %v9005_v38  ;;  %v1341_v58 = vpop.f32.mrf.mxu0  ;;  %v1566_v24 = vmul.f32 %v1565_v26, %v9005_v38 }
 0x275   : > { %v1600_v32 = vmul.f32 2.1237322e-06, %v9072_v3  ;;  %v1611_v54 = vmul.f32 3.8918573e-05, %v9072_v3  ;;  %v1529_v27 = vadd.f32 1.1283791, %v1528_v14  ;;  %vm1546_vm4 = vweird.f32 %v9057_v9 }
 0x276   : > { %v2071_v42 = vadd.f32 %v2055_v56, %v9051_v11  ;;  %2331 = vrot.lane.b32.xlu1 %v13485_v10, %s7009_s5  ;;  %v1509_v41 = vsel %vm1508_vm2, %v6833_v49, %v1505_v5  ;;  %v1578_v56 = vadd.f32 0.4994258, %v1577_v2  ;;  %v1368_v10 = vmul.f32 0.5, %v8892_v22  ;;  %v9094_v11 = vpop.permute.xlu2 %2243 }
 0x277   : > { %2329 = vrot.lane.b32.xlu0 %v13486_v4, %s7009_s5  ;;  %v6835_v31 = vpop.eup %6834  ;;  %v1514_v59 = vsel %vm9077_vm6, %v1513_v45, %v1509_v41  ;;  %v1601_v48 = vadd.f32 0.00028619796, %v1600_v32  ;;  %v1612_v6 = vadd.f32 0.001143296, %v1611_v54  ;;  %13487 = vst [vmem:[#allocation159_spill] sm:$0xff] %v9094_v11  ;;  %v9105_v22 = vadd.f32 %v8835_v47, %v1341_v58  ;;  %v9114_v58 = vpop.permute.xlu1 %2241 }
 0x278   : > { %v2087_v60 = vpack.c.bf16 %v2071_v42, %v2071_v42  ;;  %2333 = vrot.lane.b32.xlu2 %v13488_v33, %s7009_s5  ;;  %v6958_v42 = vld [vmem:[%s7056_s19 + $0xc] sm:$0xf]  ;;  %v1515_v49 = vmul.f32 %v1514_v59, %v1490_v43  ;;  %v1542_v26 = vmul.f32 %v6835_v31, %v9057_v9  ;;  %v1579_v2 = vmul.f32 %v1578_v56, %v9005_v38 }
 0x279   : > { %v9101_v5 = vunpack.c.l.bf16 %v6958_v42  ;;  %v1602_v45 = vmul.f32 %v1601_v48, %v9072_v3  ;;  %v1613_v32 = vmul.f32 %v1612_v6, %v9072_v3  ;;  %v1567_v33 = vadd.f32 0.18741608, %v1566_v24  ;;  %13490 = vst [vmem:[#allocation177_spill] sm:$0xff] %v9114_v58  ;;  %v13491_v48 = vld [vmem:[#allocation171_spill] sm:$0xff]  ;;  %v9123_v24 = vpop.permute.xlu0 %2239  ;;  %v13493_v6 = vld [vmem:[#allocation172_spill] sm:$0xff]  ;;  %v13494_v58 = vld [vmem:[#allocation173_spill] sm:$0xff] }
 0x27a   : > { %2104 = vst.msk [vmem:[%s9037_s18 + $0x4] sm:$0xf] %vm2102_vm3, %v2087_v60  ;;  %v6543_v54 = vclamps-f32 %v1515_v49, 1.0  ;;  %v1543_v41 = vsub.f32 1.0, %v1542_v26  ;;  %v1550_v60 = vand.u32 2147483647, %v9057_v9  ;;  %vm1547_vm2 = vweird.f32 %v6835_v31 }
 0x27b   : > { %13489 = vst [vmem:[#allocation155_spill] sm:$0xff] %v9101_v5  ;;  %v1552_v42 = vand.u32 2147483648, %v9057_v9  ;;  %v9112_v43 = vadd.f32 1.0, %v1579_v2  ;;  %v1603_v59 = vadd.f32 0.0036580483, %v1602_v45  ;;  %vm1548_vm5 = vmor %vm1546_vm4, %vm1547_vm2  ;;  %v1568_v9 = vmul.f32 %v1567_v33, %v9005_v38 }
 0x27c   : > { %v1614_v4 = vadd.f32 0.014752088, %v1613_v32  ;;  %v2040_v14 = vadd.f32 1.0, %v6543_v54  ;;  %v1544_v11 = vmul.f32 %v6835_v31, %v1543_v41  ;;  %v9117_v56 = vmul.f32 0.70710677, %v9105_v22  ;;  %13492 = vst [vmem:[#allocation186_spill] sm:$0xff] %v9123_v24  ;;  %v1343_v32 = vpop.f32.mrf.mxu0 }
 0x27d   : > { %6836 = vrcp.f32 %v9112_v43  ;;  %v1604_v2 = vmul.f32 %v1603_v59, %v9072_v3  ;;  %v1530_v54 = vmul.f32 %v1529_v27, %v8937_v52  ;;  %v1553_v41 = vor.u32 1.1754944e-38, %v1552_v42  ;;  %v13499_v24 = vld [vmem:[#allocation176_spill] sm:$0xff] }
 0x27e   : > { %2337 = vrot.lane.b32.xlu1 %v13491_v48, %s7009_s5  ;;  %v2056_v49 = vmul.f32 %v2040_v14, %v1368_v10  ;;  %v1545_v26 = vadd.f32 %v6835_v31, %v1544_v11  ;;  %v1615_v45 = vmul.f32 %v1614_v4, %v9072_v3  ;;  %v1638_v48 = vmul.f32 %v9117_v56, %v9117_v56  ;;  %v9138_v52 = vpop.permute.xlu2 %2249 }
 0x27f   : > { %2335 = vrot.lane.b32.xlu0 %v13493_v6, %s7009_s5  ;;  %vm1551_vm6 = vcmp.eq.f32.partialorder %v1550_v60, 8.507059e+37  ;;  %v1605_v14 = vadd.f32 0.05243302, %v1604_v2  ;;  %v9142_v42 = vadd.f32 %v8835_v47, %v1343_v32  ;;  %v6959_v32 = vld [vmem:[%s7056_s19 + $0x10] sm:$0xf]  ;;  %vm1586_vm4 = vweird.f32 %v9112_v43 }
 0x280   : > { %2339 = vrot.lane.b32.xlu2 %v13494_v58, %s7009_s5  ;;  %v2072_v10 = vadd.f32 %v2056_v49, %v9101_v5  ;;  %v1549_v11 = vsel %vm1548_vm5, %v6835_v31, %v1545_v26  ;;  %v1616_v59 = vadd.f32 0.112945676, %v1615_v45  ;;  %v9136_v6 = vmin.f32 %v1638_v48, 16.0 }
 0x281   : > { %v1554_v4 = vsel %vm1551_vm6, %v1553_v41, %v1549_v11  ;;  %v1569_v49 = vadd.f32 1.1283791, %v1568_v9  ;;  %v1369_v48 = vmul.f32 0.5, %v8929_v29  ;;  %v1590_v45 = vand.u32 2147483647, %v9112_v43 }
 0x282   : > { %v2088_v38 = vpack.c.bf16 %v2072_v10, %v2072_v10  ;;  %v1555_v33 = vmul.f32 %v1554_v4, %v1530_v54  ;;  %v1617_v27 = vmul.f32 %v1616_v59, %v9072_v3  ;;  %v1640_v31 = vmul.f32 2.1237322e-06, %v9136_v6  ;;  %v13495_v54 = vld [vmem:[#allocation174_spill] sm:$0xff]  ;;  %v9156_v59 = vpop.permute.xlu1 %2247  ;;  %v13497_v4 = vld [vmem:[#allocation175_spill] sm:$0xff] }
 0x283   : > { %v6837_v58 = vpop.eup %6836  ;;  %v1651_v60 = vmul.f32 3.8918573e-05, %v9136_v6  ;;  %v9154_v41 = vunpack.c.l.bf16 %v6959_v32  ;;  %v9162_v5 = vmul.f32 0.70710677, %v9142_v42  ;;  %vm1591_vm6 = vcmp.eq.f32.partialorder %v1590_v45, 8.507059e+37 }
 0x284   : > { %2105 = vst.msk [vmem:[%s9037_s18 + $0x8] sm:$0xf] %vm2102_vm3, %v2088_v38  ;;  %v6544_v26 = vclamps-f32 %v1555_v33, 1.0  ;;  %v1582_v2 = vmul.f32 %v6837_v58, %v9112_v43  ;;  %v1618_v9 = vadd.f32 0.4994258, %v1617_v27  ;;  %v1606_v33 = vmul.f32 %v1605_v14, %v9072_v3 }
 0x285   : > { %13496 = vst [vmem:[#allocation69_spill] sm:$0xff] %v9154_v41  ;;  %v1641_v10 = vadd.f32 0.00028619796, %v1640_v31  ;;  %v1652_v11 = vadd.f32 0.001143296, %v1651_v60  ;;  %v9168_v60 = vpop.permute.xlu0 %2245  ;;  %vm1587_vm2 = vweird.f32 %v6837_v58 }
 0x286   : > { %2343 = vrot.lane.b32.xlu1 %v13495_v54, %s7010_s6  ;;  %v2041_v29 = vadd.f32 1.0, %v6544_v26  ;;  %v1583_v38 = vsub.f32 1.0, %v1582_v2  ;;  %v1592_v54 = vand.u32 2147483648, %v9112_v43  ;;  %v1619_v32 = vmul.f32 %v1618_v9, %v9072_v3  ;;  %13498 = vst [vmem:[#allocation87_spill] sm:$0xff] %v9168_v60  ;;  %vm1588_vm5 = vmor %vm1586_vm4, %vm1587_vm2  ;;  %v13501_v43 = vld [vmem:[#allocation178_spill] sm:$0xff] }
 0x287   : > { %2341 = vrot.lane.b32.xlu0 %v13497_v4, %s7009_s5  ;;  %v1642_v27 = vmul.f32 %v1641_v10, %v9136_v6  ;;  %v1653_v31 = vmul.f32 %v1652_v11, %v9136_v6  ;;  %v1570_v2 = vmul.f32 %v1569_v49, %v8986_v50  ;;  %v1346_v4 = vpop.f32.mrf.mxu0  ;;  %v1678_v9 = vmul.f32 %v9162_v5, %v9162_v5  ;;  %v9180_v49 = vpop.permute.xlu2 %2255 }
 0x288   : > { %2345 = vrot.lane.b32.xlu2 %v13499_v24, %s7010_s6  ;;  %v2057_v26 = vmul.f32 %v2041_v29, %v1369_v48  ;;  %v1584_v14 = vmul.f32 %v6837_v58, %v1583_v38  ;;  %v9173_v28 = vadd.f32 1.0, %v1619_v32  ;;  %v1607_v24 = vadd.f32 0.18741608, %v1606_v33  ;;  %13500 = vst [vmem:[#allocation184_spill] sm:$0xff] %v9180_v49 }
 0x289   : > { %v1643_v16 = vadd.f32 0.0036580483, %v1642_v27  ;;  %v1654_v63 = vadd.f32 0.014752088, %v1653_v31  ;;  %v1593_v50 = vor.u32 1.1754944e-38, %v1592_v54  ;;  %v9183_v48 = vadd.f32 %v8835_v47, %v1346_v4  ;;  %v13502_v54 = vld [vmem:[#allocation179_spill] sm:$0xff] }
 0x28a   : > { %v2073_v10 = vadd.f32 %v2057_v26, %v9154_v41  ;;  %v1585_v11 = vadd.f32 %v6837_v58, %v1584_v14  ;;  %6838 = vrcp.f32 %v9173_v28  ;;  %v9189_v45 = vmin.f32 %v1678_v9, 16.0  ;;  %v9198_v26 = vpop.permute.xlu1 %2253  ;;  %v13504_v14 = vld [vmem:[#allocation180_spill] sm:$0xff] }
 0x28b   : > { %v1644_v32 = vmul.f32 %v1643_v16, %v9136_v6  ;;  %v1655_v27 = vmul.f32 %v1654_v63, %v9136_v6  ;;  %v1608_v31 = vmul.f32 %v1607_v24, %v9072_v3  ;;  %13503 = vst [vmem:[#allocation189_spill] sm:$0xff] %v9198_v26  ;;  %v1370_v24 = vmul.f32 0.5, %v8967_v39 }
 0x28c   : > { %v2089_v29 = vpack.c.bf16 %v2073_v10, %v2073_v10  ;;  %v1589_v38 = vsel %vm1588_vm5, %v6837_v58, %v1585_v11  ;;  %v1680_v16 = vmul.f32 2.1237322e-06, %v9189_v45  ;;  %v1691_v63 = vmul.f32 3.8918573e-05, %v9189_v45 }
 0x28d   : > { %v1594_v33 = vsel %vm1591_vm6, %v1593_v50, %v1589_v38  ;;  %v1656_v58 = vadd.f32 0.112945676, %v1655_v27  ;;  %v1645_v10 = vadd.f32 0.05243302, %v1644_v32  ;;  %v9204_v50 = vmul.f32 0.70710677, %v9183_v48 }
 0x28e   : > { %2349 = vrot.lane.b32.xlu1 %v13501_v43, %s7010_s6  ;;  %2106 = vst.msk [vmem:[%s9037_s18 + $0xc] sm:$0xf] %vm2102_vm3, %v2089_v29  ;;  %v1595_v4 = vmul.f32 %v1594_v33, %v1570_v2  ;;  %v6960_v29 = vld [vmem:[%s7056_s19 + $0x14] sm:$0xf]  ;;  %v1681_v38 = vadd.f32 0.00028619796, %v1680_v16  ;;  %v9210_v33 = vpop.permute.xlu0 %2251  ;;  %vm1626_vm2 = vweird.f32 %v9173_v28 }
 0x28f   : > { %2347 = vrot.lane.b32.xlu0 %v13502_v54, %s7010_s6  ;;  %v1657_v11 = vmul.f32 %v1656_v58, %v9136_v6  ;;  %v9207_v3 = vunpack.c.l.bf16 %v6960_v29  ;;  %v1692_v27 = vadd.f32 0.001143296, %v1691_v63  ;;  %13506 = vst [vmem:[#allocation192_spill] sm:$0xff] %v9210_v33  ;;  %v1609_v54 = vadd.f32 1.1283791, %v1608_v31  ;;  %v13507_v31 = vld [vmem:[#allocation181_spill] sm:$0xff] }
 0x290   : > { %2351 = vrot.lane.b32.xlu2 %v13504_v14, %s7010_s6  ;;  %v6545_v9 = vclamps-f32 %v1595_v4, 1.0  ;;  %v6839_v2 = vpop.eup %6838  ;;  %v1630_v32 = vand.u32 2147483647, %v9173_v28  ;;  %v1682_v14 = vmul.f32 %v1681_v38, %v9189_v45  ;;  %v1718_v29 = vmul.f32 %v9204_v50, %v9204_v50  ;;  %v9225_v38 = vpop.permute.xlu2 %2261 }
 0x291   : > { %13505 = vst [vmem:[#allocation85_spill] sm:$0xff] %v9207_v3  ;;  %v1622_v4 = vmul.f32 %v6839_v2, %v9173_v28  ;;  %v1658_v58 = vadd.f32 0.4994258, %v1657_v11  ;;  %v1693_v41 = vmul.f32 %v1692_v27, %v9189_v45  ;;  %v1632_v16 = vand.u32 2147483648, %v9173_v28  ;;  %v1348_v27 = vpop.f32.mrf.mxu0 }
 0x292   : > { %v2042_v43 = vadd.f32 1.0, %v6545_v9  ;;  %v1646_v63 = vmul.f32 %v1645_v10, %v9136_v6  ;;  %v1683_v49 = vadd.f32 0.0036580483, %v1682_v14  ;;  %v9223_v26 = vmin.f32 %v1718_v29, 16.0  ;;  %13508 = vst [vmem:[#allocation113_spill] sm:$0xff] %v9225_v38 }
 0x293   : > { %v1623_v39 = vsub.f32 1.0, %v1622_v4  ;;  %v1659_v9 = vmul.f32 %v1658_v58, %v9136_v6  ;;  %v1694_v11 = vadd.f32 0.014752088, %v1693_v41  ;;  %vm1627_vm4 = vweird.f32 %v6839_v2  ;;  %v13510_v58 = vld [vmem:[#allocation183_spill] sm:$0xff] }
 0x294   : > { %v2058_v60 = vmul.f32 %v2042_v43, %v1370_v24  ;;  %v1684_v14 = vmul.f32 %v1683_v49, %v9189_v45  ;;  %v1720_v4 = vmul.f32 2.1237322e-06, %v9223_v26  ;;  %vm1628_vm5 = vmor %vm1626_vm2, %vm1627_vm4  ;;  %vm1631_vm6 = vcmp.eq.f32.partialorder %v1630_v32, 8.507059e+37  ;;  %v9243_v49 = vpop.permute.xlu1 %2259 }
 0x295   : > { %v1624_v24 = vmul.f32 %v6839_v2, %v1623_v39  ;;  %v9231_v10 = vadd.f32 1.0, %v1659_v9  ;;  %v1695_v41 = vmul.f32 %v1694_v11, %v9189_v45  ;;  %v1633_v28 = vor.u32 1.1754944e-38, %v1632_v16  ;;  %13511 = vst [vmem:[#allocation131_spill] sm:$0xff] %v9243_v49 }
 0x296   : > { %2355 = vrot.lane.b32.xlu1 %v13507_v31, %s7010_s6  ;;  %v2074_v43 = vadd.f32 %v2058_v60, %v9207_v3  ;;  %v1731_v60 = vmul.f32 3.8918573e-05, %v9223_v26  ;;  %v9241_v39 = vadd.f32 %v8835_v47, %v1348_v27  ;;  %v1610_v9 = vmul.f32 %v1609_v54, %v9046_v21  ;;  %v9248_v3 = vpop.permute.xlu0 %2257 }
 0x297   : > { %2353 = vrot.lane.b32.xlu0 %v13509_v0, %s7010_s6  ;;  %v1625_v31 = vadd.f32 %v6839_v2, %v1624_v24  ;;  %v1647_v0 = vadd.f32 0.18741608, %v1646_v63  ;;  %6840 = vrcp.f32 %v9231_v10  ;;  %v1696_v63 = vadd.f32 0.112945676, %v1695_v41  ;;  %13512 = vst [vmem:[#allocation190_spill] sm:$0xff] %v9248_v3 }
 0x298   : > { %2357 = vrot.lane.b32.xlu2 %v13510_v58, %s7010_s6  ;;  %v2090_v29 = vpack.c.bf16 %v2074_v43, %v2074_v43  ;;  %v1685_v43 = vadd.f32 0.05243302, %v1684_v14  ;;  %v1721_v58 = vadd.f32 0.00028619796, %v1720_v4  ;;  %v1732_v38 = vadd.f32 0.001143296, %v1731_v60 }
 0x299   : > { %v1629_v11 = vsel %vm1628_vm5, %v6839_v2, %v1625_v31  ;;  %v1648_v16 = vmul.f32 %v1647_v0, %v9136_v6  ;;  %v1697_v27 = vmul.f32 %v1696_v63, %v9189_v45  ;;  %v6961_v41 = vld [vmem:[%s7056_s19 + $0x18] sm:$0xf]  ;;  %v1371_v0 = vmul.f32 0.5, %v9026_v61 }
 0x29a   : > { %2107 = vst.msk [vmem:[%s9037_s18 + $0x10] sm:$0xf] %vm2102_vm3, %v2090_v29  ;;  %v1634_v24 = vsel %vm1631_vm6, %v1633_v28, %v1629_v11  ;;  %v1722_v49 = vmul.f32 %v1721_v58, %v9223_v26  ;;  %v9254_v29 = vmul.f32 0.70710677, %v9241_v39  ;;  %v1686_v54 = vmul.f32 %v1685_v43, %v9189_v45  ;;  %v9264_v58 = vpop.permute.xlu2 %2267  ;;  %v1351_v28 = vpop.f32.mrf.mxu0 }
 0x29b   : > { %v1635_v32 = vmul.f32 %v1634_v24, %v1610_v9  ;;  %v1698_v2 = vadd.f32 0.4994258, %v1697_v27  ;;  %v1733_v31 = vmul.f32 %v1732_v38, %v9223_v26  ;;  %v9259_v4 = vunpack.c.l.bf16 %v6961_v41  ;;  %13514 = vst [vmem:[#allocation158_spill] sm:$0xff] %v9264_v58 }
 0x29c   : > { %v1723_v6 = vadd.f32 0.0036580483, %v1722_v49  ;;  %v1758_v60 = vmul.f32 %v9254_v29, %v9254_v29  ;;  %v1649_v11 = vadd.f32 1.1283791, %v1648_v16  ;;  %v1670_v63 = vand.u32 2147483647, %v9231_v10  ;;  %v9280_v33 = vpop.permute.xlu1 %2265 }
 0x29d   : > { %v6546_v21 = vclamps-f32 %v1635_v32, 1.0  ;;  %v6841_v14 = vpop.eup %6840  ;;  %13513 = vst [vmem:[#allocation128_spill] sm:$0xff] %v9259_v4  ;;  %v1672_v38 = vand.u32 2147483648, %v9231_v10  ;;  %v1699_v24 = vmul.f32 %v1698_v2, %v9189_v45  ;;  %v1734_v32 = vadd.f32 0.014752088, %v1733_v31 }
 0x29e   : > { %v1662_v43 = vmul.f32 %v6841_v14, %v9231_v10  ;;  %v9270_v27 = vmin.f32 %v1758_v60, 16.0  ;;  %v1687_v41 = vadd.f32 0.18741608, %v1686_v54  ;;  %v9273_v3 = vadd.f32 %v8835_v47, %v1351_v28  ;;  %v6962_v47 = vld [vmem:[%s7056_s19 + $0x1c] sm:$0xf] }
 0x29f   : > { %v2043_v9 = vadd.f32 1.0, %v6546_v21  ;;  %v9275_v58 = vadd.f32 1.0, %v1699_v24  ;;  %v1724_v16 = vmul.f32 %v1723_v6, %v9223_v26  ;;  %v1735_v21 = vmul.f32 %v1734_v32, %v9223_v26 }
 0x2a0   : > { %v1663_v49 = vsub.f32 1.0, %v1662_v43  ;;  %v1760_v20 = vmul.f32 2.1237322e-06, %v9270_v27  ;;  %vm1667_vm2 = vweird.f32 %v6841_v14  ;;  %v1771_v54 = vmul.f32 3.8918573e-05, %v9270_v27 }
 0x2a1   : > { %v2059_v61 = vmul.f32 %v2043_v9, %v1371_v0  ;;  %vm1666_vm4 = vweird.f32 %v9231_v10  ;;  %vm9285_vm5 = vcmp.eq.f32.partialorder %v1670_v63, 8.507059e+37  ;;  %6842 = vrcp.f32 %v9275_v58  ;;  %v9290_v0 = vpop.permute.xlu0 %2263 }
 0x2a2   : > { %v1664_v31 = vmul.f32 %v6841_v14, %v1663_v49  ;;  %v1673_v28 = vor.u32 1.1754944e-38, %v1672_v38  ;;  %v1736_v9 = vadd.f32 0.112945676, %v1735_v21  ;;  %v1650_v43 = vmul.f32 %v1649_v11, %v9117_v56  ;;  %vm1668_vm6 = vmor %vm1666_vm4, %vm1667_vm2 }
 0x2a3   : > { %v2075_v2 = vadd.f32 %v2059_v61, %v9259_v4  ;;  %v1725_v24 = vadd.f32 0.05243302, %v1724_v16  ;;  %v1761_v32 = vadd.f32 0.00028619796, %v1760_v20  ;;  %v1772_v61 = vadd.f32 0.001143296, %v1771_v54  ;;  %v9304_v20 = vpop.permute.xlu2 %2273 }
 0x2a4   : > { %v1665_v60 = vadd.f32 %v6841_v14, %v1664_v31  ;;  %v1688_v63 = vmul.f32 %v1687_v41, %v9189_v45  ;;  %v1737_v49 = vmul.f32 %v1736_v9, %v9223_v26  ;;  %v9298_v4 = vmul.f32 0.70710677, %v9273_v3  ;;  %13517 = vst [vmem:[#allocation170_spill] sm:$0xff] %v9304_v20 }
 0x2a5   : > { %v2091_v6 = vpack.c.bf16 %v2075_v2, %v2075_v2  ;;  %v1762_v56 = vmul.f32 %v1761_v32, %v9270_v27  ;;  %v1773_v11 = vmul.f32 %v1772_v61, %v9270_v27  ;;  %v1372_v41 = vmul.f32 0.5, %v9105_v22  ;;  %v9319_v22 = vpop.permute.xlu1 %2271 }
 0x2a6   : > { %v1669_v10 = vsel %vm1668_vm6, %v6841_v14, %v1665_v60  ;;  %v1738_v21 = vadd.f32 0.4994258, %v1737_v49  ;;  %v1798_v14 = vmul.f32 %v9298_v4, %v9298_v4  ;;  %v1726_v2 = vmul.f32 %v1725_v24, %v9223_v26  ;;  %13519 = vst [vmem:[#allocation185_spill] sm:$0xff] %v9319_v22 }
 0x2a7   : > { %2108 = vst.msk [vmem:[%s9037_s18 + $0x14] sm:$0xf] %vm2102_vm3, %v2091_v6  ;;  %v1674_v38 = vsel %vm9285_vm5, %v1673_v28, %v1669_v10  ;;  %v6843_v45 = vpop.eup %6842  ;;  %v1763_v31 = vadd.f32 0.0036580483, %v1762_v56  ;;  %v1774_v54 = vadd.f32 0.014752088, %v1773_v11  ;;  %v9311_v6 = vunpack.c.l.bf16 %v6962_v47 }
 0x2a8   : > { %v1675_v16 = vmul.f32 %v1674_v38, %v1650_v43  ;;  %v1689_v28 = vadd.f32 1.1283791, %v1688_v63  ;;  %v1702_v9 = vmul.f32 %v6843_v45, %v9275_v58  ;;  %v1739_v43 = vmul.f32 %v1738_v21, %v9223_v26  ;;  %v1353_v21 = vpop.f32.mrf.mxu0 }
 0x2a9   : > { %13518 = vst [vmem:[#allocation167_spill] sm:$0xff] %v9311_v6  ;;  %v1764_v32 = vmul.f32 %v1763_v31, %v9270_v27  ;;  %v1775_v61 = vmul.f32 %v1774_v54, %v9270_v27  ;;  %v9317_v10 = vmin.f32 %v1798_v14, 16.0  ;;  %v1710_v38 = vand.u32 2147483647, %v9275_v58  ;;  %v9325_v47 = vpop.permute.xlu0 %2269 }
 0x2aa   : > { %v6547_v60 = vclamps-f32 %v1675_v16, 1.0  ;;  %v1703_v49 = vsub.f32 1.0, %v1702_v9  ;;  %v1712_v56 = vand.u32 2147483648, %v9275_v58  ;;  %vm1707_vm2 = vweird.f32 %v6843_v45  ;;  %13520 = vst [vmem:[#allocation188_spill] sm:$0xff] %v9325_v47 }
 0x2ab   : > { %v1727_v63 = vadd.f32 0.18741608, %v1726_v2  ;;  %v9323_v11 = vadd.f32 1.0, %v1739_v43  ;;  %v1776_v16 = vadd.f32 0.112945676, %v1775_v61  ;;  %vm1706_vm4 = vweird.f32 %v9275_v58 }
 0x2ac   : > { %v2044_v24 = vadd.f32 1.0, %v6547_v60  ;;  %v1704_v54 = vmul.f32 %v6843_v45, %v1703_v49  ;;  %v1800_v14 = vmul.f32 2.1237322e-06, %v9317_v10  ;;  %v1811_v20 = vmul.f32 3.8918573e-05, %v9317_v10  ;;  %vm1708_vm5 = vmor %vm1706_vm4, %vm1707_vm2 }
 0x2ad   : > { %v1690_v60 = vmul.f32 %v1689_v28, %v9162_v5  ;;  %6844 = vrcp.f32 %v9323_v11  ;;  %v1765_v9 = vadd.f32 0.05243302, %v1764_v32  ;;  %v1777_v61 = vmul.f32 %v1776_v16, %v9270_v27  ;;  %v9343_v32 = vpop.permute.xlu2 %2279 }
 0x2ae   : > { %v2060_v31 = vmul.f32 %v2044_v24, %v1372_v41  ;;  %v1705_v43 = vadd.f32 %v6843_v45, %v1704_v54  ;;  %v9337_v41 = vld [vmem:[%s12761_s2] ss:$0 sm:$0xff]  ;;  %vm1711_vm6 = vcmp.eq.f32.partialorder %v1710_v38, 8.507059e+37  ;;  %v1713_v5 = vor.u32 1.1754944e-38, %v1712_v56 }
 0x2af   : > { %v9340_v24 = vadd.f32 %v9337_v41, %v1353_v21  ;;  %v1801_v58 = vadd.f32 0.00028619796, %v1800_v14  ;;  %v1812_v28 = vadd.f32 0.001143296, %v1811_v20  ;;  %v1778_v54 = vadd.f32 0.4994258, %v1777_v61 }
 0x2b0   : > { %v2076_v2 = vadd.f32 %v2060_v31, %v9311_v6  ;;  %v1709_v16 = vsel %vm1708_vm5, %v6843_v45, %v1705_v43  ;;  %v1728_v31 = vmul.f32 %v1727_v63, %v9223_v26  ;;  %v1766_v22 = vmul.f32 %v1765_v9, %v9270_v27  ;;  %v9355_v26 = vpop.permute.xlu1 %2277  ;;  %v6964_v63 = vld [vmem:[%s7056_s19 + $0x20] sm:$0xf] }
 0x2b1   : > { %v1714_v6 = vsel %vm1711_vm6, %v1713_v5, %v1709_v16  ;;  %v1802_v21 = vmul.f32 %v1801_v58, %v9317_v10  ;;  %v1813_v47 = vmul.f32 %v1812_v28, %v9317_v10  ;;  %v1779_v20 = vmul.f32 %v1778_v54, %v9270_v27  ;;  %13521 = vst [vmem:[#allocation187_spill] sm:$0xff] %v9355_v26 }
 0x2b2   : > { %v2092_v49 = vpack.c.bf16 %v2076_v2, %v2076_v2  ;;  %v1715_v38 = vmul.f32 %v1714_v6, %v1690_v60  ;;  %v9353_v56 = vmul.f32 0.70710677, %v9340_v24  ;;  %v9358_v43 = vunpack.c.l.bf16 %v6964_v63  ;;  %v1356_v63 = vpop.f32.mrf.mxu0 }
 0x2b3   : > { %v6845_v14 = vpop.eup %6844  ;;  %v1803_v45 = vadd.f32 0.0036580483, %v1802_v21  ;;  %v1814_v2 = vadd.f32 0.014752088, %v1813_v47  ;;  %v1373_v9 = vmul.f32 0.5, %v9142_v42  ;;  %v9362_v60 = vadd.f32 1.0, %v1779_v20 }
 0x2b4   : > { %2109 = vst.msk [vmem:[%s9037_s18 + $0x18] sm:$0xf] %vm2102_vm3, %v2092_v49  ;;  %v6548_v61 = vclamps-f32 %v1715_v38, 1.0  ;;  %v1742_v5 = vmul.f32 %v6845_v14, %v9323_v11  ;;  %v1729_v58 = vadd.f32 1.1283791, %v1728_v31  ;;  %v9365_v49 = vpop.permute.xlu0 %2275  ;;  %v1838_v21 = vmul.f32 %v9353_v56, %v9353_v56 }
 0x2b5   : > { %13522 = vst [vmem:[#allocation191_spill] sm:$0xff] %v9358_v43  ;;  %v1767_v6 = vadd.f32 0.18741608, %v1766_v22  ;;  %v1815_v28 = vmul.f32 %v1814_v2, %v9317_v10  ;;  %v1804_v54 = vmul.f32 %v1803_v45, %v9317_v10  ;;  %v1374_v42 = vmul.f32 0.5, %v9183_v48  ;;  %v9379_v48 = vpop.permute.xlu2 %2285 }
 0x2b6   : > { %13523 = vst [vmem:[#allocation193_spill] sm:$0xff] %v9365_v49  ;;  %v2045_v16 = vadd.f32 1.0, %v6548_v61  ;;  %v1743_v47 = vsub.f32 1.0, %v1742_v5  ;;  %v1750_v38 = vand.u32 2147483647, %v9323_v11  ;;  %v1752_v31 = vand.u32 2147483648, %v9323_v11 }
 0x2b7   : > { %6846 = vrcp.f32 %v9362_v60  ;;  %vm1747_vm2 = vweird.f32 %v6845_v14  ;;  %v1816_v2 = vadd.f32 0.112945676, %v1815_v28  ;;  %v1730_v61 = vmul.f32 %v1729_v58, %v9204_v50  ;;  %13524 = vst [vmem:[#allocation194_spill] sm:$0xff] %v9379_v48 }
 0x2b8   : > { %v2061_v22 = vmul.f32 %v2045_v16, %v1373_v9  ;;  %v1744_v20 = vmul.f32 %v6845_v14, %v1743_v47  ;;  %vm1746_vm4 = vweird.f32 %v9323_v11  ;;  %v1768_v45 = vmul.f32 %v1767_v6, %v9270_v27 }
 0x2b9   : > { %v9377_v5 = vmin.f32 %v1838_v21, 16.0  ;;  %v1805_v7 = vadd.f32 0.05243302, %v1804_v54  ;;  %v1817_v9 = vmul.f32 %v1816_v2, %v9317_v10  ;;  %vm1748_vm5 = vmor %vm1746_vm4, %vm1747_vm2  ;;  %v1753_v28 = vor.u32 1.1754944e-38, %v1752_v31  ;;  %v6965_v21 = vld [vmem:[%s7056_s19 + $0x24] sm:$0xf] }
 0x2ba   : > { %v2077_v26 = vadd.f32 %v2061_v22, %v9358_v43  ;;  %v1745_v49 = vadd.f32 %v6845_v14, %v1744_v20  ;;  %v9386_v27 = vadd.f32 %v9337_v41, %v1356_v63  ;;  %vm1751_vm6 = vcmp.eq.f32.partialorder %v1750_v38, 8.507059e+37  ;;  %v9391_v43 = vpop.permute.xlu1 %2283 }
 0x2bb   : > { %v1840_v50 = vmul.f32 2.1237322e-06, %v9377_v5  ;;  %v1851_v11 = vmul.f32 3.8918573e-05, %v9377_v5  ;;  %v1818_v16 = vadd.f32 0.4994258, %v1817_v9  ;;  %v9389_v22 = vunpack.c.l.bf16 %v6965_v21 }
 0x2bc   : > { %v2093_v58 = vpack.c.bf16 %v2077_v26, %v2077_v26  ;;  %v1749_v6 = vsel %vm1748_vm5, %v6845_v14, %v1745_v49  ;;  %13526 = vst [vmem:[#allocation196_spill] sm:$0xff] %v9391_v43  ;;  %v1769_v48 = vadd.f32 1.1283791, %v1768_v45  ;;  %v1806_v26 = vmul.f32 %v1805_v7, %v9317_v10 }
 0x2bd   : > { %v6847_v47 = vpop.eup %6846  ;;  %13525 = vst [vmem:[#allocation195_spill] sm:$0xff] %v9389_v22  ;;  %v1754_v54 = vsel %vm1751_vm6, %v1753_v28, %v1749_v6  ;;  %v1841_v20 = vadd.f32 0.00028619796, %v1840_v50  ;;  %v1852_v2 = vadd.f32 0.001143296, %v1851_v11  ;;  %v1819_v14 = vmul.f32 %v1818_v16, %v9317_v10  ;;  %v9403_v28 = vpop.permute.xlu0 %2281 }
 0x2be   : > { %2110 = vst.msk [vmem:[%s9037_s18 + $0x1c] sm:$0xf] %vm2102_vm3, %v2093_v58  ;;  %v1755_v31 = vmul.f32 %v1754_v54, %v1730_v61  ;;  %v1782_v63 = vmul.f32 %v6847_v47, %v9362_v60  ;;  %v9401_v9 = vmul.f32 0.70710677, %v9386_v27  ;;  %v1790_v61 = vand.u32 2147483647, %v9362_v60 }
 0x2bf   : > { %v1842_v49 = vmul.f32 %v1841_v20, %v9377_v5  ;;  %v1853_v38 = vmul.f32 %v1852_v2, %v9377_v5  ;;  %v1792_v45 = vand.u32 2147483648, %v9362_v60  ;;  %v9407_v58 = vadd.f32 1.0, %v1819_v14  ;;  %v9413_v2 = vpop.permute.xlu2 %2291 }
 0x2c0   : > { %v6549_v50 = vclamps-f32 %v1755_v31, 1.0  ;;  %v1783_v11 = vsub.f32 1.0, %v1782_v63  ;;  %v1878_v16 = vmul.f32 %v9401_v9, %v9401_v9  ;;  %vm1787_vm2 = vweird.f32 %v6847_v47  ;;  %13527 = vst [vmem:[#allocation197_spill] sm:$0xff] %v9413_v2 }
 0x2c1   : > { %v1843_v7 = vadd.f32 0.0036580483, %v1842_v49  ;;  %v1854_v6 = vadd.f32 0.014752088, %v1853_v38  ;;  %v1807_v20 = vadd.f32 0.18741608, %v1806_v26  ;;  %vm1786_vm4 = vweird.f32 %v9362_v60  ;;  %v1358_v38 = vpop.f32.mrf.mxu0 }
 0x2c2   : > { %v2046_v21 = vadd.f32 1.0, %v6549_v50  ;;  %v1784_v54 = vmul.f32 %v6847_v47, %v1783_v11  ;;  %6848 = vrcp.f32 %v9407_v58  ;;  %v1770_v43 = vmul.f32 %v1769_v48, %v9254_v29  ;;  %vm1788_vm5 = vmor %vm1786_vm4, %vm1787_vm2  ;;  %v9427_v48 = vpop.permute.xlu1 %2289 }
 0x2c3   : > { %v1844_v14 = vmul.f32 %v1843_v7, %v9377_v5  ;;  %v1855_v49 = vmul.f32 %v1854_v6, %v9377_v5  ;;  %vm1791_vm6 = vcmp.eq.f32.partialorder %v1790_v61, 8.507059e+37  ;;  %v1793_v50 = vor.u32 1.1754944e-38, %v1792_v45  ;;  %13528 = vst [vmem:[#allocation198_spill] sm:$0xff] %v9427_v48 }
 0x2c4   : > { %v2062_v31 = vmul.f32 %v2046_v21, %v1374_v42  ;;  %v1785_v63 = vadd.f32 %v6847_v47, %v1784_v54  ;;  %v9418_v11 = vmin.f32 %v1878_v16, 16.0  ;;  %v1808_v15 = vmul.f32 %v1807_v20, %v9317_v10 }
 0x2c5   : > { %v1856_v42 = vadd.f32 0.112945676, %v1855_v49  ;;  %v9425_v29 = vadd.f32 %v9337_v41, %v1358_v38  ;;  %v1845_v16 = vadd.f32 0.05243302, %v1844_v14  ;;  %v1375_v10 = vmul.f32 0.5, %v9241_v39 }
 0x2c6   : > { %v2078_v60 = vadd.f32 %v2062_v31, %v9389_v22  ;;  %v1789_v26 = vsel %vm1788_vm5, %v6847_v47, %v1785_v63  ;;  %v1880_v7 = vmul.f32 2.1237322e-06, %v9418_v11  ;;  %v1891_v6 = vmul.f32 3.8918573e-05, %v9418_v11  ;;  %v9431_v63 = vpop.permute.xlu0 %2287  ;;  %v6966_v49 = vld [vmem:[%s7056_s19 + $0x28] sm:$0xf] }
 0x2c7   : > { %v1794_v21 = vsel %vm1791_vm6, %v1793_v50, %v1789_v26  ;;  %v1857_v47 = vmul.f32 %v1856_v42, %v9377_v5  ;;  %13529 = vst [vmem:[#allocation199_spill] sm:$0xff] %v9431_v63  ;;  %v9436_v50 = vunpack.c.l.bf16 %v6966_v49  ;;  %v1809_v26 = vadd.f32 1.1283791, %v1808_v15  ;;  %v9449_v22 = vpop.permute.xlu2 %2297 }
 0x2c8   : > { %v2094_v61 = vpack.c.bf16 %v2078_v60, %v2078_v60  ;;  %v1795_v45 = vmul.f32 %v1794_v21, %v1770_v43  ;;  %v6849_v54 = vpop.eup %6848  ;;  %v1881_v20 = vadd.f32 0.00028619796, %v1880_v7  ;;  %v1892_v31 = vadd.f32 0.001143296, %v1891_v6 }
 0x2c9   : > { %13530 = vst [vmem:[#allocation200_spill] sm:$0xff] %v9436_v50  ;;  %v1822_v60 = vmul.f32 %v6849_v54, %v9407_v58  ;;  %v1858_v43 = vadd.f32 0.4994258, %v1857_v47  ;;  %v9442_v39 = vmul.f32 0.70710677, %v9425_v29  ;;  %v1832_v6 = vand.u32 2147483648, %v9407_v58 }
 0x2ca   : > { %2111 = vst.msk [vmem:[%s9037_s18 + $0x20] sm:$0xf] %vm2102_vm3, %v2094_v61  ;;  %v6550_v38 = vclamps-f32 %v1795_v45, 1.0  ;;  %v1882_v14 = vmul.f32 %v1881_v20, %v9418_v11  ;;  %v1893_v42 = vmul.f32 %v1892_v31, %v9418_v11  ;;  %v1846_v61 = vmul.f32 %v1845_v16, %v9377_v5 }
 0x2cb   : > { %v1823_v7 = vsub.f32 1.0, %v1822_v60  ;;  %v1859_v49 = vmul.f32 %v1858_v43, %v9377_v5  ;;  %v1918_v47 = vmul.f32 %v9442_v39, %v9442_v39  ;;  %vm1827_vm2 = vweird.f32 %v6849_v54  ;;  %v9458_v43 = vpop.permute.xlu1 %2295 }
 0x2cc   : > { %v2047_v21 = vadd.f32 1.0, %v6550_v38  ;;  %v1883_v45 = vadd.f32 0.0036580483, %v1882_v14  ;;  %v1894_v15 = vadd.f32 0.014752088, %v1893_v42  ;;  %vm1826_vm4 = vweird.f32 %v9407_v58 }
 0x2cd   : > { %v1824_v31 = vmul.f32 %v6849_v54, %v1823_v7  ;;  %v1830_v2 = vand.u32 2147483647, %v9407_v58  ;;  %v9452_v38 = vadd.f32 1.0, %v1859_v49  ;;  %v9456_v48 = vmin.f32 %v1918_v47, 16.0  ;;  %vm1828_vm5 = vmor %vm1826_vm4, %vm1827_vm2 }
 0x2ce   : > { %v2063_v20 = vmul.f32 %v2047_v21, %v1375_v10  ;;  %v1884_v60 = vmul.f32 %v1883_v45, %v9418_v11  ;;  %v1895_v16 = vmul.f32 %v1894_v15, %v9418_v11  ;;  %v1361_v10 = vpop.f32.mrf.mxu0  ;;  %v1810_v21 = vmul.f32 %v1809_v26, %v9298_v4 }
 0x2cf   : > { %v1825_v42 = vadd.f32 %v6849_v54, %v1824_v31  ;;  %v1833_v7 = vor.u32 1.1754944e-38, %v1832_v6  ;;  %v1847_v49 = vadd.f32 0.18741608, %v1846_v61  ;;  %6850 = vrcp.f32 %v9452_v38  ;;  %v9465_v31 = vpop.permute.xlu0 %2293 }
 0x2d0   : > { %v2079_v14 = vadd.f32 %v2063_v20, %v9436_v50  ;;  %vm1831_vm6 = vcmp.eq.f32.partialorder %v1830_v2, 8.507059e+37  ;;  %v1896_v47 = vadd.f32 0.112945676, %v1895_v16  ;;  %v1885_v13 = vadd.f32 0.05243302, %v1884_v60  ;;  %13531 = vst [vmem:[#allocation201_spill] sm:$0xff] %v9465_v31 }
 0x2d1   : > { %v1829_v15 = vsel %vm1828_vm5, %v6849_v54, %v1825_v42  ;;  %v1920_v20 = vmul.f32 2.1237322e-06, %v9456_v48  ;;  %v1931_v26 = vmul.f32 3.8918573e-05, %v9456_v48  ;;  %v1848_v6 = vmul.f32 %v1847_v49, %v9377_v5  ;;  %v6967_v5 = vld [vmem:[%s7056_s19 + $0x2c] sm:$0xf] }
 0x2d2   : > { %v2095_v45 = vpack.c.bf16 %v2079_v14, %v2079_v14  ;;  %v1834_v63 = vsel %vm1831_vm6, %v1833_v7, %v1829_v15  ;;  %v1897_v4 = vmul.f32 %v1896_v47, %v9418_v11  ;;  %v9473_v2 = vadd.f32 %v9337_v41, %v1361_v10 }
 0x2d3   : > { %v1835_v58 = vmul.f32 %v1834_v63, %v1810_v21  ;;  %v1921_v61 = vadd.f32 0.00028619796, %v1920_v20  ;;  %v1376_v14 = vmul.f32 0.5, %v9273_v3  ;;  %v1886_v42 = vmul.f32 %v1885_v13, %v9418_v11  ;;  %v9480_v21 = vpop.permute.xlu2 %2303 }
 0x2d4   : > { %2112 = vst.msk [vmem:[%s9037_s18 + $0x24] sm:$0xf] %vm2102_vm3, %v2095_v45  ;;  %v1898_v60 = vadd.f32 0.4994258, %v1897_v4  ;;  %v1932_v7 = vadd.f32 0.001143296, %v1931_v26  ;;  %v9482_v45 = vpop.permute.xlu1 %2301  ;;  %v9485_v49 = vunpack.c.l.bf16 %v6967_v5  ;;  %vm1866_vm4 = vweird.f32 %v9452_v38 }
 0x2d5   : > { %v6551_v54 = vclamps-f32 %v1835_v58, 1.0  ;;  %v6851_v16 = vpop.eup %6850  ;;  %v9478_v63 = vmul.f32 0.70710677, %v9473_v2  ;;  %13532 = vst [vmem:[#allocation202_spill] sm:$0xff] %v9480_v21  ;;  %v1922_v47 = vmul.f32 %v1921_v61, %v9456_v48  ;;  %v1849_v20 = vadd.f32 1.1283791, %v1848_v6 }
 0x2d6   : > { %13533 = vst [vmem:[#allocation203_spill] sm:$0xff] %v9482_v45  ;;  %v1862_v15 = vmul.f32 %v6851_v16, %v9452_v38  ;;  %v1899_v3 = vmul.f32 %v1898_v60, %v9418_v11  ;;  %v1933_v13 = vmul.f32 %v1932_v7, %v9456_v48  ;;  %v1870_v50 = vand.u32 2147483647, %v9452_v38  ;;  %v1363_v31 = vpop.f32.mrf.mxu0 }
 0x2d7   : > { %13534 = vst [vmem:[#allocation204_spill] sm:$0xff] %v9485_v49  ;;  %v2048_v10 = vadd.f32 1.0, %v6551_v54  ;;  %v1958_v58 = vmul.f32 %v9478_v63, %v9478_v63  ;;  %v1872_v5 = vand.u32 2147483648, %v9452_v38  ;;  %v1887_v54 = vadd.f32 0.18741608, %v1886_v42 }
 0x2d8   : > { %v1863_v26 = vsub.f32 1.0, %v1862_v15  ;;  %v9495_v21 = vadd.f32 1.0, %v1899_v3  ;;  %v1934_v45 = vadd.f32 0.014752088, %v1933_v13  ;;  %vm1867_vm2 = vweird.f32 %v6851_v16  ;;  %v9505_v15 = vpop.permute.xlu0 %2299 }
 0x2d9   : > { %v2064_v4 = vmul.f32 %v2048_v10, %v1376_v14  ;;  %v9497_v61 = vmin.f32 %v1958_v58, 16.0  ;;  %v1923_v7 = vadd.f32 0.0036580483, %v1922_v47  ;;  %v1850_v14 = vmul.f32 %v1849_v20, %v9353_v56  ;;  %13535 = vst [vmem:[#allocation205_spill] sm:$0xff] %v9505_v15  ;;  %vm1868_vm5 = vmor %vm1866_vm4, %vm1867_vm2 }
 0x2da   : > { %v1864_v60 = vmul.f32 %v6851_v16, %v1863_v26  ;;  %6852 = vrcp.f32 %v9495_v21  ;;  %v9503_v10 = vadd.f32 %v9337_v41, %v1363_v31  ;;  %v1935_v13 = vmul.f32 %v1934_v45, %v9456_v48 }
 0x2db   : > { %v2080_v6 = vadd.f32 %v2064_v4, %v9485_v49  ;;  %vm1871_vm6 = vcmp.eq.f32.partialorder %v1870_v50, 8.507059e+37  ;;  %v1873_v58 = vor.u32 1.1754944e-38, %v1872_v5  ;;  %v1960_v47 = vmul.f32 2.1237322e-06, %v9497_v61  ;;  %v9520_v5 = vpop.permute.xlu2 %2309 }
 0x2dc   : > { %v1865_v3 = vadd.f32 %v6851_v16, %v1864_v60  ;;  %v1971_v56 = vmul.f32 3.8918573e-05, %v9497_v61  ;;  %v9511_v20 = vpop.permute.xlu1 %2307  ;;  %v1888_v31 = vmul.f32 %v1887_v54, %v9418_v11  ;;  %v1924_v4 = vmul.f32 %v1923_v7, %v9456_v48  ;;  %13537 = vst [vmem:[#allocation207_spill] sm:$0xff] %v9520_v5 }
 0x2dd   : > { %v2096_v42 = vpack.c.bf16 %v2080_v6, %v2080_v6  ;;  %13536 = vst [vmem:[#allocation206_spill] sm:$0xff] %v9511_v20  ;;  %v1936_v26 = vadd.f32 0.112945676, %v1935_v13  ;;  %v1961_v45 = vadd.f32 0.00028619796, %v1960_v47  ;;  %v1377_v7 = vmul.f32 0.5, %v9340_v24 }
 0x2de   : > { %v1869_v41 = vsel %vm1868_vm5, %v6851_v16, %v1865_v3  ;;  %v1972_v6 = vadd.f32 0.001143296, %v1971_v56  ;;  %v9518_v50 = vmul.f32 0.70710677, %v9503_v10  ;;  %v1925_v13 = vadd.f32 0.05243302, %v1924_v4 }
 0x2df   : > { %2113 = vst.msk [vmem:[%s9037_s18 + $0x28] sm:$0xf] %vm2102_vm3, %v2096_v42  ;;  %v1874_v38 = vsel %vm1871_vm6, %v1873_v58, %v1869_v41  ;;  %v1937_v49 = vmul.f32 %v1936_v26, %v9456_v48  ;;  %v1962_v16 = vmul.f32 %v1961_v45, %v9497_v61  ;;  %v6968_v58 = vld [vmem:[%s7056_s19 + $0x30] sm:$0xf]  ;;  %v1910_v45 = vand.u32 2147483647, %v9495_v21 }
 0x2e0   : > { %v1875_v60 = vmul.f32 %v1874_v38, %v1850_v14  ;;  %v6853_v20 = vpop.eup %6852  ;;  %v1973_v11 = vmul.f32 %v1972_v6, %v9497_v61  ;;  %v1998_v54 = vmul.f32 %v9518_v50, %v9518_v50  ;;  %v9530_v47 = vunpack.c.l.bf16 %v6968_v58  ;;  %v9538_v4 = vpop.permute.xlu0 %2305 }
 0x2e1   : > { %v1902_v3 = vmul.f32 %v6853_v20, %v9495_v21  ;;  %v1889_v14 = vadd.f32 1.1283791, %v1888_v31  ;;  %v1938_v56 = vadd.f32 0.4994258, %v1937_v49  ;;  %v1912_v5 = vand.u32 2147483648, %v9495_v21  ;;  %13539 = vst [vmem:[#allocation209_spill] sm:$0xff] %v9538_v4 }
 0x2e2   : > { %v6552_v42 = vclamps-f32 %v1875_v60, 1.0  ;;  %13538 = vst [vmem:[#allocation208_spill] sm:$0xff] %v9530_v47  ;;  %v1974_v41 = vadd.f32 0.014752088, %v1973_v11  ;;  %v9533_v6 = vmin.f32 %v1998_v54, 16.0  ;;  %vm1907_vm2 = vweird.f32 %v6853_v20 }
 0x2e3   : > { %v1903_v38 = vsub.f32 1.0, %v1902_v3  ;;  %v1939_v24 = vmul.f32 %v1938_v56, %v9456_v48  ;;  %v1963_v60 = vadd.f32 0.0036580483, %v1962_v16  ;;  %v1926_v11 = vmul.f32 %v1925_v13, %v9456_v48 }
 0x2e4   : > { %v2049_v26 = vadd.f32 1.0, %v6552_v42  ;;  %v1975_v15 = vmul.f32 %v1974_v41, %v9497_v61  ;;  %v9540_v58 = vpop.permute.xlu1 %2313  ;;  %v1890_v42 = vmul.f32 %v1889_v14, %v9401_v9  ;;  %vm1906_vm4 = vweird.f32 %v9495_v21  ;;  %v9552_v14 = vpop.permute.xlu2 %2315 }
 0x2e5   : > { %v1904_v49 = vmul.f32 %v6853_v20, %v1903_v38  ;;  %v9545_v54 = vadd.f32 1.0, %v1939_v24  ;;  %vm1911_vm5 = vcmp.eq.f32.partialorder %v1910_v45, 8.507059e+37  ;;  %v2000_v41 = vmul.f32 2.1237322e-06, %v9533_v6  ;;  %vm1908_vm6 = vmor %vm1906_vm4, %vm1907_vm2 }
 0x2e6   : > { %v2065_v31 = vmul.f32 %v2049_v26, %v1377_v7  ;;  %v1976_v3 = vadd.f32 0.112945676, %v1975_v15  ;;  %v1913_v7 = vor.u32 1.1754944e-38, %v1912_v5  ;;  %v1964_v13 = vmul.f32 %v1963_v60, %v9497_v61 }
 0x2e7   : > { %v1905_v56 = vadd.f32 %v6853_v20, %v1904_v49  ;;  %6854 = vrcp.f32 %v9545_v54  ;;  %v2011_v9 = vmul.f32 3.8918573e-05, %v9533_v6  ;;  %v1927_v15 = vadd.f32 0.18741608, %v1926_v11 }
 0x2e8   : > { %v2081_v16 = vadd.f32 %v2065_v31, %v9530_v47  ;;  %v1977_v38 = vmul.f32 %v1976_v3, %v9497_v61  ;;  %v2001_v31 = vadd.f32 0.00028619796, %v2000_v41  ;;  %v1965_v49 = vadd.f32 0.05243302, %v1964_v13  ;;  %v13540_v3 = vld [vmem:[#allocation10_spill] sm:$0xff] }
 0x2e9   : > { %v1909_v26 = vsel %vm1908_vm6, %v6853_v20, %v1905_v56  ;;  %v2012_v47 = vadd.f32 0.001143296, %v2011_v9  ;;  %v1928_v57 = vmul.f32 %v1927_v15, %v9456_v48  ;;  %v6767_v20 = vld [vmem:[%s12760_s1 + $0x78] sm:$0xff]  ;;  %v2361_v56 = vsel %vm986_vm7, %v8523_v44, %v13540_v3  ;;  %v6969_v13 = vld [vmem:[%s7056_s19 + $0x34] sm:$0xf] }
 0x2ea   : > { %v2097_v21 = vpack.c.bf16 %v2081_v16, %v2081_v16  ;;  %v1914_v24 = vsel %vm1911_vm5, %v1913_v7, %v1909_v26  ;;  %v1978_v5 = vadd.f32 0.4994258, %v1977_v38  ;;  %v9569_v7 = vpop.permute.xlu0 %2311  ;;  %v9572_v9 = vunpack.c.l.bf16 %v6969_v13  ;;  %2686 = vmatpush.bf16.msra.mxu1 %v6767_v20 }
 0x2eb   : > { %v1915_v45 = vmul.f32 %v1914_v24, %v1890_v42  ;;  %v2002_v42 = vmul.f32 %v2001_v31, %v9533_v6  ;;  %v2013_v41 = vmul.f32 %v2012_v47, %v9533_v6  ;;  %v1378_v48 = vmul.f32 0.5, %v9386_v27 }
 0x2ec   : > { %2114 = vst.msk [vmem:[%s9037_s18 + $0x2c] sm:$0xf] %vm2102_vm3, %v2097_v21  ;;  %v9557_v4 = vpop.permute.xlu1 %2319  ;;  %v1979_v16 = vmul.f32 %v1978_v5, %v9497_v61  ;;  %v1966_v15 = vmul.f32 %v1965_v49, %v9497_v61  ;;  %v2384_v24 = vsel %vm1003_vm8, %v2361_v56, %v8506_v8  ;;  %v1929_v31 = vadd.f32 1.1283791, %v1928_v57  ;;  %v6766_v5 = vld [vmem:[%s12760_s1 + $0x70] sm:$0xff] }
 0x2ed   : > { %v6553_v60 = vclamps-f32 %v1915_v45, 1.0  ;;  %v6855_v11 = vpop.eup %6854  ;;  %13541 = vst [vmem:[#allocation210_spill] sm:$0xff] %v9572_v9  ;;  %v2014_v44 = vadd.f32 0.014752088, %v2013_v41  ;;  %v1950_v27 = vand.u32 2147483647, %v9545_v54  ;;  %v2400_v57 = vsel %vm1020_vm9, %v2384_v24, %v8658_v37 }
 0x2ee   : > { %v1942_v26 = vmul.f32 %v6855_v11, %v9545_v54  ;;  %v9577_v38 = vadd.f32 1.0, %v1979_v16  ;;  %v2003_v49 = vadd.f32 0.0036580483, %v2002_v42  ;;  %v9587_v16 = vpop.permute.xlu2 %2321  ;;  %vm1947_vm2 = vweird.f32 %v6855_v11  ;;  %2687 = vmatpush.bf16.msra.mxu1 %v6766_v5 }
 0x2ef   : > { %v2050_v21 = vadd.f32 1.0, %v6553_v60  ;;  %v1952_v60 = vand.u32 2147483648, %v9545_v54  ;;  %v2015_v8 = vmul.f32 %v2014_v44, %v9533_v6  ;;  %v1967_v56 = vadd.f32 0.18741608, %v1966_v15 }
 0x2f0   : > { %v1943_v45 = vsub.f32 1.0, %v1942_v26  ;;  %6856 = vrcp.f32 %v9577_v38  ;;  %vm1946_vm4 = vweird.f32 %v9545_v54  ;;  %v6765_v26 = vld [vmem:[%s12760_s1 + $0x68] sm:$0xff]  ;;  %v1930_v37 = vmul.f32 %v1929_v31, %v9442_v39  ;;  %v6764_v39 = vld [vmem:[%s12760_s1 + $0x60] sm:$0xff] }
 0x2f1   : > { %v2066_v47 = vmul.f32 %v2050_v21, %v1378_v48  ;;  %v2016_v42 = vadd.f32 0.112945676, %v2015_v8  ;;  %vm1948_vm5 = vmor %vm1946_vm4, %vm1947_vm2  ;;  %v1953_v44 = vor.u32 1.1754944e-38, %v1952_v60  ;;  %vm1951_vm6 = vcmp.eq.f32.partialorder %v1950_v27, 8.507059e+37 }
 0x2f2   : > { %v1944_v41 = vmul.f32 %v6855_v11, %v1943_v45  ;;  %v2004_v45 = vmul.f32 %v2003_v49, %v9533_v6  ;;  %2688 = vmatpush.bf16.msra.mxu1 %v6765_v26  ;;  %v1379_v8 = vmul.f32 0.5, %v9425_v29  ;;  %v6763_v29 = vld [vmem:[%s12760_s1 + $0x58] sm:$0xff]  ;;  %vm1986_vm4 = vweird.f32 %v9577_v38 }
 0x2f3   : > { %v2082_v20 = vadd.f32 %v2066_v47, %v9572_v9  ;;  %v2416_v47 = vsel %vm1037_vm10, %v2400_v57, %v8742_v36  ;;  %v2017_v54 = vmul.f32 %v2016_v42, %v9533_v6  ;;  %v1992_v42 = vand.u32 2147483648, %v9577_v38 }
 0x2f4   : > { %v9593_v13 = vpop.permute.xlu1 %2325  ;;  %v1945_v21 = vadd.f32 %v6855_v11, %v1944_v41  ;;  %v9607_v41 = vpop.permute.xlu0 %2317  ;;  %v2432_v36 = vsel %vm13061_vm11, %v2416_v47, %v8756_v25  ;;  %v2005_v31 = vadd.f32 0.05243302, %v2004_v45  ;;  %v6970_v25 = vld [vmem:[%s7056_s19 + $0x38] sm:$0xf] }
 0x2f5   : > { %v2098_v48 = vpack.c.bf16 %v2082_v20, %v2082_v20  ;;  %v1968_v20 = vmul.f32 %v1967_v56, %v9497_v61  ;;  %v2018_v27 = vadd.f32 0.4994258, %v2017_v54  ;;  %v6825_v54 = vld [vmem:[%s12761_s2] ss:$0 sm:$0xff] }
 0x2f6   : > { %v1949_v15 = vsel %vm1948_vm5, %v6855_v11, %v1945_v21  ;;  %v6857_v24 = vpop.eup %6856  ;;  %v2448_v11 = vsel %vm1071_vm12, %v2432_v36, %v8844_v19  ;;  %2689 = vmatpush.bf16.msra.mxu1 %v6764_v39  ;;  %v9625_v47 = vpop.permute.xlu2 %2327  ;;  %v6762_v36 = vld [vmem:[%s12760_s1 + $0x50] sm:$0xff]  ;;  %2683 = vrot.lane.b32.xlu0 %v6825_v54, %s7011_s7 }
 0x2f7   : > { %2115 = vst.msk [vmem:[%s9037_s18 + $0x30] sm:$0xf] %vm2102_vm3, %v2098_v48  ;;  %v1954_v5 = vsel %vm1951_vm6, %v1953_v44, %v1949_v15  ;;  %v1982_v49 = vmul.f32 %v6857_v24, %v9577_v38  ;;  %v2464_v61 = vsel %vm13066_vm13, %v2448_v11, %v8942_v53  ;;  %v9621_v48 = vunpack.c.l.bf16 %v6970_v25 }
 0x2f8   : > { %v1955_v60 = vmul.f32 %v1954_v5, %v1930_v37  ;;  %v1969_v21 = vadd.f32 1.1283791, %v1968_v20  ;;  %v2019_v26 = vmul.f32 %v2018_v27, %v9533_v6  ;;  %vm1987_vm2 = vweird.f32 %v6857_v24 }
 0x2f9   : > { %v1983_v56 = vsub.f32 1.0, %v1982_v49  ;;  %13542 = vst [vmem:[#allocation211_spill] sm:$0xff] %v9621_v48  ;;  %v1990_v53 = vand.u32 2147483647, %v9577_v38  ;;  %v2006_v37 = vmul.f32 %v2005_v31, %v9533_v6  ;;  %vm1988_vm5 = vmor %vm1986_vm4, %vm1987_vm2  ;;  %v1993_v49 = vor.u32 1.1754944e-38, %v1992_v42 }
 0x2fa   : > { %v6554_v57 = vclamps-f32 %v1955_v60, 1.0  ;;  %v9634_v15 = vadd.f32 1.0, %v2019_v26  ;;  %2690 = vmatpush.bf16.msra.mxu1 %v6763_v29  ;;  %v2480_v60 = vsel %vm13065_vm14, %v2464_v61, %v9001_v30  ;;  %v1970_v11 = vmul.f32 %v1969_v21, %v9478_v63  ;;  %v6761_v63 = vld [vmem:[%s12760_s1 + $0x48] sm:$0xff] }
 0x2fb   : > { %v1984_v45 = vmul.f32 %v6857_v24, %v1983_v56  ;;  %vm1991_vm6 = vcmp.eq.f32.partialorder %v1990_v53, 8.507059e+37  ;;  %v2496_v31 = vsel %vm13064_vm15, %v2480_v60, %v9156_v59  ;;  %v6971_v53 = vld [vmem:[%s7056_s19 + $0x3c] sm:$0xf]  ;;  %vm13545_vm2 = vcmask 785408  }
 0x2fc   : > { %v9627_v19 = vpop.permute.xlu1 %2331  ;;  %v2051_v44 = vadd.f32 1.0, %v6554_v57  ;;  %6858 = vrcp.f32 %v9634_v15  ;;  %v9651_v30 = vpop.permute.xlu0 %2323  ;;  %v2512_v61 = vsel %vm13063_vm0, %v2496_v31, %v9290_v0  ;;  %v9673_v29 = vunpack.c.l.bf16 %v6971_v53 }
 0x2fd   : > { %v1985_v20 = vadd.f32 %v6857_v24, %v1984_v45  ;;  %v2528_v26 = vsel %vm13062_vm1, %v2512_v61, %v9343_v32  ;;  %vm13546_vm4 = vcmask 850944  }
 0x2fe   : > { %v2067_v5 = vmul.f32 %v2051_v44, %v1379_v8  ;;  %v2007_v8 = vadd.f32 0.18741608, %v2006_v37  ;;  %2691 = vmatpush.bf16.msra.mxu1 %v6762_v36  ;;  %v9670_v45 = vpop.permute.xlu2 %2333  ;;  %13544 = vst [vmem:[#allocation212_spill] sm:$0xff] %v9673_v29 }
 0x2ff   : > { %v1989_v38 = vsel %vm1988_vm5, %v6857_v24, %v1985_v20  ;;  %v13543_v24 = vld [vmem:[#allocation15_spill] sm:$0xff] }
 0x300   : > { %v2083_v39 = vadd.f32 %v2067_v5, %v9621_v48  ;;  %v1994_v27 = vsel %vm1991_vm6, %v1993_v49, %v1989_v38  ;;  %v2364_v25 = vsel %vm986_vm7, %v8518_v55, %v13543_v24  ;;  %v2008_v44 = vmul.f32 %v2007_v8, %v9533_v6 }
 0x301   : > { %v1995_v56 = vmul.f32 %v1994_v27, %v1970_v11  ;;  %v2386_v21 = vsel %vm1003_vm8, %v2364_v25, %v8607_v18  ;;  %v1380_v55 = vmul.f32 0.5, %v9473_v2  ;;  %v6760_v18 = vld [vmem:[%s12760_s1 + $0x40] sm:$0xff]  ;;  %v2544_v6 = vsel %vm13545_vm2, %v2528_v26, %v9458_v43 }
 0x302   : > { %v2099_v57 = vpack.c.bf16 %v2083_v39, %v2083_v39  ;;  %v6859_v0 = vpop.eup %6858  ;;  %2692 = vmatpush.bf16.msra.mxu1 %v6761_v63  ;;  %v2402_v32 = vsel %vm1020_vm9, %v2386_v21, %v8587_v46  ;;  %v2560_v2 = vsel %vm13546_vm4, %v2544_v6, %v9569_v7  ;;  %v2009_v49 = vadd.f32 1.1283791, %v2008_v44 }
 0x303   : > { %v6555_v42 = vclamps-f32 %v1995_v56, 1.0  ;;  %v2022_v54 = vmul.f32 %v6859_v0, %v9634_v15  ;;  %v2418_v5 = vsel %vm1037_vm10, %v2402_v32, %v8737_v12  ;;  %v2032_v39 = vand.u32 2147483648, %v9634_v15 }
 0x304   : > { %v9661_v59 = vpop.permute.xlu1 %2337  ;;  %2116 = vst.msk [vmem:[%s9037_s18 + $0x34] sm:$0xf] %vm2102_vm3, %v2099_v57  ;;  %v2434_v60 = vsel %vm13061_vm11, %v2418_v5, %v8814_v62  ;;  %vm2027_vm5 = vweird.f32 %v6859_v0  ;;  %v2030_v43 = vand.u32 2147483647, %v9634_v15  ;;  %vm13547_vm6 = vcmask 916480   ;;  %v2330_v38 = vpop.permute.xlu0 %2329 }
 0x305   : > { %v2052_v37 = vadd.f32 1.0, %v6555_v42  ;;  %v2023_v36 = vsub.f32 1.0, %v2022_v54  ;;  %v2576_v12 = vsel %vm13547_vm6, %v2560_v2, %v9625_v47  ;;  %vm2026_vm2 = vweird.f32 %v9634_v15 }
 0x306   : > { %2693 = vmatpush.bf16.msra.mxu1 %v6760_v18  ;;  %vm13548_vm4 = vcmask 982016   ;;  %v2450_v8 = vsel %vm1071_vm12, %v2434_v60, %v8830_v35  ;;  %vm2028_vm11 = vmor %vm2026_vm2, %vm2027_vm5  ;;  %v2033_v61 = vor.u32 1.1754944e-38, %v2032_v39  ;;  %v2010_v47 = vmul.f32 %v2009_v49, %v9518_v50  ;;  %v9706_v25 = vpop.permute.xlu2 %2339  ;;  %v6972_v50 = vld [vmem:[%s7056_s19 + $0x40] sm:$0xf] }
 0x307   : > { %v2068_v20 = vmul.f32 %v2052_v37, %v1380_v55  ;;  %v2024_v46 = vmul.f32 %v6859_v0, %v2023_v36  ;;  %v2466_v57 = vsel %vm13066_vm13, %v2450_v8, %v8934_v40  ;;  %vm2031_vm6 = vcmp.eq.f32.partialorder %v2030_v43, 8.507059e+37  ;;  %v13550_v55 = vld [vmem:[#allocation8_spill] sm:$0xff]  ;;  %v13559_v49 = vld [vmem:[#allocation142_spill] sm:$0xff] }
 0x308   : > { %v2482_v15 = vsel %vm13065_vm14, %v2466_v57, %v9074_v23  ;;  %v1381_v23 = vmul.f32 0.5, %v9503_v10  ;;  %vm13552_vm5 = vcmask 850944   ;;  %vm13553_vm2 = vcmask 916480   ;;  %v13562_v43 = vld [vmem:[#allocation76_spill] sm:$0xff] }
 0x309   : > { %v2084_v11 = vadd.f32 %v2068_v20, %v9673_v29  ;;  %v2025_v27 = vadd.f32 %v6859_v0, %v2024_v46  ;;  %v2498_v21 = vsel %vm13064_vm15, %v2482_v15, %v9138_v52  ;;  %v2367_v52 = vsel %vm986_vm7, %v8456_v1, %v13550_v55  ;;  %v13554_v20 = vld [vmem:[#allocation136_spill] sm:$0xff] }
 0x30a   : > { %v2514_v40 = vsel %vm13063_vm0, %v2498_v21, %v9280_v33  ;;  %v2388_v33 = vsel %vm1003_vm8, %v2367_v52, %v8605_v51  ;;  %v13561_v46 = vld [vmem:[#allocation12_spill] sm:$0xff]  ;;  %v13576_v52 = vld [vmem:[#allocation70_spill] sm:$0xff] }
 0x30b   : > { %v2100_v7 = vpack.c.bf16 %v2084_v11, %v2084_v11  ;;  %v2029_v56 = vsel %vm2028_vm11, %v6859_v0, %v2025_v27  ;;  %v2530_v26 = vsel %vm13062_vm1, %v2514_v40, %v9403_v28  ;;  %v9715_v0 = vunpack.c.l.bf16 %v6972_v50  ;;  %v13569_v15 = vld [vmem:[#allocation60_spill] sm:$0xff] }
 0x30c   : > { %v2344_v31 = vpop.permute.xlu1 %2343  ;;  %v2034_v63 = vsel %vm2031_vm6, %v2033_v61, %v2029_v56  ;;  %v9718_v53 = vpop.permute.xlu0 %2335  ;;  %vm13551_vm11 = vcmask 785408   ;;  %v2404_v54 = vsel %vm1020_vm9, %v2388_v33, %v8685_v34  ;;  %vm13556_vm6 = vcmask 982016   ;;  %v13557_v34 = vld [vmem:[#allocation122_spill] sm:$0xff]  ;;  %v13566_v61 = vld [vmem:[#allocation205_spill] sm:$0xff]  ;;  %v13572_v40 = vld [vmem:[#allocation92_spill] sm:$0xff] }
 0x30d   : > { %v2592_v62 = vsel %vm13548_vm4, %v2576_v12, %v2344_v31  ;;  %2117 = vst.msk [vmem:[%s9037_s18 + $0x38] sm:$0xf] %vm2102_vm3, %v2100_v7  ;;  %v2035_v35 = vmul.f32 %v2034_v63, %v2010_v47  ;;  %v2546_v28 = vsel %vm13551_vm11, %v2530_v26, %v9449_v22  ;;  %v2420_v1 = vsel %vm1037_vm10, %v2404_v54, %v8687_v17  ;;  %v13560_v17 = vld [vmem:[#allocation192_spill] sm:$0xff]  ;;  %v13568_v47 = vld [vmem:[#allocation90_spill] sm:$0xff]  ;;  %v13578_v54 = vld [vmem:[#allocation189_spill] sm:$0xff] }
 0x30e   : > { %2694 = vmatmul.bf16.vlgmr.msra.gmra.mxu1 %v2592_v62  ;;  %13549 = vst [vmem:[#allocation213_spill] sm:$0xff] %v9715_v0  ;;  %v2562_v10 = vsel %vm13552_vm5, %v2546_v28, %v9540_v58  ;;  %v2346_v6 = vpop.permute.xlu2 %2345  ;;  %vm13555_vm4 = vcmask 326656   ;;  %v13558_v58 = vld [vmem:[#allocation95_spill] sm:$0xff]  ;;  %v2370_v12 = vsel %vm986_vm7, %v13562_v43, %v13561_v46  ;;  %v13564_v7 = vld [vmem:[#allocation196_spill] sm:$0xff]  ;;  %v13565_v62 = vld [vmem:[#allocation145_spill] sm:$0xff] }
 0x30f   : > { %v6556_v42 = vclamps-f32 %v2035_v35, 1.0  ;;  %v2578_v32 = vsel %vm13553_vm2, %v2562_v10, %v2330_v38  ;;  %v2436_v51 = vsel %vm13555_vm4, %v2420_v1, %v13554_v20  ;;  %v13563_v38 = vld [vmem:[#allocation158_spill] sm:$0xff]  ;;  %v2390_v8 = vsel %vm1003_vm8, %v2370_v12, %v13565_v62  ;;  %v13580_v10 = vld [vmem:[#allocation16_spill] sm:$0xff] }
 0x310   : > { %v2595_v22 = vsel %vm13556_vm6, %v2578_v32, %v2346_v6  ;;  %v2452_v36 = vsel %vm1071_vm12, %v2436_v51, %v13557_v34  ;;  %v2406_v56 = vsel %vm1020_vm9, %v2390_v8, %v13568_v47  ;;  %v13577_v33 = vld [vmem:[#allocation114_spill] sm:$0xff]  ;;  %v13581_v32 = vld [vmem:[#allocation64_spill] sm:$0xff]  ;;  %v13596_v47 = vld [vmem:[#allocation185_spill] sm:$0xff] }
 0x311   : > { %v2053_v44 = vadd.f32 1.0, %v6556_v42  ;;  %v2468_v60 = vsel %vm13066_vm13, %v2452_v36, %v13558_v58  ;;  %v2422_v63 = vsel %vm1037_vm10, %v2406_v56, %v13569_v15  ;;  %v2373_v6 = vsel %vm986_vm7, %v13581_v32, %v13580_v10  ;;  %v13583_v20 = vld [vmem:[#allocation194_spill] sm:$0xff]  ;;  %v13586_v36 = vld [vmem:[#allocation116_spill] sm:$0xff]  ;;  %v13597_v15 = vld [vmem:[#allocation199_spill] sm:$0xff] }
 0x312   : > { %v2484_v39 = vsel %vm13065_vm14, %v2468_v60, %v13559_v49  ;;  %v13588_v49 = vld [vmem:[#allocation63_spill] sm:$0xff]  ;;  %v13609_v32 = vld [vmem:[#allocation98_spill] sm:$0xff] }
 0x313   : > { %v2069_v37 = vmul.f32 %v2053_v44, %v1381_v23  ;;  %v2500_v11 = vsel %vm13064_vm15, %v2484_v39, %v13560_v17  ;;  %v13575_v23 = vld [vmem:[#allocation126_spill] sm:$0xff] }
 0x314   : > { %v9742_v2 = vpop.permute.xlu0 %2341  ;;  %v2516_v31 = vsel %vm13063_vm0, %v2500_v11, %v13563_v38  ;;  %v2350_v17 = vpop.permute.xlu1 %2349  ;;  %v13589_v11 = vld [vmem:[#allocation82_spill] sm:$0xff] }
 0x315   : > { %v2085_v18 = vadd.f32 %v2069_v37, %v9715_v0  ;;  %v2532_v27 = vsel %vm13062_vm1, %v2516_v31, %v13564_v7  ;;  %v13592_v31 = vld [vmem:[#allocation107_spill] sm:$0xff] }
 0x317   : > { %v2101_v5 = vpack.c.bf16 %v2085_v18, %v2085_v18  ;;  %v13579_v18 = vld [vmem:[#allocation188_spill] sm:$0xff] }
 0x319   : > { %2118 = vst.msk [vmem:[%s9037_s18 + $0x3c] sm:$0xf] %vm2102_vm3, %v2101_v5  ;;  %vm13567_vm3 = vmmov %vm13551_vm11  ;;  %v13582_v5 = vld [vmem:[#allocation58_spill] sm:$0xff] }
 0x31a   : > { %v2548_v57 = vsel %vm13567_vm3, %v2532_v27, %v13566_v61  ;;  %vm13570_vm11 = vmmov %vm13552_vm5  ;;  %v2392_v1 = vsel %vm1003_vm8, %v2373_v6, %v13582_v5  ;;  %v13593_v27 = vld [vmem:[#allocation139_spill] sm:$0xff]  ;;  %v13595_v61 = vld [vmem:[#allocation184_spill] sm:$0xff] }
 0x31b   : > { %v2564_v21 = vsel %vm13570_vm11, %v2548_v57, %v9552_v14  ;;  %vm13571_vm5 = vmmov %vm13553_vm2  ;;  %v2408_v58 = vsel %vm1020_vm9, %v2392_v1, %v13586_v36  ;;  %v13610_v5 = vld [vmem:[#allocation125_spill] sm:$0xff] }
 0x31c   : > { %v2348_v35 = vpop.permute.xlu0 %2347  ;;  %v2580_v42 = vsel %vm13571_vm5, %v2564_v21, %v9627_v19  ;;  %vm13573_vm2 = vmmov %vm13555_vm4  ;;  %v2424_v39 = vsel %vm1037_vm10, %v2408_v58, %v13588_v49  ;;  %v13615_v58 = vld [vmem:[#allocation170_spill] sm:$0xff] }
 0x31d   : > { %v2438_v26 = vsel %vm13573_vm2, %v2422_v63, %v13572_v40  ;;  %vm13574_vm4 = vmmov %vm13556_vm6  ;;  %v13598_v63 = vld [vmem:[#allocation19_spill] sm:$0xff]  ;;  %v13616_v49 = vld [vmem:[#allocation198_spill] sm:$0xff] }
 0x31e   : > { %2699 = vmatmul.bf16.gmra.mxu1 %v2595_v22  ;;  %v2598_v50 = vsel %vm13574_vm4, %v2580_v42, %v2348_v35  ;;  %v2454_v44 = vsel %vm1071_vm12, %v2438_v26, %v13575_v23  ;;  %v13584_v22 = vld [vmem:[#allocation203_spill] sm:$0xff]  ;;  %vm13585_vm6 = vmmov %vm13567_vm3  ;;  %v13599_v35 = vld [vmem:[#allocation149_spill] sm:$0xff] }
 0x31f   : > { %v2470_v37 = vsel %vm13066_vm13, %v2454_v44, %v13576_v52  ;;  %vm13587_vm3 = vmmov %vm13570_vm11  ;;  %v2376_v21 = vsel %vm986_vm7, %v13599_v35, %v13598_v63  ;;  %v13600_v42 = vld [vmem:[#allocation148_spill] sm:$0xff]  ;;  %v13601_v26 = vld [vmem:[#allocation202_spill] sm:$0xff] }
 0x320   : > { %v2486_v28 = vsel %vm13065_vm14, %v2470_v37, %v13577_v33  ;;  %vm13590_vm11 = vmmov %vm13573_vm2  ;;  %v2394_v40 = vsel %vm1003_vm8, %v2376_v21, %v13600_v42  ;;  %v13603_v23 = vld [vmem:[#allocation137_spill] sm:$0xff]  ;;  %v2352_v33 = vpop.permute.xlu2 %2351  ;;  %v13629_v21 = vld [vmem:[#allocation159_spill] sm:$0xff] }
 0x321   : > { %v2502_v14 = vsel %vm13064_vm15, %v2486_v28, %v13578_v54  ;;  %v2440_v43 = vsel %vm13590_vm11, %v2424_v39, %v13589_v11  ;;  %vm13591_vm2 = vmmov %vm13574_vm4  ;;  %v2410_v44 = vsel %vm1020_vm9, %v2394_v40, %v13603_v23  ;;  %v13606_v28 = vld [vmem:[#allocation133_spill] sm:$0xff]  ;;  %v13630_v40 = vld [vmem:[#allocation131_spill] sm:$0xff] }
 0x322   : > { %v2518_v19 = vsel %vm13063_vm0, %v2502_v14, %v13579_v18  ;;  %v2456_v7 = vsel %vm1071_vm12, %v2440_v43, %v13592_v31  ;;  %vm13602_vm4 = vmmov %vm13585_vm6  ;;  %v2426_v54 = vsel %vm1037_vm10, %v2410_v44, %v13606_v28  ;;  %v13607_v14 = vld [vmem:[#allocation51_spill] sm:$0xff]  ;;  %v13618_v43 = vld [vmem:[#allocation209_spill] sm:$0xff] }
 0x323   : > { %v2534_v51 = vsel %vm13062_vm1, %v2518_v19, %v13583_v20  ;;  %v2472_v62 = vsel %vm13066_vm13, %v2456_v7, %v13593_v27  ;;  %v2442_v18 = vsel %vm13590_vm11, %v2426_v54, %v13607_v14  ;;  %v13621_v7 = vld [vmem:[#allocation104_spill] sm:$0xff]  ;;  %v13633_v23 = vld [vmem:[#allocation102_spill] sm:$0xff] }
 0x324   : > { %v2550_v34 = vsel %vm13585_vm6, %v2534_v51, %v13584_v22  ;;  %vm13604_vm6 = vmmov %vm13587_vm3  ;;  %v2458_v6 = vsel %vm1071_vm12, %v2442_v18, %v13609_v32  ;;  %v13613_v22 = vld [vmem:[#allocation18_spill] sm:$0xff]  ;;  %v13638_v18 = vld [vmem:[#allocation75_spill] sm:$0xff] }
 0x325   : > { %v2566_v60 = vsel %vm13587_vm3, %v2550_v34, %v9607_v41  ;;  %v13594_v41 = vld [vmem:[#allocation186_spill] sm:$0xff]  ;;  %vm13605_vm3 = vmmov %vm13571_vm5  ;;  %v2474_v1 = vsel %vm13066_vm13, %v2458_v6, %v13610_v5  ;;  %v13614_v34 = vld [vmem:[#allocation120_spill] sm:$0xff] }
 0x326   : > { %v2582_v12 = vsel %vm13571_vm5, %v2566_v60, %v9670_v45  ;;  %v2488_v8 = vsel %vm13065_vm14, %v2472_v62, %v13594_v41  ;;  %vm13608_vm5 = vmmov %vm13591_vm2  ;;  %v2379_v36 = vsel %vm986_vm7, %v13614_v34, %v13613_v22  ;;  %v2354_v62 = vpop.permute.xlu0 %2353  ;;  %v13636_v54 = vld [vmem:[#allocation206_spill] sm:$0xff]  ;;  %v13640_v6 = vld [vmem:[#allocation108_spill] sm:$0xff] }
 0x327   : > { %v2601_v38 = vsel %vm13591_vm2, %v2582_v12, %v2350_v17  ;;  %v2504_v57 = vsel %vm13064_vm15, %v2488_v8, %v13595_v61  ;;  %v13617_v17 = vld [vmem:[#allocation72_spill] sm:$0xff]  ;;  %vm13619_vm2 = vmmov %vm13602_vm4  ;;  %v13624_v61 = vld [vmem:[#allocation151_spill] sm:$0xff] }
 0x328   : > { %v2520_v56 = vsel %vm13063_vm0, %v2504_v57, %v13596_v47  ;;  %v2396_v11 = vsel %vm1003_vm8, %v2379_v36, %v13617_v17  ;;  %v13644_v34 = vld [vmem:[#allocation55_spill] sm:$0xff] }
 0x329   : > { %v2536_v45 = vsel %vm13062_vm1, %v2520_v56, %v13597_v15  ;;  %v13627_v56 = vld [vmem:[#allocation81_spill] sm:$0xff] }
 0x32e   : > { %2704 = vmatmul.bf16.gmra.mxu1 %v2598_v50  ;;  %v2552_v50 = vsel %vm13602_vm4, %v2536_v45, %v13601_v26  ;;  %vm13622_vm4 = vmmov %vm13604_vm6  ;;  %v13628_v45 = vld [vmem:[#allocation97_spill] sm:$0xff] }
 0x32f   : > { %v2568_v52 = vsel %vm13604_vm6, %v2552_v50, %v9557_v4  ;;  %v13611_v4 = vld [vmem:[#allocation177_spill] sm:$0xff]  ;;  %vm13623_vm6 = vmmov %vm13605_vm3 }
 0x330   : > { %v2584_v37 = vsel %vm13605_vm3, %v2568_v52, %v9718_v53  ;;  %v2490_v20 = vsel %vm13065_vm14, %v2474_v1, %v13611_v4  ;;  %v13612_v53 = vld [vmem:[#allocation190_spill] sm:$0xff]  ;;  %vm13625_vm3 = vmmov %vm13590_vm11  ;;  %v13631_v26 = vld [vmem:[#allocation193_spill] sm:$0xff]  ;;  %v2356_v1 = vpop.permute.xlu1 %2355 }
 0x331   : > { %v2604_v19 = vsel %vm13608_vm5, %v2584_v37, %v2352_v33  ;;  %v2506_v51 = vsel %vm13064_vm15, %v2490_v20, %v13612_v53  ;;  %vm13626_vm11 = vmmov %vm13608_vm5  ;;  %v13632_v50 = vld [vmem:[#allocation17_spill] sm:$0xff]  ;;  %v13641_v4 = vld [vmem:[#allocation78_spill] sm:$0xff] }
 0x332   : > { %v2522_v60 = vsel %vm13063_vm0, %v2506_v51, %v13615_v58  ;;  %v2382_v44 = vsel %vm986_vm7, %v13633_v23, %v13632_v50  ;;  %v13634_v52 = vld [vmem:[#allocation93_spill] sm:$0xff]  ;;  %vm13637_vm5 = vmmov %vm13619_vm2  ;;  %v13645_v58 = vld [vmem:[#allocation66_spill] sm:$0xff] }
 0x333   : > { %v2538_v39 = vsel %vm13062_vm1, %v2522_v60, %v13616_v49  ;;  %v2398_v37 = vsel %vm1003_vm8, %v2382_v44, %v13634_v52  ;;  %v13635_v33 = vld [vmem:[#allocation197_spill] sm:$0xff] }
 0x334   : > { %v2554_v12 = vsel %vm13619_vm2, %v2538_v39, %v13618_v43  ;;  %vm13639_vm2 = vmmov %vm13622_vm4  ;;  %v13647_v39 = vld [vmem:[#allocation113_spill] sm:$0xff] }
 0x335   : > { %v2570_v41 = vsel %vm13622_vm4, %v2554_v12, %v9587_v16  ;;  %vm13642_vm4 = vmmov %vm13625_vm3  ;;  %v13649_v12 = vld [vmem:[#allocation201_spill] sm:$0xff] }
 0x336   : > { %v2586_v8 = vsel %vm13623_vm6, %v2570_v41, %v9661_v59 }
 0x337   : > { %v2607_v47 = vsel %vm13626_vm11, %v2586_v8, %v2354_v62  ;;  %v2358_v62 = vpop.permute.xlu2 %2357 }
 0x33e   : > { %2709 = vmatmul.bf16.gmra.mxu1 %v2601_v38  ;;  %v13620_v38 = vld [vmem:[#allocation119_spill] sm:$0xff] }
 0x33f   : > { %v2412_v31 = vsel %vm1020_vm9, %v2396_v11, %v13620_v38  ;;  %v13648_v11 = vld [vmem:[#allocation187_spill] sm:$0xff] }
 0x340   : > { %v2428_v27 = vsel %vm1037_vm10, %v2412_v31, %v13621_v7  ;;  %v13650_v38 = vld [vmem:[#allocation207_spill] sm:$0xff] }
 0x341   : > { %v2444_v57 = vsel %vm13625_vm3, %v2428_v27, %v13624_v61  ;;  %vm13643_vm3 = vmmov %vm13626_vm11 }
 0x342   : > { %v2460_v15 = vsel %vm1071_vm12, %v2444_v57, %v13627_v56  ;;  %vm13651_vm11 = vmmov %vm13637_vm5 }
 0x343   : > { %v2476_v35 = vsel %vm13066_vm13, %v2460_v15, %v13628_v45 }
 0x344   : > { %v2492_v42 = vsel %vm13065_vm14, %v2476_v35, %v13629_v21 }
 0x345   : > { %v2508_v16 = vsel %vm13064_vm15, %v2492_v42, %v13630_v40 }
 0x346   : > { %v2524_v59 = vsel %vm13063_vm0, %v2508_v16, %v13631_v26 }
 0x347   : > { %v2540_v28 = vsel %vm13062_vm1, %v2524_v59, %v13635_v33 }
 0x348   : > { %v2556_v14 = vsel %vm13637_vm5, %v2540_v28, %v13636_v54  ;;  %vm13652_vm5 = vmmov %vm13639_vm2 }
 0x349   : > { %v2572_v32 = vsel %vm13639_vm2, %v2556_v14, %v9651_v30  ;;  %v13646_v30 = vld [vmem:[#allocation87_spill] sm:$0xff]  ;;  %vm13653_vm2 = vmmov %vm13623_vm6 }
 0x34a   : > { %v2588_v53 = vsel %vm13623_vm6, %v2572_v32, %v9706_v25 }
 0x34b   : > { %v2610_v51 = vsel %vm13643_vm3, %v2588_v53, %v2356_v1 }
 0x34e   : > { %2714 = vmatmul.bf16.gmra.mxu1 %v2604_v19  ;;  %v2414_v19 = vsel %vm1020_vm9, %v2398_v37, %v13638_v18 }
 0x34f   : > { %v2430_v5 = vsel %vm1037_vm10, %v2414_v19, %v13640_v6 }
 0x350   : > { %v2446_v20 = vsel %vm13642_vm4, %v2430_v5, %v13641_v4  ;;  %vm13654_vm4 = vmmov %vm13643_vm3 }
 0x351   : > { %v2462_v36 = vsel %vm1071_vm12, %v2446_v20, %v13644_v34 }
 0x352   : > { %v2478_v60 = vsel %vm13066_vm13, %v2462_v36, %v13645_v58 }
 0x353   : > { %v2494_v49 = vsel %vm13065_vm14, %v2478_v60, %v13646_v30 }
 0x354   : > { %v2510_v17 = vsel %vm13064_vm15, %v2494_v49, %v13647_v39 }
 0x355   : > { %v2526_v43 = vsel %vm13063_vm0, %v2510_v17, %v13648_v11 }
 0x356   : > { %v2542_v25 = vsel %vm13062_vm1, %v2526_v43, %v13649_v12 }
 0x357   : > { %v2558_v31 = vsel %vm13651_vm11, %v2542_v25, %v13650_v38 }
 0x358   : > { %v2574_v7 = vsel %vm13652_vm5, %v2558_v31, %v9593_v13 }
 0x359   : > { %v2590_v27 = vsel %vm13653_vm2, %v2574_v7, %v9742_v2 }
 0x35a   : > { %v2613_v41 = vsel %vm13654_vm4, %v2590_v27, %v2358_v62 }
 0x35e   : > { %2719 = vmatmul.bf16.gmra.mxu1 %v2607_v47 }
 0x368   : > { %v9911_v8 = vpop.permute.xlu0 %2683 }
 0x36e   : > { %2724 = vmatmul.bf16.gmra.mxu1 %v2610_v51 }
 0x37e   : > { %2729 = vmatmul.bf16.gmra.mxu1 %v2613_v41 }
 0x38b   : > { %v2695_v61 = vpop.f32.mrf.mxu1 }
 0x38c   : > { %v9914_v57 = vadd.f32 %v2695_v61, %v9911_v8 }
 0x38e   : > { %v9917_v47 = vmul.f32 0.70710677, %v9914_v57 }
 0x390   : > { %v2767_v56 = vmul.f32 %v9917_v47, %v9917_v47 }
 0x392   : > { %v2768_v13 = vmin.f32 %v2767_v56, 16.0 }
 0x393   : > { %v2697_v15 = vpop.f32.mrf.mxu1 }
 0x394   : > { %v9922_v2 = vadd.f32 %v2697_v15, %v9911_v8  ;;  %v2769_v45 = vmul.f32 2.1237322e-06, %v2768_v13  ;;  %v2780_v35 = vmul.f32 3.8918573e-05, %v2768_v13 }
 0x396   : > { %v9925_v21 = vmul.f32 0.70710677, %v9922_v2  ;;  %v2770_v42 = vadd.f32 0.00028619796, %v2769_v45  ;;  %v2781_v40 = vadd.f32 0.001143296, %v2780_v35 }
 0x398   : > { %v2807_v16 = vmul.f32 %v9925_v21, %v9925_v21  ;;  %v2771_v26 = vmul.f32 %v2770_v42, %v2768_v13  ;;  %v2782_v59 = vmul.f32 %v2781_v40, %v2768_v13 }
 0x39a   : > { %v9929_v23 = vmin.f32 %v2807_v16, 16.0  ;;  %v2772_v44 = vadd.f32 0.0036580483, %v2771_v26  ;;  %v2783_v37 = vadd.f32 0.014752088, %v2782_v59 }
 0x39b   : > { %v2700_v52 = vpop.f32.mrf.mxu1 }
 0x39c   : > { %v2809_v33 = vmul.f32 2.1237322e-06, %v9929_v23  ;;  %v2820_v28 = vmul.f32 3.8918573e-05, %v9929_v23  ;;  %v9934_v54 = vadd.f32 %v2700_v52, %v9911_v8  ;;  %v2773_v14 = vmul.f32 %v2772_v44, %v2768_v13 }
 0x39d   : > { %v2784_v18 = vmul.f32 %v2783_v37, %v2768_v13 }
 0x39e   : > { %v2810_v19 = vadd.f32 0.00028619796, %v2809_v33  ;;  %v2821_v32 = vadd.f32 0.001143296, %v2820_v28  ;;  %v9937_v6 = vmul.f32 0.70710677, %v9934_v54 }
 0x39f   : > { %v2785_v5 = vadd.f32 0.112945676, %v2784_v18  ;;  %v2774_v20 = vadd.f32 0.05243302, %v2773_v14 }
 0x3a0   : > { %v2811_v1 = vmul.f32 %v2810_v19, %v9929_v23  ;;  %v2822_v4 = vmul.f32 %v2821_v32, %v9929_v23  ;;  %v2847_v53 = vmul.f32 %v9937_v6, %v9937_v6 }
 0x3a1   : > { %v2786_v51 = vmul.f32 %v2785_v5, %v2768_v13  ;;  %v2775_v11 = vmul.f32 %v2774_v20, %v2768_v13 }
 0x3a2   : > { %v2812_v34 = vadd.f32 0.0036580483, %v2811_v1  ;;  %v2823_v36 = vadd.f32 0.014752088, %v2822_v4  ;;  %v9943_v58 = vmin.f32 %v2847_v53, 16.0 }
 0x3a3   : > { %v2702_v60 = vpop.f32.mrf.mxu1  ;;  %v2787_v30 = vadd.f32 0.4994258, %v2786_v51  ;;  %v2776_v61 = vadd.f32 0.18741608, %v2775_v11  ;;  %v9984_v11 = vmul.f32 0.5, %v9914_v57 }
 0x3a4   : > { %v2813_v49 = vmul.f32 %v2812_v34, %v9929_v23  ;;  %v2824_v39 = vmul.f32 %v2823_v36, %v9929_v23  ;;  %v2703_v17 = vadd.f32 %v2702_v60, %v9911_v8  ;;  %v2849_v43 = vmul.f32 2.1237322e-06, %v9943_v58 }
 0x3a5   : > { %v2860_v12 = vmul.f32 3.8918573e-05, %v9943_v58  ;;  %v2788_v62 = vmul.f32 %v2787_v30, %v2768_v13  ;;  %v2777_v33 = vmul.f32 %v2776_v61, %v2768_v13  ;;  %v9979_v30 = vmul.f32 0.5, %v9922_v2 }
 0x3a6   : > { %v2814_v25 = vadd.f32 0.05243302, %v2813_v49  ;;  %v2825_v38 = vadd.f32 0.112945676, %v2824_v39  ;;  %v2850_v31 = vadd.f32 0.00028619796, %v2849_v43 }
 0x3a7   : > { %v2861_v7 = vadd.f32 0.001143296, %v2860_v12  ;;  %v9950_v27 = vmul.f32 0.70710677, %v2703_v17  ;;  %v9960_v44 = vadd.f32 1.0, %v2788_v62  ;;  %v9987_v43 = vmul.f32 0.5, %v9934_v54 }
 0x3a8   : > { %v2826_v41 = vmul.f32 %v2825_v38, %v9929_v23  ;;  %v2815_v56 = vmul.f32 %v2814_v25, %v9929_v23  ;;  %v2851_v15 = vmul.f32 %v2850_v31, %v9943_v58  ;;  %v2778_v13 = vadd.f32 1.1283791, %v2777_v33 }
 0x3a9   : > { %v2862_v45 = vmul.f32 %v2861_v7, %v9943_v58  ;;  %v2887_v35 = vmul.f32 %v9950_v27, %v9950_v27  ;;  %6860 = vrcp.f32 %v9960_v44  ;;  %v9989_v25 = vmul.f32 0.5, %v2703_v17 }
 0x3aa   : > { %v2827_v42 = vadd.f32 0.4994258, %v2826_v41  ;;  %v2852_v40 = vadd.f32 0.0036580483, %v2851_v15  ;;  %v2816_v28 = vadd.f32 0.18741608, %v2815_v56  ;;  %v9995_v62 = vmul.f32 %v2778_v13, %v9917_v47 }
 0x3ab   : > { %v2863_v16 = vadd.f32 0.014752088, %v2862_v45  ;;  %v9958_v26 = vmin.f32 %v2887_v35, 16.0  ;;  %v2705_v59 = vpop.f32.mrf.mxu1  ;;  %v2799_v56 = vand.u32 2147483647, %v9960_v44 }
 0x3ac   : > { %v2828_v52 = vmul.f32 %v2827_v42, %v9929_v23  ;;  %v2706_v37 = vadd.f32 %v2705_v59, %v9911_v8  ;;  %v2853_v14 = vmul.f32 %v2852_v40, %v9943_v58  ;;  %v2817_v51 = vmul.f32 %v2816_v28, %v9929_v23 }
 0x3ad   : > { %v2864_v18 = vmul.f32 %v2863_v16, %v9943_v58  ;;  %v2889_v19 = vmul.f32 2.1237322e-06, %v9958_v26  ;;  %v2900_v5 = vmul.f32 3.8918573e-05, %v9958_v26 }
 0x3ae   : > { %v9967_v32 = vadd.f32 1.0, %v2828_v52  ;;  %v9970_v1 = vmul.f32 0.70710677, %v2706_v37  ;;  %v2854_v4 = vadd.f32 0.05243302, %v2853_v14  ;;  %v10000_v54 = vmul.f32 0.5, %v2706_v37 }
 0x3af   : > { %v2865_v20 = vadd.f32 0.112945676, %v2864_v18  ;;  %v2890_v53 = vadd.f32 0.00028619796, %v2889_v19  ;;  %v2901_v49 = vadd.f32 0.001143296, %v2900_v5  ;;  %v9997_v41 = vpop.eup %6860 }
 0x3b0   : > { %6862 = vrcp.f32 %v9967_v32  ;;  %v2855_v34 = vmul.f32 %v2854_v4, %v9943_v58  ;;  %v2927_v39 = vmul.f32 %v9970_v1, %v9970_v1  ;;  %v2818_v57 = vadd.f32 1.1283791, %v2817_v51 }
 0x3b1   : > { %v2866_v36 = vmul.f32 %v2865_v20, %v9943_v58  ;;  %v2891_v60 = vmul.f32 %v2890_v53, %v9958_v26  ;;  %v2902_v31 = vmul.f32 %v2901_v49, %v9958_v26  ;;  %v2839_v40 = vand.u32 2147483647, %v9967_v32 }
 0x3b2   : > { %v2856_v23 = vadd.f32 0.18741608, %v2855_v34  ;;  %v9992_v7 = vmin.f32 %v2927_v39, 16.0  ;;  %v2819_v14 = vmul.f32 %v2818_v57, %v9925_v21  ;;  %v2841_v5 = vand.u32 2147483648, %v9967_v32 }
 0x3b3   : > { %v2867_v12 = vadd.f32 0.4994258, %v2866_v36  ;;  %v2892_v38 = vadd.f32 0.0036580483, %v2891_v60  ;;  %v2707_v2 = vpop.f32.mrf.mxu1  ;;  %v2903_v45 = vadd.f32 0.014752088, %v2902_v31  ;;  %v10021_v20 = vmul.f32 %v9997_v41, %v9960_v44 }
 0x3b4   : > { %v2929_v35 = vmul.f32 2.1237322e-06, %v9992_v7  ;;  %v2940_v42 = vmul.f32 3.8918573e-05, %v9992_v7  ;;  %v2857_v16 = vmul.f32 %v2856_v23, %v9943_v58  ;;  %v10015_v19 = vadd.f32 %v2707_v2, %v9911_v8 }
 0x3b5   : > { %v2868_v61 = vmul.f32 %v2867_v12, %v9943_v58  ;;  %v2893_v15 = vmul.f32 %v2892_v38, %v9958_v26  ;;  %v2904_v37 = vmul.f32 %v2903_v45, %v9958_v26  ;;  %vm2835_vm3 = vweird.f32 %v9967_v32 }
 0x3b6   : > { %v6863_v17 = vpop.eup %6862  ;;  %v2930_v33 = vadd.f32 0.00028619796, %v2929_v35  ;;  %v2941_v28 = vadd.f32 0.001143296, %v2940_v42  ;;  %vm10026_vm11 = vcmp.eq.f32.partialorder %v2839_v40, 8.507059e+37  ;;  %v2842_v12 = vor.u32 1.1754944e-38, %v2841_v5 }
 0x3b7   : > { %v2831_v47 = vmul.f32 %v6863_v17, %v9967_v32  ;;  %v10009_v59 = vadd.f32 1.0, %v2868_v61  ;;  %v2894_v52 = vadd.f32 0.05243302, %v2893_v15  ;;  %v2905_v58 = vadd.f32 0.112945676, %v2904_v37 }
 0x3b8   : > { %vm2836_vm6 = vweird.f32 %v6863_v17  ;;  %v2931_v13 = vmul.f32 %v2930_v33, %v9992_v7  ;;  %v2942_v21 = vmul.f32 %v2941_v28, %v9992_v7  ;;  %v2858_v34 = vadd.f32 1.1283791, %v2857_v16 }
 0x3b9   : > { %v2832_v18 = vsub.f32 1.0, %v2831_v47  ;;  %6864 = vrcp.f32 %v10009_v59  ;;  %v2895_v4 = vmul.f32 %v2894_v52, %v9958_v26  ;;  %v2906_v36 = vmul.f32 %v2905_v58, %v9958_v26  ;;  %vm2837_vm5 = vmor %vm2835_vm3, %vm2836_vm6 }
 0x3ba   : > { %v2932_v49 = vadd.f32 0.0036580483, %v2931_v13  ;;  %v2943_v39 = vadd.f32 0.014752088, %v2942_v21  ;;  %v10032_v23 = vmul.f32 0.70710677, %v10015_v19  ;;  %v2859_v47 = vmul.f32 %v2858_v34, %v9937_v6 }
 0x3bb   : > { %v2833_v53 = vmul.f32 %v6863_v17, %v2832_v18  ;;  %v2896_v38 = vadd.f32 0.18741608, %v2895_v4  ;;  %v2907_v31 = vadd.f32 0.4994258, %v2906_v36  ;;  %v2710_v2 = vpop.f32.mrf.mxu1  ;;  %v2792_v32 = vsub.f32 1.0, %v10021_v20 }
 0x3bc   : > { %v2933_v15 = vmul.f32 %v2932_v49, %v9992_v7  ;;  %v2944_v45 = vmul.f32 %v2943_v39, %v9992_v7  ;;  %v2967_v35 = vmul.f32 %v10032_v23, %v10032_v23  ;;  %v2879_v16 = vand.u32 2147483647, %v10009_v59 }
 0x3bd   : > { %v2834_v60 = vadd.f32 %v6863_v17, %v2833_v53  ;;  %v2908_v37 = vmul.f32 %v2907_v31, %v9958_v26  ;;  %v10046_v33 = vadd.f32 %v2710_v2, %v9911_v8  ;;  %v2881_v18 = vand.u32 2147483648, %v10009_v59 }
 0x3be   : > { %v2934_v5 = vadd.f32 0.05243302, %v2933_v15  ;;  %v10049_v4 = vmin.f32 %v2967_v35, 16.0  ;;  %v2897_v6 = vmul.f32 %v2896_v38, %v9958_v26  ;;  %vm2875_vm4 = vweird.f32 %v10009_v59 }
 0x3bf   : > { %v6865_v57 = vpop.eup %6864  ;;  %v2838_v61 = vsel %vm2837_vm5, %v6863_v17, %v2834_v60  ;;  %v2945_v17 = vadd.f32 0.112945676, %v2944_v45  ;;  %v10052_v20 = vadd.f32 1.0, %v2908_v37  ;;  %v10060_v34 = vmul.f32 0.70710677, %v10046_v33 }
 0x3c0   : > { %v2843_v42 = vsel %vm10026_vm11, %v2842_v12, %v2838_v61  ;;  %v2871_v40 = vmul.f32 %v6865_v57, %v10009_v59  ;;  %vm2876_vm2 = vweird.f32 %v6865_v57  ;;  %v2969_v13 = vmul.f32 2.1237322e-06, %v10049_v4 }
 0x3c1   : > { %v2844_v52 = vmul.f32 %v2843_v42, %v2819_v14  ;;  %v2946_v53 = vmul.f32 %v2945_v17, %v9992_v7  ;;  %v2980_v21 = vmul.f32 3.8918573e-05, %v10049_v4  ;;  %6866 = vrcp.f32 %v10052_v20  ;;  %vm2877_vm3 = vmor %vm2875_vm4, %vm2876_vm2 }
 0x3c2   : > { %v2872_v28 = vsub.f32 1.0, %v2871_v40  ;;  %vm2796_vm6 = vweird.f32 %v9997_v41  ;;  %v2882_v36 = vor.u32 1.1754944e-38, %v2881_v18  ;;  %v2935_v60 = vmul.f32 %v2934_v5, %v9992_v7 }
 0x3c3   : > { %v6606_v58 = vclamps-f32 %v2844_v52, 1.0  ;;  %v2947_v49 = vadd.f32 0.4994258, %v2946_v53  ;;  %v2898_v12 = vadd.f32 1.1283791, %v2897_v6  ;;  %vm2795_vm11 = vweird.f32 %v9960_v44 }
 0x3c4   : > { %v2873_v14 = vmul.f32 %v6865_v57, %v2872_v28  ;;  %v2970_v38 = vadd.f32 0.00028619796, %v2969_v13  ;;  %v2981_v31 = vadd.f32 0.001143296, %v2980_v21  ;;  %vm2880_vm5 = vcmp.eq.f32.partialorder %v2879_v16, 8.507059e+37  ;;  %v10084_v16 = vpop.f32.mrf.mxu1 }
 0x3c5   : > { %v3408_v51 = vadd.f32 1.0, %v6606_v58  ;;  %v2948_v2 = vmul.f32 %v2947_v49, %v9992_v7  ;;  %v2793_v61 = vmul.f32 %v9997_v41, %v2792_v32  ;;  %v2936_v40 = vadd.f32 0.18741608, %v2935_v60 }
 0x3c6   : > { %v2874_v26 = vadd.f32 %v6865_v57, %v2873_v14  ;;  %v2971_v45 = vmul.f32 %v2970_v38, %v10049_v4  ;;  %v2982_v35 = vmul.f32 %v2981_v31, %v10049_v4  ;;  %vm10080_vm2 = vcmp.eq.f32.partialorder %v2799_v56, 8.507059e+37 }
 0x3c7   : > { %v3424_v39 = vmul.f32 %v3408_v51, %v9979_v30  ;;  %v3007_v30 = vmul.f32 %v10060_v34, %v10060_v34  ;;  %v10073_v52 = vadd.f32 1.0, %v2948_v2  ;;  %v6867_v37 = vpop.eup %6866  ;;  %v2899_v17 = vmul.f32 %v2898_v12, %v9950_v27 }
 0x3c8   : > { %v2878_v59 = vsel %vm2877_vm3, %v6865_v57, %v2874_v26  ;;  %v10076_v57 = vmul.f32 0.5, %v10015_v19  ;;  %v2972_v28 = vadd.f32 0.0036580483, %v2971_v45  ;;  %v2983_v18 = vadd.f32 0.014752088, %v2982_v35 }
 0x3c9   : > { %v2883_v15 = vsel %vm2880_vm5, %v2882_v36, %v2878_v59  ;;  %3457 = vrot.lane.b32.xlu2 %v3424_v39, %s6997_s20  ;;  %v2911_v58 = vmul.f32 %v6867_v37, %v10052_v20  ;;  %vm2915_vm4 = vweird.f32 %v10052_v20  ;;  %v2919_v19 = vand.u32 2147483647, %v10052_v20  ;;  %vm10106_vm5 = vmor %vm2795_vm11, %vm2796_vm6 }
 0x3ca   : > { %v2884_v42 = vmul.f32 %v2883_v15, %v2859_v47  ;;  %v10087_v47 = vmin.f32 %v3007_v30, 16.0  ;;  %v2921_v56 = vand.u32 2147483648, %v10052_v20  ;;  %6868 = vrcp.f32 %v10073_v52 }
 0x3cb   : > { %v2794_v6 = vadd.f32 %v9997_v41, %v2793_v61  ;;  %v2801_v53 = vand.u32 2147483648, %v9960_v44  ;;  %v2912_v14 = vsub.f32 1.0, %v2911_v58  ;;  %v2973_v13 = vmul.f32 %v2972_v28, %v10049_v4 }
 0x3cc   : > { %v6607_v5 = vclamps-f32 %v2884_v42, 1.0  ;;  %v2984_v21 = vmul.f32 %v2983_v18, %v10049_v4  ;;  %vm2916_vm3 = vweird.f32 %v6867_v37  ;;  %v2937_v51 = vmul.f32 %v2936_v40, %v9992_v7  ;;  %v2715_v45 = vpop.f32.mrf.mxu1 }
 0x3cd   : > { %v3009_v26 = vmul.f32 2.1237322e-06, %v10087_v47  ;;  %v3020_v36 = vmul.f32 3.8918573e-05, %v10087_v47  ;;  %v2913_v49 = vmul.f32 %v6867_v37, %v2912_v14  ;;  %v2974_v39 = vadd.f32 0.05243302, %v2973_v13  ;;  %vm2917_vm6 = vmor %vm2915_vm4, %vm2916_vm3 }
 0x3ce   : > { %v3409_v27 = vadd.f32 1.0, %v6607_v5  ;;  %v2985_v12 = vadd.f32 0.112945676, %v2984_v21  ;;  %v2798_v7 = vsel %vm10106_vm5, %v9997_v41, %v2794_v6  ;;  %v2802_v2 = vor.u32 1.1754944e-38, %v2801_v53 }
 0x3cf   : > { %v3010_v31 = vadd.f32 0.00028619796, %v3009_v26  ;;  %v3021_v59 = vadd.f32 0.001143296, %v3020_v36  ;;  %v2914_v61 = vadd.f32 %v6867_v37, %v2913_v49  ;;  %vm2920_vm1 = vcmp.eq.f32.partialorder %v2919_v19, 8.507059e+37 }
 0x3d0   : > { %v3425_v60 = vmul.f32 %v3409_v27, %v9987_v43  ;;  %v2975_v43 = vmul.f32 %v2974_v39, %v10049_v4  ;;  %v2986_v15 = vmul.f32 %v2985_v12, %v10049_v4  ;;  %v6869_v44 = vpop.eup %6868  ;;  %v2922_v35 = vor.u32 1.1754944e-38, %v2921_v56 }
 0x3d1   : > { %v3011_v30 = vmul.f32 %v3010_v31, %v10087_v47  ;;  %v3022_v41 = vmul.f32 %v3021_v59, %v10087_v47  ;;  %v2803_v42 = vsel %vm10080_vm2, %v2802_v2, %v2798_v7  ;;  %v2918_v40 = vsel %vm2917_vm6, %v6867_v37, %v2914_v61 }
 0x3d2   : > { %3459 = vrot.lane.b32.xlu0 %v3425_v60, %s6997_s20  ;;  %v2938_v28 = vadd.f32 1.1283791, %v2937_v51  ;;  %v2951_v18 = vmul.f32 %v6869_v44, %v10073_v52  ;;  %v2976_v5 = vadd.f32 0.18741608, %v2975_v43  ;;  %v2923_v58 = vsel %vm2920_vm1, %v2922_v35, %v2918_v40 }
 0x3d3   : > { %v2987_v19 = vadd.f32 0.4994258, %v2986_v15  ;;  %v3012_v6 = vadd.f32 0.0036580483, %v3011_v30  ;;  %v3023_v53 = vadd.f32 0.014752088, %v3022_v41  ;;  %v2924_v27 = vmul.f32 %v2923_v58, %v2899_v17 }
 0x3d4   : > { %v2952_v20 = vsub.f32 1.0, %v2951_v18  ;;  %v2959_v56 = vand.u32 2147483647, %v10073_v52  ;;  %v2804_v14 = vmul.f32 %v2803_v42, %v9995_v62  ;;  %v2961_v13 = vand.u32 2147483648, %v10073_v52  ;;  %v2717_v61 = vpop.f32.mrf.mxu1 }
 0x3d5   : > { %v2988_v32 = vmul.f32 %v2987_v19, %v10049_v4  ;;  %v3013_v37 = vmul.f32 %v3012_v6, %v10087_v47  ;;  %v3024_v21 = vmul.f32 %v3023_v53, %v10087_v47  ;;  %vm2956_vm11 = vweird.f32 %v6869_v44 }
 0x3d6   : > { %v2953_v51 = vmul.f32 %v6869_v44, %v2952_v20  ;;  %v2977_v26 = vmul.f32 %v2976_v5, %v10049_v4  ;;  %v6605_v36 = vclamps-f32 %v2804_v14, 1.0  ;;  %v6608_v60 = vclamps-f32 %v2924_v27, 1.0 }
 0x3d7   : > { %v10131_v17 = vadd.f32 1.0, %v2988_v32  ;;  %v3014_v49 = vadd.f32 0.05243302, %v3013_v37  ;;  %v3025_v39 = vadd.f32 0.112945676, %v3024_v21  ;;  %vm2955_vm1 = vweird.f32 %v10073_v52 }
 0x3d8   : > { %v2954_v12 = vadd.f32 %v6869_v44, %v2953_v51  ;;  %v3407_v62 = vadd.f32 1.0, %v6605_v36  ;;  %v10136_v38 = vadd.f32 %v10084_v16, %v9911_v8  ;;  %v2939_v31 = vmul.f32 %v2938_v28, %v9970_v1  ;;  %vm2957_vm2 = vmor %vm2955_vm1, %vm2956_vm11 }
 0x3d9   : > { %v2962_v59 = vor.u32 1.1754944e-38, %v2961_v13  ;;  %6870 = vrcp.f32 %v10131_v17  ;;  %v10141_v4 = vadd.f32 %v2715_v45, %v9911_v8  ;;  %vm2960_vm4 = vcmp.eq.f32.partialorder %v2959_v56, 8.507059e+37 }
 0x3da   : > { %v2958_v7 = vsel %vm2957_vm2, %v6869_v44, %v2954_v12  ;;  %v3015_v2 = vmul.f32 %v3014_v49, %v10087_v47  ;;  %v3026_v52 = vmul.f32 %v3025_v39, %v10087_v47  ;;  %v3410_v43 = vadd.f32 1.0, %v6608_v60 }
 0x3db   : > { %v2963_v15 = vsel %vm2960_vm4, %v2962_v59, %v2958_v7  ;;  %v2978_v16 = vadd.f32 1.1283791, %v2977_v26  ;;  %v3423_v35 = vmul.f32 %v3407_v62, %v9984_v11  ;;  %v10147_v42 = vmul.f32 0.70710677, %v10136_v38 }
 0x3dc   : > { %v2964_v1 = vmul.f32 %v2963_v15, %v2939_v31  ;;  %v3016_v30 = vadd.f32 0.18741608, %v3015_v2  ;;  %v3027_v41 = vadd.f32 0.4994258, %v3026_v52  ;;  %v2999_v45 = vand.u32 2147483647, %v10131_v17  ;;  %v2720_v62 = vpop.f32.mrf.mxu1 }
 0x3dd   : > { %v3001_v44 = vand.u32 2147483648, %v10131_v17  ;;  %3455 = vrot.lane.b32.xlu1 %v3423_v35, %s6997_s20  ;;  %v10153_v40 = vmul.f32 0.70710677, %v10141_v4  ;;  %v10156_v28 = vadd.f32 %v2717_v61, %v9911_v8  ;;  %v3047_v58 = vmul.f32 %v10147_v42, %v10147_v42 }
 0x3de   : > { %v6609_v18 = vclamps-f32 %v2964_v1, 1.0  ;;  %v3017_v11 = vmul.f32 %v3016_v30, %v10087_v47  ;;  %v3028_v5 = vmul.f32 %v3027_v41, %v10087_v47  ;;  %v2979_v6 = vmul.f32 %v2978_v16, %v10032_v23 }
 0x3df   : > { %v6871_v19 = vpop.eup %6870  ;;  %vm2995_vm3 = vweird.f32 %v10131_v17  ;;  %v3087_v53 = vmul.f32 %v10153_v40, %v10153_v40  ;;  %v10167_v27 = vmul.f32 0.70710677, %v10156_v28  ;;  %v3426_v20 = vmul.f32 %v3410_v43, %v9989_v25 }
 0x3e0   : > { %v3411_v56 = vadd.f32 1.0, %v6609_v18  ;;  %v2991_v14 = vmul.f32 %v6871_v19, %v10131_v17  ;;  %v3018_v47 = vadd.f32 1.1283791, %v3017_v11  ;;  %v10171_v13 = vadd.f32 1.0, %v3028_v5 }
 0x3e1   : > { %v10173_v32 = vmin.f32 %v3047_v58, 16.0  ;;  %v10175_v37 = vmin.f32 %v3087_v53, 16.0  ;;  %v3127_v23 = vmul.f32 %v10167_v27, %v10167_v27  ;;  %vm10180_vm5 = vcmp.eq.f32.partialorder %v2999_v45, 8.507059e+37 }
 0x3e2   : > { %v3427_v21 = vmul.f32 %v3411_v56, %v10000_v54  ;;  %v2992_v51 = vsub.f32 1.0, %v2991_v14  ;;  %v3002_v25 = vor.u32 1.1754944e-38, %v3001_v44  ;;  %vm2996_vm6 = vweird.f32 %v6871_v19 }
 0x3e3   : > { %v10185_v36 = vmul.f32 %v3018_v47, %v10060_v34  ;;  %6872 = vrcp.f32 %v10171_v13  ;;  %v3041_v60 = vand.u32 2147483648, %v10171_v13  ;;  %v3049_v39 = vmul.f32 2.1237322e-06, %v10173_v32  ;;  %vm2997_vm11 = vmor %vm2995_vm3, %vm2996_vm6 }
 0x3e4   : > { %v2993_v49 = vmul.f32 %v6871_v19, %v2992_v51  ;;  %v3060_v12 = vmul.f32 3.8918573e-05, %v10173_v32  ;;  %v3089_v54 = vmul.f32 2.1237322e-06, %v10175_v37  ;;  %3463 = vrot.lane.b32.xlu2 %v3427_v21, %s6997_s20  ;;  %v3039_v31 = vand.u32 2147483647, %v10171_v13 }
 0x3e5   : > { %v10194_v59 = vor.u32 1.1754944e-38, %v3041_v60  ;;  %v3100_v34 = vmul.f32 3.8918573e-05, %v10175_v37  ;;  %v10197_v7 = vmin.f32 %v3127_v23, 16.0  ;;  %3461 = vrot.lane.b32.xlu1 %v3426_v20, %s6997_s20  ;;  %v3050_v52 = vadd.f32 0.00028619796, %v3049_v39 }
 0x3e6   : > { %v2994_v2 = vadd.f32 %v6871_v19, %v2993_v49  ;;  %v3061_v61 = vadd.f32 0.001143296, %v3060_v12  ;;  %v3090_v43 = vadd.f32 0.00028619796, %v3089_v54  ;;  %v10206_v1 = vadd.f32 %v2720_v62, %v9911_v8 }
 0x3e7   : > { %v3101_v15 = vadd.f32 0.001143296, %v3100_v34  ;;  %v3129_v16 = vmul.f32 2.1237322e-06, %v10197_v7  ;;  %v3140_v35 = vmul.f32 3.8918573e-05, %v10197_v7  ;;  %vm3035_vm1 = vweird.f32 %v10171_v13 }
 0x3e8   : > { %v2998_v30 = vsel %vm2997_vm11, %v6871_v19, %v2994_v2  ;;  %v3051_v41 = vmul.f32 %v3050_v52, %v10173_v32  ;;  %v3062_v45 = vmul.f32 %v3061_v61, %v10173_v32  ;;  %v3091_v44 = vmul.f32 %v3090_v43, %v10175_v37 }
 0x3e9   : > { %v6873_v18 = vpop.eup %6872  ;;  %v3003_v17 = vsel %vm10180_vm5, %v3002_v25, %v2998_v30  ;;  %v3102_v11 = vmul.f32 %v3101_v15, %v10175_v37  ;;  %v3130_v5 = vadd.f32 0.00028619796, %v3129_v16  ;;  %v3141_v58 = vadd.f32 0.001143296, %v3140_v35 }
 0x3ea   : > { %v3004_v53 = vmul.f32 %v3003_v17, %v2979_v6  ;;  %v3031_v20 = vmul.f32 %v6873_v18, %v10171_v13  ;;  %vm3036_vm2 = vweird.f32 %v6873_v18  ;;  %v3052_v19 = vadd.f32 0.0036580483, %v3051_v41  ;;  %v2722_v41 = vpop.f32.mrf.mxu1 }
 0x3eb   : > { %v3063_v56 = vadd.f32 0.014752088, %v3062_v45  ;;  %v3092_v14 = vadd.f32 0.0036580483, %v3091_v44  ;;  %v3103_v47 = vadd.f32 0.014752088, %v3102_v11  ;;  %v3131_v23 = vmul.f32 %v3130_v5, %v10197_v7  ;;  %vm3037_vm4 = vmor %vm3035_vm1, %vm3036_vm2 }
 0x3ec   : > { %v6610_v21 = vclamps-f32 %v3004_v53, 1.0  ;;  %v3032_v51 = vsub.f32 1.0, %v3031_v20  ;;  %v3053_v60 = vmul.f32 %v3052_v19, %v10173_v32  ;;  %v3142_v26 = vmul.f32 %v3141_v58, %v10197_v7 }
 0x3ed   : > { %v3064_v25 = vmul.f32 %v3063_v56, %v10173_v32  ;;  %v3093_v49 = vmul.f32 %v3092_v14, %v10175_v37  ;;  %v3104_v6 = vmul.f32 %v3103_v47, %v10175_v37  ;;  %v3132_v39 = vadd.f32 0.0036580483, %v3131_v23 }
 0x3ee   : > { %v3412_v12 = vadd.f32 1.0, %v6610_v21  ;;  %v3033_v54 = vmul.f32 %v6873_v18, %v3032_v51  ;;  %v3054_v62 = vadd.f32 0.05243302, %v3053_v60  ;;  %v3143_v34 = vadd.f32 0.014752088, %v3142_v26 }
 0x3ef   : > { %v3065_v2 = vadd.f32 0.112945676, %v3064_v25  ;;  %v3094_v52 = vadd.f32 0.05243302, %v3093_v49  ;;  %v3105_v61 = vadd.f32 0.112945676, %v3104_v6  ;;  %v3133_v43 = vmul.f32 %v3132_v39, %v10197_v7 }
 0x3f0   : > { %v3428_v15 = vmul.f32 %v3412_v12, %v10076_v57  ;;  %v3034_v16 = vadd.f32 %v6873_v18, %v3033_v54  ;;  %v3055_v35 = vmul.f32 %v3054_v62, %v10173_v32  ;;  %v3144_v30 = vmul.f32 %v3143_v34, %v10197_v7 }
 0x3f1   : > { %v3066_v45 = vmul.f32 %v3065_v2, %v10173_v32  ;;  %v3095_v44 = vmul.f32 %v3094_v52, %v10175_v37  ;;  %v3106_v17 = vmul.f32 %v3105_v61, %v10175_v37  ;;  %v3134_v11 = vadd.f32 0.05243302, %v3133_v43 }
 0x3f2   : > { %v3038_v5 = vsel %vm3037_vm4, %v6873_v18, %v3034_v16  ;;  %vm3040_vm3 = vcmp.eq.f32.partialorder %v3039_v31, 8.507059e+37  ;;  %v3056_v57 = vadd.f32 0.18741608, %v3055_v35  ;;  %v3145_v58 = vadd.f32 0.112945676, %v3144_v30  ;;  %3465 = vrot.lane.b32.xlu0 %v3428_v15, %s6997_s20 }
 0x3f3   : > { %v3043_v53 = vsel %vm3040_vm3, %v10194_v59, %v3038_v5  ;;  %v3067_v20 = vadd.f32 0.4994258, %v3066_v45  ;;  %v3096_v19 = vadd.f32 0.18741608, %v3095_v44  ;;  %v3107_v56 = vadd.f32 0.4994258, %v3106_v17 }
 0x3f4   : > { %v3044_v13 = vmul.f32 %v3043_v53, %v10185_v36  ;;  %v3057_v14 = vmul.f32 %v3056_v57, %v10173_v32  ;;  %v3135_v47 = vmul.f32 %v3134_v11, %v10197_v7  ;;  %v3146_v23 = vmul.f32 %v3145_v58, %v10197_v7 }
 0x3f5   : > { %v3068_v18 = vmul.f32 %v3067_v20, %v10173_v32  ;;  %v3108_v31 = vmul.f32 %v3107_v56, %v10175_v37  ;;  %v10241_v21 = vmul.f32 0.70710677, %v10206_v1  ;;  %v3097_v36 = vmul.f32 %v3096_v19, %v10175_v37  ;;  %v2725_v37 = vpop.f32.mrf.mxu1 }
 0x3f6   : > { %v6611_v51 = vclamps-f32 %v3044_v13, 1.0  ;;  %v3136_v59 = vadd.f32 0.18741608, %v3135_v47  ;;  %v3058_v60 = vadd.f32 1.1283791, %v3057_v14  ;;  %v2741_v49 = vmul.f32 0.5, %v10046_v33 }
 0x3f7   : > { %v10243_v26 = vadd.f32 1.0, %v3068_v18  ;;  %v10246_v25 = vadd.f32 1.0, %v3108_v31  ;;  %v3147_v39 = vadd.f32 0.4994258, %v3146_v23  ;;  %v3167_v32 = vmul.f32 %v10241_v21, %v10241_v21 }
 0x3f8   : > { %v3413_v6 = vadd.f32 1.0, %v6611_v51  ;;  %v3137_v12 = vmul.f32 %v3136_v59, %v10197_v7  ;;  %v10254_v54 = vadd.f32 %v2722_v41, %v9911_v8  ;;  %v10257_v34 = vmul.f32 0.5, %v10136_v38 }
 0x3f9   : > { %6874 = vrcp.f32 %v10243_v26  ;;  %v10261_v33 = vmul.f32 %v3058_v60, %v10147_v42  ;;  %v3079_v2 = vand.u32 2147483647, %v10243_v26  ;;  %v10265_v52 = vmul.f32 0.5, %v10141_v4 }
 0x3fa   : > { %v3429_v62 = vmul.f32 %v3413_v6, %v2741_v49  ;;  %6876 = vrcp.f32 %v10246_v25  ;;  %v3098_v61 = vadd.f32 1.1283791, %v3097_v36  ;;  %v3081_v43 = vand.u32 2147483648, %v10243_v26 }
 0x3fb   : > { %v3119_v15 = vand.u32 2147483647, %v10246_v25  ;;  %v3148_v16 = vmul.f32 %v3147_v39, %v10197_v7  ;;  %v10270_v38 = vmin.f32 %v3167_v32, 16.0  ;;  %v3121_v35 = vand.u32 2147483648, %v10246_v25 }
 0x3fc   : > { %3467 = vrot.lane.b32.xlu1 %v3429_v62, %s6997_s20  ;;  %v3138_v42 = vadd.f32 1.1283791, %v3137_v12  ;;  %v10275_v30 = vmul.f32 0.70710677, %v10254_v54  ;;  %v10278_v4 = vadd.f32 %v2725_v37, %v9911_v8  ;;  %vm3075_vm5 = vweird.f32 %v10243_v26 }
 0x3fd   : > { %v10281_v41 = vadd.f32 1.0, %v3148_v16  ;;  %v3169_v45 = vmul.f32 2.1237322e-06, %v10270_v38  ;;  %v3180_v7 = vmul.f32 3.8918573e-05, %v10270_v38  ;;  %v3099_v17 = vmul.f32 %v3098_v61, %v10153_v40  ;;  %v2727_v6 = vpop.f32.mrf.mxu1 }
 0x3fe   : > { %vm3115_vm6 = vweird.f32 %v10246_v25  ;;  %v3207_v11 = vmul.f32 %v10275_v30, %v10275_v30  ;;  %v10290_v5 = vmul.f32 0.70710677, %v10278_v4  ;;  %vm10293_vm11 = vcmp.eq.f32.partialorder %v3079_v2, 8.507059e+37 }
 0x3ff   : > { %v6875_v44 = vpop.eup %6874  ;;  %v3082_v20 = vor.u32 1.1754944e-38, %v3081_v43  ;;  %6878 = vrcp.f32 %v10281_v41  ;;  %vm10299_vm2 = vcmp.eq.f32.partialorder %v3119_v15, 8.507059e+37  ;;  %v3122_v56 = vor.u32 1.1754944e-38, %v3121_v35 }
 0x400   : > { %v6877_v57 = vpop.eup %6876  ;;  %v3071_v58 = vmul.f32 %v6875_v44, %v10243_v26  ;;  %vm3076_vm1 = vweird.f32 %v6875_v44  ;;  %v10304_v13 = vmul.f32 %v3138_v42, %v10167_v27  ;;  %v3170_v47 = vadd.f32 0.00028619796, %v3169_v45 }
 0x401   : > { %v3111_v40 = vmul.f32 %v6877_v57, %v10246_v25  ;;  %v3181_v23 = vadd.f32 0.001143296, %v3180_v7  ;;  %v10306_v18 = vmin.f32 %v3207_v11, 16.0  ;;  %vm3116_vm4 = vweird.f32 %v6877_v57  ;;  %vm3077_vm0 = vmor %vm3075_vm5, %vm3076_vm1 }
 0x402   : > { %v3072_v14 = vsub.f32 1.0, %v3071_v58  ;;  %v3159_v51 = vand.u32 2147483647, %v10281_v41  ;;  %v3247_v59 = vmul.f32 %v10290_v5, %v10290_v5  ;;  %v3171_v36 = vmul.f32 %v3170_v47, %v10270_v38  ;;  %vm3117_vm13 = vmor %vm3115_vm6, %vm3116_vm4 }
 0x403   : > { %v3112_v31 = vsub.f32 1.0, %v3111_v40  ;;  %v3182_v49 = vmul.f32 %v3181_v23, %v10270_v38  ;;  %v3209_v27 = vmul.f32 2.1237322e-06, %v10306_v18  ;;  %vm3155_vm3 = vweird.f32 %v10281_v41 }
 0x404   : > { %v3073_v60 = vmul.f32 %v6875_v44, %v3072_v14  ;;  %v3161_v32 = vand.u32 2147483648, %v10281_v41  ;;  %v3220_v12 = vmul.f32 3.8918573e-05, %v10306_v18  ;;  %v10317_v62 = vmin.f32 %v3247_v59, 16.0 }
 0x405   : > { %v3113_v39 = vmul.f32 %v6877_v57, %v3112_v31  ;;  %v6879_v37 = vpop.eup %6878  ;;  %v3172_v61 = vadd.f32 0.0036580483, %v3171_v36  ;;  %v3183_v43 = vadd.f32 0.014752088, %v3182_v49  ;;  %v3210_v15 = vadd.f32 0.00028619796, %v3209_v27 }
 0x406   : > { %v3074_v2 = vadd.f32 %v6875_v44, %v3073_v60  ;;  %v3151_v35 = vmul.f32 %v6879_v37, %v10281_v41  ;;  %vm3156_vm15 = vweird.f32 %v6879_v37  ;;  %vm10323_vm14 = vcmp.eq.f32.partialorder %v3159_v51, 8.507059e+37 }
 0x407   : > { %v3114_v16 = vadd.f32 %v6877_v57, %v3113_v39  ;;  %v3221_v45 = vadd.f32 0.001143296, %v3220_v12  ;;  %v3173_v11 = vmul.f32 %v3172_v61, %v10270_v38  ;;  %v3184_v58 = vmul.f32 %v3183_v43, %v10270_v38  ;;  %v2730_v43 = vpop.f32.mrf.mxu1 }
 0x408   : > { %v3078_v7 = vsel %vm3077_vm0, %v6875_v44, %v3074_v2  ;;  %v3211_v26 = vmul.f32 %v3210_v15, %v10306_v18  ;;  %v3152_v47 = vsub.f32 1.0, %v3151_v35  ;;  %vm3535_vm4 = vcmask 126016  }
 0x409   : > { %v3083_v40 = vsel %vm10293_vm11, %v3082_v20, %v3078_v7  ;;  %v3118_v14 = vsel %vm3117_vm13, %v6877_v57, %v3114_v16  ;;  %v3222_v23 = vmul.f32 %v3221_v45, %v10306_v18  ;;  %v3174_v25 = vadd.f32 0.05243302, %v3173_v11  ;;  %vm3157_vm13 = vmor %vm3155_vm3, %vm3156_vm15 }
 0x40a   : > { %v3084_v31 = vmul.f32 %v3083_v40, %v10261_v33  ;;  %v3123_v44 = vsel %vm10299_vm2, %v3122_v56, %v3118_v14  ;;  %v3185_v51 = vadd.f32 0.112945676, %v3184_v58  ;;  %v3153_v60 = vmul.f32 %v6879_v37, %v3152_v47 }
 0x40b   : > { %v3124_v59 = vmul.f32 %v3123_v44, %v3099_v17  ;;  %v3212_v36 = vadd.f32 0.0036580483, %v3211_v26  ;;  %v3223_v49 = vadd.f32 0.014752088, %v3222_v23  ;;  %v3175_v39 = vmul.f32 %v3174_v25, %v10270_v38 }
 0x40c   : > { %v6612_v27 = vclamps-f32 %v3084_v31, 1.0  ;;  %v3186_v53 = vmul.f32 %v3185_v51, %v10270_v38  ;;  %v3249_v57 = vmul.f32 2.1237322e-06, %v10317_v62  ;;  %v3154_v12 = vadd.f32 %v6879_v37, %v3153_v60 }
 0x40d   : > { %v6613_v20 = vclamps-f32 %v3124_v59, 1.0  ;;  %v3213_v33 = vmul.f32 %v3212_v36, %v10306_v18  ;;  %v3224_v19 = vmul.f32 %v3223_v49, %v10306_v18  ;;  %v3162_v17 = vor.u32 1.1754944e-38, %v3161_v32 }
 0x40e   : > { %v3414_v56 = vadd.f32 1.0, %v6612_v27  ;;  %v3176_v2 = vadd.f32 0.18741608, %v3175_v39  ;;  %v3187_v61 = vadd.f32 0.4994258, %v3186_v53  ;;  %v3158_v16 = vsel %vm3157_vm13, %v6879_v37, %v3154_v12 }
 0x40f   : > { %v3415_v15 = vadd.f32 1.0, %v6613_v20  ;;  %v3214_v35 = vadd.f32 0.05243302, %v3213_v33  ;;  %v3225_v45 = vadd.f32 0.112945676, %v3224_v19  ;;  %v3163_v11 = vsel %vm10323_vm14, %v3162_v17, %v3158_v16  ;;  %v2732_v20 = vpop.f32.mrf.mxu1 }
 0x410   : > { %v3430_v7 = vmul.f32 %v3414_v56, %v10257_v34  ;;  %v3177_v58 = vmul.f32 %v3176_v2, %v10270_v38  ;;  %v3188_v26 = vmul.f32 %v3187_v61, %v10270_v38  ;;  %v3164_v32 = vmul.f32 %v3163_v11, %v10304_v13 }
 0x411   : > { %v3431_v41 = vmul.f32 %v3415_v15, %v10265_v52  ;;  %v3215_v40 = vmul.f32 %v3214_v35, %v10306_v18  ;;  %v3226_v14 = vmul.f32 %v3225_v45, %v10306_v18  ;;  %v3250_v47 = vadd.f32 0.00028619796, %v3249_v57 }
 0x412   : > { %v10356_v37 = vadd.f32 1.0, %v3188_v26  ;;  %v10359_v34 = vadd.f32 %v2727_v6, %v9911_v8  ;;  %3469 = vrot.lane.b32.xlu2 %v3430_v7, %s6997_s20  ;;  %v6614_v42 = vclamps-f32 %v3164_v32, 1.0  ;;  %v10365_v52 = vadd.f32 %v2730_v43, %v9911_v8 }
 0x413   : > { %v3216_v23 = vadd.f32 0.18741608, %v3215_v40  ;;  %v3227_v31 = vadd.f32 0.4994258, %v3226_v14  ;;  %3471 = vrot.lane.b32.xlu0 %v3431_v41, %s6997_s20  ;;  %v2744_v38 = vmul.f32 0.5, %v10156_v28  ;;  %v3251_v51 = vmul.f32 %v3250_v47, %v10317_v62 }
 0x414   : > { %6880 = vrcp.f32 %v10356_v37  ;;  %v3416_v13 = vadd.f32 1.0, %v6614_v42  ;;  %v3178_v44 = vadd.f32 1.1283791, %v3177_v58  ;;  %v3260_v59 = vmul.f32 3.8918573e-05, %v10317_v62 }
 0x415   : > { %v3228_v25 = vmul.f32 %v3227_v31, %v10306_v18  ;;  %v3217_v6 = vmul.f32 %v3216_v23, %v10306_v18  ;;  %v10373_v60 = vmul.f32 0.70710677, %v10359_v34  ;;  %v3199_v49 = vand.u32 2147483647, %v10356_v37 }
 0x416   : > { %v3432_v36 = vmul.f32 %v3416_v13, %v2744_v38  ;;  %v3201_v27 = vand.u32 2147483648, %v10356_v37  ;;  %v3252_v28 = vadd.f32 0.0036580483, %v3251_v51  ;;  %v3261_v53 = vadd.f32 0.001143296, %v3260_v59 }
 0x417   : > { %v10377_v39 = vadd.f32 1.0, %v3228_v25  ;;  %v3287_v57 = vmul.f32 %v10373_v60, %v10373_v60  ;;  %v10382_v18 = vmul.f32 0.70710677, %v10365_v52  ;;  %v10385_v12 = vmul.f32 0.5, %v10206_v1 }
 0x418   : > { %3473 = vrot.lane.b32.xlu1 %v3432_v36, %s6997_s20  ;;  %v3218_v19 = vadd.f32 1.1283791, %v3217_v6  ;;  %v3253_v56 = vmul.f32 %v3252_v28, %v10317_v62  ;;  %v3262_v17 = vmul.f32 %v3261_v53, %v10317_v62  ;;  %v3179_v61 = vmul.f32 %v3178_v44, %v10241_v21 }
 0x419   : > { %6882 = vrcp.f32 %v10377_v39  ;;  %v10391_v2 = vmin.f32 %v3287_v57, 16.0  ;;  %v3327_v1 = vmul.f32 %v10382_v18, %v10382_v18  ;;  %v10398_v15 = vadd.f32 %v2732_v20, %v9911_v8 }
 0x41a   : > { %v6881_v33 = vpop.eup %6880  ;;  %vm3195_vm14 = vweird.f32 %v10356_v37  ;;  %vm10401_vm15 = vcmp.eq.f32.partialorder %v3199_v49, 8.507059e+37  ;;  %v3202_v35 = vor.u32 1.1754944e-38, %v3201_v27  ;;  %v3263_v45 = vadd.f32 0.014752088, %v3262_v17 }
 0x41b   : > { %v3191_v43 = vmul.f32 %v6881_v33, %v10356_v37  ;;  %v3289_v11 = vmul.f32 2.1237322e-06, %v10391_v2  ;;  %v3300_v21 = vmul.f32 3.8918573e-05, %v10391_v2  ;;  %v10407_v58 = vmin.f32 %v3327_v1, 16.0 }
 0x41c   : > { %vm3196_vm0 = vweird.f32 %v6881_v33  ;;  %v3219_v26 = vmul.f32 %v3218_v19, %v10275_v30  ;;  %v3254_v8 = vadd.f32 0.05243302, %v3253_v56  ;;  %v3264_v41 = vmul.f32 %v3263_v45, %v10317_v62 }
 0x41d   : > { %v3192_v7 = vsub.f32 1.0, %v3191_v43  ;;  %v3290_v14 = vadd.f32 0.00028619796, %v3289_v11  ;;  %v3301_v47 = vadd.f32 0.001143296, %v3300_v21  ;;  %vm3235_vm5 = vweird.f32 %v10377_v39  ;;  %vm3197_vm6 = vmor %vm3195_vm14, %vm3196_vm0 }
 0x41e   : > { %v3329_v42 = vmul.f32 2.1237322e-06, %v10407_v58  ;;  %v3239_v31 = vand.u32 2147483647, %v10377_v39  ;;  %v3265_v38 = vadd.f32 0.112945676, %v3264_v41  ;;  %v3255_v27 = vmul.f32 %v3254_v8, %v10317_v62 }
 0x41f   : > { %v6883_v32 = vpop.eup %6882  ;;  %v3193_v40 = vmul.f32 %v6881_v33, %v3192_v7  ;;  %v3291_v44 = vmul.f32 %v3290_v14, %v10391_v2  ;;  %v3302_v30 = vmul.f32 %v3301_v47, %v10391_v2  ;;  %v3241_v51 = vand.u32 2147483648, %v10377_v39 }
 0x420   : > { %v3231_v23 = vmul.f32 %v6883_v32, %v10377_v39  ;;  %v3330_v25 = vadd.f32 0.00028619796, %v3329_v42  ;;  %v3266_v59 = vmul.f32 %v3265_v38, %v10317_v62  ;;  %v3340_v36 = vmul.f32 3.8918573e-05, %v10407_v58 }
 0x421   : > { %v3194_v13 = vadd.f32 %v6881_v33, %v3193_v40  ;;  %v3292_v28 = vadd.f32 0.0036580483, %v3291_v44  ;;  %v3303_v53 = vadd.f32 0.014752088, %v3302_v30  ;;  %vm3236_vm11 = vweird.f32 %v6883_v32 }
 0x422   : > { %v3232_v6 = vsub.f32 1.0, %v3231_v23  ;;  %v3267_v19 = vadd.f32 0.4994258, %v3266_v59  ;;  %v3331_v17 = vmul.f32 %v3330_v25, %v10407_v58  ;;  %v10429_v43 = vmul.f32 0.70710677, %v10398_v15  ;;  %vm3237_vm1 = vmor %vm3235_vm5, %vm3236_vm11 }
 0x423   : > { %v3198_v49 = vsel %vm3197_vm6, %v6881_v33, %v3194_v13  ;;  %v3304_v56 = vmul.f32 %v3303_v53, %v10391_v2  ;;  %v3293_v45 = vmul.f32 %v3292_v28, %v10391_v2  ;;  %v3341_v7 = vadd.f32 0.001143296, %v3340_v36  ;;  %v3458_v59 = vpop.permute.xlu2 %3457 }
 0x424   : > { %v3203_v57 = vsel %vm10401_vm15, %v3202_v35, %v3198_v49  ;;  %v3233_v20 = vmul.f32 %v6883_v32, %v3232_v6  ;;  %v3268_v33 = vmul.f32 %v3267_v19, %v10317_v62  ;;  %vm3240_vm2 = vcmp.eq.f32.partialorder %v3239_v31, 8.507059e+37 }
 0x425   : > { %v3204_v37 = vmul.f32 %v3203_v57, %v3179_v61  ;;  %v3242_v16 = vor.u32 1.1754944e-38, %v3241_v51  ;;  %v3305_v61 = vadd.f32 0.112945676, %v3304_v56  ;;  %v3256_v21 = vadd.f32 0.18741608, %v3255_v27 }
 0x426   : > { %v3234_v1 = vadd.f32 %v6883_v32, %v3233_v20  ;;  %v3269_v8 = vadd.f32 1.0, %v3268_v33  ;;  %v3342_v41 = vmul.f32 %v3341_v7, %v10407_v58  ;;  %v3367_v42 = vmul.f32 %v10429_v43, %v10429_v43  ;;  %v13671_v20 = vld [vmem:[#allocation110_spill] sm:$0xff] }
 0x427   : > { %v6615_v11 = vclamps-f32 %v3204_v37, 1.0  ;;  %v3306_v47 = vmul.f32 %v3305_v61, %v10391_v2  ;;  %v3294_v38 = vadd.f32 0.05243302, %v3293_v45  ;;  %v3332_v39 = vadd.f32 0.0036580483, %v3331_v17 }
 0x428   : > { %v3238_v35 = vsel %vm3237_vm1, %v6883_v32, %v3234_v1  ;;  %6884 = vrcp.f32 %v3269_v8  ;;  %v3343_v32 = vadd.f32 0.014752088, %v3342_v41  ;;  %v2746_v30 = vmul.f32 0.5, %v10254_v54 }
 0x429   : > { %v3417_v40 = vadd.f32 1.0, %v6615_v11  ;;  %v3243_v14 = vsel %vm3240_vm2, %v3242_v16, %v3238_v35  ;;  %v3307_v13 = vadd.f32 0.4994258, %v3306_v47  ;;  %v3257_v25 = vmul.f32 %v3256_v21, %v10317_v62 }
 0x42a   : > { %v3244_v23 = vmul.f32 %v3243_v14, %v3219_v26  ;;  %v10443_v51 = vmin.f32 %v3367_v42, 16.0  ;;  %v3295_v36 = vmul.f32 %v3294_v38, %v10391_v2  ;;  %v3333_v49 = vmul.f32 %v3332_v39, %v10407_v58 }
 0x42b   : > { %v3433_v31 = vmul.f32 %v3417_v40, %v10385_v12  ;;  %v3308_v6 = vmul.f32 %v3307_v13, %v10391_v2  ;;  %v3344_v12 = vmul.f32 %v3343_v32, %v10407_v58  ;;  %v3504_v19 = vadd.f32 %v3458_v59, %v13671_v20 }
 0x42c   : > { %v6616_v44 = vclamps-f32 %v3244_v23, 1.0  ;;  %v3369_v54 = vmul.f32 2.1237322e-06, %v10443_v51  ;;  %v3380_v57 = vmul.f32 3.8918573e-05, %v10443_v51  ;;  %v3281_v61 = vand.u32 2147483648, %v3269_v8 }
 0x42d   : > { %3475 = vrot.lane.b32.xlu2 %v3433_v31, %s6997_s20  ;;  %v10449_v27 = vadd.f32 1.0, %v3308_v6  ;;  %v3345_v53 = vadd.f32 0.112945676, %v3344_v12  ;;  %v3258_v37 = vadd.f32 1.1283791, %v3257_v25  ;;  %v3520_v35 = vpack.c.bf16 %v3504_v19, %v3504_v19 }
 0x42e   : > { %v3418_v26 = vadd.f32 1.0, %v6616_v44  ;;  %v6885_v28 = vpop.eup %6884  ;;  %v3296_v17 = vadd.f32 0.18741608, %v3295_v36  ;;  %v3334_v1 = vadd.f32 0.05243302, %v3333_v49  ;;  %vm3275_vm13 = vweird.f32 %v3269_v8 }
 0x42f   : > { %v3271_v56 = vmul.f32 %v6885_v28, %v3269_v8  ;;  %6886 = vrcp.f32 %v10449_v27  ;;  %v3346_v45 = vmul.f32 %v3345_v53, %v10407_v58  ;;  %v3370_v7 = vadd.f32 0.00028619796, %v3369_v54  ;;  %3537 = vst.msk [vmem:[%s9037_s18 + $0x4] sm:$0xf] %vm3535_vm4, %v3520_v35 }
 0x430   : > { %v3434_v62 = vmul.f32 %v3418_v26, %v2746_v30  ;;  %v3381_v11 = vadd.f32 0.001143296, %v3380_v57  ;;  %vm3276_vm3 = vweird.f32 %v6885_v28  ;;  %v3279_v16 = vand.u32 2147483647, %v3269_v8 }
 0x431   : > { %v3272_v33 = vsub.f32 1.0, %v3271_v56  ;;  %v3347_v41 = vadd.f32 0.4994258, %v3346_v45  ;;  %v3371_v40 = vmul.f32 %v3370_v7, %v10443_v51  ;;  %v3297_v47 = vmul.f32 %v3296_v17, %v10391_v2  ;;  %vm3277_vm14 = vmor %vm3275_vm13, %vm3276_vm3 }
 0x432   : > { %3477 = vrot.lane.b32.xlu0 %v3434_v62, %s6997_s20  ;;  %v3382_v14 = vmul.f32 %v3381_v11, %v10443_v51  ;;  %v3335_v38 = vmul.f32 %v3334_v1, %v10407_v58  ;;  %v3259_v13 = vmul.f32 %v3258_v37, %v10290_v5  ;;  %vm3280_vm15 = vcmp.eq.f32.partialorder %v3279_v16, 8.507059e+37 }
 0x433   : > { %v3273_v21 = vmul.f32 %v6885_v28, %v3272_v33  ;;  %v3348_v39 = vmul.f32 %v3347_v41, %v10407_v58  ;;  %v3282_v44 = vor.u32 1.1754944e-38, %v3281_v61  ;;  %v3372_v2 = vadd.f32 0.0036580483, %v3371_v40 }
 0x434   : > { %v3383_v31 = vadd.f32 0.014752088, %v3382_v14  ;;  %v3298_v59 = vadd.f32 1.1283791, %v3297_v47  ;;  %v3321_v49 = vand.u32 2147483648, %v10449_v27  ;;  %vm3315_vm5 = vweird.f32 %v10449_v27 }
 0x435   : > { %v6887_v42 = vpop.eup %6886  ;;  %v3274_v23 = vadd.f32 %v6885_v28, %v3273_v21  ;;  %v10467_v30 = vadd.f32 1.0, %v3348_v39  ;;  %v3336_v12 = vadd.f32 0.18741608, %v3335_v38  ;;  %v3319_v54 = vand.u32 2147483647, %v10449_v27  ;;  %v13672_v21 = vld [vmem:[#allocation85_spill] sm:$0xff] }
 0x436   : > { %v3311_v32 = vmul.f32 %v6887_v42, %v10449_v27  ;;  %v3384_v25 = vmul.f32 %v3383_v31, %v10443_v51  ;;  %vm3316_vm0 = vweird.f32 %v6887_v42  ;;  %v3373_v53 = vmul.f32 %v3372_v2, %v10443_v51 }
 0x437   : > { %v3278_v8 = vsel %vm3277_vm14, %v6885_v28, %v3274_v23  ;;  %6888 = vrcp.f32 %v10467_v30  ;;  %v2747_v37 = vmul.f32 0.5, %v10278_v4  ;;  %v3299_v17 = vmul.f32 %v3298_v59, %v10373_v60  ;;  %vm3317_vm6 = vmor %vm3315_vm5, %vm3316_vm0  ;;  %v13673_v59 = vld [vmem:[#allocation155_spill] sm:$0xff] }
 0x438   : > { %v3283_v6 = vsel %vm3280_vm15, %v3282_v44, %v3278_v8  ;;  %v3312_v26 = vsub.f32 1.0, %v3311_v32  ;;  %v3385_v62 = vadd.f32 0.112945676, %v3384_v25  ;;  %v3322_v1 = vor.u32 1.1754944e-38, %v3321_v49 }
 0x439   : > { %v3284_v36 = vmul.f32 %v3283_v6, %v3259_v13  ;;  %vm3320_vm11 = vcmp.eq.f32.partialorder %v3319_v54, 8.507059e+37  ;;  %v3337_v45 = vmul.f32 %v3336_v12, %v10407_v58  ;;  %v3374_v27 = vadd.f32 0.05243302, %v3373_v53 }
 0x43a   : > { %v3313_v5 = vmul.f32 %v6887_v42, %v3312_v26  ;;  %v3386_v19 = vmul.f32 %v3385_v62, %v10443_v51  ;;  %v2748_v47 = vmul.f32 0.5, %v10359_v34  ;;  %v3361_v38 = vand.u32 2147483648, %v10467_v30 }
 0x43b   : > { %v6617_v28 = vclamps-f32 %v3284_v36, 1.0  ;;  %v3338_v23 = vadd.f32 1.1283791, %v3337_v45  ;;  %v3375_v39 = vmul.f32 %v3374_v27, %v10443_v51  ;;  %v3359_v32 = vand.u32 2147483647, %v10467_v30 }
 0x43c   : > { %v3314_v57 = vadd.f32 %v6887_v42, %v3313_v5  ;;  %v3387_v7 = vadd.f32 0.4994258, %v3386_v19  ;;  %vm3355_vm2 = vweird.f32 %v10467_v30  ;;  %v3362_v25 = vor.u32 1.1754944e-38, %v3361_v38 }
 0x43d   : > { %v3419_v56 = vadd.f32 1.0, %v6617_v28  ;;  %v6889_v16 = vpop.eup %6888  ;;  %v3376_v6 = vadd.f32 0.18741608, %v3375_v39  ;;  %v3339_v36 = vmul.f32 %v3338_v23, %v10382_v18  ;;  %vm3360_vm13 = vcmp.eq.f32.partialorder %v3359_v32, 8.507059e+37  ;;  %v13678_v39 = vld [vmem:[#allocation5_spill] sm:$0xff]  ;;  %v13681_v32 = vld [vmem:[#allocation128_spill] sm:$0xff] }
 0x43e   : > { %v3318_v33 = vsel %vm3317_vm6, %v6887_v42, %v3314_v57  ;;  %v3464_v11 = vpop.permute.xlu2 %3463  ;;  %v3351_v4 = vmul.f32 %v6889_v16, %v10467_v30  ;;  %v3388_v60 = vmul.f32 %v3387_v7, %v10443_v51  ;;  %vm3356_vm1 = vweird.f32 %v6889_v16 }
 0x43f   : > { %v3435_v61 = vmul.f32 %v3419_v56, %v2747_v37  ;;  %v3323_v35 = vsel %vm3320_vm11, %v3322_v1, %v3318_v33  ;;  %v3507_v41 = vadd.f32 %v3464_v11, %v13672_v21  ;;  %vm3357_vm3 = vmor %vm3355_vm2, %vm3356_vm1  ;;  %v3377_v28 = vmul.f32 %v3376_v6, %v10443_v51  ;;  %v13674_v56 = vld [vmem:[#allocation143_spill] sm:$0xff]  ;;  %v13675_v51 = vld [vmem:[#allocation4_spill] sm:$0xff] }
 0x440   : > { %v3324_v40 = vmul.f32 %v3323_v35, %v3299_v17  ;;  %v3352_v42 = vsub.f32 1.0, %v3351_v4  ;;  %v3389_v31 = vadd.f32 1.0, %v3388_v60  ;;  %v2749_v19 = vmul.f32 0.5, %v10365_v52  ;;  %v13676_v60 = vld [vmem:[#allocation69_spill] sm:$0xff]  ;;  %v13684_v6 = vld [vmem:[#allocation191_spill] sm:$0xff] }
 0x441   : > { %3479 = vrot.lane.b32.xlu1 %v3435_v61, %s6997_s20  ;;  %v3523_v14 = vpack.c.bf16 %v3507_v41, %v3507_v41  ;;  %v3378_v1 = vadd.f32 1.1283791, %v3377_v28  ;;  %v2750_v23 = vmul.f32 0.5, %v10398_v15  ;;  %v13687_v28 = vld [vmem:[#allocation30_spill] sm:$0xff]  ;;  %vm13844_vm6 = vcmask 457728  }
 0x442   : > { %v6618_v58 = vclamps-f32 %v3324_v40, 1.0  ;;  %v3353_v44 = vmul.f32 %v6889_v16, %v3352_v42  ;;  %6890 = vrcp.f32 %v3389_v31  ;;  %v3399_v33 = vand.u32 2147483647, %v3389_v31 }
 0x443   : > { %3540 = vst.msk [vmem:[%s9037_s18 + $0x10] sm:$0xf] %vm3535_vm4, %v3523_v14  ;;  %v3401_v45 = vand.u32 2147483648, %v3389_v31  ;;  %vm3395_vm15 = vweird.f32 %v3389_v31  ;;  %v3379_v35 = vmul.f32 %v3378_v1, %v10429_v43  ;;  %vm13845_vm11 = vcmask 523264  }
 0x444   : > { %v3420_v13 = vadd.f32 1.0, %v6618_v58  ;;  %v3354_v2 = vadd.f32 %v6889_v16, %v3353_v44  ;;  %v3460_v34 = vpop.permute.xlu0 %3459  ;;  %vm3400_vm5 = vcmp.eq.f32.partialorder %v3399_v33, 8.507059e+37  ;;  %v13677_v58 = vld [vmem:[#allocation3_spill] sm:$0xff]  ;;  %vm13846_vm1 = vcmask 588800  }
 0x445   : > { %v3505_v26 = vadd.f32 %v3460_v34, %v13673_v59  ;;  %v3402_v52 = vor.u32 1.1754944e-38, %v3401_v45  ;;  %v13683_v34 = vld [vmem:[#allocation7_spill] sm:$0xff]  ;;  %v13691_v45 = vld [vmem:[#allocation33_spill] sm:$0xff]  ;;  %vm13847_vm2 = vcmask 654336  }
 0x446   : > { %v3436_v8 = vmul.f32 %v3420_v13, %v2748_v47  ;;  %v3358_v49 = vsel %vm3357_vm3, %v6889_v16, %v3354_v2  ;;  %v13680_v13 = vld [vmem:[#allocation6_spill] sm:$0xff]  ;;  %vm13848_vm3 = vcmask 719872  }
 0x447   : > { %v3363_v12 = vsel %vm3360_vm13, %v3362_v25, %v3358_v49  ;;  %v3521_v5 = vpack.c.bf16 %v3505_v26, %v3505_v26  ;;  %v13682_v2 = vld [vmem:[#allocation2_spill] sm:$0xff]  ;;  %vm13850_vm13 = vcmask 785408  }
 0x448   : > { %3481 = vrot.lane.b32.xlu2 %v3436_v8, %s6997_s20  ;;  %v3364_v54 = vmul.f32 %v3363_v12, %v3339_v36  ;;  %v6891_v62 = vpop.eup %6890  ;;  %v13685_v12 = vld [vmem:[#allocation167_spill] sm:$0xff] }
 0x449   : > { %3538 = vst.msk [vmem:[%s9037_s18 + $0x8] sm:$0xf] %vm3535_vm4, %v3521_v5  ;;  %v3391_v53 = vmul.f32 %v6891_v62, %v3389_v31  ;;  %vm3396_vm14 = vweird.f32 %v6891_v62  ;;  %v13679_v31 = vld [vmem:[#allocation13_spill] sm:$0xff] }
 0x44a   : > { %v6619_v30 = vclamps-f32 %v3364_v54, 1.0  ;;  %vm3397_vm0 = vmor %vm3395_vm15, %vm3396_vm14  ;;  %v13686_v54 = vld [vmem:[#allocation14_spill] sm:$0xff]  ;;  %vm13851_vm14 = vcmask 850944   ;;  %vm13852_vm15 = vcmask 916480  }
 0x44b   : > { %v3392_v18 = vsub.f32 1.0, %v3391_v53 }
 0x44c   : > { %v3421_v37 = vadd.f32 1.0, %v6619_v30  ;;  %v13688_v30 = vld [vmem:[#allocation26_spill] sm:$0xff] }
 0x44d   : > { %v3393_v11 = vmul.f32 %v6891_v62, %v3392_v18  ;;  %v13690_v18 = vld [vmem:[#allocation204_spill] sm:$0xff] }
 0x44e   : > { %v3437_v7 = vmul.f32 %v3421_v37, %v2749_v19 }
 0x44f   : > { %v3456_v57 = vpop.permute.xlu1 %3455  ;;  %v3394_v61 = vadd.f32 %v6891_v62, %v3393_v11  ;;  %v13692_v11 = vld [vmem:[#allocation29_spill] sm:$0xff] }
 0x450   : > { %v3503_v17 = vadd.f32 %v3456_v57, %v13674_v56  ;;  %3552 = vrot.lane.b32.xlu2 %v13675_v51, %s7010_s6  ;;  %3483 = vrot.lane.b32.xlu0 %v3437_v7, %s6997_s20  ;;  %v13689_v57 = vld [vmem:[#allocation195_spill] sm:$0xff]  ;;  %v13793_v51 = vld [vmem:[#allocation161_spill] sm:$0xff]  ;;  %v13799_v56 = vld [vmem:[#allocation164_spill] sm:$0xff] }
 0x451   : > { %v3398_v27 = vsel %vm3397_vm0, %v6891_v62, %v3394_v61 }
 0x452   : > { %v3519_v16 = vpack.c.bf16 %v3503_v17, %v3503_v17  ;;  %v3403_v41 = vsel %vm3400_vm5, %v3402_v52, %v3398_v27  ;;  %v13695_v27 = vld [vmem:[#allocation36_spill] sm:$0xff]  ;;  %vm13854_vm5 = vcmask 982016  }
 0x453   : > { %v3404_v4 = vmul.f32 %v3403_v41, %v3379_v35  ;;  %v13694_v35 = vld [vmem:[#allocation28_spill] sm:$0xff] }
 0x454   : > { %3536 = vst.msk [vmem:[%s9037_s18] sm:$0xf] %vm3535_vm4, %v3519_v16  ;;  %v13693_v16 = vld [vmem:[#allocation200_spill] sm:$0xff] }
 0x455   : > { %v6620_v47 = vclamps-f32 %v3404_v4, 1.0  ;;  %v13696_v41 = vld [vmem:[#allocation32_spill] sm:$0xff]  ;;  %v13698_v4 = vld [vmem:[#allocation39_spill] sm:$0xff] }
 0x457   : > { %v3462_v40 = vpop.permute.xlu1 %3461  ;;  %v3422_v38 = vadd.f32 1.0, %v6620_v47  ;;  %v13700_v47 = vld [vmem:[#allocation34_spill] sm:$0xff] }
 0x458   : > { %v3506_v14 = vadd.f32 %v3462_v40, %v13676_v60  ;;  %3558 = vrot.lane.b32.xlu2 %v13677_v58, %s7010_s6  ;;  %3554 = vrot.lane.b32.xlu0 %v13678_v39, %s7010_s6  ;;  %v13697_v40 = vld [vmem:[#allocation31_spill] sm:$0xff]  ;;  %v13746_v58 = vld [vmem:[#allocation100_spill] sm:$0xff] }
 0x459   : > { %v3438_v43 = vmul.f32 %v3422_v38, %v2750_v23  ;;  %v13702_v23 = vld [vmem:[#allocation38_spill] sm:$0xff]  ;;  %v13789_v39 = vld [vmem:[#allocation156_spill] sm:$0xff]  ;;  %v13792_v60 = vld [vmem:[#allocation147_spill] sm:$0xff] }
 0x45a   : > { %v3522_v42 = vpack.c.bf16 %v3506_v14, %v3506_v14  ;;  %v13699_v14 = vld [vmem:[#allocation35_spill] sm:$0xff] }
 0x45b   : > { %3485 = vrot.lane.b32.xlu1 %v3438_v43, %s6997_s20 }
 0x45c   : > { %3539 = vst.msk [vmem:[%s9037_s18 + $0xc] sm:$0xf] %vm3535_vm4, %v3522_v42  ;;  %v13701_v42 = vld [vmem:[#allocation42_spill] sm:$0xff] }
 0x460   : > { %3564 = vrot.lane.b32.xlu2 %v13679_v31, %s7010_s6  ;;  %3560 = vrot.lane.b32.xlu0 %v13680_v13, %s7010_s6  ;;  %v13725_v31 = vld [vmem:[#allocation73_spill] sm:$0xff]  ;;  %v13739_v13 = vld [vmem:[#allocation83_spill] sm:$0xff] }
 0x463   : > { %3556 = vrot.lane.b32.xlu1 %v13682_v2, %s7010_s6 }
 0x464   : > { %v3466_v44 = vpop.permute.xlu0 %3465 }
 0x465   : > { %v3508_v15 = vadd.f32 %v3466_v44, %v13681_v32 }
 0x467   : > { %v3524_v8 = vpack.c.bf16 %v3508_v15, %v3508_v15  ;;  %v13703_v15 = vld [vmem:[#allocation208_spill] sm:$0xff] }
 0x468   : > { %3570 = vrot.lane.b32.xlu2 %v13543_v24, %s7011_s7  ;;  %3566 = vrot.lane.b32.xlu0 %v13683_v34, %s7010_s6  ;;  %v13722_v34 = vld [vmem:[#allocation59_spill] sm:$0xff]  ;;  %v13762_v24 = vld [vmem:[#allocation106_spill] sm:$0xff] }
 0x469   : > { %3541 = vst.msk [vmem:[%s9037_s18 + $0x14] sm:$0xf] %vm3535_vm4, %v3524_v8 }
 0x46b   : > { %3562 = vrot.lane.b32.xlu1 %v13686_v54, %s7010_s6  ;;  %v13733_v54 = vld [vmem:[#allocation68_spill] sm:$0xff] }
 0x46c   : > { %v3470_v25 = vpop.permute.xlu2 %3469 }
 0x46d   : > { %v3510_v26 = vadd.f32 %v3470_v25, %v13684_v6 }
 0x46e   : > { %v3468_v36 = vpop.permute.xlu1 %3467 }
 0x46f   : > { %v3526_v49 = vpack.c.bf16 %v3510_v26, %v3510_v26  ;;  %v3509_v5 = vadd.f32 %v3468_v36, %v13685_v12  ;;  %v13704_v36 = vld [vmem:[#allocation37_spill] sm:$0xff] }
 0x470   : > { %3576 = vrot.lane.b32.xlu2 %v13580_v10, %s7011_s7  ;;  %3572 = vrot.lane.b32.xlu0 %v13550_v55, %s7011_s7  ;;  %v13755_v55 = vld [vmem:[#allocation111_spill] sm:$0xff] }
 0x471   : > { %3543 = vst.msk [vmem:[%s9037_s18 + $0x1c] sm:$0xf] %vm3535_vm4, %v3526_v49  ;;  %v3525_v62 = vpack.c.bf16 %v3509_v5, %v3509_v5  ;;  %v13705_v49 = vld [vmem:[#allocation45_spill] sm:$0xff] }
 0x472   : > { %v13706_v5 = vld [vmem:[#allocation41_spill] sm:$0xff] }
 0x473   : > { %3542 = vst.msk [vmem:[%s9037_s18 + $0x18] sm:$0xf] %vm3535_vm4, %v3525_v62  ;;  %3568 = vrot.lane.b32.xlu1 %v13540_v3, %s7011_s7 }
 0x478   : > { %3582 = vrot.lane.b32.xlu2 %v13632_v50, %s7011_s7  ;;  %3578 = vrot.lane.b32.xlu0 %v13598_v63, %s7011_s7  ;;  %v13720_v50 = vld [vmem:[#allocation53_spill] sm:$0xff] }
 0x47b   : > { %3574 = vrot.lane.b32.xlu1 %v13561_v46, %s7011_s7  ;;  %v13745_v46 = vld [vmem:[#allocation86_spill] sm:$0xff] }
 0x480   : > { %3588 = vrot.lane.b32.xlu2 %v13687_v28, %s6997_s20  ;;  %3584 = vrot.lane.b32.xlu0 %v13688_v30, %s6997_s20 }
 0x483   : > { %3580 = vrot.lane.b32.xlu1 %v13613_v22, %s7011_s7  ;;  %v13724_v22 = vld [vmem:[#allocation57_spill] sm:$0xff] }
 0x485   : > { %v3472_v53 = vpop.permute.xlu0 %3471 }
 0x486   : > { %v3511_v19 = vadd.f32 %v3472_v53, %v13689_v57  ;;  %v13707_v53 = vld [vmem:[#allocation40_spill] sm:$0xff] }
 0x487   : > { %v3476_v37 = vpop.permute.xlu2 %3475  ;;  %v13776_v57 = vld [vmem:[#allocation140_spill] sm:$0xff] }
 0x488   : > { %v3513_v17 = vadd.f32 %v3476_v37, %v13690_v18  ;;  %v3527_v1 = vpack.c.bf16 %v3511_v19, %v3511_v19  ;;  %3594 = vrot.lane.b32.xlu2 %v13691_v45, %s6997_s20  ;;  %3590 = vrot.lane.b32.xlu0 %v13692_v11, %s6997_s20  ;;  %v13708_v19 = vld [vmem:[#allocation48_spill] sm:$0xff]  ;;  %v13719_v45 = vld [vmem:[#allocation54_spill] sm:$0xff]  ;;  %v13759_v18 = vld [vmem:[#allocation117_spill] sm:$0xff] }
 0x489   : > { %v13709_v37 = vld [vmem:[#allocation44_spill] sm:$0xff] }
 0x48a   : > { %v3529_v33 = vpack.c.bf16 %v3513_v17, %v3513_v17  ;;  %3544 = vst.msk [vmem:[%s9037_s18 + $0x20] sm:$0xf] %vm3535_vm4, %v3527_v1  ;;  %v3474_v7 = vpop.permute.xlu1 %3473 }
 0x48b   : > { %v3512_v61 = vadd.f32 %v3474_v7, %v13693_v16  ;;  %3586 = vrot.lane.b32.xlu1 %v13694_v35, %s6997_s20  ;;  %v13710_v7 = vld [vmem:[#allocation43_spill] sm:$0xff]  ;;  %v13734_v35 = vld [vmem:[#allocation84_spill] sm:$0xff] }
 0x48c   : > { %3546 = vst.msk [vmem:[%s9037_s18 + $0x28] sm:$0xf] %vm3535_vm4, %v3529_v33 }
 0x48d   : > { %v3528_v52 = vpack.c.bf16 %v3512_v61, %v3512_v61 }
 0x48f   : > { %3545 = vst.msk [vmem:[%s9037_s18 + $0x24] sm:$0xf] %vm3535_vm4, %v3528_v52  ;;  %v13711_v52 = vld [vmem:[#allocation52_spill] sm:$0xff] }
 0x490   : > { %3600 = vrot.lane.b32.xlu2 %v13695_v27, %s6998_s21  ;;  %3596 = vrot.lane.b32.xlu0 %v13696_v41, %s6997_s20  ;;  %v13718_v41 = vld [vmem:[#allocation61_spill] sm:$0xff] }
 0x493   : > { %3592 = vrot.lane.b32.xlu1 %v13697_v40, %s6997_s20 }
 0x498   : > { %3606 = vrot.lane.b32.xlu2 %v13698_v4, %s6998_s21  ;;  %3602 = vrot.lane.b32.xlu0 %v13699_v14, %s6998_s21  ;;  %v13767_v14 = vld [vmem:[#allocation129_spill] sm:$0xff] }
 0x49b   : > { %3598 = vrot.lane.b32.xlu1 %v13700_v47, %s6997_s20 }
 0x4a0   : > { %3612 = vrot.lane.b32.xlu2 %v13701_v42, %s6998_s21  ;;  %3608 = vrot.lane.b32.xlu0 %v13702_v23, %s6998_s21  ;;  %v13738_v23 = vld [vmem:[#allocation89_spill] sm:$0xff] }
 0x4a2   : > { %v3482_v38 = vpop.permute.xlu2 %3481 }
 0x4a3   : > { %v3516_v44 = vadd.f32 %v3482_v38, %v9621_v48  ;;  %3604 = vrot.lane.b32.xlu1 %v13704_v36, %s6998_s21  ;;  %v13712_v38 = vld [vmem:[#allocation47_spill] sm:$0xff] }
 0x4a4   : > { %v3478_v43 = vpop.permute.xlu0 %3477 }
 0x4a5   : > { %v3514_v8 = vadd.f32 %v3478_v43, %v13703_v15  ;;  %v3532_v25 = vpack.c.bf16 %v3516_v44, %v3516_v44  ;;  %v13714_v44 = vld [vmem:[#allocation46_spill] sm:$0xff] }
 0x4a7   : > { %v3530_v26 = vpack.c.bf16 %v3514_v8, %v3514_v8  ;;  %3549 = vst.msk [vmem:[%s9037_s18 + $0x34] sm:$0xf] %vm3535_vm4, %v3532_v25  ;;  %v13715_v8 = vld [vmem:[#allocation56_spill] sm:$0xff]  ;;  %v13716_v25 = vld [vmem:[#allocation50_spill] sm:$0xff] }
 0x4a8   : > { %3618 = vrot.lane.b32.xlu2 %v13705_v49, %s6999_s22  ;;  %3614 = vrot.lane.b32.xlu0 %v13706_v5, %s6998_s21  ;;  %v13721_v5 = vld [vmem:[#allocation67_spill] sm:$0xff]  ;;  %v13760_v49 = vld [vmem:[#allocation109_spill] sm:$0xff] }
 0x4a9   : > { %3547 = vst.msk [vmem:[%s9037_s18 + $0x2c] sm:$0xf] %vm3535_vm4, %v3530_v26 }
 0x4aa   : > { %v10595_v62 = vpop.permute.xlu2 %3552 }
 0x4ab   : > { %3610 = vrot.lane.b32.xlu1 %v13707_v53, %s6998_s21 }
 0x4b0   : > { %3624 = vrot.lane.b32.xlu2 %v13708_v19, %s6999_s22  ;;  %3620 = vrot.lane.b32.xlu0 %v13709_v37, %s6999_s22 }
 0x4b2   : > { %v10603_v17 = vpop.permute.xlu2 %3558 }
 0x4b3   : > { %v3480_v1 = vpop.permute.xlu1 %3479  ;;  %3616 = vrot.lane.b32.xlu1 %v13710_v7, %s6999_s22  ;;  %v13786_v7 = vld [vmem:[#allocation144_spill] sm:$0xff] }
 0x4b4   : > { %v3515_v33 = vadd.f32 %v3480_v1, %v9572_v9  ;;  %v13750_v9 = vld [vmem:[#allocation105_spill] sm:$0xff] }
 0x4b6   : > { %v3531_v61 = vpack.c.bf16 %v3515_v33, %v3515_v33 }
 0x4b8   : > { %3548 = vst.msk [vmem:[%s9037_s18 + $0x30] sm:$0xf] %vm3535_vm4, %v3531_v61  ;;  %3630 = vrot.lane.b32.xlu2 %v13711_v52, %s6999_s22  ;;  %3626 = vrot.lane.b32.xlu0 %v13712_v38, %s6999_s22  ;;  %v13717_v61 = vld [vmem:[#allocation49_spill] sm:$0xff]  ;;  %v13731_v38 = vld [vmem:[#allocation71_spill] sm:$0xff] }
 0x4ba   : > { %v10614_v43 = vpop.permute.xlu2 %3564 }
 0x4bb   : > { %13713 = vst [vmem:[#allocation136_spill] sm:$0xff] %v10614_v43  ;;  %3622 = vrot.lane.b32.xlu1 %v13714_v44, %s6999_s22  ;;  %v13824_v43 = vld [vmem:[#allocation181_spill] sm:$0xff] }
 0x4c0   : > { %3636 = vrot.lane.b32.xlu2 %v13715_v8, %s7000_s23  ;;  %3632 = vrot.lane.b32.xlu0 %v13716_v25, %s7000_s23  ;;  %v13747_v8 = vld [vmem:[#allocation94_spill] sm:$0xff] }
 0x4c1   : > { %v13780_v25 = vld [vmem:[#allocation138_spill] sm:$0xff] }
 0x4c2   : > { %v10622_v26 = vpop.permute.xlu2 %3570  ;;  %v3484_v1 = vpop.permute.xlu0 %3483 }
 0x4c3   : > { %v3517_v33 = vadd.f32 %v3484_v1, %v9673_v29  ;;  %3628 = vrot.lane.b32.xlu1 %v13717_v61, %s6999_s22 }
 0x4c5   : > { %v3533_v47 = vpack.c.bf16 %v3517_v33, %v3517_v33 }
 0x4c7   : > { %3550 = vst.msk [vmem:[%s9037_s18 + $0x38] sm:$0xf] %vm3535_vm4, %v3533_v47 }
 0x4c8   : > { %3642 = vrot.lane.b32.xlu2 %v13718_v41, %s7000_s23  ;;  %3638 = vrot.lane.b32.xlu0 %v13719_v45, %s7000_s23 }
 0x4ca   : > { %v10633_v40 = vpop.permute.xlu2 %3576  ;;  %v10635_v52 = vpop.permute.xlu0 %3554 }
 0x4cb   : > { %3634 = vrot.lane.b32.xlu1 %v13720_v50, %s7000_s23 }
 0x4cd   : > { %v3486_v1 = vpop.permute.xlu1 %3485 }
 0x4ce   : > { %v3518_v33 = vadd.f32 %v3486_v1, %v9715_v0  ;;  %v13726_v1 = vld [vmem:[#allocation65_spill] sm:$0xff] }
 0x4d0   : > { %3648 = vrot.lane.b32.xlu2 %v13721_v5, %s7001_s24  ;;  %3644 = vrot.lane.b32.xlu0 %v13722_v34, %s7000_s23  ;;  %v3534_v11 = vpack.c.bf16 %v3518_v33, %v3518_v33  ;;  %v13728_v33 = vld [vmem:[#allocation62_spill] sm:$0xff] }
 0x4d1   : > { %v13772_v5 = vld [vmem:[#allocation134_spill] sm:$0xff] }
 0x4d2   : > { %v10644_v47 = vpop.permute.xlu2 %3582  ;;  %v10646_v61 = vpop.permute.xlu0 %3560  ;;  %3551 = vst.msk [vmem:[%s9037_s18 + $0x3c] sm:$0xf] %vm3535_vm4, %v3534_v11  ;;  %v13730_v11 = vld [vmem:[#allocation79_spill] sm:$0xff]  ;;  %vm13843_vm4 = vcmask 326656  }
 0x4d3   : > { %13723 = vst [vmem:[#allocation122_spill] sm:$0xff] %v10644_v47  ;;  %3640 = vrot.lane.b32.xlu1 %v13724_v22, %s7000_s23  ;;  %vm13853_vm0 = vmmov %vm13843_vm4 }
 0x4d5   : > { %v10652_v42 = vpop.permute.xlu1 %3556 }
 0x4d8   : > { %3654 = vrot.lane.b32.xlu2 %v13725_v31, %s7001_s24  ;;  %3650 = vrot.lane.b32.xlu0 %v13726_v1, %s7001_s24  ;;  %v13742_v31 = vld [vmem:[#allocation11_spill] sm:$0xff] }
 0x4da   : > { %v10658_v41 = vpop.permute.xlu2 %3588  ;;  %v10660_v34 = vpop.permute.xlu0 %3566 }
 0x4db   : > { %13727 = vst [vmem:[#allocation95_spill] sm:$0xff] %v10660_v34  ;;  %3646 = vrot.lane.b32.xlu1 %v13728_v33, %s7000_s23  ;;  %v13735_v33 = vld [vmem:[#allocation77_spill] sm:$0xff]  ;;  %v13811_v34 = vld [vmem:[#allocation175_spill] sm:$0xff] }
 0x4dd   : > { %v10664_v28 = vpop.permute.xlu1 %3562 }
 0x4de   : > { %13729 = vst [vmem:[#allocation142_spill] sm:$0xff] %v10664_v28 }
 0x4e0   : > { %3660 = vrot.lane.b32.xlu2 %v13730_v11, %s7001_s24  ;;  %3656 = vrot.lane.b32.xlu0 %v13731_v38, %s7001_s24  ;;  %v13737_v38 = vld [vmem:[#allocation74_spill] sm:$0xff] }
 0x4e2   : > { %v10670_v63 = vpop.permute.xlu2 %3594  ;;  %v10672_v53 = vpop.permute.xlu0 %3572 }
 0x4e3   : > { %13732 = vst [vmem:[#allocation192_spill] sm:$0xff] %v10670_v63  ;;  %3652 = vrot.lane.b32.xlu1 %v13733_v54, %s7001_s24 }
 0x4e5   : > { %v10676_v22 = vpop.permute.xlu1 %3568 }
 0x4e8   : > { %3666 = vrot.lane.b32.xlu2 %v13734_v35, %s7002_s25  ;;  %3662 = vrot.lane.b32.xlu0 %v13735_v33, %s7001_s24  ;;  %v13740_v33 = vld [vmem:[#allocation80_spill] sm:$0xff] }
 0x4ea   : > { %v10682_v19 = vpop.permute.xlu2 %3600  ;;  %v10684_v11 = vpop.permute.xlu0 %3578 }
 0x4eb   : > { %13736 = vst [vmem:[#allocation76_spill] sm:$0xff] %v10684_v11  ;;  %3658 = vrot.lane.b32.xlu1 %v13737_v38, %s7001_s24  ;;  %v13743_v38 = vld [vmem:[#allocation88_spill] sm:$0xff] }
 0x4ed   : > { %v10688_v10 = vpop.permute.xlu1 %3574 }
 0x4f0   : > { %3672 = vrot.lane.b32.xlu2 %v13738_v23, %s7002_s25  ;;  %3668 = vrot.lane.b32.xlu0 %v13739_v13, %s7002_s25 }
 0x4f2   : > { %v10694_v45 = vpop.permute.xlu2 %3606  ;;  %v10696_v30 = vpop.permute.xlu0 %3584 }
 0x4f3   : > { %3664 = vrot.lane.b32.xlu1 %v13740_v33, %s7002_s25  ;;  %v13784_v33 = vld [vmem:[#allocation152_spill] sm:$0xff] }
 0x4f5   : > { %v10700_v44 = vpop.permute.xlu1 %3580 }
 0x4f6   : > { %13741 = vst [vmem:[#allocation158_spill] sm:$0xff] %v10700_v44  ;;  %v13826_v44 = vld [vmem:[#allocation180_spill] sm:$0xff] }
 0x4f8   : > { %3678 = vrot.lane.b32.xlu2 %v13742_v31, %s7002_s25  ;;  %3674 = vrot.lane.b32.xlu0 %v13743_v38, %s7002_s25  ;;  %v13749_v38 = vld [vmem:[#allocation91_spill] sm:$0xff] }
 0x4fa   : > { %v10706_v0 = vpop.permute.xlu2 %3612  ;;  %v10708_v23 = vpop.permute.xlu0 %3590 }
 0x4fb   : > { %13744 = vst [vmem:[#allocation196_spill] sm:$0xff] %v10706_v0  ;;  %3670 = vrot.lane.b32.xlu1 %v13745_v46, %s7002_s25  ;;  %v13751_v46 = vld [vmem:[#allocation99_spill] sm:$0xff]  ;;  %v13820_v0 = vld [vmem:[#allocation182_spill] sm:$0xff] }
 0x4fd   : > { %v10712_v4 = vpop.permute.xlu1 %3586 }
 0x500   : > { %3684 = vrot.lane.b32.xlu2 %v13746_v58, %s7003_s26  ;;  %3680 = vrot.lane.b32.xlu0 %v13747_v8, %s7003_s26  ;;  %v13752_v58 = vld [vmem:[#allocation96_spill] sm:$0xff] }
 0x502   : > { %v10718_v48 = vpop.permute.xlu0 %3596  ;;  %v10720_v31 = vpop.permute.xlu2 %3618 }
 0x503   : > { %13748 = vst [vmem:[#allocation145_spill] sm:$0xff] %v10718_v48  ;;  %3676 = vrot.lane.b32.xlu1 %v13749_v38, %s7002_s25  ;;  %v13756_v38 = vld [vmem:[#allocation103_spill] sm:$0xff] }
 0x505   : > { %v10724_v13 = vpop.permute.xlu1 %3592 }
 0x508   : > { %3690 = vrot.lane.b32.xlu2 %v13750_v9, %s7003_s26  ;;  %3686 = vrot.lane.b32.xlu0 %v13751_v46, %s7003_s26  ;;  %v13757_v9 = vld [vmem:[#allocation101_spill] sm:$0xff] }
 0x50a   : > { %v10730_v37 = vpop.permute.xlu0 %3602  ;;  %v10734_v54 = vpop.permute.xlu2 %3624 }
 0x50b   : > { %3682 = vrot.lane.b32.xlu1 %v13752_v58, %s7003_s26  ;;  %13753 = vst [vmem:[#allocation205_spill] sm:$0xff] %v10734_v54  ;;  %v13764_v58 = vld [vmem:[#allocation123_spill] sm:$0xff] }
 0x50d   : > { %v10736_v29 = vpop.permute.xlu1 %3598 }
 0x50e   : > { %13754 = vst [vmem:[#allocation90_spill] sm:$0xff] %v10736_v29 }
 0x510   : > { %3696 = vrot.lane.b32.xlu2 %v13755_v55, %s7004_s27  ;;  %3692 = vrot.lane.b32.xlu0 %v13756_v38, %s7003_s26 }
 0x512   : > { %v10742_v36 = vpop.permute.xlu0 %3608  ;;  %v10748_v35 = vpop.permute.xlu2 %3630 }
 0x513   : > { %3688 = vrot.lane.b32.xlu1 %v13757_v9, %s7003_s26  ;;  %13758 = vst [vmem:[#allocation60_spill] sm:$0xff] %v10748_v35  ;;  %v13765_v9 = vld [vmem:[#allocation115_spill] sm:$0xff] }
 0x515   : > { %v10746_v46 = vpop.permute.xlu1 %3604 }
 0x518   : > { %3702 = vrot.lane.b32.xlu2 %v13759_v18, %s7004_s27  ;;  %3698 = vrot.lane.b32.xlu0 %v13760_v49, %s7004_s27  ;;  %v13766_v18 = vld [vmem:[#allocation112_spill] sm:$0xff] }
 0x51a   : > { %v10754_v1 = vpop.permute.xlu0 %3614  ;;  %v10764_v15 = vpop.permute.xlu2 %3636 }
 0x51b   : > { %13761 = vst [vmem:[#allocation92_spill] sm:$0xff] %v10754_v1  ;;  %3694 = vrot.lane.b32.xlu1 %v13762_v24, %s7003_s26  ;;  %v13768_v24 = vld [vmem:[#allocation121_spill] sm:$0xff]  ;;  %v13807_v1 = vld [vmem:[#allocation172_spill] sm:$0xff] }
 0x51d   : > { %v10758_v38 = vpop.permute.xlu1 %3610 }
 0x51e   : > { %13763 = vst [vmem:[#allocation126_spill] sm:$0xff] %v10758_v38 }
 0x520   : > { %3708 = vrot.lane.b32.xlu2 %v13764_v58, %s7004_s27  ;;  %3704 = vrot.lane.b32.xlu0 %v13765_v9, %s7004_s27  ;;  %v13771_v9 = vld [vmem:[#allocation118_spill] sm:$0xff] }
 0x522   : > { %v10766_v16 = vpop.permute.xlu0 %3620  ;;  %v10778_v58 = vpop.permute.xlu2 %3642 }
 0x523   : > { %3700 = vrot.lane.b32.xlu1 %v13766_v18, %s7004_s27  ;;  %13770 = vst [vmem:[#allocation114_spill] sm:$0xff] %v10778_v58  ;;  %v13773_v18 = vld [vmem:[#allocation127_spill] sm:$0xff] }
 0x525   : > { %v10770_v49 = vpop.permute.xlu1 %3616 }
 0x528   : > { %3714 = vrot.lane.b32.xlu2 %v13767_v14, %s7005_s28  ;;  %3710 = vrot.lane.b32.xlu0 %v13768_v24, %s7004_s27  ;;  %v13774_v14 = vld [vmem:[#allocation124_spill] sm:$0xff] }
 0x52a   : > { %v10776_v50 = vpop.permute.xlu0 %3626  ;;  %v10792_v24 = vpop.permute.xlu2 %3648 }
 0x52b   : > { %13769 = vst [vmem:[#allocation70_spill] sm:$0xff] %v10776_v50  ;;  %3706 = vrot.lane.b32.xlu1 %v13771_v9, %s7004_s27  ;;  %v13777_v9 = vld [vmem:[#allocation132_spill] sm:$0xff] }
 0x52d   : > { %v10782_v55 = vpop.permute.xlu1 %3622 }
 0x530   : > { %3720 = vrot.lane.b32.xlu2 %v13772_v5, %s7005_s28  ;;  %3716 = vrot.lane.b32.xlu0 %v13773_v18, %s7005_s28  ;;  %v13778_v5 = vld [vmem:[#allocation130_spill] sm:$0xff] }
 0x532   : > { %v10788_v6 = vpop.permute.xlu0 %3632  ;;  %v10806_v27 = vpop.permute.xlu2 %3654 }
 0x533   : > { %3712 = vrot.lane.b32.xlu1 %v13774_v14, %s7005_s28  ;;  %v13779_v14 = vld [vmem:[#allocation146_spill] sm:$0xff] }
 0x535   : > { %v10794_v12 = vpop.permute.xlu1 %3628 }
 0x536   : > { %13775 = vst [vmem:[#allocation189_spill] sm:$0xff] %v10794_v12 }
 0x538   : > { %3726 = vrot.lane.b32.xlu2 %v13776_v57, %s7005_s28  ;;  %3722 = vrot.lane.b32.xlu0 %v13777_v9, %s7005_s28  ;;  %v13782_v57 = vld [vmem:[#allocation135_spill] sm:$0xff] }
 0x53a   : > { %v10800_v8 = vpop.permute.xlu0 %3638 }
 0x53b   : > { %3718 = vrot.lane.b32.xlu1 %v13778_v5, %s7005_s28  ;;  %v10820_v5 = vpop.permute.xlu2 %3660 }
 0x53c   : > { %13785 = vst [vmem:[#allocation58_spill] sm:$0xff] %v10820_v5  ;;  %v13814_v5 = vld [vmem:[#allocation169_spill] sm:$0xff] }
 0x53d   : > { %v10804_v18 = vpop.permute.xlu1 %3634 }
 0x540   : > { %3732 = vrot.lane.b32.xlu2 %v13779_v14, %s7006_s29  ;;  %3728 = vrot.lane.b32.xlu0 %v13780_v25, %s7006_s29  ;;  %v13787_v14 = vld [vmem:[#allocation141_spill] sm:$0xff] }
 0x542   : > { %v10812_v2 = vpop.permute.xlu0 %3644 }
 0x543   : > { %13781 = vst [vmem:[#allocation188_spill] sm:$0xff] %v10812_v2  ;;  %3724 = vrot.lane.b32.xlu1 %v13782_v57, %s7005_s28  ;;  %v13790_v57 = vld [vmem:[#allocation150_spill] sm:$0xff]  ;;  %v10834_v3 = vpop.permute.xlu2 %3666  ;;  %v13815_v2 = vld [vmem:[#allocation179_spill] sm:$0xff] }
 0x545   : > { %v10816_v9 = vpop.permute.xlu1 %3640 }
 0x546   : > { %13783 = vst [vmem:[#allocation64_spill] sm:$0xff] %v10816_v9 }
 0x548   : > { %3738 = vrot.lane.b32.xlu2 %v13784_v33, %s7006_s29  ;;  %3734 = vrot.lane.b32.xlu0 %v13786_v7, %s7006_s29 }
 0x54a   : > { %v10824_v21 = vpop.permute.xlu0 %3650 }
 0x54b   : > { %3730 = vrot.lane.b32.xlu1 %v13787_v14, %s7006_s29  ;;  %v13794_v14 = vld [vmem:[#allocation154_spill] sm:$0xff] }
 0x54d   : > { %v10828_v25 = vpop.permute.xlu1 %3646 }
 0x54e   : > { %13788 = vst [vmem:[#allocation194_spill] sm:$0xff] %v10828_v25  ;;  %v13803_v25 = vld [vmem:[#allocation168_spill] sm:$0xff] }
 0x550   : > { %3744 = vrot.lane.b32.xlu2 %v13789_v39, %s7007_s30  ;;  %3740 = vrot.lane.b32.xlu0 %v13790_v57, %s7006_s29  ;;  %v10848_v39 = vpop.permute.xlu2 %3672  ;;  %v13797_v57 = vld [vmem:[#allocation153_spill] sm:$0xff] }
 0x551   : > { %13796 = vst [vmem:[#allocation63_spill] sm:$0xff] %v10848_v39 }
 0x552   : > { %v10836_v33 = vpop.permute.xlu0 %3656 }
 0x553   : > { %13791 = vst [vmem:[#allocation203_spill] sm:$0xff] %v10836_v33  ;;  %3736 = vrot.lane.b32.xlu1 %v13792_v60, %s7006_s29  ;;  %v13800_v60 = vld [vmem:[#allocation160_spill] sm:$0xff] }
 0x555   : > { %v10840_v7 = vpop.permute.xlu1 %3652 }
 0x558   : > { %3750 = vrot.lane.b32.xlu2 %v13793_v51, %s7007_s30  ;;  %3746 = vrot.lane.b32.xlu0 %v13794_v14, %s7007_s30  ;;  %v13801_v51 = vld [vmem:[#allocation157_spill] sm:$0xff]  ;;  %v10862_v14 = vpop.permute.xlu2 %3678 }
 0x559   : > { %13802 = vst [vmem:[#allocation107_spill] sm:$0xff] %v10862_v14  ;;  %v13808_v14 = vld [vmem:[#allocation166_spill] sm:$0xff] }
 0x55a   : > { %v10846_v32 = vpop.permute.xlu0 %3662 }
 0x55b   : > { %13795 = vst [vmem:[#allocation116_spill] sm:$0xff] %v10846_v32  ;;  %3742 = vrot.lane.b32.xlu1 %v13797_v57, %s7006_s29  ;;  %v13804_v57 = vld [vmem:[#allocation163_spill] sm:$0xff] }
 0x55d   : > { %v10852_v20 = vpop.permute.xlu1 %3658 }
 0x55e   : > { %13798 = vst [vmem:[#allocation82_spill] sm:$0xff] %v10852_v20 }
 0x560   : > { %3756 = vrot.lane.b32.xlu2 %v13799_v56, %s7007_s30  ;;  %3752 = vrot.lane.b32.xlu0 %v13800_v60, %s7007_s30  ;;  %v13806_v56 = vld [vmem:[#allocation162_spill] sm:$0xff] }
 0x562   : > { %v10858_v59 = vpop.permute.xlu0 %3668 }
 0x563   : > { %3748 = vrot.lane.b32.xlu1 %v13801_v51, %s7007_s30  ;;  %v10878_v51 = vpop.permute.xlu2 %3684 }
 0x565   : > { %v10864_v32 = vpop.permute.xlu1 %3664 }
 0x568   : > { %3762 = vrot.lane.b32.xlu2 %v13803_v25, %s7008_s4  ;;  %3758 = vrot.lane.b32.xlu0 %v13804_v57, %s7007_s30  ;;  %v13809_v25 = vld [vmem:[#allocation165_spill] sm:$0xff] }
 0x56a   : > { %v10870_v35 = vpop.permute.xlu0 %3674 }
 0x56b   : > { %13805 = vst [vmem:[#allocation139_spill] sm:$0xff] %v10870_v35  ;;  %3754 = vrot.lane.b32.xlu1 %v13806_v56, %s7007_s30  ;;  %v13812_v56 = vld [vmem:[#allocation171_spill] sm:$0xff]  ;;  %v10892_v47 = vpop.permute.xlu2 %3690 }
 0x56c   : > { %13813 = vst [vmem:[#allocation184_spill] sm:$0xff] %v10892_v47 }
 0x56d   : > { %v10874_v60 = vpop.permute.xlu1 %3670 }
 0x570   : > { %3768 = vrot.lane.b32.xlu2 %v13807_v1, %s7008_s4  ;;  %3764 = vrot.lane.b32.xlu0 %v13808_v14, %s7008_s4 }
 0x572   : > { %v10882_v29 = vpop.permute.xlu0 %3680 }
 0x573   : > { %3760 = vrot.lane.b32.xlu1 %v13809_v25, %s7008_s4  ;;  %v13816_v25 = vld [vmem:[#allocation174_spill] sm:$0xff] }
 0x575   : > { %v10886_v57 = vpop.permute.xlu1 %3676 }
 0x576   : > { %13810 = vst [vmem:[#allocation186_spill] sm:$0xff] %v10886_v57 }
 0x578   : > { %3774 = vrot.lane.b32.xlu2 %v13811_v34, %s7008_s4  ;;  %3770 = vrot.lane.b32.xlu0 %v13812_v56, %s7008_s4  ;;  %v10906_v34 = vpop.permute.xlu2 %3696  ;;  %v13818_v56 = vld [vmem:[#allocation173_spill] sm:$0xff] }
 0x57a   : > { %v10894_v1 = vpop.permute.xlu0 %3686 }
 0x57b   : > { %3766 = vrot.lane.b32.xlu1 %v13814_v5, %s7008_s4  ;;  %v13821_v5 = vld [vmem:[#allocation178_spill] sm:$0xff] }
 0x57d   : > { %v10898_v14 = vpop.permute.xlu1 %3682 }
 0x580   : > { %3780 = vrot.lane.b32.xlu2 %v13815_v2, %s7009_s5  ;;  %3776 = vrot.lane.b32.xlu0 %v13816_v25, %s7009_s5  ;;  %v13822_v2 = vld [vmem:[#allocation176_spill] sm:$0xff]  ;;  %v10920_v25 = vpop.permute.xlu2 %3702 }
 0x582   : > { %v10904_v57 = vpop.permute.xlu0 %3692 }
 0x583   : > { %13817 = vst [vmem:[#allocation185_spill] sm:$0xff] %v10904_v57  ;;  %3772 = vrot.lane.b32.xlu1 %v13818_v56, %s7008_s4 }
 0x585   : > { %v10910_v12 = vpop.permute.xlu1 %3688 }
 0x586   : > { %13819 = vst [vmem:[#allocation199_spill] sm:$0xff] %v10910_v12  ;;  %v6770_v12 = vld [vmem:[%s12760_s1 + $0x90] sm:$0xff] }
 0x588   : > { %3786 = vrot.lane.b32.xlu2 %v13820_v0, %s7009_s5  ;;  %3782 = vrot.lane.b32.xlu0 %v13821_v5, %s7009_s5  ;;  %v10932_v5 = vpop.permute.xlu2 %3708 }
 0x589   : > { %13827 = vst [vmem:[#allocation202_spill] sm:$0xff] %v10932_v5 }
 0x58a   : > { %v10916_v48 = vpop.permute.xlu0 %3698 }
 0x58b   : > { %3778 = vrot.lane.b32.xlu1 %v13822_v2, %s7009_s5  ;;  %v13829_v2 = vld [vmem:[#allocation183_spill] sm:$0xff] }
 0x58d   : > { %v10922_v57 = vpop.permute.xlu1 %3694 }
 0x58e   : > { %13823 = vst [vmem:[#allocation149_spill] sm:$0xff] %v10922_v57 }
 0x590   : > { %3788 = vrot.lane.b32.xlu0 %v13824_v43, %s7009_s5  ;;  %v10940_v57 = vpop.permute.xlu2 %3714 }
 0x592   : > { %v10926_v56 = vpop.permute.xlu0 %3704 }
 0x593   : > { %13825 = vst [vmem:[#allocation148_spill] sm:$0xff] %v10926_v56  ;;  %3784 = vrot.lane.b32.xlu1 %v13826_v44, %s7009_s5 }
 0x595   : > { %v10930_v0 = vpop.permute.xlu1 %3700 }
 0x598   : > { %v10946_v50 = vpop.permute.xlu2 %3720 }
 0x599   : > { %13832 = vst [vmem:[#allocation98_spill] sm:$0xff] %v10946_v50 }
 0x59a   : > { %v10934_v47 = vpop.permute.xlu0 %3710 }
 0x59b   : > { %13828 = vst [vmem:[#allocation137_spill] sm:$0xff] %v10934_v47  ;;  %3790 = vrot.lane.b32.xlu1 %v13829_v2, %s7009_s5  ;;  %v6775_v2 = vld [vmem:[%s12760_s1 + $0xb8] sm:$0xff] }
 0x59c   : > { %4119 = vmatpush.bf16.msra.mxu2 %v6775_v2  ;;  %v6772_v2 = vld [vmem:[%s12760_s1 + $0xa0] sm:$0xff] }
 0x59d   : > { %v10938_v35 = vpop.permute.xlu1 %3706 }
 0x59e   : > { %13830 = vst [vmem:[#allocation133_spill] sm:$0xff] %v10938_v35  ;;  %v6774_v35 = vld [vmem:[%s12760_s1 + $0xb0] sm:$0xff] }
 0x5a0   : > { %v10950_v5 = vpop.permute.xlu2 %3726  ;;  %4120 = vmatpush.bf16.msra.mxu2 %v6774_v35  ;;  %v6771_v35 = vld [vmem:[%s12760_s1 + $0x98] sm:$0xff] }
 0x5a1   : > { %13833 = vst [vmem:[#allocation125_spill] sm:$0xff] %v10950_v5  ;;  %v6773_v5 = vld [vmem:[%s12760_s1 + $0xa8] sm:$0xff] }
 0x5a2   : > { %v10942_v20 = vpop.permute.xlu0 %3716 }
 0x5a4   : > { %4121 = vmatpush.bf16.msra.mxu2 %v6773_v5 }
 0x5a5   : > { %v3713_v43 = vpop.permute.xlu1 %3712 }
 0x5a8   : > { %v10967_v50 = vpop.permute.xlu2 %3732  ;;  %4122 = vmatpush.bf16.msra.mxu2 %v6772_v2  ;;  %v6769_v2 = vld [vmem:[%s12760_s1 + $0x88] sm:$0xff] }
 0x5aa   : > { %v10944_v58 = vpop.permute.xlu0 %3722 }
 0x5ab   : > { %13831 = vst [vmem:[#allocation51_spill] sm:$0xff] %v10944_v58 }
 0x5ac   : > { %4123 = vmatpush.bf16.msra.mxu2 %v6771_v35 }
 0x5ad   : > { %v10948_v44 = vpop.permute.xlu1 %3718 }
 0x5b0   : > { %v10982_v28 = vpop.permute.xlu2 %3738  ;;  %4124 = vmatpush.bf16.msra.mxu2 %v6770_v12  ;;  %v3794_v12 = vsel %vm986_vm7, %v10595_v62, %v10676_v22 }
 0x5b1   : > { %13837 = vst [vmem:[#allocation170_spill] sm:$0xff] %v10982_v28 }
 0x5b2   : > { %v3729_v38 = vpop.permute.xlu0 %3728 }
 0x5b4   : > { %4125 = vmatpush.bf16.msra.mxu2 %v6769_v2 }
 0x5b5   : > { %v10952_v47 = vpop.permute.xlu1 %3724 }
 0x5b6   : > { %13834 = vst [vmem:[#allocation177_spill] sm:$0xff] %v10952_v47 }
 0x5ba   : > { %v10960_v63 = vpop.permute.xlu0 %3734 }
 0x5bd   : > { %v10962_v58 = vpop.permute.xlu1 %3730 }
 0x5c2   : > { %v10972_v47 = vpop.permute.xlu0 %3740 }
 0x5c3   : > { %13835 = vst [vmem:[#allocation190_spill] sm:$0xff] %v10972_v47  ;;  %v6768_v47 = vld [vmem:[%s12760_s1 + $0x80] sm:$0xff] }
 0x5c4   : > { %4126 = vmatpush.bf16.msra.mxu2 %v6768_v47 }
 0x5c5   : > { %v10974_v56 = vpop.permute.xlu1 %3736 }
 0x5c6   : > { %13836 = vst [vmem:[#allocation120_spill] sm:$0xff] %v10974_v56  ;;  %v3745_v56 = vpop.permute.xlu2 %3744 }
 0x5ca   : > { %v3747_v5 = vpop.permute.xlu0 %3746 }
 0x5cd   : > { %v10984_v11 = vpop.permute.xlu1 %3742 }
 0x5ce   : > { %13838 = vst [vmem:[#allocation198_spill] sm:$0xff] %v10984_v11  ;;  %v13841_v11 = vld [vmem:[#allocation9_spill] sm:$0xff]  ;;  %v11003_v2 = vpop.permute.xlu2 %3750 }
 0x5cf   : > { %v3817_v33 = vsel %vm1003_vm8, %v3794_v12, %v13841_v11 }
 0x5d2   : > { %v10992_v35 = vpop.permute.xlu0 %3752 }
 0x5d3   : > { %13839 = vst [vmem:[#allocation72_spill] sm:$0xff] %v10992_v35  ;;  %v3833_v35 = vsel %vm1020_vm9, %v3817_v33, %v10696_v30 }
 0x5d4   : > { %v3849_v47 = vsel %vm1037_vm10, %v3833_v35, %v10682_v19 }
 0x5d5   : > { %v10994_v39 = vpop.permute.xlu1 %3748 }
 0x5da   : > { %v10996_v28 = vpop.permute.xlu0 %3758 }
 0x5db   : > { %13840 = vst [vmem:[#allocation209_spill] sm:$0xff] %v10996_v28  ;;  %v3865_v28 = vsel %vm13843_vm4, %v3849_v47, %v10770_v49  ;;  %v3797_v49 = vsel %vm986_vm7, %v10635_v52, %v10622_v26  ;;  %vm13855_vm4 = vmmov %vm13844_vm6 }
 0x5dc   : > { %v3881_v22 = vsel %vm1071_vm12, %v3865_v28, %v10788_v6 }
 0x5dd   : > { %v11005_v9 = vpop.permute.xlu1 %3754  ;;  %v3897_v12 = vsel %vm13844_vm6, %v3881_v22, %v10792_v24  ;;  %v13849_v24 = vld [vmem:[#allocation21_spill] sm:$0xff]  ;;  %vm13856_vm6 = vmmov %vm13845_vm11 }
 0x5de   : > { %13842 = vst [vmem:[#allocation119_spill] sm:$0xff] %v11005_v9  ;;  %v3913_v11 = vsel %vm13845_vm11, %v3897_v12, %v10864_v32  ;;  %v11019_v9 = vpop.permute.xlu2 %3756  ;;  %v3819_v33 = vsel %vm1003_vm8, %v3797_v49, %v13849_v24  ;;  %vm13857_vm11 = vmmov %vm13846_vm1 }
 0x5df   : > { %v3929_v30 = vsel %vm13846_vm1, %v3913_v11, %v10882_v29  ;;  %v3835_v29 = vsel %vm1020_vm9, %v3819_v33, %v10712_v4  ;;  %v6826_v4 = vld [vmem:[%s12761_s2] ss:$0 sm:$0xff]  ;;  %vm13858_vm1 = vmmov %vm13847_vm2 }
 0x5e0   : > { %v3945_v6 = vsel %vm13847_vm2, %v3929_v30, %v10906_v34  ;;  %v3851_v11 = vsel %vm1037_vm10, %v3835_v29, %v10730_v37  ;;  %4116 = vrot.lane.b32.xlu2 %v6826_v4, %s7010_s6  ;;  %v13859_v30 = vld [vmem:[#allocation20_spill] sm:$0xff]  ;;  %vm13860_vm2 = vmmov %vm13848_vm3  ;;  %v3803_v29 = vsel %vm986_vm7, %v10603_v17, %v10688_v10 }
 0x5e1   : > { %v3961_v28 = vsel %vm13848_vm3, %v3945_v6, %v3713_v43  ;;  %v3867_v43 = vsel %vm13853_vm0, %v3851_v11, %v10720_v31  ;;  %vm13861_vm3 = vmmov %vm13850_vm13  ;;  %v13870_v11 = vld [vmem:[#allocation22_spill] sm:$0xff] }
 0x5e2   : > { %v3765_v54 = vpop.permute.xlu0 %3764  ;;  %v3977_v32 = vsel %vm13850_vm13, %v3961_v28, %v3729_v38  ;;  %v3883_v38 = vsel %vm1071_vm12, %v3867_v43, %v10804_v18  ;;  %vm13862_vm13 = vmmov %vm13851_vm14 }
 0x5e3   : > { %v3993_v52 = vsel %vm13851_vm14, %v3977_v32, %v3745_v56  ;;  %v3899_v56 = vsel %vm13855_vm4, %v3883_v38, %v10824_v21  ;;  %vm13863_vm14 = vmmov %vm13853_vm0  ;;  %v13887_v38 = vld [vmem:[#allocation64_spill] sm:$0xff] }
 0x5e4   : > { %v3915_v31 = vsel %vm13856_vm6, %v3899_v56, %v10834_v3  ;;  %vm13864_vm0 = vmmov %vm13854_vm5 }
 0x5e5   : > { %v3761_v62 = vpop.permute.xlu1 %3760  ;;  %v3931_v18 = vsel %vm13857_vm11, %v3915_v31, %v10898_v14  ;;  %v13892_v31 = vld [vmem:[#allocation76_spill] sm:$0xff] }
 0x5e6   : > { %v3763_v26 = vpop.permute.xlu2 %3762  ;;  %v4009_v34 = vsel %vm13852_vm15, %v3993_v52, %v3761_v62  ;;  %v3800_v62 = vsel %vm986_vm7, %v10652_v42, %v10672_v53  ;;  %v3947_v12 = vsel %vm13858_vm1, %v3931_v18, %v10916_v48 }
 0x5e7   : > { %v3821_v21 = vsel %vm1003_vm8, %v3800_v62, %v13859_v30  ;;  %v3963_v6 = vsel %vm13860_vm2, %v3947_v12, %v10940_v57  ;;  %v13896_v12 = vld [vmem:[#allocation148_spill] sm:$0xff] }
 0x5e8   : > { %v3979_v3 = vsel %vm13861_vm3, %v3963_v6, %v10962_v58  ;;  %v3837_v28 = vsel %vm1020_vm9, %v3821_v21, %v10658_v41  ;;  %v13898_v6 = vld [vmem:[#allocation23_spill] sm:$0xff] }
 0x5e9   : > { %v3995_v42 = vsel %vm13862_vm13, %v3979_v3, %v3747_v5  ;;  %v3853_v14 = vsel %vm1037_vm10, %v3837_v28, %v10746_v46  ;;  %v13899_v28 = vld [vmem:[#allocation98_spill] sm:$0xff] }
 0x5ea   : > { %v11023_v19 = vpop.permute.xlu0 %3770  ;;  %v3869_v48 = vsel %vm13863_vm14, %v3853_v14, %v10766_v16  ;;  %v4011_v33 = vsel %vm13852_vm15, %v3995_v42, %v3763_v26  ;;  %v13901_v14 = vld [vmem:[#allocation120_spill] sm:$0xff] }
 0x5eb   : > { %v3885_v57 = vsel %vm1071_vm12, %v3869_v48, %v10764_v15  ;;  %v13903_v48 = vld [vmem:[#allocation192_spill] sm:$0xff] }
 0x5ed   : > { %v11034_v35 = vpop.permute.xlu1 %3766 }
 0x5ee   : > { %v3769_v49 = vpop.permute.xlu2 %3768 }
 0x5f2   : > { %v3777_v47 = vpop.permute.xlu0 %3776 }
 0x5f3   : > { %v4025_v22 = vsel %vm13854_vm5, %v4009_v34, %v3777_v47  ;;  %vm13865_vm5 = vmmov %vm13855_vm4  ;;  %v13880_v34 = vld [vmem:[#allocation24_spill] sm:$0xff] }
 0x5f4   : > { %4127 = vmatmul.bf16.vlgmr.msra.gmra.mxu2 %v4025_v22  ;;  %v3901_v58 = vsel %vm13865_vm5, %v3885_v57, %v10840_v7  ;;  %vm13866_vm4 = vmmov %vm13856_vm6  ;;  %v3823_v7 = vsel %vm1003_vm8, %v3803_v29, %v13870_v11 }
 0x5f5   : > { %v11052_v37 = vpop.permute.xlu1 %3772  ;;  %v3917_v41 = vsel %vm13866_vm4, %v3901_v58, %v10858_v59  ;;  %vm13867_vm6 = vmmov %vm13857_vm11  ;;  %v3839_v52 = vsel %vm1020_vm9, %v3823_v7, %v10708_v23  ;;  %v13906_v58 = vld [vmem:[#allocation126_spill] sm:$0xff] }
 0x5f6   : > { %v11085_v5 = vpop.permute.xlu2 %3774  ;;  %v3933_v46 = vsel %vm13867_vm6, %v3917_v41, %v10878_v51  ;;  %vm13868_vm11 = vmmov %vm13858_vm1  ;;  %v3855_v10 = vsel %vm1037_vm10, %v3839_v52, %v10694_v45  ;;  %v3806_v45 = vsel %vm986_vm7, %v10646_v61, %v10633_v40 }
 0x5f7   : > { %v3949_v16 = vsel %vm13868_vm11, %v3933_v46, %v10930_v0  ;;  %vm13869_vm1 = vmmov %vm13860_vm2  ;;  %v3825_v47 = vsel %vm1003_vm8, %v3806_v45, %v13880_v34  ;;  %v13921_v45 = vld [vmem:[#allocation51_spill] sm:$0xff] }
 0x5f8   : > { %v3965_v15 = vsel %vm13869_vm1, %v3949_v16, %v10942_v20  ;;  %vm13871_vm2 = vmmov %vm13861_vm3  ;;  %v3871_v20 = vsel %vm13863_vm14, %v3855_v10, %v10782_v55  ;;  %v13907_v16 = vld [vmem:[#allocation70_spill] sm:$0xff] }
 0x5f9   : > { %v3981_v59 = vsel %vm13871_vm2, %v3965_v15, %v10967_v50  ;;  %vm13872_vm3 = vmmov %vm13862_vm13  ;;  %v3887_v50 = vsel %vm1071_vm12, %v3871_v20, %v10800_v8  ;;  %v13915_v20 = vld [vmem:[#allocation184_spill] sm:$0xff] }
 0x5fa   : > { %v3997_v51 = vsel %vm13872_vm3, %v3981_v59, %v10994_v39  ;;  %vm13873_vm13 = vmmov %vm13852_vm15  ;;  %v3783_v43 = vpop.permute.xlu0 %3782  ;;  %v13910_v59 = vld [vmem:[#allocation114_spill] sm:$0xff] }
 0x5fb   : > { %v4013_v0 = vsel %vm13873_vm13, %v3997_v51, %v3765_v54  ;;  %vm13874_vm15 = vmmov %vm13864_vm0  ;;  %v13911_v51 = vld [vmem:[#allocation82_spill] sm:$0xff] }
 0x5fd   : > { %v3779_v53 = vpop.permute.xlu1 %3778 }
 0x5fe   : > { %v4028_v32 = vsel %vm13864_vm0, %v4011_v33, %v3779_v53  ;;  %v3781_v26 = vpop.permute.xlu2 %3780  ;;  %vm13875_vm0 = vmmov %vm13865_vm5 }
 0x5ff   : > { %v4031_v17 = vsel %vm13874_vm15, %v4013_v0, %v3781_v26  ;;  %v3903_v23 = vsel %vm13875_vm0, %v3887_v50, %v10806_v27  ;;  %vm13876_vm5 = vmmov %vm13866_vm4  ;;  %v13913_v26 = vld [vmem:[#allocation139_spill] sm:$0xff]  ;;  %v13917_v50 = vld [vmem:[#allocation133_spill] sm:$0xff] }
 0x600   : > { %v3919_v39 = vsel %vm13876_vm5, %v3903_v23, %v10874_v60  ;;  %vm13877_vm4 = vmmov %vm13867_vm6  ;;  %v3841_v60 = vsel %vm1020_vm9, %v3825_v47, %v10724_v13  ;;  %v13888_v13 = vld [vmem:[#allocation203_spill] sm:$0xff] }
 0x601   : > { %v3935_v54 = vsel %vm13877_vm4, %v3919_v39, %v10894_v1  ;;  %vm13878_vm6 = vmmov %vm13868_vm11  ;;  %v3857_v1 = vsel %vm1037_vm10, %v3841_v60, %v10742_v36  ;;  %v13890_v36 = vld [vmem:[#allocation63_spill] sm:$0xff]  ;;  %v13919_v39 = vld [vmem:[#allocation158_spill] sm:$0xff] }
 0x602   : > { %v3951_v55 = vsel %vm13878_vm6, %v3935_v54, %v10920_v25  ;;  %vm13879_vm11 = vmmov %vm13869_vm1 }
 0x603   : > { %v3967_v8 = vsel %vm13879_vm11, %v3951_v55, %v10948_v44  ;;  %vm13881_vm1 = vmmov %vm13871_vm2  ;;  %v13884_v44 = vld [vmem:[#allocation205_spill] sm:$0xff] }
 0x604   : > { %4132 = vmatmul.bf16.gmra.mxu2 %v4028_v32  ;;  %v3983_v27 = vsel %vm13881_vm1, %v3967_v8, %v10960_v63  ;;  %vm13882_vm2 = vmmov %vm13872_vm3  ;;  %v13904_v32 = vld [vmem:[#allocation72_spill] sm:$0xff]  ;;  %v13923_v8 = vld [vmem:[#allocation25_spill] sm:$0xff] }
 0x605   : > { %v3999_v40 = vsel %vm13882_vm2, %v3983_v27, %v11003_v2  ;;  %vm13883_vm3 = vmmov %vm13873_vm13  ;;  %v13893_v2 = vld [vmem:[#allocation142_spill] sm:$0xff]  ;;  %v3785_v46 = vpop.permute.xlu1 %3784 }
 0x606   : > { %v4015_v25 = vsel %vm13883_vm3, %v3999_v40, %v11034_v35  ;;  %vm13885_vm13 = vmmov %vm13863_vm14  ;;  %v3809_v62 = vsel %vm986_vm7, %v13893_v2, %v13892_v31  ;;  %v13894_v35 = vld [vmem:[#allocation199_spill] sm:$0xff]  ;;  %v13924_v27 = vld [vmem:[#allocation170_spill] sm:$0xff] }
 0x607   : > { %v3873_v61 = vsel %vm13885_vm13, %v3857_v1, %v13884_v44  ;;  %vm13886_vm14 = vmmov %vm13874_vm15  ;;  %v3827_v3 = vsel %vm1003_vm8, %v3809_v62, %v13898_v6  ;;  %v13926_v1 = vld [vmem:[#allocation145_spill] sm:$0xff]  ;;  %v13927_v40 = vld [vmem:[#allocation119_spill] sm:$0xff] }
 0x608   : > { %v4034_v22 = vsel %vm13886_vm14, %v4015_v25, %v3783_v43  ;;  %v3889_v63 = vsel %vm1071_vm12, %v3873_v61, %v13887_v38  ;;  %vm13889_vm15 = vmmov %vm13875_vm0  ;;  %v3843_v33 = vsel %vm1020_vm9, %v3827_v3, %v13903_v48  ;;  %v3787_v61 = vpop.permute.xlu2 %3786  ;;  %v13934_v31 = vld [vmem:[#allocation58_spill] sm:$0xff]  ;;  %v13946_v48 = vld [vmem:[#allocation27_spill] sm:$0xff] }
 0x609   : > { %v3905_v4 = vsel %vm13889_vm15, %v3889_v63, %v13888_v13  ;;  %vm13891_vm0 = vmmov %vm13876_vm5  ;;  %v3859_v41 = vsel %vm1037_vm10, %v3843_v33, %v13906_v58  ;;  %v13931_v63 = vld [vmem:[#allocation189_spill] sm:$0xff]  ;;  %v13936_v62 = vld [vmem:[#allocation186_spill] sm:$0xff] }
 0x60a   : > { %v3921_v56 = vsel %vm13891_vm0, %v3905_v4, %v13890_v36  ;;  %vm13895_vm5 = vmmov %vm13877_vm4  ;;  %v13933_v36 = vld [vmem:[#allocation188_spill] sm:$0xff]  ;;  %v13949_v58 = vld [vmem:[#allocation90_spill] sm:$0xff] }
 0x60b   : > { %v3937_v18 = vsel %vm13895_vm5, %v3921_v56, %v13894_v35  ;;  %vm13897_vm4 = vmmov %vm13878_vm6 }
 0x60c   : > { %v3953_v21 = vsel %vm13897_vm4, %v3937_v18, %v13896_v12  ;;  %vm13900_vm6 = vmmov %vm13879_vm11  ;;  %v13940_v12 = vld [vmem:[#allocation122_spill] sm:$0xff] }
 0x60d   : > { %v3969_v42 = vsel %vm13900_vm6, %v3953_v21, %v13899_v28  ;;  %vm13902_vm11 = vmmov %vm13881_vm1  ;;  %v13941_v21 = vld [vmem:[#allocation95_spill] sm:$0xff]  ;;  %v13942_v28 = vld [vmem:[#allocation202_spill] sm:$0xff] }
 0x60e   : > { %v3985_v53 = vsel %vm13902_vm11, %v3969_v42, %v13901_v14  ;;  %vm13905_vm1 = vmmov %vm13882_vm2  ;;  %v3815_v3 = vsel %vm986_vm7, %v13941_v21, %v13940_v12  ;;  %v13944_v14 = vld [vmem:[#allocation177_spill] sm:$0xff] }
 0x60f   : > { %v4001_v57 = vsel %vm13905_vm1, %v3985_v53, %v13904_v32  ;;  %vm13908_vm2 = vmmov %vm13885_vm13  ;;  %v3831_v33 = vsel %vm1003_vm8, %v3815_v3, %v13946_v48  ;;  %v13947_v32 = vld [vmem:[#allocation190_spill] sm:$0xff] }
 0x610   : > { %v3875_v29 = vsel %vm13908_vm2, %v3859_v41, %v13907_v16  ;;  %v4017_v15 = vsel %vm13883_vm3, %v4001_v57, %v3769_v49  ;;  %vm13909_vm13 = vmmov %vm13886_vm14  ;;  %v13920_v49 = vld [vmem:[#allocation136_spill] sm:$0xff]  ;;  %v3847_v41 = vsel %vm1020_vm9, %v3831_v33, %v13949_v58 }
 0x611   : > { %v4037_v7 = vsel %vm13909_vm13, %v4017_v15, %v3785_v46  ;;  %v3891_v52 = vsel %vm1071_vm12, %v3875_v29, %v13910_v59  ;;  %vm13912_vm14 = vmmov %vm13889_vm15  ;;  %v3812_v54 = vsel %vm986_vm7, %v13920_v49, %v13919_v39  ;;  %v13950_v46 = vld [vmem:[#allocation92_spill] sm:$0xff]  ;;  %v3789_v29 = vpop.permute.xlu0 %3788  ;;  %v13963_v39 = vld [vmem:[#allocation137_spill] sm:$0xff] }
 0x612   : > { %v3907_v0 = vsel %vm13912_vm14, %v3891_v52, %v13911_v51  ;;  %vm13914_vm15 = vmmov %vm13891_vm0  ;;  %v3829_v47 = vsel %vm1003_vm8, %v3812_v54, %v13923_v8  ;;  %v3863_v16 = vsel %vm1037_vm10, %v3847_v41, %v13950_v46  ;;  %v13953_v59 = vld [vmem:[#allocation60_spill] sm:$0xff]  ;;  %v13965_v49 = vld [vmem:[#allocation125_spill] sm:$0xff] }
 0x613   : > { %v3923_v10 = vsel %vm13914_vm15, %v3907_v0, %v13913_v26  ;;  %vm13916_vm0 = vmmov %vm13895_vm5  ;;  %v3845_v43 = vsel %vm1020_vm9, %v3829_v47, %v13926_v1  ;;  %v13956_v0 = vld [vmem:[#allocation194_spill] sm:$0xff]  ;;  %v13969_v47 = vld [vmem:[#allocation209_spill] sm:$0xff] }
 0x614   : > { %4137 = vmatmul.bf16.gmra.mxu2 %v4031_v17  ;;  %v3939_v17 = vsel %vm13916_vm0, %v3923_v10, %v13915_v20  ;;  %vm13918_vm5 = vmmov %vm13897_vm4  ;;  %v13957_v10 = vld [vmem:[#allocation116_spill] sm:$0xff] }
 0x615   : > { %v3955_v23 = vsel %vm13918_vm5, %v3939_v17, %v13917_v50  ;;  %vm13922_vm4 = vmmov %vm13900_vm6  ;;  %v13959_v17 = vld [vmem:[#allocation107_spill] sm:$0xff] }
 0x616   : > { %v3971_v55 = vsel %vm13922_vm4, %v3955_v23, %v13921_v45  ;;  %vm13925_vm6 = vmmov %vm13902_vm11  ;;  %v13961_v23 = vld [vmem:[#allocation149_spill] sm:$0xff]  ;;  %v13967_v45 = vld [vmem:[#allocation198_spill] sm:$0xff] }
 0x617   : > { %v3987_v60 = vsel %vm13925_vm6, %v3971_v55, %v13924_v27  ;;  %vm13928_vm11 = vmmov %vm13905_vm1 }
 0x618   : > { %v4003_v25 = vsel %vm13928_vm11, %v3987_v60, %v13927_v40  ;;  %vm13929_vm1 = vmmov %vm13883_vm3  ;;  %v3791_v60 = vpop.permute.xlu1 %3790 }
 0x619   : > { %v4019_v44 = vsel %vm13929_vm1, %v4003_v25, %v11023_v19  ;;  %vm13932_vm3 = vmmov %vm13909_vm13  ;;  %v13938_v19 = vld [vmem:[#allocation185_spill] sm:$0xff] }
 0x61a   : > { %v4040_v4 = vsel %vm13932_vm3, %v4019_v44, %v3787_v61  ;;  %vm13935_vm13 = vmmov %vm13912_vm14 }
 0x61b   : > { %vm13937_vm14 = vmmov %vm13914_vm15 }
 0x61c   : > { %vm13939_vm15 = vmmov %vm13916_vm0 }
 0x61d   : > { %vm13943_vm0 = vmmov %vm13918_vm5 }
 0x61e   : > { %vm13945_vm5 = vmmov %vm13922_vm4 }
 0x61f   : > { %vm13948_vm4 = vmmov %vm13925_vm6 }
 0x620   : > { %vm13951_vm6 = vmmov %vm13928_vm11 }
 0x621   : > { %vm13952_vm11 = vmmov %vm13929_vm1 }
 0x622   : > { %vm13954_vm1 = vmmov %vm13908_vm2 }
 0x623   : > { %v3879_v52 = vsel %vm13954_vm1, %v3863_v16, %v13953_v59 }
 0x624   : > { %4142 = vmatmul.bf16.gmra.mxu2 %v4034_v22  ;;  %v13930_v22 = vld [vmem:[#allocation196_spill] sm:$0xff]  ;;  %v3895_v26 = vsel %vm1071_vm12, %v3879_v52, %v13956_v0 }
 0x625   : > { %v3861_v38 = vsel %vm1037_vm10, %v3845_v43, %v13930_v22 }
 0x626   : > { %v3877_v13 = vsel %vm13908_vm2, %v3861_v38, %v13931_v63  ;;  %vm13955_vm2 = vmmov %vm13932_vm3 }
 0x627   : > { %v3893_v56 = vsel %vm1071_vm12, %v3877_v13, %v13933_v36  ;;  %vm13958_vm3 = vmmov %vm13935_vm13 }
 0x628   : > { %v3909_v2 = vsel %vm13935_vm13, %v3893_v56, %v13934_v31  ;;  %v3911_v20 = vsel %vm13958_vm3, %v3895_v26, %v13957_v10  ;;  %vm13960_vm13 = vmmov %vm13937_vm14 }
 0x629   : > { %v3925_v35 = vsel %vm13937_vm14, %v3909_v2, %v13936_v62  ;;  %v3927_v50 = vsel %vm13960_vm13, %v3911_v20, %v13959_v17  ;;  %vm13962_vm14 = vmmov %vm13939_vm15 }
 0x62a   : > { %v3941_v18 = vsel %vm13939_vm15, %v3925_v35, %v13938_v19  ;;  %vm13964_vm15 = vmmov %vm13943_vm0 }
 0x62b   : > { %v3957_v42 = vsel %vm13943_vm0, %v3941_v18, %v13942_v28  ;;  %vm13966_vm0 = vmmov %vm13945_vm5 }
 0x62c   : > { %v3973_v53 = vsel %vm13945_vm5, %v3957_v42, %v13944_v14  ;;  %vm13968_vm5 = vmmov %vm13948_vm4 }
 0x62d   : > { %v3989_v57 = vsel %vm13948_vm4, %v3973_v53, %v13947_v32  ;;  %vm13970_vm4 = vmmov %vm13951_vm6 }
 0x62e   : > { %v4005_v15 = vsel %vm13951_vm6, %v3989_v57, %v11019_v9  ;;  %v3943_v9 = vsel %vm13962_vm14, %v3927_v50, %v13961_v23  ;;  %vm13971_vm6 = vmmov %vm13952_vm11 }
 0x634   : > { %4147 = vmatmul.bf16.gmra.mxu2 %v4037_v7  ;;  %v4021_v7 = vsel %vm13952_vm11, %v4005_v15, %v11052_v37  ;;  %v3959_v37 = vsel %vm13964_vm15, %v3943_v9, %v13963_v39  ;;  %vm13972_vm11 = vmmov %vm13955_vm2 }
 0x635   : > { %v4043_v51 = vsel %vm13955_vm2, %v4021_v7, %v3789_v29  ;;  %v3975_v54 = vsel %vm13966_vm0, %v3959_v37, %v13965_v49 }
 0x636   : > { %v3991_v55 = vsel %vm13968_vm5, %v3975_v54, %v13967_v45 }
 0x637   : > { %v4007_v27 = vsel %vm13970_vm4, %v3991_v55, %v13969_v47 }
 0x638   : > { %v4023_v1 = vsel %vm13971_vm6, %v4007_v27, %v11085_v5 }
 0x639   : > { %v4046_v43 = vsel %vm13972_vm11, %v4023_v1, %v3791_v60 }
 0x63a   : > { %v11248_v40 = vpop.permute.xlu2 %4116 }
 0x644   : > { %4152 = vmatmul.bf16.gmra.mxu2 %v4040_v4 }
 0x654   : > { %4157 = vmatmul.bf16.gmra.mxu2 %v4043_v51 }
 0x664   : > { %4162 = vmatmul.bf16.gmra.mxu2 %v4046_v43 }
 0x677   : > { %v4128_v25 = vpop.f32.mrf.mxu2 }
 0x678   : > { %v11251_v44 = vadd.f32 %v4128_v25, %v11248_v40 }
 0x67a   : > { %v11254_v61 = vmul.f32 0.70710677, %v11251_v44 }
 0x67c   : > { %v4200_v22 = vmul.f32 %v11254_v61, %v11254_v61 }
 0x67e   : > { %v4201_v38 = vmin.f32 %v4200_v22, 16.0 }
 0x67f   : > { %v4130_v63 = vpop.f32.mrf.mxu2 }
 0x680   : > { %v4202_v13 = vmul.f32 2.1237322e-06, %v4201_v38  ;;  %v4213_v4 = vmul.f32 3.8918573e-05, %v4201_v38  ;;  %v11259_v5 = vadd.f32 %v4130_v63, %v11248_v40 }
 0x682   : > { %v4203_v36 = vadd.f32 0.00028619796, %v4202_v13  ;;  %v4214_v56 = vadd.f32 0.001143296, %v4213_v4  ;;  %v11262_v31 = vmul.f32 0.70710677, %v11259_v5 }
 0x684   : > { %v4204_v2 = vmul.f32 %v4203_v36, %v4201_v38  ;;  %v4215_v62 = vmul.f32 %v4214_v56, %v4201_v38  ;;  %v4240_v35 = vmul.f32 %v11262_v31, %v11262_v31 }
 0x686   : > { %v4205_v19 = vadd.f32 0.0036580483, %v4204_v2  ;;  %v4216_v18 = vadd.f32 0.014752088, %v4215_v62  ;;  %v4241_v12 = vmin.f32 %v4240_v35, 16.0 }
 0x687   : > { %v4133_v21 = vpop.f32.mrf.mxu2 }
 0x688   : > { %v4206_v3 = vmul.f32 %v4205_v19, %v4201_v38  ;;  %v4217_v28 = vmul.f32 %v4216_v18, %v4201_v38  ;;  %v11267_v42 = vadd.f32 %v4133_v21, %v11248_v40  ;;  %v4242_v14 = vmul.f32 2.1237322e-06, %v4241_v12 }
 0x689   : > { %v4253_v53 = vmul.f32 3.8918573e-05, %v4241_v12 }
 0x68a   : > { %v4207_v33 = vadd.f32 0.05243302, %v4206_v3  ;;  %v4218_v32 = vadd.f32 0.112945676, %v4217_v28  ;;  %v4243_v57 = vadd.f32 0.00028619796, %v4242_v14 }
 0x68b   : > { %v4254_v58 = vadd.f32 0.001143296, %v4253_v53  ;;  %v11270_v41 = vmul.f32 0.70710677, %v11267_v42 }
 0x68c   : > { %v4219_v46 = vmul.f32 %v4218_v32, %v4201_v38  ;;  %v4208_v16 = vmul.f32 %v4207_v33, %v4201_v38  ;;  %v4244_v29 = vmul.f32 %v4243_v57, %v4241_v12 }
 0x68d   : > { %v4255_v15 = vmul.f32 %v4254_v58, %v4241_v12  ;;  %v4280_v7 = vmul.f32 %v11270_v41, %v11270_v41 }
 0x68e   : > { %v4220_v59 = vadd.f32 0.4994258, %v4219_v46  ;;  %v4245_v52 = vadd.f32 0.0036580483, %v4244_v29  ;;  %v4209_v17 = vadd.f32 0.18741608, %v4208_v16 }
 0x68f   : > { %v4256_v51 = vadd.f32 0.014752088, %v4255_v15  ;;  %v11274_v0 = vmin.f32 %v4280_v7, 16.0  ;;  %v4135_v26 = vpop.f32.mrf.mxu2 }
 0x690   : > { %v4221_v10 = vmul.f32 %v4220_v59, %v4201_v38  ;;  %v11277_v20 = vadd.f32 %v4135_v26, %v11248_v40  ;;  %v4246_v50 = vmul.f32 %v4245_v52, %v4241_v12  ;;  %v4210_v47 = vmul.f32 %v4209_v17, %v4201_v38 }
 0x691   : > { %v4257_v23 = vmul.f32 %v4256_v51, %v4241_v12  ;;  %v4282_v9 = vmul.f32 2.1237322e-06, %v11274_v0  ;;  %v4293_v37 = vmul.f32 3.8918573e-05, %v11274_v0 }
 0x692   : > { %v4222_v39 = vadd.f32 1.0, %v4221_v10  ;;  %v11282_v49 = vmul.f32 0.70710677, %v11277_v20  ;;  %v4247_v54 = vadd.f32 0.05243302, %v4246_v50 }
 0x693   : > { %v4258_v45 = vadd.f32 0.112945676, %v4257_v23  ;;  %v4283_v55 = vadd.f32 0.00028619796, %v4282_v9  ;;  %v4294_v43 = vadd.f32 0.001143296, %v4293_v37 }
 0x694   : > { %6892 = vrcp.f32 %v4222_v39  ;;  %v4248_v27 = vmul.f32 %v4247_v54, %v4241_v12  ;;  %v4320_v25 = vmul.f32 %v11282_v49, %v11282_v49  ;;  %v4211_v2 = vadd.f32 1.1283791, %v4210_v47 }
 0x695   : > { %v4259_v60 = vmul.f32 %v4258_v45, %v4241_v12  ;;  %v4284_v1 = vmul.f32 %v4283_v55, %v11274_v0  ;;  %v4295_v36 = vmul.f32 %v4294_v43, %v11274_v0  ;;  %v4232_v14 = vand.u32 2147483647, %v4222_v39 }
 0x696   : > { %v4249_v22 = vadd.f32 0.18741608, %v4248_v27  ;;  %v11288_v56 = vmin.f32 %v4320_v25, 16.0  ;;  %v4234_v53 = vand.u32 2147483648, %v4222_v39  ;;  %v4212_v15 = vmul.f32 %v4211_v2, %v11254_v61 }
 0x697   : > { %v4260_v63 = vadd.f32 0.4994258, %v4259_v60  ;;  %v4138_v13 = vpop.f32.mrf.mxu2  ;;  %v4285_v4 = vadd.f32 0.0036580483, %v4284_v1  ;;  %v4296_v18 = vadd.f32 0.014752088, %v4295_v36  ;;  %vm4228_vm2 = vweird.f32 %v4222_v39 }
 0x698   : > { %v4250_v62 = vmul.f32 %v4249_v22, %v4241_v12  ;;  %v4322_v21 = vmul.f32 2.1237322e-06, %v11288_v56  ;;  %v4333_v3 = vmul.f32 3.8918573e-05, %v11288_v56  ;;  %v11299_v29 = vadd.f32 %v4138_v13, %v11248_v40 }
 0x699   : > { %v4261_v35 = vmul.f32 %v4260_v63, %v4241_v12  ;;  %v4286_v19 = vmul.f32 %v4285_v4, %v11274_v0  ;;  %v4297_v57 = vmul.f32 %v4296_v18, %v11274_v0  ;;  %v4168_v12 = vmul.f32 0.5, %v11251_v44 }
 0x69a   : > { %v6893_v38 = vpop.eup %6892  ;;  %v4323_v58 = vadd.f32 0.00028619796, %v4322_v21  ;;  %v4334_v46 = vadd.f32 0.001143296, %v4333_v3  ;;  %v4251_v7 = vadd.f32 1.1283791, %v4250_v62 }
 0x69b   : > { %v4224_v28 = vmul.f32 %v6893_v38, %v4222_v39  ;;  %v11293_v33 = vadd.f32 1.0, %v4261_v35  ;;  %v4287_v32 = vadd.f32 0.05243302, %v4286_v19  ;;  %v4298_v52 = vadd.f32 0.112945676, %v4297_v57 }
 0x69c   : > { %vm4229_vm1 = vweird.f32 %v6893_v38  ;;  %v4324_v26 = vmul.f32 %v4323_v58, %v11288_v56  ;;  %v4335_v10 = vmul.f32 %v4334_v46, %v11288_v56  ;;  %vm11305_vm3 = vcmp.eq.f32.partialorder %v4232_v14, 8.507059e+37 }
 0x69d   : > { %v4225_v16 = vsub.f32 1.0, %v4224_v28  ;;  %6894 = vrcp.f32 %v11293_v33  ;;  %v4288_v59 = vmul.f32 %v4287_v32, %v11274_v0  ;;  %v4235_v50 = vor.u32 1.1754944e-38, %v4234_v53  ;;  %vm4230_vm13 = vmor %vm4228_vm2, %vm4229_vm1 }
 0x69e   : > { %v4299_v23 = vmul.f32 %v4298_v52, %v11274_v0  ;;  %v4325_v9 = vadd.f32 0.0036580483, %v4324_v26  ;;  %v4336_v37 = vadd.f32 0.014752088, %v4335_v10  ;;  %v11311_v54 = vmul.f32 0.70710677, %v11299_v29 }
 0x69f   : > { %v4226_v51 = vmul.f32 %v6893_v38, %v4225_v16  ;;  %v4140_v17 = vpop.f32.mrf.mxu2  ;;  %v4252_v45 = vmul.f32 %v4251_v7, %v11262_v31  ;;  %vm4268_vm14 = vweird.f32 %v11293_v33  ;;  %v4289_v55 = vadd.f32 0.18741608, %v4288_v59 }
 0x6a0   : > { %v4300_v39 = vadd.f32 0.4994258, %v4299_v23  ;;  %v4326_v60 = vmul.f32 %v4325_v9, %v11288_v56  ;;  %v4337_v1 = vmul.f32 %v4336_v37, %v11288_v56  ;;  %v4360_v43 = vmul.f32 %v11311_v54, %v11311_v54 }
 0x6a1   : > { %v4227_v61 = vadd.f32 %v6893_v38, %v4226_v51  ;;  %v4272_v31 = vand.u32 2147483647, %v11293_v33  ;;  %v11324_v63 = vadd.f32 %v4140_v17, %v11248_v40  ;;  %v4274_v35 = vand.u32 2147483648, %v11293_v33 }
 0x6a2   : > { %v4301_v4 = vmul.f32 %v4300_v39, %v11274_v0  ;;  %v4327_v36 = vadd.f32 0.05243302, %v4326_v60  ;;  %v4338_v2 = vadd.f32 0.112945676, %v4337_v1  ;;  %v11329_v19 = vmin.f32 %v4360_v43, 16.0 }
 0x6a3   : > { %v6895_v47 = vpop.eup %6894  ;;  %v4231_v27 = vsel %vm4230_vm13, %v6893_v38, %v4227_v61  ;;  %v4290_v38 = vmul.f32 %v4289_v55, %v11274_v0  ;;  %vm11337_vm0 = vcmp.eq.f32.partialorder %v4272_v31, 8.507059e+37  ;;  %v11343_v0 = vmul.f32 0.70710677, %v11324_v63 }
 0x6a4   : > { %v4236_v25 = vsel %vm11305_vm3, %v4235_v50, %v4231_v27  ;;  %v4264_v22 = vmul.f32 %v6895_v47, %v11293_v33  ;;  %v11331_v21 = vadd.f32 1.0, %v4301_v4  ;;  %v4328_v3 = vmul.f32 %v4327_v36, %v11288_v56 }
 0x6a5   : > { %v4237_v13 = vmul.f32 %v4236_v25, %v4212_v15  ;;  %v4339_v28 = vmul.f32 %v4338_v2, %v11288_v56  ;;  %vm4269_vm15 = vweird.f32 %v6895_v47  ;;  %v4362_v53 = vmul.f32 2.1237322e-06, %v11329_v19 }
 0x6a6   : > { %v4265_v62 = vsub.f32 1.0, %v4264_v22  ;;  %v4373_v32 = vmul.f32 3.8918573e-05, %v11329_v19  ;;  %6896 = vrcp.f32 %v11331_v21  ;;  %v4275_v15 = vor.u32 1.1754944e-38, %v4274_v35  ;;  %vm4270_vm5 = vmor %vm4268_vm14, %vm4269_vm15 }
 0x6a7   : > { %v6669_v18 = vclamps-f32 %v4237_v13, 1.0  ;;  %v4143_v57 = vpop.f32.mrf.mxu2  ;;  %v4329_v7 = vadd.f32 0.18741608, %v4328_v3  ;;  %v4340_v59 = vadd.f32 0.4994258, %v4339_v28  ;;  %v4400_v33 = vmul.f32 %v11343_v0, %v11343_v0 }
 0x6a8   : > { %v4266_v14 = vmul.f32 %v6895_v47, %v4265_v62  ;;  %v4291_v51 = vadd.f32 1.1283791, %v4290_v38  ;;  %v4363_v26 = vadd.f32 0.00028619796, %v4362_v53  ;;  %v4374_v10 = vadd.f32 0.001143296, %v4373_v32 }
 0x6a9   : > { %v4840_v58 = vadd.f32 1.0, %v6669_v18  ;;  %v4312_v44 = vand.u32 2147483647, %v11331_v21  ;;  %v4330_v50 = vmul.f32 %v4329_v7, %v11288_v56  ;;  %v4341_v23 = vmul.f32 %v4340_v59, %v11288_v56 }
 0x6aa   : > { %v4267_v16 = vadd.f32 %v6895_v47, %v4266_v14  ;;  %v4364_v9 = vmul.f32 %v4363_v26, %v11329_v19  ;;  %v4169_v37 = vmul.f32 0.5, %v11259_v5  ;;  %v11359_v39 = vmul.f32 0.5, %v11267_v42 }
 0x6ab   : > { %v4856_v52 = vmul.f32 %v4840_v58, %v4168_v12  ;;  %v4375_v12 = vmul.f32 %v4374_v10, %v11329_v19  ;;  %v4314_v27 = vand.u32 2147483648, %v11331_v21  ;;  %v11364_v43 = vmin.f32 %v4400_v33, 16.0 }
 0x6ac   : > { %v4271_v17 = vsel %vm4270_vm5, %v6895_v47, %v4267_v16  ;;  %v11361_v47 = vadd.f32 1.0, %v4341_v23  ;;  %v6897_v56 = vpop.eup %6896  ;;  %v4365_v60 = vadd.f32 0.0036580483, %v4364_v9  ;;  %v4292_v22 = vmul.f32 %v4291_v51, %v11270_v41 }
 0x6ad   : > { %v4276_v61 = vsel %vm11337_vm0, %v4275_v15, %v4271_v17  ;;  %4888 = vrot.lane.b32.xlu0 %v4856_v52, %s6998_s21  ;;  %v4376_v1 = vadd.f32 0.014752088, %v4375_v12  ;;  %v4304_v31 = vmul.f32 %v6897_v56, %v11331_v21  ;;  %vm4308_vm4 = vweird.f32 %v11331_v21 }
 0x6ae   : > { %v4277_v55 = vmul.f32 %v4276_v61, %v4252_v45  ;;  %vm11369_vm6 = vcmp.eq.f32.partialorder %v4312_v44, 8.507059e+37  ;;  %v4331_v42 = vadd.f32 1.1283791, %v4330_v50  ;;  %6898 = vrcp.f32 %v11361_v47 }
 0x6af   : > { %v11375_v45 = vadd.f32 %v4143_v57, %v11248_v40  ;;  %v4305_v4 = vsub.f32 1.0, %v4304_v31  ;;  %v4366_v36 = vmul.f32 %v4365_v60, %v11329_v19  ;;  %v4377_v41 = vmul.f32 %v4376_v1, %v11329_v19  ;;  %v4145_v2 = vpop.f32.mrf.mxu2 }
 0x6b0   : > { %v6670_v25 = vclamps-f32 %v4277_v55, 1.0  ;;  %vm4309_vm11 = vweird.f32 %v6897_v56  ;;  %v4315_v62 = vor.u32 1.1754944e-38, %v4314_v27  ;;  %v4402_v35 = vmul.f32 2.1237322e-06, %v11364_v43 }
 0x6b1   : > { %v4413_v38 = vmul.f32 3.8918573e-05, %v11364_v43  ;;  %v4306_v3 = vmul.f32 %v6897_v56, %v4305_v4  ;;  %v4367_v28 = vadd.f32 0.05243302, %v4366_v36  ;;  %v4378_v14 = vadd.f32 0.112945676, %v4377_v41  ;;  %vm4310_vm1 = vmor %vm4308_vm4, %vm4309_vm11 }
 0x6b2   : > { %v4841_v13 = vadd.f32 1.0, %v6670_v25  ;;  %v4332_v53 = vmul.f32 %v4331_v42, %v11282_v49  ;;  %v4403_v32 = vadd.f32 0.00028619796, %v4402_v35  ;;  %v11383_v58 = vadd.f32 %v4145_v2, %v11248_v40 }
 0x6b3   : > { %v4414_v57 = vadd.f32 0.001143296, %v4413_v38  ;;  %v4307_v46 = vadd.f32 %v6897_v56, %v4306_v3  ;;  %v4368_v16 = vmul.f32 %v4367_v28, %v11329_v19  ;;  %v4379_v15 = vmul.f32 %v4378_v14, %v11329_v19 }
 0x6b4   : > { %v4857_v18 = vmul.f32 %v4841_v13, %v4169_v37  ;;  %v11388_v7 = vmul.f32 0.70710677, %v11375_v45  ;;  %v6899_v59 = vpop.eup %6898  ;;  %v4352_v49 = vand.u32 2147483647, %v11361_v47  ;;  %v4404_v52 = vmul.f32 %v4403_v32, %v11364_v43 }
 0x6b5   : > { %v4415_v51 = vmul.f32 %v4414_v57, %v11364_v43  ;;  %v11398_v26 = vmul.f32 0.70710677, %v11383_v58  ;;  %v4311_v10 = vsel %vm4310_vm1, %v6897_v56, %v4307_v46  ;;  %v4344_v17 = vmul.f32 %v6899_v59, %v11361_v47 }
 0x6b6   : > { %4890 = vrot.lane.b32.xlu1 %v4857_v18, %s6998_s21  ;;  %v4354_v44 = vand.u32 2147483648, %v11361_v47  ;;  %v4369_v50 = vadd.f32 0.18741608, %v4368_v16  ;;  %v4316_v23 = vsel %vm11369_vm6, %v4315_v62, %v4311_v10  ;;  %v4380_v21 = vadd.f32 0.4994258, %v4379_v15 }
 0x6b7   : > { %v4405_v61 = vadd.f32 0.0036580483, %v4404_v52  ;;  %v4416_v9 = vadd.f32 0.014752088, %v4415_v51  ;;  %v4317_v12 = vmul.f32 %v4316_v23, %v4292_v22  ;;  %v4345_v33 = vsub.f32 1.0, %v4344_v17  ;;  %v4148_v22 = vpop.f32.mrf.mxu2 }
 0x6b8   : > { %v4370_v37 = vmul.f32 %v4369_v50, %v11329_v19  ;;  %v4440_v55 = vmul.f32 %v11388_v7, %v11388_v7  ;;  %v4381_v56 = vmul.f32 %v4380_v21, %v11329_v19  ;;  %v4480_v1 = vmul.f32 %v11398_v26, %v11398_v26 }
 0x6b9   : > { %v4406_v27 = vmul.f32 %v4405_v61, %v11364_v43  ;;  %v4417_v60 = vmul.f32 %v4416_v9, %v11364_v43  ;;  %v6671_v25 = vclamps-f32 %v4317_v12, 1.0  ;;  %v4346_v31 = vmul.f32 %v6899_v59, %v4345_v33 }
 0x6ba   : > { %vm4349_vm2 = vweird.f32 %v6899_v59  ;;  %v11412_v5 = vmin.f32 %v4440_v55, 16.0  ;;  %vm4348_vm3 = vweird.f32 %v11361_v47  ;;  %v11415_v42 = vadd.f32 1.0, %v4381_v56 }
 0x6bb   : > { %v4407_v13 = vadd.f32 0.05243302, %v4406_v27  ;;  %v4418_v4 = vadd.f32 0.112945676, %v4417_v60  ;;  %v4842_v19 = vadd.f32 1.0, %v6671_v25  ;;  %v4347_v36 = vadd.f32 %v6899_v59, %v4346_v31  ;;  %vm4350_vm14 = vmor %vm4348_vm3, %vm4349_vm2 }
 0x6bc   : > { %vm4353_vm13 = vcmp.eq.f32.partialorder %v4352_v49, 8.507059e+37  ;;  %v4442_v41 = vmul.f32 2.1237322e-06, %v11412_v5  ;;  %v4355_v2 = vor.u32 1.1754944e-38, %v4354_v44  ;;  %v4371_v62 = vadd.f32 1.1283791, %v4370_v37 }
 0x6bd   : > { %6900 = vrcp.f32 %v11415_v42  ;;  %v11419_v35 = vmin.f32 %v4480_v1, 16.0  ;;  %v4858_v38 = vmul.f32 %v4842_v19, %v11359_v39  ;;  %v4351_v18 = vsel %vm4350_vm14, %v6899_v59, %v4347_v36 }
 0x6be   : > { %v4408_v47 = vmul.f32 %v4407_v13, %v11364_v43  ;;  %v4419_v3 = vmul.f32 %v4418_v4, %v11364_v43  ;;  %v4171_v28 = vmul.f32 0.5, %v11277_v20  ;;  %v4356_v14 = vsel %vm4353_vm13, %v4355_v2, %v4351_v18 }
 0x6bf   : > { %v4443_v32 = vadd.f32 0.00028619796, %v4442_v41  ;;  %v4357_v57 = vmul.f32 %v4356_v14, %v4332_v53  ;;  %v4453_v15 = vmul.f32 3.8918573e-05, %v11412_v5  ;;  %4892 = vrot.lane.b32.xlu2 %v4858_v38, %s6998_s21  ;;  %v11428_v49 = vmul.f32 0.5, %v11299_v29  ;;  %v4150_v33 = vpop.f32.mrf.mxu2 }
 0x6c0   : > { %v4409_v46 = vadd.f32 0.18741608, %v4408_v47  ;;  %v4420_v16 = vadd.f32 0.4994258, %v4419_v3  ;;  %v4482_v59 = vmul.f32 2.1237322e-06, %v11419_v35  ;;  %v4372_v20 = vmul.f32 %v4371_v62, %v11311_v54 }
 0x6c1   : > { %v4444_v39 = vmul.f32 %v4443_v32, %v11412_v5  ;;  %v4493_v52 = vmul.f32 3.8918573e-05, %v11419_v35  ;;  %v6672_v51 = vclamps-f32 %v4357_v57, 1.0  ;;  %v4454_v10 = vadd.f32 0.001143296, %v4453_v15 }
 0x6c2   : > { %v4421_v53 = vmul.f32 %v4420_v16, %v11364_v43  ;;  %v4410_v44 = vmul.f32 %v4409_v46, %v11364_v43  ;;  %v4483_v23 = vadd.f32 0.00028619796, %v4482_v59  ;;  %v4392_v9 = vand.u32 2147483647, %v11415_v42 }
 0x6c3   : > { %v6901_v17 = vpop.eup %6900  ;;  %v4445_v50 = vadd.f32 0.0036580483, %v4444_v39  ;;  %v4494_v21 = vadd.f32 0.001143296, %v4493_v52  ;;  %v4843_v29 = vadd.f32 1.0, %v6672_v51  ;;  %v4394_v12 = vand.u32 2147483648, %v11415_v42 }
 0x6c4   : > { %v4384_v61 = vmul.f32 %v6901_v17, %v11415_v42  ;;  %v11439_v37 = vadd.f32 1.0, %v4421_v53  ;;  %v4455_v55 = vmul.f32 %v4454_v10, %v11412_v5  ;;  %v4484_v56 = vmul.f32 %v4483_v23, %v11419_v35 }
 0x6c5   : > { %v4446_v54 = vmul.f32 %v4445_v50, %v11412_v5  ;;  %v4859_v43 = vmul.f32 %v4843_v29, %v4171_v28  ;;  %v4495_v60 = vmul.f32 %v4494_v21, %v11419_v35  ;;  %v11446_v1 = vadd.f32 %v4148_v22, %v11248_v40 }
 0x6c6   : > { %v4385_v27 = vsub.f32 1.0, %v4384_v61  ;;  %vm4389_vm15 = vweird.f32 %v6901_v17  ;;  %v4411_v25 = vadd.f32 1.1283791, %v4410_v44  ;;  %6902 = vrcp.f32 %v11439_v37 }
 0x6c7   : > { %v11450_v31 = vadd.f32 %v4150_v33, %v11248_v40  ;;  %v4447_v4 = vadd.f32 0.05243302, %v4446_v54  ;;  %v4456_v19 = vadd.f32 0.014752088, %v4455_v55  ;;  %v4485_v36 = vadd.f32 0.0036580483, %v4484_v56  ;;  %4894 = vrot.lane.b32.xlu0 %v4859_v43, %s6998_s21 }
 0x6c8   : > { %v4386_v13 = vmul.f32 %v6901_v17, %v4385_v27  ;;  %vm4388_vm0 = vweird.f32 %v11415_v42  ;;  %vm11454_vm5 = vcmp.eq.f32.partialorder %v4392_v9, 8.507059e+37  ;;  %v4395_v22 = vor.u32 1.1754944e-38, %v4394_v12  ;;  %v4153_v27 = vpop.f32.mrf.mxu2 }
 0x6c9   : > { %v4496_v2 = vadd.f32 0.014752088, %v4495_v60  ;;  %v4448_v38 = vmul.f32 %v4447_v4, %v11412_v5  ;;  %v4457_v18 = vmul.f32 %v4456_v19, %v11412_v5  ;;  %v4486_v47 = vmul.f32 %v4485_v36, %v11419_v35  ;;  %vm4390_vm4 = vmor %vm4388_vm0, %vm4389_vm15 }
 0x6ca   : > { %v4387_v62 = vadd.f32 %v6901_v17, %v4386_v13  ;;  %v4412_v3 = vmul.f32 %v4411_v25, %v11343_v0  ;;  %v11465_v42 = vmul.f32 0.70710677, %v11446_v1  ;;  %v11468_v14 = vmul.f32 0.70710677, %v11450_v31 }
 0x6cb   : > { %v4497_v28 = vmul.f32 %v4496_v2, %v11419_v35  ;;  %vm4428_vm6 = vweird.f32 %v11439_v37  ;;  %v4458_v57 = vadd.f32 0.112945676, %v4457_v18  ;;  %v4487_v46 = vadd.f32 0.05243302, %v4486_v47 }
 0x6cc   : > { %v4391_v32 = vsel %vm4390_vm4, %v6901_v17, %v4387_v62  ;;  %v6903_v16 = vpop.eup %6902  ;;  %v4520_v0 = vmul.f32 %v11465_v42, %v11465_v42  ;;  %v4560_v59 = vmul.f32 %v11468_v14, %v11468_v14  ;;  %v4432_v53 = vand.u32 2147483647, %v11439_v37 }
 0x6cd   : > { %v4396_v15 = vsel %vm11454_vm5, %v4395_v22, %v4391_v32  ;;  %v4498_v39 = vadd.f32 0.112945676, %v4497_v28  ;;  %v4424_v51 = vmul.f32 %v6903_v16, %v11439_v37  ;;  %v4449_v10 = vadd.f32 0.18741608, %v4448_v38 }
 0x6ce   : > { %v4397_v52 = vmul.f32 %v4396_v15, %v4372_v20  ;;  %v4459_v17 = vmul.f32 %v4458_v57, %v11412_v5  ;;  %v4488_v44 = vmul.f32 %v4487_v46, %v11419_v35  ;;  %v11482_v23 = vmin.f32 %v4520_v0, 16.0 }
 0x6cf   : > { %v4499_v50 = vmul.f32 %v4498_v39, %v11419_v35  ;;  %v4425_v29 = vsub.f32 1.0, %v4424_v51  ;;  %v4434_v61 = vand.u32 2147483648, %v11439_v37  ;;  %v11485_v9 = vmin.f32 %v4560_v59, 16.0 }
 0x6d0   : > { %v6673_v21 = vclamps-f32 %v4397_v52, 1.0  ;;  %vm4429_vm11 = vweird.f32 %v6903_v16  ;;  %v4460_v20 = vadd.f32 0.4994258, %v4459_v17  ;;  %v4489_v12 = vadd.f32 0.18741608, %v4488_v44 }
 0x6d1   : > { %v4500_v33 = vadd.f32 0.4994258, %v4499_v50  ;;  %v4426_v55 = vmul.f32 %v6903_v16, %v4425_v29  ;;  %v4450_v56 = vmul.f32 %v4449_v10, %v11412_v5  ;;  %v4522_v43 = vmul.f32 2.1237322e-06, %v11482_v23  ;;  %vm4430_vm1 = vmor %vm4428_vm6, %vm4429_vm11 }
 0x6d2   : > { %v4844_v54 = vadd.f32 1.0, %v6673_v21  ;;  %v4461_v60 = vmul.f32 %v4460_v20, %v11412_v5  ;;  %v4490_v25 = vmul.f32 %v4489_v12, %v11419_v35  ;;  %v4533_v4 = vmul.f32 3.8918573e-05, %v11482_v23  ;;  %v4155_v21 = vpop.f32.mrf.mxu2 }
 0x6d3   : > { %v4501_v13 = vmul.f32 %v4500_v33, %v11419_v35  ;;  %v4427_v36 = vadd.f32 %v6903_v16, %v4426_v55  ;;  %v4523_v41 = vadd.f32 0.00028619796, %v4522_v43  ;;  %v4562_v22 = vmul.f32 2.1237322e-06, %v11485_v9 }
 0x6d4   : > { %v4860_v19 = vmul.f32 %v4844_v54, %v11428_v49  ;;  %vm4433_vm2 = vcmp.eq.f32.partialorder %v4432_v53, 8.507059e+37  ;;  %v4435_v2 = vor.u32 1.1754944e-38, %v4434_v61  ;;  %v11498_v62 = vadd.f32 1.0, %v4461_v60 }
 0x6d5   : > { %v11500_v5 = vadd.f32 1.0, %v4501_v13  ;;  %v4431_v38 = vsel %vm4430_vm1, %v6903_v16, %v4427_v36  ;;  %v4451_v35 = vadd.f32 1.1283791, %v4450_v56  ;;  %v4524_v18 = vmul.f32 %v4523_v41, %v11482_v23 }
 0x6d6   : > { %v4534_v47 = vadd.f32 0.001143296, %v4533_v4  ;;  %4896 = vrot.lane.b32.xlu1 %v4860_v19, %s6998_s21  ;;  %v4436_v49 = vsel %vm4433_vm2, %v4435_v2, %v4431_v38  ;;  %6904 = vrcp.f32 %v11498_v62  ;;  %v4563_v28 = vadd.f32 0.00028619796, %v4562_v22 }
 0x6d7   : > { %v4573_v37 = vmul.f32 3.8918573e-05, %v11485_v9  ;;  %v4437_v32 = vmul.f32 %v4436_v49, %v4412_v3  ;;  %v4491_v57 = vadd.f32 1.1283791, %v4490_v25  ;;  %6906 = vrcp.f32 %v11500_v5 }
 0x6d8   : > { %v4173_v46 = vmul.f32 0.5, %v11324_v63  ;;  %v4472_v16 = vand.u32 2147483647, %v11498_v62  ;;  %v11510_v15 = vadd.f32 %v4153_v27, %v11248_v40  ;;  %v4474_v0 = vand.u32 2147483648, %v11498_v62 }
 0x6d9   : > { %v6674_v39 = vclamps-f32 %v4437_v32, 1.0  ;;  %v4525_v59 = vadd.f32 0.0036580483, %v4524_v18  ;;  %v4535_v52 = vmul.f32 %v4534_v47, %v11482_v23  ;;  %v4452_v51 = vmul.f32 %v4451_v35, %v11388_v7 }
 0x6da   : > { %v4512_v3 = vand.u32 2147483647, %v11500_v5  ;;  %v4564_v53 = vmul.f32 %v4563_v28, %v11485_v9  ;;  %v4574_v10 = vadd.f32 0.001143296, %v4573_v37  ;;  %vm4468_vm3 = vweird.f32 %v11498_v62 }
 0x6db   : > { %v4845_v17 = vadd.f32 1.0, %v6674_v39  ;;  %v4492_v63 = vmul.f32 %v4491_v57, %v11398_v26  ;;  %v4526_v44 = vmul.f32 %v4525_v59, %v11482_v23  ;;  %v4536_v50 = vadd.f32 0.014752088, %v4535_v52 }
 0x6dc   : > { %v6905_v29 = vpop.eup %6904  ;;  %vm4508_vm13 = vweird.f32 %v11500_v5  ;;  %v4514_v61 = vand.u32 2147483648, %v11500_v5  ;;  %v4565_v7 = vadd.f32 0.0036580483, %v4564_v53  ;;  %v4575_v20 = vmul.f32 %v4574_v10, %v11485_v9 }
 0x6dd   : > { %v11524_v12 = vmul.f32 0.70710677, %v11510_v15  ;;  %v6907_v33 = vpop.eup %6906  ;;  %v4861_v54 = vmul.f32 %v4845_v17, %v4173_v46  ;;  %v4464_v55 = vmul.f32 %v6905_v29, %v11498_v62  ;;  %vm11527_vm14 = vcmp.eq.f32.partialorder %v4472_v16, 8.507059e+37 }
 0x6de   : > { %v4475_v56 = vor.u32 1.1754944e-38, %v4474_v0  ;;  %v4527_v43 = vadd.f32 0.05243302, %v4526_v44  ;;  %v4504_v27 = vmul.f32 %v6907_v33, %v11500_v5  ;;  %vm11532_vm15 = vcmp.eq.f32.partialorder %v4512_v3, 8.507059e+37 }
 0x6df   : > { %v4537_v25 = vmul.f32 %v4536_v50, %v11482_v23  ;;  %v4566_v13 = vmul.f32 %v4565_v7, %v11485_v9  ;;  %v4465_v4 = vsub.f32 1.0, %v4464_v55  ;;  %v4576_v36 = vadd.f32 0.014752088, %v4575_v20  ;;  %4898 = vrot.lane.b32.xlu2 %v4861_v54, %s6998_s21  ;;  %v4158_v50 = vpop.f32.mrf.mxu2 }
 0x6e0   : > { %v4528_v19 = vmul.f32 %v4527_v43, %v11482_v23  ;;  %v4600_v41 = vmul.f32 %v11524_v12, %v11524_v12  ;;  %v4505_v22 = vsub.f32 1.0, %v4504_v27  ;;  %v11543_v35 = vadd.f32 %v4155_v21, %v11248_v40 }
 0x6e1   : > { %v4538_v2 = vadd.f32 0.112945676, %v4537_v25  ;;  %v4567_v38 = vadd.f32 0.05243302, %v4566_v13  ;;  %v4466_v18 = vmul.f32 %v6905_v29, %v4465_v4  ;;  %vm4469_vm0 = vweird.f32 %v6905_v29 }
 0x6e2   : > { %v4577_v47 = vmul.f32 %v4576_v36, %v11485_v9  ;;  %v11546_v49 = vmin.f32 %v4600_v41, 16.0  ;;  %v4506_v28 = vmul.f32 %v6907_v33, %v4505_v22  ;;  %vm4509_vm5 = vweird.f32 %v6907_v33  ;;  %vm4470_vm4 = vmor %vm4468_vm3, %vm4469_vm0 }
 0x6e3   : > { %v4539_v37 = vmul.f32 %v4538_v2, %v11482_v23  ;;  %v4568_v32 = vmul.f32 %v4567_v38, %v11485_v9  ;;  %v4467_v57 = vadd.f32 %v6905_v29, %v4466_v18  ;;  %v4529_v46 = vadd.f32 0.18741608, %v4528_v19  ;;  %vm4510_vm6 = vmor %vm4508_vm13, %vm4509_vm5 }
 0x6e4   : > { %v4578_v16 = vadd.f32 0.112945676, %v4577_v47  ;;  %v4602_v39 = vmul.f32 2.1237322e-06, %v11546_v49  ;;  %v4507_v0 = vadd.f32 %v6907_v33, %v4506_v28  ;;  %v4515_v59 = vor.u32 1.1754944e-38, %v4514_v61 }
 0x6e5   : > { %v4540_v52 = vadd.f32 0.4994258, %v4539_v37  ;;  %v4569_v3 = vadd.f32 0.18741608, %v4568_v32  ;;  %v4471_v53 = vsel %vm4470_vm4, %v6905_v29, %v4467_v57  ;;  %v4613_v44 = vmul.f32 3.8918573e-05, %v11546_v49 }
 0x6e6   : > { %v4579_v10 = vmul.f32 %v4578_v16, %v11485_v9  ;;  %v4603_v17 = vadd.f32 0.00028619796, %v4602_v39  ;;  %v4476_v21 = vsel %vm11527_vm14, %v4475_v56, %v4471_v53  ;;  %v4511_v7 = vsel %vm4510_vm6, %v6907_v33, %v4507_v0 }
 0x6e7   : > { %v4541_v62 = vmul.f32 %v4540_v52, %v11482_v23  ;;  %v11561_v61 = vmul.f32 0.70710677, %v11543_v35  ;;  %v4477_v20 = vmul.f32 %v4476_v21, %v4452_v51  ;;  %v4516_v5 = vsel %vm11532_vm15, %v4515_v59, %v4511_v7  ;;  %v4160_v32 = vpop.f32.mrf.mxu2 }
 0x6e8   : > { %v4530_v29 = vmul.f32 %v4529_v46, %v11482_v23  ;;  %v4580_v54 = vadd.f32 0.4994258, %v4579_v10  ;;  %v4517_v55 = vmul.f32 %v4516_v5, %v4492_v63  ;;  %v4570_v27 = vmul.f32 %v4569_v3, %v11485_v9 }
 0x6e9   : > { %v11566_v43 = vadd.f32 1.0, %v4541_v62  ;;  %v4604_v26 = vmul.f32 %v4603_v17, %v11546_v49  ;;  %v6675_v33 = vclamps-f32 %v4477_v20, 1.0  ;;  %v4614_v25 = vadd.f32 0.001143296, %v4613_v44 }
 0x6ea   : > { %v4581_v56 = vmul.f32 %v4580_v54, %v11485_v9  ;;  %v4174_v13 = vmul.f32 0.5, %v11375_v45  ;;  %v4175_v51 = vmul.f32 0.5, %v11383_v58  ;;  %v6676_v60 = vclamps-f32 %v4517_v55, 1.0 }
 0x6eb   : > { %6908 = vrcp.f32 %v11566_v43  ;;  %v4846_v23 = vadd.f32 1.0, %v6675_v33  ;;  %v4531_v4 = vadd.f32 1.1283791, %v4530_v29  ;;  %v4640_v19 = vmul.f32 %v11561_v61, %v11561_v61 }
 0x6ec   : > { %v11574_v63 = vadd.f32 1.0, %v4581_v56  ;;  %v4847_v36 = vadd.f32 1.0, %v6676_v60  ;;  %v4571_v41 = vadd.f32 1.1283791, %v4570_v27  ;;  %v4605_v22 = vadd.f32 0.0036580483, %v4604_v26 }
 0x6ed   : > { %v4615_v9 = vmul.f32 %v4614_v25, %v11546_v49  ;;  %v4862_v2 = vmul.f32 %v4846_v23, %v4174_v13  ;;  %v4552_v45 = vand.u32 2147483647, %v11566_v43  ;;  %v4554_v58 = vand.u32 2147483648, %v11566_v43 }
 0x6ee   : > { %6910 = vrcp.f32 %v11574_v63  ;;  %v4863_v38 = vmul.f32 %v4847_v36, %v4175_v51  ;;  %v4532_v18 = vmul.f32 %v4531_v4, %v11465_v42  ;;  %v11583_v28 = vmin.f32 %v4640_v19, 16.0 }
 0x6ef   : > { %v4616_v47 = vadd.f32 0.014752088, %v4615_v9  ;;  %v11586_v37 = vadd.f32 %v4158_v50, %v11248_v40  ;;  %4900 = vrot.lane.b32.xlu0 %v4862_v2, %s6998_s21  ;;  %vm4548_vm11 = vweird.f32 %v11566_v43  ;;  %v4572_v46 = vmul.f32 %v4571_v41, %v11468_v14 }
 0x6f0   : > { %v4592_v16 = vand.u32 2147483647, %v11574_v63  ;;  %v4606_v39 = vmul.f32 %v4605_v22, %v11546_v49  ;;  %4902 = vrot.lane.b32.xlu1 %v4863_v38, %s6998_s21  ;;  %vm11595_vm1 = vcmp.eq.f32.partialorder %v4552_v45, 8.507059e+37  ;;  %v4555_v59 = vor.u32 1.1754944e-38, %v4554_v58 }
 0x6f1   : > { %v6909_v57 = vpop.eup %6908  ;;  %v4617_v52 = vmul.f32 %v4616_v47, %v11546_v49  ;;  %v4642_v3 = vmul.f32 2.1237322e-06, %v11583_v28  ;;  %v4594_v53 = vand.u32 2147483648, %v11574_v63  ;;  %v4653_v14 = vmul.f32 3.8918573e-05, %v11583_v28 }
 0x6f2   : > { %v4544_v42 = vmul.f32 %v6909_v57, %v11566_v43  ;;  %v11604_v10 = vmul.f32 0.70710677, %v11586_v37  ;;  %v11607_v17 = vadd.f32 %v4160_v32, %v11248_v40  ;;  %vm4588_vm2 = vweird.f32 %v11574_v63 }
 0x6f3   : > { %v4618_v21 = vadd.f32 0.112945676, %v4617_v52  ;;  %v4643_v7 = vadd.f32 0.00028619796, %v4642_v3  ;;  %vm4549_vm3 = vweird.f32 %v6909_v57  ;;  %vm11611_vm13 = vcmp.eq.f32.partialorder %v4592_v16, 8.507059e+37 }
 0x6f4   : > { %v6911_v44 = vpop.eup %6910  ;;  %v4545_v50 = vsub.f32 1.0, %v4544_v42  ;;  %v4607_v5 = vadd.f32 0.05243302, %v4606_v39  ;;  %v4654_v29 = vadd.f32 0.001143296, %v4653_v14  ;;  %v4680_v26 = vmul.f32 %v11604_v10, %v11604_v10  ;;  %vm4550_vm14 = vmor %vm4548_vm11, %vm4549_vm3 }
 0x6f5   : > { %v4584_v62 = vmul.f32 %v6911_v44, %v11574_v63  ;;  %v4619_v55 = vmul.f32 %v4618_v21, %v11546_v49  ;;  %v4644_v27 = vmul.f32 %v4643_v7, %v11583_v28  ;;  %v4595_v56 = vor.u32 1.1754944e-38, %v4594_v53 }
 0x6f6   : > { %v4546_v54 = vmul.f32 %v6909_v57, %v4545_v50  ;;  %v4655_v25 = vmul.f32 %v4654_v29, %v11583_v28  ;;  %v11621_v13 = vmul.f32 0.70710677, %v11607_v17  ;;  %v11623_v4 = vmin.f32 %v4680_v26, 16.0 }
 0x6f7   : > { %v4585_v33 = vsub.f32 1.0, %v4584_v62  ;;  %v4620_v60 = vadd.f32 0.4994258, %v4619_v55  ;;  %v4645_v23 = vadd.f32 0.0036580483, %v4644_v27  ;;  %vm4589_vm15 = vweird.f32 %v6911_v44 }
 0x6f8   : > { %v4547_v51 = vadd.f32 %v6909_v57, %v4546_v54  ;;  %v4608_v36 = vmul.f32 %v4607_v5, %v11546_v49  ;;  %v4656_v41 = vadd.f32 0.014752088, %v4655_v25  ;;  %v4682_v45 = vmul.f32 2.1237322e-06, %v11623_v4  ;;  %vm4590_vm0 = vmor %vm4588_vm2, %vm4589_vm15  ;;  %v4163_v5 = vpop.f32.mrf.mxu2 }
 0x6f9   : > { %v4586_v19 = vmul.f32 %v6911_v44, %v4585_v33  ;;  %v4621_v9 = vmul.f32 %v4620_v60, %v11546_v49  ;;  %v4646_v2 = vmul.f32 %v4645_v23, %v11583_v28  ;;  %v4720_v43 = vmul.f32 %v11621_v13, %v11621_v13 }
 0x6fa   : > { %v4551_v22 = vsel %vm4550_vm14, %v6909_v57, %v4547_v51  ;;  %v4657_v47 = vmul.f32 %v4656_v41, %v11583_v28  ;;  %v4683_v39 = vadd.f32 0.00028619796, %v4682_v45  ;;  %v4609_v52 = vadd.f32 0.18741608, %v4608_v36 }
 0x6fb   : > { %v4556_v58 = vsel %vm11595_vm1, %v4555_v59, %v4551_v22  ;;  %v4587_v38 = vadd.f32 %v6911_v44, %v4586_v19  ;;  %v11639_v57 = vadd.f32 1.0, %v4621_v9  ;;  %v4647_v16 = vadd.f32 0.05243302, %v4646_v2 }
 0x6fc   : > { %v4557_v32 = vmul.f32 %v4556_v58, %v4532_v18  ;;  %v4658_v3 = vadd.f32 0.112945676, %v4657_v47  ;;  %v4693_v0 = vmul.f32 3.8918573e-05, %v11623_v4  ;;  %v4176_v18 = vmul.f32 0.5, %v11446_v1 }
 0x6fd   : > { %v4591_v42 = vsel %vm4590_vm0, %v6911_v44, %v4587_v38  ;;  %6912 = vrcp.f32 %v11639_v57  ;;  %v4648_v63 = vmul.f32 %v4647_v16, %v11583_v28  ;;  %v11647_v50 = vmin.f32 %v4720_v43, 16.0 }
 0x6fe   : > { %v6677_v59 = vclamps-f32 %v4557_v32, 1.0  ;;  %v4596_v53 = vsel %vm11611_vm13, %v4595_v56, %v4591_v42  ;;  %v4659_v44 = vmul.f32 %v4658_v3, %v11583_v28  ;;  %v4684_v7 = vmul.f32 %v4683_v39, %v11623_v4 }
 0x6ff   : > { %v4597_v14 = vmul.f32 %v4596_v53, %v4572_v46  ;;  %v4694_v62 = vadd.f32 0.001143296, %v4693_v0  ;;  %v4610_v20 = vmul.f32 %v4609_v52, %v11546_v49  ;;  %v4177_v55 = vmul.f32 0.5, %v11450_v31 }
 0x700   : > { %v4848_v21 = vadd.f32 1.0, %v6677_v59  ;;  %v4660_v27 = vadd.f32 0.4994258, %v4659_v44  ;;  %v4722_v26 = vmul.f32 2.1237322e-06, %v11647_v50  ;;  %v11657_v56 = vadd.f32 %v4163_v5, %v11248_v40 }
 0x701   : > { %v6678_v29 = vclamps-f32 %v4597_v14, 1.0  ;;  %v4695_v1 = vmul.f32 %v4694_v62, %v11623_v4  ;;  %v4733_v33 = vmul.f32 3.8918573e-05, %v11647_v50  ;;  %v4649_v51 = vadd.f32 0.18741608, %v4648_v63 }
 0x702   : > { %v4864_v54 = vmul.f32 %v4848_v21, %v4176_v18  ;;  %v4661_v60 = vmul.f32 %v4660_v27, %v11583_v28  ;;  %v4685_v23 = vadd.f32 0.0036580483, %v4684_v7  ;;  %v4611_v19 = vadd.f32 1.1283791, %v4610_v20 }
 0x703   : > { %v4849_v46 = vadd.f32 1.0, %v6678_v29  ;;  %v6913_v25 = vpop.eup %6912  ;;  %v4696_v49 = vadd.f32 0.014752088, %v4695_v1  ;;  %v4632_v41 = vand.u32 2147483647, %v11639_v57  ;;  %v4634_v47 = vand.u32 2147483648, %v11639_v57 }
 0x704   : > { %4904 = vrot.lane.b32.xlu2 %v4864_v54, %s6998_s21  ;;  %v4624_v36 = vmul.f32 %v6913_v25, %v11639_v57  ;;  %v11663_v22 = vadd.f32 1.0, %v4661_v60  ;;  %v4723_v2 = vadd.f32 0.00028619796, %v4722_v26  ;;  %v4734_v58 = vadd.f32 0.001143296, %v4733_v33 }
 0x705   : > { %v4865_v31 = vmul.f32 %v4849_v46, %v4177_v55  ;;  %v4697_v9 = vmul.f32 %v4696_v49, %v11623_v4  ;;  %v11667_v38 = vmul.f32 0.70710677, %v11657_v56  ;;  %v4650_v43 = vmul.f32 %v4649_v51, %v11583_v28  ;;  %v4165_v46 = vpop.f32.mrf.mxu2 }
 0x706   : > { %v4625_v45 = vsub.f32 1.0, %v4624_v36  ;;  %6914 = vrcp.f32 %v11663_v22  ;;  %v4686_v32 = vmul.f32 %v4685_v23, %v11623_v4  ;;  %vm4629_vm5 = vweird.f32 %v6913_v25 }
 0x707   : > { %4906 = vrot.lane.b32.xlu0 %v4865_v31, %s6998_s21  ;;  %v4698_v39 = vadd.f32 0.112945676, %v4697_v9  ;;  %v4724_v42 = vmul.f32 %v4723_v2, %v11647_v50  ;;  %v4178_v52 = vmul.f32 0.5, %v11510_v15  ;;  %v4612_v3 = vmul.f32 %v4611_v19, %v11524_v12 }
 0x708   : > { %v4626_v16 = vmul.f32 %v6913_v25, %v4625_v45  ;;  %v4735_v0 = vmul.f32 %v4734_v58, %v11647_v50  ;;  %v4760_v59 = vmul.f32 %v11667_v38, %v11667_v38  ;;  %vm4628_vm4 = vweird.f32 %v11639_v57 }
 0x709   : > { %vm4633_vm6 = vcmp.eq.f32.partialorder %v4632_v41, 8.507059e+37  ;;  %v4699_v28 = vmul.f32 %v4698_v39, %v11623_v4  ;;  %vm4630_vm11 = vmor %vm4628_vm4, %vm4629_vm5  ;;  %v4635_v18 = vor.u32 1.1754944e-38, %v4634_v47  ;;  %v4725_v14 = vadd.f32 0.0036580483, %v4724_v42 }
 0x70a   : > { %v4627_v53 = vadd.f32 %v6913_v25, %v4626_v16  ;;  %v4736_v63 = vadd.f32 0.014752088, %v4735_v0  ;;  %v11682_v21 = vmin.f32 %v4760_v59, 16.0  ;;  %v4651_v44 = vadd.f32 1.1283791, %v4650_v43 }
 0x70b   : > { %v4687_v12 = vadd.f32 0.05243302, %v4686_v32  ;;  %v4700_v7 = vadd.f32 0.4994258, %v4699_v28  ;;  %v4672_v27 = vand.u32 2147483647, %v11663_v22  ;;  %v4726_v33 = vmul.f32 %v4725_v14, %v11647_v50 }
 0x70c   : > { %v4631_v15 = vsel %vm4630_vm11, %v6913_v25, %v4627_v53  ;;  %v6915_v62 = vpop.eup %6914  ;;  %v4737_v29 = vmul.f32 %v4736_v63, %v11647_v50  ;;  %v4762_v20 = vmul.f32 2.1237322e-06, %v11682_v21  ;;  %v4773_v57 = vmul.f32 3.8918573e-05, %v11682_v21 }
 0x70d   : > { %v4636_v5 = vsel %vm4633_vm6, %v4635_v18, %v4631_v15  ;;  %v4664_v55 = vmul.f32 %v6915_v62, %v11663_v22  ;;  %v4674_v1 = vand.u32 2147483648, %v11663_v22  ;;  %v4701_v26 = vmul.f32 %v4700_v7, %v11623_v4 }
 0x70e   : > { %v4637_v54 = vmul.f32 %v4636_v5, %v4612_v3  ;;  %v4738_v25 = vadd.f32 0.112945676, %v4737_v29  ;;  %v4763_v51 = vadd.f32 0.00028619796, %v4762_v20  ;;  %v4688_v49 = vmul.f32 %v4687_v12, %v11623_v4 }
 0x70f   : > { %v4665_v23 = vsub.f32 1.0, %v4664_v55  ;;  %v4774_v31 = vadd.f32 0.001143296, %v4773_v57  ;;  %v11693_v19 = vadd.f32 1.0, %v4701_v26  ;;  %v11698_v9 = vadd.f32 %v4165_v46, %v11248_v40 }
 0x710   : > { %v6679_v60 = vclamps-f32 %v4637_v54, 1.0  ;;  %v4739_v36 = vmul.f32 %v4738_v25, %v11647_v50  ;;  %v4764_v41 = vmul.f32 %v4763_v51, %v11682_v21  ;;  %vm4669_vm1 = vweird.f32 %v6915_v62 }
 0x711   : > { %v4666_v45 = vmul.f32 %v6915_v62, %v4665_v23  ;;  %v4775_v58 = vmul.f32 %v4774_v31, %v11682_v21  ;;  %vm4668_vm2 = vweird.f32 %v11663_v22  ;;  %6916 = vrcp.f32 %v11693_v19 }
 0x712   : > { %v4850_v2 = vadd.f32 1.0, %v6679_v60  ;;  %v4727_v47 = vadd.f32 0.05243302, %v4726_v33  ;;  %v4689_v16 = vadd.f32 0.18741608, %v4688_v49  ;;  %v4652_v42 = vmul.f32 %v4651_v44, %v11561_v61  ;;  %vm4670_vm3 = vmor %vm4668_vm2, %vm4669_vm1 }
 0x713   : > { %v4667_v32 = vadd.f32 %v6915_v62, %v4666_v45  ;;  %v4740_v39 = vadd.f32 0.4994258, %v4739_v36  ;;  %v4675_v3 = vor.u32 1.1754944e-38, %v4674_v1  ;;  %v4765_v40 = vadd.f32 0.0036580483, %v4764_v41 }
 0x714   : > { %v4866_v43 = vmul.f32 %v4850_v2, %v4178_v52  ;;  %v4776_v0 = vadd.f32 0.014752088, %v4775_v58  ;;  %vm4673_vm13 = vcmp.eq.f32.partialorder %v4672_v27, 8.507059e+37  ;;  %v11706_v28 = vmul.f32 0.70710677, %v11698_v9 }
 0x715   : > { %v4671_v59 = vsel %vm4670_vm3, %v6915_v62, %v4667_v32  ;;  %v4741_v53 = vmul.f32 %v4740_v39, %v11647_v50  ;;  %v4728_v52 = vmul.f32 %v4727_v47, %v11647_v50  ;;  %v4690_v61 = vmul.f32 %v4689_v16, %v11623_v4 }
 0x716   : > { %4908 = vrot.lane.b32.xlu1 %v4866_v43, %s6998_s21  ;;  %v4676_v22 = vsel %vm4673_vm13, %v4675_v3, %v4671_v59  ;;  %v4777_v18 = vmul.f32 %v4776_v0, %v11682_v21  ;;  %v4766_v44 = vmul.f32 %v4765_v40, %v11682_v21  ;;  %v4800_v7 = vmul.f32 %v11706_v28, %v11706_v28  ;;  %v13989_v59 = vld [vmem:[#allocation155_spill] sm:$0xff] }
 0x717   : > { %v4677_v14 = vmul.f32 %v4676_v22, %v4652_v42  ;;  %v11712_v63 = vadd.f32 1.0, %v4741_v53  ;;  %v6917_v15 = vpop.eup %6916  ;;  %v4179_v29 = vmul.f32 0.5, %v11543_v35  ;;  %v4729_v20 = vadd.f32 0.18741608, %v4728_v52 }
 0x718   : > { %v4778_v12 = vadd.f32 0.112945676, %v4777_v18  ;;  %v4704_v5 = vmul.f32 %v6917_v15, %v11693_v19  ;;  %v4691_v54 = vadd.f32 1.1283791, %v4690_v61  ;;  %v4712_v27 = vand.u32 2147483647, %v11693_v19 }
 0x719   : > { %v6680_v62 = vclamps-f32 %v4677_v14, 1.0  ;;  %6918 = vrcp.f32 %v11712_v63  ;;  %v4714_v1 = vand.u32 2147483648, %v11693_v19  ;;  %v4767_v46 = vadd.f32 0.05243302, %v4766_v44  ;;  %v4893_v47 = vpop.permute.xlu2 %4892 }
 0x71a   : > { %v4705_v4 = vsub.f32 1.0, %v4704_v5  ;;  %v4779_v55 = vmul.f32 %v4778_v12, %v11682_v21  ;;  %v11723_v26 = vmin.f32 %v4800_v7, 16.0  ;;  %vm4709_vm14 = vweird.f32 %v6917_v15 }
 0x71b   : > { %v4851_v57 = vadd.f32 1.0, %v6680_v62  ;;  %v4730_v35 = vmul.f32 %v4729_v20, %v11647_v50  ;;  %vm4708_vm15 = vweird.f32 %v11693_v19  ;;  %v4715_v41 = vor.u32 1.1754944e-38, %v4714_v1  ;;  %v13990_v1 = vld [vmem:[#allocation143_spill] sm:$0xff] }
 0x71c   : > { %v4706_v25 = vmul.f32 %v6917_v15, %v4705_v4  ;;  %v4780_v51 = vadd.f32 0.4994258, %v4779_v55  ;;  %v4802_v60 = vmul.f32 2.1237322e-06, %v11723_v26  ;;  %v4813_v23 = vmul.f32 3.8918573e-05, %v11723_v26  ;;  %vm4710_vm0 = vmor %vm4708_vm15, %vm4709_vm14 }
 0x71d   : > { %v4867_v33 = vmul.f32 %v4851_v57, %v4179_v29  ;;  %v4768_v2 = vmul.f32 %v4767_v46, %v11682_v21  ;;  %v4692_v50 = vmul.f32 %v4691_v54, %v11604_v10  ;;  %vm4713_vm5 = vcmp.eq.f32.partialorder %v4712_v27, 8.507059e+37 }
 0x71e   : > { %v4707_v49 = vadd.f32 %v6917_v15, %v4706_v25  ;;  %v4781_v31 = vmul.f32 %v4780_v51, %v11682_v21  ;;  %v4803_v45 = vadd.f32 0.00028619796, %v4802_v60  ;;  %v4814_v58 = vadd.f32 0.001143296, %v4813_v23 }
 0x71f   : > { %4910 = vrot.lane.b32.xlu2 %v4867_v33, %s6998_s21  ;;  %v6919_v36 = vpop.eup %6918  ;;  %v4731_v19 = vadd.f32 1.1283791, %v4730_v35  ;;  %v4938_v53 = vadd.f32 %v4893_v47, %v13989_v59  ;;  %v4752_v22 = vand.u32 2147483647, %v11712_v63  ;;  %v4754_v10 = vand.u32 2147483648, %v11712_v63  ;;  %v4889_v57 = vpop.permute.xlu0 %4888 }
 0x720   : > { %v4711_v43 = vsel %vm4710_vm0, %v6917_v15, %v4707_v49  ;;  %v4744_v32 = vmul.f32 %v6919_v36, %v11712_v63  ;;  %v11734_v39 = vadd.f32 1.0, %v4781_v31  ;;  %v4815_v42 = vmul.f32 %v4814_v58, %v11723_v26 }
 0x721   : > { %v4716_v16 = vsel %vm4713_vm5, %v4715_v41, %v4711_v43  ;;  %v4804_v0 = vmul.f32 %v4803_v45, %v11723_v26  ;;  %v4769_v52 = vadd.f32 0.18741608, %v4768_v2  ;;  %vm4749_vm4 = vweird.f32 %v6919_v36  ;;  %v13991_v45 = vld [vmem:[#allocation110_spill] sm:$0xff] }
 0x722   : > { %v4717_v3 = vmul.f32 %v4716_v16, %v4692_v50  ;;  %v4745_v40 = vsub.f32 1.0, %v4744_v32  ;;  %6920 = vrcp.f32 %v11734_v39  ;;  %v4816_v61 = vadd.f32 0.014752088, %v4815_v42 }
 0x723   : > { %v4180_v15 = vmul.f32 0.5, %v11586_v37  ;;  %vm4748_vm6 = vweird.f32 %v11712_v63  ;;  %vm4968_vm11 = vcmask 191616   ;;  %v4954_v44 = vpack.c.bf16 %v4938_v53, %v4938_v53 }
 0x724   : > { %v6681_v18 = vclamps-f32 %v4717_v3, 1.0  ;;  %v4746_v14 = vmul.f32 %v6919_v36, %v4745_v40  ;;  %v4805_v62 = vadd.f32 0.0036580483, %v4804_v0  ;;  %v4817_v5 = vmul.f32 %v4816_v61, %v11723_v26  ;;  %vm4750_vm1 = vmor %vm4748_vm6, %vm4749_vm4 }
 0x725   : > { %v4732_v29 = vmul.f32 %v4731_v19, %v11621_v13  ;;  %vm4753_vm2 = vcmp.eq.f32.partialorder %v4752_v22, 8.507059e+37  ;;  %v4755_v20 = vor.u32 1.1754944e-38, %v4754_v10  ;;  %4971 = vst.msk [vmem:[%s9037_s18 + $0x8] sm:$0xf] %vm4968_vm11, %v4954_v44  ;;  %v4770_v37 = vmul.f32 %v4769_v52, %v11682_v21 }
 0x726   : > { %v4852_v12 = vadd.f32 1.0, %v6681_v18  ;;  %v4747_v7 = vadd.f32 %v6919_v36, %v4746_v14  ;;  %v4818_v63 = vadd.f32 0.112945676, %v4817_v5  ;;  %v4936_v46 = vadd.f32 %v4889_v57, %v13990_v1  ;;  %v13993_v5 = vld [vmem:[#allocation4_spill] sm:$0xff] }
 0x727   : > { %v4806_v13 = vmul.f32 %v4805_v62, %v11723_v26  ;;  %v4771_v23 = vadd.f32 1.1283791, %v4770_v37  ;;  %v4792_v21 = vand.u32 2147483647, %v11734_v39  ;;  %v4794_v41 = vand.u32 2147483648, %v11734_v39 }
 0x728   : > { %v4868_v54 = vmul.f32 %v4852_v12, %v4180_v15  ;;  %v4751_v4 = vsel %vm4750_vm1, %v6919_v36, %v4747_v7  ;;  %v6921_v55 = vpop.eup %6920  ;;  %v4819_v51 = vmul.f32 %v4818_v63, %v11723_v26  ;;  %v4952_v35 = vpack.c.bf16 %v4936_v46, %v4936_v46  ;;  %v4891_v31 = vpop.permute.xlu1 %4890  ;;  %v13992_v15 = vld [vmem:[#allocation128_spill] sm:$0xff] }
 0x729   : > { %v4756_v27 = vsel %vm4753_vm2, %v4755_v20, %v4751_v4  ;;  %v4784_v25 = vmul.f32 %v6921_v55, %v11734_v39  ;;  %v4181_v36 = vmul.f32 0.5, %v11607_v17  ;;  %v4937_v58 = vadd.f32 %v4891_v31, %v13991_v45 }
 0x72a   : > { %v4757_v33 = vmul.f32 %v4756_v27, %v4732_v29  ;;  %4912 = vrot.lane.b32.xlu0 %v4868_v54, %s6998_s21  ;;  %v4820_v2 = vadd.f32 0.4994258, %v4819_v51  ;;  %4969 = vst.msk [vmem:[%s9037_s18] sm:$0xf] %vm4968_vm11, %v4952_v35  ;;  %vm4789_vm3 = vweird.f32 %v6921_v55  ;;  %v4807_v43 = vadd.f32 0.05243302, %v4806_v13 }
 0x72b   : > { %v4785_v49 = vsub.f32 1.0, %v4784_v25  ;;  %v4953_v16 = vpack.c.bf16 %v4937_v58, %v4937_v58  ;;  %vm4788_vm13 = vweird.f32 %v11734_v39  ;;  %v4795_v17 = vor.u32 1.1754944e-38, %v4794_v41  ;;  %v13994_v54 = vld [vmem:[#allocation69_spill] sm:$0xff]  ;;  %v13995_v13 = vld [vmem:[#allocation10_spill] sm:$0xff]  ;;  %v13998_v58 = vld [vmem:[#allocation43_spill] sm:$0xff] }
 0x72c   : > { %v6682_v60 = vclamps-f32 %v4757_v33, 1.0  ;;  %v4821_v32 = vmul.f32 %v4820_v2, %v11723_v26  ;;  %vm4790_vm14 = vmor %vm4788_vm13, %vm4789_vm3  ;;  %v4772_v40 = vmul.f32 %v4771_v23, %v11667_v38  ;;  %vm4793_vm15 = vcmp.eq.f32.partialorder %v4792_v21, 8.507059e+37  ;;  %v13997_v21 = vld [vmem:[#allocation85_spill] sm:$0xff] }
 0x72d   : > { %v4786_v50 = vmul.f32 %v6921_v55, %v4785_v49  ;;  %4970 = vst.msk [vmem:[%s9037_s18 + $0x4] sm:$0xf] %vm4968_vm11, %v4953_v16  ;;  %v4808_v53 = vmul.f32 %v4807_v43, %v11723_v26  ;;  %v4182_v14 = vmul.f32 0.5, %v11657_v56  ;;  %v14001_v43 = vld [vmem:[#allocation2_spill] sm:$0xff]  ;;  %vm14060_vm1 = vcmask 457728  }
 0x72e   : > { %v4853_v47 = vadd.f32 1.0, %v6682_v60  ;;  %v4822_v3 = vadd.f32 1.0, %v4821_v32  ;;  %v13996_v60 = vld [vmem:[#allocation5_spill] sm:$0xff]  ;;  %v14003_v32 = vld [vmem:[#allocation124_spill] sm:$0xff]  ;;  %vm14062_vm2 = vcmask 523264   ;;  %vm14065_vm3 = vcmask 588800  }
 0x72f   : > { %v4787_v42 = vadd.f32 %v6921_v55, %v4786_v50  ;;  %v4809_v18 = vadd.f32 0.18741608, %v4808_v53  ;;  %v14000_v50 = vld [vmem:[#allocation80_spill] sm:$0xff]  ;;  %v14007_v53 = vld [vmem:[#allocation167_spill] sm:$0xff]  ;;  %vm14066_vm13 = vcmask 654336  }
 0x730   : > { %v4869_v19 = vmul.f32 %v4853_v47, %v4181_v36  ;;  %6922 = vrcp.f32 %v4822_v3  ;;  %v4834_v56 = vand.u32 2147483648, %v4822_v3  ;;  %vm4828_vm5 = vweird.f32 %v4822_v3  ;;  %v13999_v47 = vld [vmem:[#allocation9_spill] sm:$0xff] }
 0x731   : > { %v4791_v0 = vsel %vm4790_vm14, %v6921_v55, %v4787_v42  ;;  %v4810_v7 = vmul.f32 %v4809_v18, %v11723_v26  ;;  %v4832_v55 = vand.u32 2147483647, %v4822_v3  ;;  %v4183_v36 = vmul.f32 0.5, %v11698_v9  ;;  %v14002_v9 = vld [vmem:[#allocation50_spill] sm:$0xff] }
 0x732   : > { %4914 = vrot.lane.b32.xlu1 %v4869_v19, %s6998_s21  ;;  %v4796_v22 = vsel %vm4793_vm15, %v4795_v17, %v4791_v0  ;;  %v4835_v46 = vor.u32 1.1754944e-38, %v4834_v56  ;;  %v14004_v19 = vld [vmem:[#allocation36_spill] sm:$0xff]  ;;  %v14005_v42 = vld [vmem:[#allocation94_spill] sm:$0xff]  ;;  %v14006_v17 = vld [vmem:[#allocation195_spill] sm:$0xff]  ;;  %vm14068_vm14 = vcmask 719872   ;;  %vm14071_vm15 = vcmask 785408  }
 0x733   : > { %v4797_v10 = vmul.f32 %v4796_v22, %v4772_v40  ;;  %v4811_v37 = vadd.f32 1.1283791, %v4810_v7  ;;  %vm4833_vm6 = vcmp.eq.f32.partialorder %v4832_v55, 8.507059e+37  ;;  %v14013_v7 = vld [vmem:[#allocation174_spill] sm:$0xff]  ;;  %v14019_v55 = vld [vmem:[#allocation96_spill] sm:$0xff] }
 0x735   : > { %v6683_v52 = vclamps-f32 %v4797_v10, 1.0  ;;  %v4812_v33 = vmul.f32 %v4811_v37, %v11706_v28 }
 0x736   : > { %v6923_v12 = vpop.eup %6922 }
 0x737   : > { %v4854_v61 = vadd.f32 1.0, %v6683_v52  ;;  %v4824_v62 = vmul.f32 %v6923_v12, %v4822_v3  ;;  %vm4829_vm0 = vweird.f32 %v6923_v12  ;;  %v14008_v52 = vld [vmem:[#allocation191_spill] sm:$0xff] }
 0x738   : > { %vm4830_vm4 = vmor %vm4828_vm5, %vm4829_vm0  ;;  %vm14072_vm0 = vcmask 850944   ;;  %vm14073_vm5 = vcmask 916480  }
 0x739   : > { %v4899_v39 = vpop.permute.xlu2 %4898  ;;  %v4870_v38 = vmul.f32 %v4854_v61, %v4182_v14  ;;  %v4825_v20 = vsub.f32 1.0, %v4824_v62  ;;  %v4895_v57 = vpop.permute.xlu0 %4894  ;;  %v14014_v62 = vld [vmem:[#allocation53_spill] sm:$0xff] }
 0x73a   : > { %v4941_v44 = vadd.f32 %v4899_v39, %v13992_v15  ;;  %4985 = vrot.lane.b32.xlu1 %v13993_v5, %s7009_s5  ;;  %v4939_v4 = vadd.f32 %v4895_v57, %v13994_v54  ;;  %v14009_v39 = vld [vmem:[#allocation165_spill] sm:$0xff]  ;;  %v14015_v5 = vld [vmem:[#allocation156_spill] sm:$0xff] }
 0x73b   : > { %4916 = vrot.lane.b32.xlu2 %v4870_v38, %s6998_s21  ;;  %v4826_v63 = vmul.f32 %v6923_v12, %v4825_v20  ;;  %v14012_v38 = vld [vmem:[#allocation111_spill] sm:$0xff]  ;;  %v14017_v57 = vld [vmem:[#allocation200_spill] sm:$0xff] }
 0x73c   : > { %v4957_v29 = vpack.c.bf16 %v4941_v44, %v4941_v44  ;;  %v4955_v26 = vpack.c.bf16 %v4939_v4, %v4939_v4  ;;  %v14010_v44 = vld [vmem:[#allocation67_spill] sm:$0xff]  ;;  %v14018_v4 = vld [vmem:[#allocation208_spill] sm:$0xff] }
 0x73d   : > { %v4827_v27 = vadd.f32 %v6923_v12, %v4826_v63 }
 0x73e   : > { %4974 = vst.msk [vmem:[%s9037_s18 + $0x14] sm:$0xf] %vm4968_vm11, %v4957_v29  ;;  %v14016_v29 = vld [vmem:[#allocation35_spill] sm:$0xff] }
 0x73f   : > { %4972 = vst.msk [vmem:[%s9037_s18 + $0xc] sm:$0xf] %vm4968_vm11, %v4955_v26  ;;  %v4831_v25 = vsel %vm4830_vm4, %v6923_v12, %v4827_v27  ;;  %v14011_v12 = vld [vmem:[#allocation138_spill] sm:$0xff]  ;;  %v14020_v27 = vld [vmem:[#allocation15_spill] sm:$0xff]  ;;  %vm14074_vm4 = vcmask 982016  }
 0x740   : > { %v4836_v51 = vsel %vm4833_vm6, %v4835_v46, %v4831_v25  ;;  %v14021_v46 = vld [vmem:[#allocation65_spill] sm:$0xff] }
 0x741   : > { %v4837_v35 = vmul.f32 %v4836_v51, %v4812_v33  ;;  %v14022_v33 = vld [vmem:[#allocation141_spill] sm:$0xff] }
 0x742   : > { %5001 = vrot.lane.b32.xlu1 %v13995_v13, %s7010_s6  ;;  %v14023_v25 = vld [vmem:[#allocation45_spill] sm:$0xff] }
 0x743   : > { %4987 = vrot.lane.b32.xlu2 %v13996_v60, %s7009_s5  ;;  %v6684_v49 = vclamps-f32 %v4837_v35, 1.0  ;;  %v14024_v13 = vld [vmem:[#allocation109_spill] sm:$0xff]  ;;  %v14025_v35 = vld [vmem:[#allocation204_spill] sm:$0xff] }
 0x745   : > { %v4855_v41 = vadd.f32 1.0, %v6684_v49  ;;  %v14026_v49 = vld [vmem:[#allocation176_spill] sm:$0xff] }
 0x747   : > { %v4871_v28 = vmul.f32 %v4855_v41, %v4183_v36  ;;  %v14028_v36 = vld [vmem:[#allocation154_spill] sm:$0xff]  ;;  %v14029_v41 = vld [vmem:[#allocation37_spill] sm:$0xff] }
 0x748   : > { %v4897_v23 = vpop.permute.xlu1 %4896 }
 0x749   : > { %v4940_v31 = vadd.f32 %v4897_v23, %v13997_v21  ;;  %4918 = vrot.lane.b32.xlu0 %v4871_v28, %s6998_s21  ;;  %v14031_v28 = vld [vmem:[#allocation8_spill] sm:$0xff] }
 0x74a   : > { %5049 = vrot.lane.b32.xlu1 %v13998_v58, %s6998_s21 }
 0x74b   : > { %v4956_v2 = vpack.c.bf16 %v4940_v31, %v4940_v31  ;;  %5017 = vrot.lane.b32.xlu2 %v13999_v47, %s7011_s7  ;;  %v14027_v31 = vld [vmem:[#allocation84_spill] sm:$0xff] }
 0x74c   : > { %v14032_v47 = vld [vmem:[#allocation212_spill] sm:$0xff] }
 0x74d   : > { %4973 = vst.msk [vmem:[%s9037_s18 + $0x10] sm:$0xf] %vm4968_vm11, %v4956_v2  ;;  %v14030_v2 = vld [vmem:[#allocation129_spill] sm:$0xff] }
 0x751   : > { %4989 = vrot.lane.b32.xlu0 %v14001_v43, %s7009_s5 }
 0x752   : > { %5097 = vrot.lane.b32.xlu1 %v14000_v50, %s7001_s24 }
 0x753   : > { %5065 = vrot.lane.b32.xlu2 %v14002_v9, %s6999_s22  ;;  %v14033_v9 = vld [vmem:[#allocation68_spill] sm:$0xff] }
 0x759   : > { %5033 = vrot.lane.b32.xlu0 %v14004_v19, %s6997_s20  ;;  %v14035_v19 = vld [vmem:[#allocation44_spill] sm:$0xff] }
 0x75a   : > { %5145 = vrot.lane.b32.xlu1 %v14003_v32, %s7004_s27  ;;  %v14034_v32 = vld [vmem:[#allocation168_spill] sm:$0xff] }
 0x75b   : > { %5113 = vrot.lane.b32.xlu2 %v14005_v42, %s7002_s25  ;;  %v14036_v42 = vld [vmem:[#allocation210_spill] sm:$0xff] }
 0x75e   : > { %v4905_v16 = vpop.permute.xlu2 %4904 }
 0x75f   : > { %v4944_v3 = vadd.f32 %v4905_v16, %v14006_v17 }
 0x761   : > { %v4960_v40 = vpack.c.bf16 %v4944_v3, %v4944_v3  ;;  %v4901_v0 = vpop.permute.xlu0 %4900  ;;  %5081 = vrot.lane.b32.xlu0 %v14010_v44, %s7000_s23  ;;  %v6783_v44 = vld [vmem:[%s12760_s1 + $0xf8] sm:$0xff] }
 0x762   : > { %v4942_v22 = vadd.f32 %v4901_v0, %v14007_v53  ;;  %v4903_v10 = vpop.permute.xlu1 %4902  ;;  %5193 = vrot.lane.b32.xlu1 %v14009_v39, %s7007_s30  ;;  %v14039_v39 = vld [vmem:[#allocation211_spill] sm:$0xff]  ;;  %5552 = vmatpush.bf16.msra.mxu3 %v6783_v44 }
 0x763   : > { %4977 = vst.msk [vmem:[%s9037_s18 + $0x20] sm:$0xf] %vm4968_vm11, %v4960_v40  ;;  %v4943_v18 = vadd.f32 %v4903_v10, %v14008_v52  ;;  %5161 = vrot.lane.b32.xlu2 %v14011_v12, %s7005_s28 }
 0x764   : > { %v4958_v14 = vpack.c.bf16 %v4942_v22, %v4942_v22  ;;  %v14037_v22 = vld [vmem:[#allocation112_spill] sm:$0xff] }
 0x765   : > { %v4959_v61 = vpack.c.bf16 %v4943_v18, %v4943_v18  ;;  %v14038_v18 = vld [vmem:[#allocation83_spill] sm:$0xff] }
 0x766   : > { %4975 = vst.msk [vmem:[%s9037_s18 + $0x18] sm:$0xf] %vm4968_vm11, %v4958_v14 }
 0x767   : > { %4976 = vst.msk [vmem:[%s9037_s18 + $0x1c] sm:$0xf] %vm4968_vm11, %v4959_v61 }
 0x769   : > { %5129 = vrot.lane.b32.xlu0 %v14012_v38, %s7003_s26  ;;  %v14040_v38 = vld [vmem:[#allocation157_spill] sm:$0xff] }
 0x76a   : > { %5019 = vrot.lane.b32.xlu1 %v13849_v24, %s7011_s7 }
 0x76b   : > { %5209 = vrot.lane.b32.xlu2 %v14013_v7, %s7008_s4 }
 0x771   : > { %5177 = vrot.lane.b32.xlu0 %v14015_v5, %s7006_s29 }
 0x772   : > { %5067 = vrot.lane.b32.xlu1 %v14014_v62, %s6999_s22  ;;  %v14042_v62 = vld [vmem:[#allocation127_spill] sm:$0xff] }
 0x773   : > { %5035 = vrot.lane.b32.xlu2 %v14016_v29, %s6997_s20  ;;  %v6782_v29 = vld [vmem:[%s12760_s1 + $0xf0] sm:$0xff] }
 0x774   : > { %5553 = vmatpush.bf16.msra.mxu3 %v6782_v29 }
 0x779   : > { %v4907_v20 = vpop.permute.xlu0 %4906  ;;  %v4911_v24 = vpop.permute.xlu2 %4910  ;;  %5003 = vrot.lane.b32.xlu0 %v14020_v27, %s7010_s6  ;;  %v6779_v27 = vld [vmem:[%s12760_s1 + $0xd8] sm:$0xff] }
 0x77a   : > { %v4945_v56 = vadd.f32 %v4907_v20, %v14017_v57  ;;  %v4947_v37 = vadd.f32 %v4911_v24, %v14018_v4  ;;  %5115 = vrot.lane.b32.xlu1 %v14019_v55, %s7002_s25  ;;  %v6781_v20 = vld [vmem:[%s12760_s1 + $0xe8] sm:$0xff]  ;;  %v14044_v24 = vld [vmem:[#allocation100_spill] sm:$0xff] }
 0x77b   : > { %5083 = vrot.lane.b32.xlu2 %v14021_v46, %s7000_s23  ;;  %5554 = vmatpush.bf16.msra.mxu3 %v6781_v20  ;;  %v14046_v46 = vld [vmem:[#allocation39_spill] sm:$0xff] }
 0x77c   : > { %v4961_v63 = vpack.c.bf16 %v4945_v56, %v4945_v56  ;;  %v4963_v26 = vpack.c.bf16 %v4947_v37, %v4947_v37  ;;  %v14043_v56 = vld [vmem:[#allocation3_spill] sm:$0xff] }
 0x77e   : > { %4978 = vst.msk [vmem:[%s9037_s18 + $0x24] sm:$0xf] %vm4968_vm11, %v4961_v63  ;;  %v14045_v63 = vld [vmem:[#allocation166_spill] sm:$0xff] }
 0x77f   : > { %4980 = vst.msk [vmem:[%s9037_s18 + $0x2c] sm:$0xf] %vm4968_vm11, %v4963_v26  ;;  %v6780_v26 = vld [vmem:[%s12760_s1 + $0xe0] sm:$0xff] }
 0x780   : > { %5555 = vmatpush.bf16.msra.mxu3 %v6780_v26 }
 0x781   : > { %5051 = vrot.lane.b32.xlu0 %v14023_v25, %s6998_s21 }
 0x782   : > { %5163 = vrot.lane.b32.xlu1 %v14022_v33, %s7005_s28  ;;  %v14047_v33 = vld [vmem:[#allocation146_spill] sm:$0xff] }
 0x783   : > { %5131 = vrot.lane.b32.xlu2 %v14024_v13, %s7003_s26  ;;  %v14048_v13 = vld [vmem:[#allocation12_spill] sm:$0xff] }
 0x784   : > { %5556 = vmatpush.bf16.msra.mxu3 %v6779_v27  ;;  %v14064_v27 = vld [vmem:[#allocation169_spill] sm:$0xff] }
 0x788   : > { %v4909_v51 = vpop.permute.xlu1 %4908 }
 0x789   : > { %v4946_v60 = vadd.f32 %v4909_v51, %v14025_v35  ;;  %5099 = vrot.lane.b32.xlu0 %v14027_v31, %s7001_s24 }
 0x78a   : > { %5211 = vrot.lane.b32.xlu1 %v14026_v49, %s7008_s4  ;;  %v14049_v49 = vld [vmem:[#allocation213_spill] sm:$0xff] }
 0x78b   : > { %v4962_v23 = vpack.c.bf16 %v4946_v60, %v4946_v60  ;;  %5179 = vrot.lane.b32.xlu2 %v14028_v36, %s7006_s29  ;;  %v6777_v36 = vld [vmem:[%s12760_s1 + $0xc8] sm:$0xff] }
 0x78d   : > { %4979 = vst.msk [vmem:[%s9037_s18 + $0x28] sm:$0xf] %vm4968_vm11, %v4962_v23  ;;  %v6778_v23 = vld [vmem:[%s12760_s1 + $0xd0] sm:$0xff] }
 0x78e   : > { %5557 = vmatpush.bf16.msra.mxu3 %v6778_v23  ;;  %v14069_v23 = vld [vmem:[#allocation144_spill] sm:$0xff] }
 0x791   : > { %5147 = vrot.lane.b32.xlu0 %v14030_v2, %s7004_s27  ;;  %v14050_v2 = vld [vmem:[#allocation73_spill] sm:$0xff] }
 0x792   : > { %5037 = vrot.lane.b32.xlu1 %v14029_v41, %s6997_s20  ;;  %5558 = vmatpush.bf16.msra.mxu3 %v6777_v36  ;;  %v14070_v36 = vld [vmem:[#allocation16_spill] sm:$0xff] }
 0x793   : > { %5005 = vrot.lane.b32.xlu2 %v14031_v28, %s7010_s6  ;;  %v14051_v28 = vld [vmem:[#allocation179_spill] sm:$0xff] }
 0x795   : > { %v4917_v58 = vpop.permute.xlu2 %4916 }
 0x796   : > { %v4950_v50 = vadd.f32 %v4917_v58, %v14032_v47 }
 0x798   : > { %v4966_v43 = vpack.c.bf16 %v4950_v50, %v4950_v50  ;;  %v14052_v50 = vld [vmem:[#allocation46_spill] sm:$0xff] }
 0x799   : > { %5195 = vrot.lane.b32.xlu0 %v14034_v32, %s7007_s30  ;;  %v6776_v32 = vld [vmem:[%s12760_s1 + $0xc0] sm:$0xff] }
 0x79a   : > { %5085 = vrot.lane.b32.xlu1 %v14033_v9, %s7000_s23  ;;  %4983 = vst.msk [vmem:[%s9037_s18 + $0x38] sm:$0xf] %vm4968_vm11, %v4966_v43  ;;  %5559 = vmatpush.bf16.msra.mxu3 %v6776_v32  ;;  %v14075_v32 = vld [vmem:[#allocation71_spill] sm:$0xff] }
 0x79b   : > { %5053 = vrot.lane.b32.xlu2 %v14035_v19, %s6998_s21 }
 0x79c   : > { %v4913_v16 = vpop.permute.xlu0 %4912 }
 0x79d   : > { %v4948_v3 = vadd.f32 %v4913_v16, %v14036_v42  ;;  %v11874_v40 = vpop.permute.xlu2 %4987  ;;  %v14053_v16 = vld [vmem:[#allocation117_spill] sm:$0xff] }
 0x79f   : > { %v4964_v0 = vpack.c.bf16 %v4948_v3, %v4948_v3 }
 0x7a1   : > { %4981 = vst.msk [vmem:[%s9037_s18 + $0x30] sm:$0xf] %vm4968_vm11, %v4964_v0  ;;  %5021 = vrot.lane.b32.xlu0 %v13859_v30, %s7011_s7  ;;  %v14041_v30 = vld [vmem:[#allocation56_spill] sm:$0xff]  ;;  %v14054_v0 = vld [vmem:[#allocation86_spill] sm:$0xff] }
 0x7a2   : > { %5133 = vrot.lane.b32.xlu1 %v14037_v22, %s7003_s26 }
 0x7a3   : > { %5101 = vrot.lane.b32.xlu2 %v14038_v18, %s7001_s24 }
 0x7a4   : > { %v4915_v10 = vpop.permute.xlu1 %4914 }
 0x7a5   : > { %v4949_v14 = vadd.f32 %v4915_v10, %v14039_v39  ;;  %v5018_v61 = vpop.permute.xlu2 %5017 }
 0x7a7   : > { %v4965_v12 = vpack.c.bf16 %v4949_v14, %v4949_v14  ;;  %v14055_v14 = vld [vmem:[#allocation26_spill] sm:$0xff] }
 0x7a9   : > { %4982 = vst.msk [vmem:[%s9037_s18 + $0x34] sm:$0xf] %vm4968_vm11, %v4965_v12  ;;  %5069 = vrot.lane.b32.xlu0 %v14041_v30, %s6999_s22  ;;  %v14057_v30 = vld [vmem:[#allocation54_spill] sm:$0xff] }
 0x7aa   : > { %5181 = vrot.lane.b32.xlu1 %v14040_v38, %s7006_s29  ;;  %v14056_v38 = vld [vmem:[#allocation161_spill] sm:$0xff] }
 0x7ab   : > { %5149 = vrot.lane.b32.xlu2 %v14042_v62, %s7004_s27  ;;  %v14059_v62 = vld [vmem:[#allocation130_spill] sm:$0xff] }
 0x7ac   : > { %v4986_v7 = vpop.permute.xlu1 %4985 }
 0x7ad   : > { %v5066_v5 = vpop.permute.xlu2 %5065 }
 0x7b1   : > { %5117 = vrot.lane.b32.xlu0 %v14044_v24, %s7002_s25  ;;  %v14061_v24 = vld [vmem:[#allocation6_spill] sm:$0xff] }
 0x7b2   : > { %4991 = vrot.lane.b32.xlu1 %v14043_v56, %s7009_s5 }
 0x7b3   : > { %5197 = vrot.lane.b32.xlu2 %v14045_v63, %s7007_s30  ;;  %v14063_v63 = vld [vmem:[#allocation99_spill] sm:$0xff] }
 0x7b4   : > { %v5002_v37 = vpop.permute.xlu1 %5001 }
 0x7b5   : > { %v5114_v55 = vpop.permute.xlu2 %5113  ;;  %v5227_v19 = vsel %vm986_vm7, %v4986_v7, %v5002_v37 }
 0x7b6   : > { %v5250_v22 = vsel %vm1003_vm8, %v5227_v19, %v5018_v61 }
 0x7b7   : > { %v5266_v44 = vsel %vm1020_vm9, %v5250_v22, %v14055_v14 }
 0x7b9   : > { %5165 = vrot.lane.b32.xlu0 %v14047_v33, %s7005_s28 }
 0x7ba   : > { %5039 = vrot.lane.b32.xlu1 %v14046_v46, %s6997_s20 }
 0x7bb   : > { %5007 = vrot.lane.b32.xlu2 %v14048_v13, %s7010_s6  ;;  %v4919_v51 = vpop.permute.xlu0 %4918  ;;  %v14067_v13 = vld [vmem:[#allocation38_spill] sm:$0xff] }
 0x7bc   : > { %v5050_v25 = vpop.permute.xlu1 %5049  ;;  %v4951_v31 = vadd.f32 %v4919_v51, %v14049_v49 }
 0x7bd   : > { %v5162_v60 = vpop.permute.xlu2 %5161 }
 0x7be   : > { %v4967_v41 = vpack.c.bf16 %v4951_v31, %v4951_v31 }
 0x7c0   : > { %4984 = vst.msk [vmem:[%s9037_s18 + $0x3c] sm:$0xf] %vm4968_vm11, %v4967_v41  ;;  %vm14058_vm11 = vcmask 326656  }
 0x7c1   : > { %5213 = vrot.lane.b32.xlu0 %v14051_v28, %s7008_s4  ;;  %vm14081_vm6 = vmmov %vm14058_vm11 }
 0x7c2   : > { %5087 = vrot.lane.b32.xlu1 %v14050_v2, %s7000_s23 }
 0x7c3   : > { %5055 = vrot.lane.b32.xlu2 %v14052_v50, %s6998_s21  ;;  %v11935_v43 = vpop.permute.xlu0 %4989 }
 0x7c4   : > { %v5098_v58 = vpop.permute.xlu1 %5097 }
 0x7c5   : > { %v5210_v9 = vpop.permute.xlu2 %5209 }
 0x7c9   : > { %5023 = vrot.lane.b32.xlu0 %v13870_v11, %s7011_s7 }
 0x7ca   : > { %5135 = vrot.lane.b32.xlu1 %v14053_v16, %s7003_s26  ;;  %v14076_v16 = vld [vmem:[#allocation178_spill] sm:$0xff] }
 0x7cb   : > { %5103 = vrot.lane.b32.xlu2 %v14054_v0, %s7001_s24  ;;  %v5034_v10 = vpop.permute.xlu0 %5033 }
 0x7cc   : > { %v5146_v3 = vpop.permute.xlu1 %5145  ;;  %v5282_v12 = vsel %vm1037_vm10, %v5266_v44, %v5034_v10  ;;  %v14078_v10 = vld [vmem:[#allocation115_spill] sm:$0xff]  ;;  %v14079_v44 = vld [vmem:[#allocation89_spill] sm:$0xff] }
 0x7cd   : > { %v5036_v18 = vpop.permute.xlu2 %5035  ;;  %v5298_v7 = vsel %vm14058_vm11, %v5282_v12, %v5050_v25  ;;  %vm14085_vm11 = vmmov %vm14060_vm1 }
 0x7ce   : > { %v5314_v20 = vsel %vm1071_vm12, %v5298_v7, %v5066_v5 }
 0x7d1   : > { %5071 = vrot.lane.b32.xlu0 %v14057_v30, %s6999_s22 }
 0x7d2   : > { %5183 = vrot.lane.b32.xlu1 %v14056_v38, %s7006_s29  ;;  %v14080_v38 = vld [vmem:[#allocation28_spill] sm:$0xff] }
 0x7d3   : > { %5151 = vrot.lane.b32.xlu2 %v14059_v62, %s7004_s27  ;;  %v5082_v61 = vpop.permute.xlu0 %5081  ;;  %v14082_v62 = vld [vmem:[#allocation160_spill] sm:$0xff] }
 0x7d4   : > { %v5194_v11 = vpop.permute.xlu1 %5193  ;;  %v5330_v56 = vsel %vm14060_vm1, %v5314_v20, %v5082_v61  ;;  %v14083_v61 = vld [vmem:[#allocation57_spill] sm:$0xff]  ;;  %vm14086_vm1 = vmmov %vm14062_vm2 }
 0x7d5   : > { %v5084_v29 = vpop.permute.xlu2 %5083  ;;  %v5346_v37 = vsel %vm14062_vm2, %v5330_v56, %v5098_v58  ;;  %v14084_v56 = vld [vmem:[#allocation134_spill] sm:$0xff]  ;;  %vm14088_vm2 = vmmov %vm14065_vm3 }
 0x7d6   : > { %v5362_v25 = vsel %vm14065_vm3, %v5346_v37, %v5114_v55  ;;  %vm14091_vm3 = vmmov %vm14066_vm13 }
 0x7d9   : > { %5119 = vrot.lane.b32.xlu0 %v14063_v63, %s7002_s25 }
 0x7da   : > { %4993 = vrot.lane.b32.xlu1 %v14061_v24, %s7009_s5 }
 0x7db   : > { %5199 = vrot.lane.b32.xlu2 %v14064_v27, %s7007_s30  ;;  %v5130_v46 = vpop.permute.xlu0 %5129 }
 0x7dc   : > { %v5020_v26 = vpop.permute.xlu1 %5019  ;;  %v5378_v5 = vsel %vm14066_vm13, %v5362_v25, %v5130_v46  ;;  %v14089_v46 = vld [vmem:[#allocation101_spill] sm:$0xff]  ;;  %vm14092_vm13 = vmmov %vm14068_vm14 }
 0x7dd   : > { %v5132_v33 = vpop.permute.xlu2 %5131  ;;  %v5394_v51 = vsel %vm14068_vm14, %v5378_v5, %v5146_v3  ;;  %v14077_v3 = vld [vmem:[#allocation48_spill] sm:$0xff]  ;;  %vm14094_vm14 = vmmov %vm14071_vm15 }
 0x7de   : > { %v5410_v2 = vsel %vm14071_vm15, %v5394_v51, %v5162_v60  ;;  %v14090_v5 = vld [vmem:[#allocation172_spill] sm:$0xff]  ;;  %vm14097_vm15 = vmmov %vm14072_vm0 }
 0x7e1   : > { %5167 = vrot.lane.b32.xlu0 %v14069_v23, %s7005_s28 }
 0x7e2   : > { %5041 = vrot.lane.b32.xlu1 %v14067_v13, %s6997_s20 }
 0x7e3   : > { %5009 = vrot.lane.b32.xlu2 %v14070_v36, %s7010_s6  ;;  %v5178_v41 = vpop.permute.xlu0 %5177 }
 0x7e4   : > { %v5068_v31 = vpop.permute.xlu1 %5067  ;;  %v5426_v55 = vsel %vm14072_vm0, %v5410_v2, %v5178_v41  ;;  %v14095_v41 = vld [vmem:[#allocation147_spill] sm:$0xff]  ;;  %vm14098_vm0 = vmmov %vm14073_vm5 }
 0x7e5   : > { %v5180_v28 = vpop.permute.xlu2 %5179  ;;  %v5442_v58 = vsel %vm14073_vm5, %v5426_v55, %v5194_v11  ;;  %v14096_v55 = vld [vmem:[#allocation19_spill] sm:$0xff]  ;;  %vm14099_vm5 = vmmov %vm14074_vm4 }
 0x7e6   : > { %v5458_v50 = vsel %vm14074_vm4, %v5442_v58, %v5210_v9  ;;  %vm14106_vm4 = vmmov %vm14081_vm6 }
 0x7e7   : > { %5560 = vmatmul.bf16.vlgmr.msra.gmra.mxu3 %v5458_v50 }
 0x7e9   : > { %5215 = vrot.lane.b32.xlu0 %v14076_v16, %s7008_s4 }
 0x7ea   : > { %5089 = vrot.lane.b32.xlu1 %v14075_v32, %s7000_s23 }
 0x7eb   : > { %5057 = vrot.lane.b32.xlu2 %v14077_v3, %s6998_s21  ;;  %v5004_v0 = vpop.permute.xlu0 %5003  ;;  %v14101_v3 = vld [vmem:[#allocation180_spill] sm:$0xff] }
 0x7ec   : > { %v5116_v19 = vpop.permute.xlu1 %5115  ;;  %v5230_v60 = vsel %vm986_vm7, %v11874_v40, %v5004_v0 }
 0x7ed   : > { %v5006_v22 = vpop.permute.xlu2 %5005  ;;  %v5252_v9 = vsel %vm1003_vm8, %v5230_v60, %v5020_v26  ;;  %v14087_v26 = vld [vmem:[#allocation14_spill] sm:$0xff]  ;;  %v14102_v60 = vld [vmem:[#allocation47_spill] sm:$0xff] }
 0x7ee   : > { %v5268_v30 = vsel %vm1020_vm9, %v5252_v9, %v14080_v38 }
 0x7ef   : > { %v5284_v40 = vsel %vm1037_vm10, %v5268_v30, %v5036_v18 }
 0x7f1   : > { %5025 = vrot.lane.b32.xlu0 %v13880_v34, %s7011_s7 }
 0x7f2   : > { %5137 = vrot.lane.b32.xlu1 %v14078_v10, %s7003_s26 }
 0x7f3   : > { %5105 = vrot.lane.b32.xlu2 %v14079_v44, %s7001_s24  ;;  %v5052_v12 = vpop.permute.xlu0 %5051  ;;  %v14103_v44 = vld [vmem:[#allocation118_spill] sm:$0xff] }
 0x7f4   : > { %v5164_v14 = vpop.permute.xlu1 %5163  ;;  %v5300_v7 = vsel %vm14081_vm6, %v5284_v40, %v5052_v12  ;;  %v14104_v12 = vld [vmem:[#allocation30_spill] sm:$0xff]  ;;  %v14105_v40 = vld [vmem:[#allocation88_spill] sm:$0xff]  ;;  %vm14109_vm6 = vmmov %vm14085_vm11 }
 0x7f5   : > { %v5054_v11 = vpop.permute.xlu2 %5053  ;;  %v5316_v20 = vsel %vm1071_vm12, %v5300_v7, %v5068_v31  ;;  %v14093_v31 = vld [vmem:[#allocation40_spill] sm:$0xff] }
 0x7f6   : > { %v5332_v37 = vsel %vm14085_vm11, %v5316_v20, %v5084_v29  ;;  %v14108_v20 = vld [vmem:[#allocation61_spill] sm:$0xff]  ;;  %vm14111_vm11 = vmmov %vm14086_vm1 }
 0x7f9   : > { %5073 = vrot.lane.b32.xlu0 %v14083_v61, %s6999_s22 }
 0x7fa   : > { %5185 = vrot.lane.b32.xlu1 %v14082_v62, %s7006_s29 }
 0x7fb   : > { %5153 = vrot.lane.b32.xlu2 %v14084_v56, %s7004_s27  ;;  %v5100_v24 = vpop.permute.xlu0 %5099 }
 0x7fc   : > { %v5212_v34 = vpop.permute.xlu1 %5211  ;;  %v5348_v18 = vsel %vm14086_vm1, %v5332_v37, %v5100_v24  ;;  %v14110_v24 = vld [vmem:[#allocation132_spill] sm:$0xff]  ;;  %vm14112_vm1 = vmmov %vm14088_vm2 }
 0x7fd   : > { %v5102_v63 = vpop.permute.xlu2 %5101  ;;  %v5364_v27 = vsel %vm14088_vm2, %v5348_v18, %v5116_v19  ;;  %v14100_v19 = vld [vmem:[#allocation74_spill] sm:$0xff]  ;;  %vm14114_vm2 = vmmov %vm14091_vm3 }
 0x7fe   : > { %v5380_v51 = vsel %vm14091_vm3, %v5364_v27, %v5132_v33  ;;  %v14113_v27 = vld [vmem:[#allocation13_spill] sm:$0xff]  ;;  %vm14117_vm3 = vmmov %vm14092_vm13 }
 0x801   : > { %5121 = vrot.lane.b32.xlu0 %v14089_v46, %s7002_s25 }
 0x802   : > { %4995 = vrot.lane.b32.xlu1 %v14087_v26, %s7009_s5 }
 0x803   : > { %5201 = vrot.lane.b32.xlu2 %v14090_v5, %s7007_s30  ;;  %v5148_v13 = vpop.permute.xlu0 %5147 }
 0x804   : > { %v5038_v25 = vpop.permute.xlu1 %5037  ;;  %v5396_v29 = vsel %vm14092_vm13, %v5380_v51, %v5148_v13  ;;  %v14116_v13 = vld [vmem:[#allocation171_spill] sm:$0xff]  ;;  %vm14118_vm13 = vmmov %vm14094_vm14 }
 0x805   : > { %v5150_v23 = vpop.permute.xlu2 %5149  ;;  %v5412_v36 = vsel %vm14094_vm14, %v5396_v29, %v5164_v14  ;;  %vm14120_vm14 = vmmov %vm14097_vm15 }
 0x806   : > { %v5428_v50 = vsel %vm14097_vm15, %v5412_v36, %v5180_v28  ;;  %v5233_v28 = vsel %vm986_vm7, %v11935_v43, %v5006_v22  ;;  %v14119_v36 = vld [vmem:[#allocation42_spill] sm:$0xff]  ;;  %vm14123_vm15 = vmmov %vm14098_vm0 }
 0x809   : > { %5169 = vrot.lane.b32.xlu0 %v14095_v41, %s7005_s28 }
 0x80a   : > { %5043 = vrot.lane.b32.xlu1 %v14093_v31, %s6997_s20 }
 0x80b   : > { %5011 = vrot.lane.b32.xlu2 %v14096_v55, %s7010_s6  ;;  %v5196_v58 = vpop.permute.xlu0 %5195 }
 0x80c   : > { %v5086_v2 = vpop.permute.xlu1 %5085  ;;  %v5444_v33 = vsel %vm14098_vm0, %v5428_v50, %v5196_v58  ;;  %v14122_v58 = vld [vmem:[#allocation18_spill] sm:$0xff]  ;;  %vm14124_vm0 = vmmov %vm14099_vm5 }
 0x80d   : > { %v5461_v32 = vsel %vm14099_vm5, %v5444_v33, %v5212_v34  ;;  %v5198_v16 = vpop.permute.xlu2 %5197  ;;  %v14107_v34 = vld [vmem:[#allocation162_spill] sm:$0xff]  ;;  %vm14131_vm5 = vmmov %vm14106_vm4 }
 0x80e   : > { %5565 = vmatmul.bf16.gmra.mxu3 %v5461_v32 }
 0x811   : > { %5217 = vrot.lane.b32.xlu0 %v14101_v3, %s7008_s4  ;;  %v14126_v3 = vld [vmem:[#allocation182_spill] sm:$0xff] }
 0x812   : > { %5091 = vrot.lane.b32.xlu1 %v14100_v19, %s7000_s23  ;;  %v14125_v19 = vld [vmem:[#allocation79_spill] sm:$0xff] }
 0x813   : > { %5059 = vrot.lane.b32.xlu2 %v14102_v60, %s6998_s21  ;;  %v5022_v10 = vpop.permute.xlu0 %5021 }
 0x814   : > { %v5134_v0 = vpop.permute.xlu1 %5133  ;;  %v5254_v9 = vsel %vm1003_vm8, %v5233_v28, %v5022_v10  ;;  %v14127_v10 = vld [vmem:[#allocation49_spill] sm:$0xff] }
 0x815   : > { %v5008_v14 = vpop.permute.xlu2 %5007  ;;  %v5270_v38 = vsel %vm1020_vm9, %v5254_v9, %v14104_v12  ;;  %v14129_v12 = vld [vmem:[#allocation29_spill] sm:$0xff] }
 0x816   : > { %v5286_v7 = vsel %vm1037_vm10, %v5270_v38, %v5038_v25  ;;  %v14115_v25 = vld [vmem:[#allocation105_spill] sm:$0xff] }
 0x817   : > { %v5302_v22 = vsel %vm14106_vm4, %v5286_v7, %v5054_v11  ;;  %vm14134_vm4 = vmmov %vm14109_vm6 }
 0x819   : > { %5027 = vrot.lane.b32.xlu0 %v13898_v6, %s7011_s7 }
 0x81a   : > { %5139 = vrot.lane.b32.xlu1 %v14103_v44, %s7003_s26  ;;  %v14128_v44 = vld [vmem:[#allocation123_spill] sm:$0xff] }
 0x81b   : > { %5107 = vrot.lane.b32.xlu2 %v14105_v40, %s7001_s24  ;;  %v5070_v62 = vpop.permute.xlu0 %5069  ;;  %v14130_v40 = vld [vmem:[#allocation91_spill] sm:$0xff] }
 0x81c   : > { %v5182_v30 = vpop.permute.xlu1 %5181  ;;  %v5318_v61 = vsel %vm1071_vm12, %v5302_v22, %v5070_v62 }
 0x81d   : > { %v5056_v43 = vpop.permute.xlu2 %5055  ;;  %v5334_v6 = vsel %vm14109_vm6, %v5318_v61, %v5086_v2  ;;  %v14121_v2 = vld [vmem:[#allocation152_spill] sm:$0xff]  ;;  %vm14136_vm6 = vmmov %vm14111_vm11 }
 0x81e   : > { %v5350_v18 = vsel %vm14111_vm11, %v5334_v6, %v5102_v63  ;;  %v14135_v6 = vld [vmem:[#allocation135_spill] sm:$0xff]  ;;  %vm14137_vm11 = vmmov %vm14112_vm1 }
 0x821   : > { %5075 = vrot.lane.b32.xlu0 %v14108_v20, %s6999_s22  ;;  %v14133_v20 = vld [vmem:[#allocation59_spill] sm:$0xff] }
 0x822   : > { %5187 = vrot.lane.b32.xlu1 %v14107_v34, %s7006_s29  ;;  %v14132_v34 = vld [vmem:[#allocation164_spill] sm:$0xff] }
 0x823   : > { %5155 = vrot.lane.b32.xlu2 %v14110_v24, %s7004_s27  ;;  %v5118_v37 = vpop.permute.xlu0 %5117 }
 0x824   : > { %v4992_v56 = vpop.permute.xlu1 %4991  ;;  %v5366_v11 = vsel %vm14112_vm1, %v5350_v18, %v5118_v37  ;;  %vm14139_vm1 = vmmov %vm14114_vm2 }
 0x825   : > { %v5104_v26 = vpop.permute.xlu2 %5103  ;;  %v5382_v46 = vsel %vm14114_vm2, %v5366_v11, %v5134_v0  ;;  %v5236_v60 = vsel %vm986_vm7, %v4992_v56, %v5008_v14  ;;  %v14138_v11 = vld [vmem:[#allocation7_spill] sm:$0xff]  ;;  %vm14142_vm2 = vmmov %vm14117_vm3 }
 0x826   : > { %v5398_v29 = vsel %vm14117_vm3, %v5382_v46, %v5150_v23  ;;  %v14140_v46 = vld [vmem:[#allocation103_spill] sm:$0xff]  ;;  %vm14143_vm3 = vmmov %vm14118_vm13 }
 0x829   : > { %5123 = vrot.lane.b32.xlu0 %v14115_v25, %s7002_s25 }
 0x82a   : > { %4997 = vrot.lane.b32.xlu1 %v14113_v27, %s7009_s5 }
 0x82b   : > { %5203 = vrot.lane.b32.xlu2 %v14116_v13, %s7007_s30  ;;  %v5166_v51 = vpop.permute.xlu0 %5165 }
 0x82c   : > { %v5040_v5 = vpop.permute.xlu1 %5039  ;;  %v5414_v63 = vsel %vm14118_vm13, %v5398_v29, %v5166_v51  ;;  %vm14145_vm13 = vmmov %vm14120_vm14 }
 0x82d   : > { %v5152_v31 = vpop.permute.xlu2 %5151  ;;  %v5430_v41 = vsel %vm14120_vm14, %v5414_v63, %v5182_v30  ;;  %v14144_v63 = vld [vmem:[#allocation41_spill] sm:$0xff]  ;;  %vm14148_vm14 = vmmov %vm14123_vm15 }
 0x82e   : > { %v5446_v50 = vsel %vm14123_vm15, %v5430_v41, %v5198_v16  ;;  %v14146_v41 = vld [vmem:[#allocation150_spill] sm:$0xff]  ;;  %vm14149_vm15 = vmmov %vm14124_vm0 }
 0x831   : > { %5171 = vrot.lane.b32.xlu0 %v14121_v2, %s7005_s28 }
 0x832   : > { %5045 = vrot.lane.b32.xlu1 %v14119_v36, %s6997_s20 }
 0x833   : > { %5013 = vrot.lane.b32.xlu2 %v14122_v58, %s7010_s6  ;;  %v5214_v33 = vpop.permute.xlu0 %5213 }
 0x834   : > { %v5088_v55 = vpop.permute.xlu1 %5087  ;;  %v5464_v23 = vsel %vm14124_vm0, %v5446_v50, %v5214_v33  ;;  %v14150_v33 = vld [vmem:[#allocation77_spill] sm:$0xff]  ;;  %vm14156_vm0 = vmmov %vm14131_vm5 }
 0x835   : > { %5570 = vmatmul.bf16.gmra.mxu3 %v5464_v23  ;;  %v5200_v32 = vpop.permute.xlu2 %5199 }
 0x839   : > { %5219 = vrot.lane.b32.xlu0 %v14126_v3, %s7008_s4 }
 0x83a   : > { %5093 = vrot.lane.b32.xlu1 %v14125_v19, %s7000_s23  ;;  %v14151_v19 = vld [vmem:[#allocation181_spill] sm:$0xff] }
 0x83b   : > { %5061 = vrot.lane.b32.xlu2 %v14127_v10, %s6998_s21  ;;  %v5024_v28 = vpop.permute.xlu0 %5023 }
 0x83c   : > { %v5136_v0 = vpop.permute.xlu1 %5135  ;;  %v5256_v16 = vsel %vm1003_vm8, %v5236_v60, %v5024_v28  ;;  %v14152_v60 = vld [vmem:[#allocation52_spill] sm:$0xff]  ;;  %v14153_v28 = vld [vmem:[#allocation121_spill] sm:$0xff] }
 0x83d   : > { %v5010_v9 = vpop.permute.xlu2 %5009  ;;  %v5272_v38 = vsel %vm1020_vm9, %v5256_v16, %v14129_v12  ;;  %v14154_v16 = vld [vmem:[#allocation31_spill] sm:$0xff] }
 0x83e   : > { %v5288_v14 = vsel %vm1037_vm10, %v5272_v38, %v5040_v5  ;;  %v14141_v5 = vld [vmem:[#allocation173_spill] sm:$0xff] }
 0x83f   : > { %v5304_v22 = vsel %vm14131_vm5, %v5288_v14, %v5056_v43  ;;  %vm14159_vm5 = vmmov %vm14134_vm4 }
 0x841   : > { %5029 = vrot.lane.b32.xlu0 %v13923_v8, %s7011_s7 }
 0x842   : > { %5141 = vrot.lane.b32.xlu1 %v14128_v44, %s7003_s26 }
 0x843   : > { %5109 = vrot.lane.b32.xlu2 %v14130_v40, %s7001_s24  ;;  %v5072_v7 = vpop.permute.xlu0 %5071 }
 0x844   : > { %v5184_v30 = vpop.permute.xlu1 %5183  ;;  %v5320_v61 = vsel %vm1071_vm12, %v5304_v22, %v5072_v7  ;;  %v14157_v22 = vld [vmem:[#allocation163_spill] sm:$0xff] }
 0x845   : > { %v5058_v62 = vpop.permute.xlu2 %5057  ;;  %v5336_v8 = vsel %vm14134_vm4, %v5320_v61, %v5088_v55  ;;  %v14147_v55 = vld [vmem:[#allocation17_spill] sm:$0xff]  ;;  %v14158_v61 = vld [vmem:[#allocation62_spill] sm:$0xff]  ;;  %vm14161_vm4 = vmmov %vm14136_vm6 }
 0x846   : > { %v5352_v37 = vsel %vm14136_vm6, %v5336_v8, %v5104_v26  ;;  %v6827_v8 = vld [vmem:[%s12761_s2] ss:$0 sm:$0xff]  ;;  %vm14162_vm6 = vmmov %vm14137_vm11 }
 0x849   : > { %5077 = vrot.lane.b32.xlu0 %v14133_v20, %s6999_s22  ;;  %v14160_v20 = vld [vmem:[#allocation140_spill] sm:$0xff] }
 0x84a   : > { %5189 = vrot.lane.b32.xlu1 %v14132_v34, %s7006_s29 }
 0x84b   : > { %5157 = vrot.lane.b32.xlu2 %v14135_v6, %s7004_s27  ;;  %v5120_v24 = vpop.permute.xlu0 %5119 }
 0x84c   : > { %v4994_v56 = vpop.permute.xlu1 %4993  ;;  %v5368_v43 = vsel %vm14137_vm11, %v5352_v37, %v5120_v24  ;;  %vm14163_vm11 = vmmov %vm14139_vm1 }
 0x84d   : > { %v5106_v18 = vpop.permute.xlu2 %5105  ;;  %v5384_v27 = vsel %vm14139_vm1, %v5368_v43, %v5136_v0  ;;  %v5239_v0 = vsel %vm986_vm7, %v4994_v56, %v5010_v9  ;;  %v14164_v43 = vld [vmem:[#allocation106_spill] sm:$0xff]  ;;  %vm14166_vm1 = vmmov %vm14142_vm2 }
 0x84e   : > { %v5400_v51 = vsel %vm14142_vm2, %v5384_v27, %v5152_v31  ;;  %v14165_v27 = vld [vmem:[#allocation175_spill] sm:$0xff]  ;;  %vm14167_vm2 = vmmov %vm14143_vm3 }
 0x851   : > { %5125 = vrot.lane.b32.xlu0 %v14140_v46, %s7002_s25 }
 0x852   : > { %4999 = vrot.lane.b32.xlu1 %v14138_v11, %s7009_s5 }
 0x853   : > { %5205 = vrot.lane.b32.xlu2 %v14141_v5, %s7007_s30  ;;  %v5168_v13 = vpop.permute.xlu0 %5167 }
 0x854   : > { %v5042_v25 = vpop.permute.xlu1 %5041  ;;  %v5416_v26 = vsel %vm14143_vm3, %v5400_v51, %v5168_v13  ;;  %vm14168_vm3 = vmmov %vm14145_vm13  ;;  %v14169_v51 = vld [vmem:[#allocation153_spill] sm:$0xff] }
 0x855   : > { %v5154_v29 = vpop.permute.xlu2 %5153  ;;  %v5432_v36 = vsel %vm14145_vm13, %v5416_v26, %v5184_v30  ;;  %v14155_v30 = vld [vmem:[#allocation11_spill] sm:$0xff]  ;;  %vm14170_vm13 = vmmov %vm14148_vm14 }
 0x856   : > { %v5448_v58 = vsel %vm14148_vm14, %v5432_v36, %v5200_v32  ;;  %vm14171_vm14 = vmmov %vm14149_vm15 }
 0x859   : > { %5173 = vrot.lane.b32.xlu0 %v14146_v41, %s7005_s28 }
 0x85a   : > { %5047 = vrot.lane.b32.xlu1 %v14144_v63, %s6997_s20 }
 0x85b   : > { %5015 = vrot.lane.b32.xlu2 %v14147_v55, %s7010_s6  ;;  %v5216_v50 = vpop.permute.xlu0 %5215  ;;  %v14172_v55 = vld [vmem:[#allocation183_spill] sm:$0xff] }
 0x85c   : > { %v5090_v2 = vpop.permute.xlu1 %5089  ;;  %v5467_v31 = vsel %vm14149_vm15, %v5448_v58, %v5216_v50  ;;  %vm14174_vm15 = vmmov %vm14156_vm0 }
 0x85d   : > { %5575 = vmatmul.bf16.gmra.mxu3 %v5467_v31  ;;  %v5202_v23 = vpop.permute.xlu2 %5201 }
 0x861   : > { %5221 = vrot.lane.b32.xlu0 %v14151_v19, %s7008_s4 }
 0x862   : > { %5095 = vrot.lane.b32.xlu1 %v14150_v33, %s7000_s23  ;;  %v14173_v33 = vld [vmem:[#allocation33_spill] sm:$0xff] }
 0x863   : > { %5063 = vrot.lane.b32.xlu2 %v14152_v60, %s6998_s21  ;;  %v5026_v10 = vpop.permute.xlu0 %5025 }
 0x864   : > { %v5138_v3 = vpop.permute.xlu1 %5137  ;;  %v5258_v32 = vsel %vm1003_vm8, %v5239_v0, %v5026_v10 }
 0x865   : > { %v5274_v44 = vsel %vm1020_vm9, %v5258_v32, %v14154_v16  ;;  %v5012_v38 = vpop.permute.xlu2 %5011 }
 0x866   : > { %v5290_v9 = vsel %vm1037_vm10, %v5274_v44, %v5042_v25 }
 0x867   : > { %v5306_v14 = vsel %vm14156_vm0, %v5290_v9, %v5058_v62  ;;  %vm14175_vm0 = vmmov %vm14159_vm5 }
 0x869   : > { %5031 = vrot.lane.b32.xlu0 %v13946_v48, %s7011_s7 }
 0x86a   : > { %5143 = vrot.lane.b32.xlu1 %v14153_v28, %s7003_s26 }
 0x86b   : > { %5111 = vrot.lane.b32.xlu2 %v14155_v30, %s7001_s24  ;;  %v5074_v40 = vpop.permute.xlu0 %5073 }
 0x86c   : > { %v5186_v12 = vpop.permute.xlu1 %5185  ;;  %v5322_v7 = vsel %vm1071_vm12, %v5306_v14, %v5074_v40 }
 0x86d   : > { %v5338_v48 = vsel %vm14159_vm5, %v5322_v7, %v5090_v2  ;;  %v5060_v62 = vpop.permute.xlu2 %5059  ;;  %vm14176_vm5 = vmmov %vm14161_vm4 }
 0x86e   : > { %v5354_v6 = vsel %vm14161_vm4, %v5338_v48, %v5106_v18  ;;  %vm14177_vm4 = vmmov %vm14162_vm6 }
 0x871   : > { %5079 = vrot.lane.b32.xlu0 %v14158_v61, %s6999_s22 }
 0x872   : > { %5191 = vrot.lane.b32.xlu1 %v14157_v22, %s7006_s29 }
 0x873   : > { %5159 = vrot.lane.b32.xlu2 %v14160_v20, %s7004_s27  ;;  %v5122_v56 = vpop.permute.xlu0 %5121 }
 0x874   : > { %v4996_v34 = vpop.permute.xlu1 %4995  ;;  %v5370_v24 = vsel %vm14162_vm6, %v5354_v6, %v5122_v56  ;;  %vm14178_vm6 = vmmov %vm14163_vm11 }
 0x875   : > { %v5386_v37 = vsel %vm14163_vm11, %v5370_v24, %v5138_v3  ;;  %v5108_v13 = vpop.permute.xlu2 %5107  ;;  %v5242_v58 = vsel %vm986_vm7, %v4996_v34, %v5012_v38  ;;  %vm14179_vm11 = vmmov %vm14166_vm1 }
 0x876   : > { %v5402_v25 = vsel %vm14166_vm1, %v5386_v37, %v5154_v29  ;;  %vm14180_vm1 = vmmov %vm14167_vm2 }
 0x879   : > { %5127 = vrot.lane.b32.xlu0 %v14164_v43, %s7002_s25 }
 0x87a   : > { %5549 = vrot.lane.b32.xlu1 %v6827_v8, %s7009_s5 }
 0x87b   : > { %5207 = vrot.lane.b32.xlu2 %v14165_v27, %s7007_s30  ;;  %v5170_v46 = vpop.permute.xlu0 %5169 }
 0x87c   : > { %v5044_v11 = vpop.permute.xlu1 %5043  ;;  %v5418_v5 = vsel %vm14167_vm2, %v5402_v25, %v5170_v46  ;;  %vm14181_vm2 = vmmov %vm14168_vm3 }
 0x87d   : > { %v5434_v18 = vsel %vm14168_vm3, %v5418_v5, %v5186_v12  ;;  %v5156_v2 = vpop.permute.xlu2 %5155  ;;  %vm14182_vm3 = vmmov %vm14170_vm13  ;;  %v5561_v5 = vpop.f32.mrf.mxu3 }
 0x87e   : > { %v5450_v63 = vsel %vm14170_vm13, %v5434_v18, %v5202_v23  ;;  %vm14183_vm13 = vmmov %vm14171_vm14 }
 0x881   : > { %5175 = vrot.lane.b32.xlu0 %v14169_v51, %s7005_s28 }
 0x883   : > { %v5218_v36 = vpop.permute.xlu0 %5217 }
 0x884   : > { %v5092_v26 = vpop.permute.xlu1 %5091  ;;  %v5470_v41 = vsel %vm14171_vm14, %v5450_v63, %v5218_v36  ;;  %vm14185_vm14 = vmmov %vm14174_vm15 }
 0x885   : > { %5580 = vmatmul.bf16.gmra.mxu3 %v5470_v41  ;;  %v5204_v0 = vpop.permute.xlu2 %5203 }
 0x889   : > { %5223 = vrot.lane.b32.xlu0 %v14172_v55, %s7008_s4  ;;  %v5563_v55 = vpop.f32.mrf.mxu3 }
 0x88b   : > { %v5028_v50 = vpop.permute.xlu0 %5027 }
 0x88c   : > { %v5140_v29 = vpop.permute.xlu1 %5139  ;;  %v5260_v31 = vsel %vm1003_vm8, %v5242_v58, %v5028_v50 }
 0x88d   : > { %v5276_v19 = vsel %vm1020_vm9, %v5260_v31, %v14173_v33  ;;  %v5014_v12 = vpop.permute.xlu2 %5013 }
 0x88e   : > { %v5292_v23 = vsel %vm1037_vm10, %v5276_v19, %v5044_v11  ;;  %v14184_v11 = vld [vmem:[#allocation32_spill] sm:$0xff] }
 0x88f   : > { %v5308_v10 = vsel %vm14174_vm15, %v5292_v23, %v5060_v62  ;;  %vm14186_vm15 = vmmov %vm14175_vm0 }
 0x893   : > { %v5076_v60 = vpop.permute.xlu0 %5075 }
 0x894   : > { %v5188_v3 = vpop.permute.xlu1 %5187  ;;  %v5324_v32 = vsel %vm1071_vm12, %v5308_v10, %v5076_v60 }
 0x895   : > { %v5340_v16 = vsel %vm14175_vm0, %v5324_v32, %v5092_v26  ;;  %v5062_v61 = vpop.permute.xlu2 %5061  ;;  %vm14187_vm0 = vmmov %vm14176_vm5 }
 0x896   : > { %v5356_v38 = vsel %vm14176_vm5, %v5340_v16, %v5108_v13  ;;  %vm14188_vm5 = vmmov %vm14177_vm4 }
 0x89b   : > { %v5124_v44 = vpop.permute.xlu0 %5123 }
 0x89c   : > { %v4998_v28 = vpop.permute.xlu1 %4997  ;;  %v5372_v30 = vsel %vm14177_vm4, %v5356_v38, %v5124_v44  ;;  %vm14189_vm4 = vmmov %vm14178_vm6 }
 0x89d   : > { %v5388_v9 = vsel %vm14178_vm6, %v5372_v30, %v5140_v29  ;;  %v5110_v62 = vpop.permute.xlu2 %5109  ;;  %v5245_v24 = vsel %vm986_vm7, %v4998_v28, %v5014_v12  ;;  %vm14190_vm6 = vmmov %vm14179_vm11 }
 0x89e   : > { %v5404_v7 = vsel %vm14179_vm11, %v5388_v9, %v5156_v2  ;;  %vm14191_vm11 = vmmov %vm14180_vm1 }
 0x8a3   : > { %v5172_v14 = vpop.permute.xlu0 %5171 }
 0x8a4   : > { %v5046_v40 = vpop.permute.xlu1 %5045  ;;  %v5420_v22 = vsel %vm14180_vm1, %v5404_v7, %v5172_v14  ;;  %vm14192_vm1 = vmmov %vm14181_vm2  ;;  %v14195_v7 = vld [vmem:[#allocation34_spill] sm:$0xff] }
 0x8a5   : > { %v5436_v34 = vsel %vm14181_vm2, %v5420_v22, %v5188_v3  ;;  %v5158_v25 = vpop.permute.xlu2 %5157  ;;  %v5566_v3 = vpop.f32.mrf.mxu3  ;;  %vm14193_vm2 = vmmov %vm14182_vm3 }
 0x8a6   : > { %v5452_v20 = vsel %vm14182_vm3, %v5436_v34, %v5204_v0  ;;  %vm14194_vm3 = vmmov %vm14183_vm13 }
 0x8ab   : > { %v5220_v56 = vpop.permute.xlu0 %5219 }
 0x8ac   : > { %v5094_v48 = vpop.permute.xlu1 %5093  ;;  %v5473_v8 = vsel %vm14183_vm13, %v5452_v20, %v5220_v56  ;;  %vm14196_vm13 = vmmov %vm14185_vm14 }
 0x8ad   : > { %5585 = vmatmul.bf16.gmra.mxu3 %v5473_v8  ;;  %v5206_v2 = vpop.permute.xlu2 %5205  ;;  %v12198_v44 = vpop.f32.mrf.mxu3 }
 0x8b3   : > { %v5030_v37 = vpop.permute.xlu0 %5029 }
 0x8b4   : > { %v5142_v6 = vpop.permute.xlu1 %5141  ;;  %v5262_v43 = vsel %vm1003_vm8, %v5245_v24, %v5030_v37 }
 0x8b5   : > { %v5278_v27 = vsel %vm1020_vm9, %v5262_v43, %v14184_v11  ;;  %v5016_v23 = vpop.permute.xlu2 %5015 }
 0x8b6   : > { %v5294_v13 = vsel %vm1037_vm10, %v5278_v27, %v5046_v40 }
 0x8b7   : > { %v5310_v51 = vsel %vm14185_vm14, %v5294_v13, %v5062_v61  ;;  %vm14202_vm14 = vmmov %vm14191_vm11 }
 0x8b8   : > { %v12202_v14 = vpop.f32.mrf.mxu3 }
 0x8bb   : > { %v5078_v18 = vpop.permute.xlu0 %5077 }
 0x8bc   : > { %v5190_v46 = vpop.permute.xlu1 %5189  ;;  %v5326_v26 = vsel %vm1071_vm12, %v5310_v51, %v5078_v18 }
 0x8bd   : > { %v5342_v36 = vsel %vm14186_vm15, %v5326_v26, %v5094_v48  ;;  %v5064_v12 = vpop.permute.xlu2 %5063 }
 0x8be   : > { %v5358_v29 = vsel %vm14187_vm0, %v5342_v36, %v5110_v62 }
 0x8c0   : > { %v5573_v62 = vpop.f32.mrf.mxu3 }
 0x8c3   : > { %v5126_v41 = vpop.permute.xlu0 %5125 }
 0x8c4   : > { %v5000_v63 = vpop.permute.xlu1 %4999  ;;  %v5374_v58 = vsel %vm14188_vm5, %v5358_v29, %v5126_v41 }
 0x8c5   : > { %v5390_v50 = vsel %vm14189_vm4, %v5374_v58, %v5142_v6  ;;  %v5248_v38 = vsel %vm986_vm7, %v5000_v63, %v5016_v23  ;;  %v5112_v48 = vpop.permute.xlu2 %5111  ;;  %vm14197_vm7 = vmmov %vm14186_vm15 }
 0x8c6   : > { %v5406_v19 = vsel %vm14190_vm6, %v5390_v50, %v5158_v25  ;;  %vm14203_vm15 = vmmov %vm14192_vm1 }
 0x8cb   : > { %v5174_v33 = vpop.permute.xlu0 %5173 }
 0x8cc   : > { %v5048_v31 = vpop.permute.xlu1 %5047  ;;  %v5422_v0 = vsel %vm14191_vm11, %v5406_v19, %v5174_v33 }
 0x8cd   : > { %v5438_v60 = vsel %vm14192_vm1, %v5422_v0, %v5190_v46  ;;  %v5160_v13 = vpop.permute.xlu2 %5159 }
 0x8ce   : > { %v5454_v32 = vsel %vm14193_vm2, %v5438_v60, %v5206_v2 }
 0x8d3   : > { %v5222_v28 = vpop.permute.xlu0 %5221 }
 0x8d4   : > { %v5096_v10 = vpop.permute.xlu1 %5095  ;;  %v5476_v16 = vsel %vm14194_vm3, %v5454_v32, %v5222_v28 }
 0x8d5   : > { %5590 = vmatmul.bf16.gmra.mxu3 %v5476_v16 }
 0x8db   : > { %v5032_v9 = vpop.permute.xlu0 %5031 }
 0x8dc   : > { %v5144_v30 = vpop.permute.xlu1 %5143  ;;  %v5264_v40 = vsel %vm1003_vm8, %v5248_v38, %v5032_v9  ;;  %vm14198_vm8 = vmmov %vm14187_vm0 }
 0x8dd   : > { %v5280_v22 = vsel %vm1020_vm9, %v5264_v40, %v14195_v7  ;;  %vm14199_vm9 = vmmov %vm14188_vm5 }
 0x8de   : > { %v5296_v34 = vsel %vm1037_vm10, %v5280_v22, %v5048_v31  ;;  %vm14200_vm10 = vmmov %vm14189_vm4  ;;  %v5208_v22 = vpop.permute.xlu2 %5207 }
 0x8df   : > { %v5312_v56 = vsel %vm14196_vm13, %v5296_v34, %v5064_v12  ;;  %vm14204_vm0 = vmmov %vm14193_vm2 }
 0x8e0   : > { %v12263_v7 = vpop.f32.mrf.mxu3  ;;  %vm14205_vm5 = vmmov %vm14194_vm3 }
 0x8e3   : > { %v5080_v20 = vpop.permute.xlu0 %5079 }
 0x8e4   : > { %v5192_v61 = vpop.permute.xlu1 %5191  ;;  %v5328_v8 = vsel %vm1071_vm12, %v5312_v56, %v5080_v20  ;;  %vm14201_vm12 = vmmov %vm14190_vm6 }
 0x8e5   : > { %v5344_v6 = vsel %vm14197_vm7, %v5328_v8, %v5096_v10 }
 0x8e6   : > { %v5360_v25 = vsel %vm14198_vm8, %v5344_v6, %v5112_v48 }
 0x8eb   : > { %v5128_v46 = vpop.permute.xlu0 %5127 }
 0x8ec   : > { %v12210_v24 = vpop.permute.xlu1 %5549  ;;  %v5376_v51 = vsel %vm14199_vm9, %v5360_v25, %v5128_v46 }
 0x8ed   : > { %v12213_v37 = vadd.f32 %v5566_v3, %v12210_v24  ;;  %v12216_v43 = vadd.f32 %v5563_v55, %v12210_v24  ;;  %v12219_v11 = vadd.f32 %v5561_v5, %v12210_v24  ;;  %v12222_v27 = vadd.f32 %v5573_v62, %v12210_v24 }
 0x8ee   : > { %v5392_v55 = vsel %vm14200_vm10, %v5376_v51, %v5144_v30 }
 0x8ef   : > { %v12226_v18 = vmul.f32 0.70710677, %v12213_v37  ;;  %v12230_v26 = vmul.f32 0.70710677, %v12216_v43  ;;  %v12233_v63 = vmul.f32 0.70710677, %v12219_v11  ;;  %v5408_v0 = vsel %vm14201_vm12, %v5392_v55, %v5160_v13 }
 0x8f0   : > { %v12238_v36 = vmul.f32 0.70710677, %v12222_v27 }
 0x8f1   : > { %v5713_v5 = vmul.f32 %v12226_v18, %v12226_v18  ;;  %v5673_v41 = vmul.f32 %v12230_v26, %v12230_v26  ;;  %v5633_v2 = vmul.f32 %v12233_v63, %v12233_v63 }
 0x8f2   : > { %v5833_v58 = vmul.f32 %v12238_v36, %v12238_v36 }
 0x8f3   : > { %v12245_v29 = vmin.f32 %v5713_v5, 16.0  ;;  %v12249_v50 = vmin.f32 %v5673_v41, 16.0  ;;  %v12251_v31 = vmin.f32 %v5633_v2, 16.0  ;;  %v5176_v23 = vpop.permute.xlu0 %5175 }
 0x8f4   : > { %v12255_v3 = vmin.f32 %v5833_v58, 16.0  ;;  %v5424_v28 = vsel %vm14202_vm14, %v5408_v0, %v5176_v23 }
 0x8f5   : > { %v5715_v33 = vmul.f32 2.1237322e-06, %v12245_v29  ;;  %v5726_v19 = vmul.f32 3.8918573e-05, %v12245_v29  ;;  %v5675_v60 = vmul.f32 2.1237322e-06, %v12249_v50  ;;  %v5440_v34 = vsel %vm14203_vm15, %v5424_v28, %v5192_v61 }
 0x8f6   : > { %v5686_v10 = vmul.f32 3.8918573e-05, %v12249_v50  ;;  %v5635_v32 = vmul.f32 2.1237322e-06, %v12251_v31  ;;  %v5646_v38 = vmul.f32 3.8918573e-05, %v12251_v31  ;;  %v5456_v61 = vsel %vm14204_vm0, %v5440_v34, %v5208_v22 }
 0x8f7   : > { %v5716_v16 = vadd.f32 0.00028619796, %v5715_v33  ;;  %v5727_v12 = vadd.f32 0.001143296, %v5726_v19  ;;  %v5676_v30 = vadd.f32 0.00028619796, %v5675_v60 }
 0x8f8   : > { %v5687_v9 = vadd.f32 0.001143296, %v5686_v10  ;;  %v5636_v40 = vadd.f32 0.00028619796, %v5635_v32  ;;  %v5647_v56 = vadd.f32 0.001143296, %v5646_v38 }
 0x8f9   : > { %v5717_v48 = vmul.f32 %v5716_v16, %v12245_v29  ;;  %v5728_v20 = vmul.f32 %v5727_v12, %v12245_v29  ;;  %v5677_v8 = vmul.f32 %v5676_v30, %v12249_v50  ;;  %v5835_v46 = vmul.f32 2.1237322e-06, %v12255_v3 }
 0x8fa   : > { %v5688_v62 = vmul.f32 %v5687_v9, %v12249_v50  ;;  %v5637_v6 = vmul.f32 %v5636_v40, %v12251_v31  ;;  %v5648_v51 = vmul.f32 %v5647_v56, %v12251_v31  ;;  %v5846_v5 = vmul.f32 3.8918573e-05, %v12255_v3 }
 0x8fb   : > { %v5718_v25 = vadd.f32 0.0036580483, %v5717_v48  ;;  %v5729_v13 = vadd.f32 0.014752088, %v5728_v20  ;;  %v5678_v41 = vadd.f32 0.0036580483, %v5677_v8  ;;  %v5224_v23 = vpop.permute.xlu0 %5223 }
 0x8fc   : > { %v5689_v2 = vadd.f32 0.014752088, %v5688_v62  ;;  %v5638_v55 = vadd.f32 0.0036580483, %v5637_v6  ;;  %v5649_v19 = vadd.f32 0.014752088, %v5648_v51  ;;  %v5479_v16 = vsel %vm14205_vm5, %v5456_v61, %v5224_v23 }
 0x8fd   : > { %v5719_v58 = vmul.f32 %v5718_v25, %v12245_v29  ;;  %v5730_v33 = vmul.f32 %v5729_v13, %v12245_v29  ;;  %v5836_v0 = vadd.f32 0.00028619796, %v5835_v46  ;;  %v5679_v60 = vmul.f32 %v5678_v41, %v12249_v50  ;;  %5595 = vmatmul.bf16.gmra.mxu3 %v5479_v16  ;;  %v12289_v25 = vpop.f32.mrf.mxu3 }
 0x8fe   : > { %v5690_v10 = vmul.f32 %v5689_v2, %v12249_v50  ;;  %v5639_v32 = vmul.f32 %v5638_v55, %v12251_v31  ;;  %v5847_v28 = vadd.f32 0.001143296, %v5846_v5  ;;  %v5650_v30 = vmul.f32 %v5649_v19, %v12251_v31 }
 0x8ff   : > { %v5720_v12 = vadd.f32 0.05243302, %v5719_v58  ;;  %v5731_v38 = vadd.f32 0.112945676, %v5730_v33  ;;  %v5680_v9 = vadd.f32 0.05243302, %v5679_v60  ;;  %v5837_v34 = vmul.f32 %v5836_v0, %v12255_v3 }
 0x900   : > { %v5691_v40 = vadd.f32 0.112945676, %v5690_v10  ;;  %v5640_v22 = vadd.f32 0.05243302, %v5639_v32  ;;  %v5651_v56 = vadd.f32 0.112945676, %v5650_v30  ;;  %v5848_v8 = vmul.f32 %v5847_v28, %v12255_v3 }
 0x901   : > { %v5721_v48 = vmul.f32 %v5720_v12, %v12245_v29  ;;  %v5732_v20 = vmul.f32 %v5731_v38, %v12245_v29  ;;  %v5681_v62 = vmul.f32 %v5680_v9, %v12249_v50  ;;  %v5838_v5 = vadd.f32 0.0036580483, %v5837_v34 }
 0x902   : > { %v5692_v6 = vmul.f32 %v5691_v40, %v12249_v50  ;;  %v5641_v46 = vmul.f32 %v5640_v22, %v12251_v31  ;;  %v5652_v51 = vmul.f32 %v5651_v56, %v12251_v31  ;;  %v5849_v61 = vadd.f32 0.014752088, %v5848_v8 }
 0x903   : > { %v5733_v13 = vadd.f32 0.4994258, %v5732_v20  ;;  %v5722_v41 = vadd.f32 0.18741608, %v5721_v48  ;;  %v12294_v55 = vadd.f32 %v12202_v14, %v12210_v24  ;;  %v5682_v33 = vadd.f32 0.18741608, %v5681_v62 }
 0x904   : > { %v5693_v2 = vadd.f32 0.4994258, %v5692_v6  ;;  %v5653_v19 = vadd.f32 0.4994258, %v5652_v51  ;;  %v5850_v0 = vmul.f32 %v5849_v61, %v12255_v3  ;;  %v5642_v60 = vadd.f32 0.18741608, %v5641_v46 }
 0x905   : > { %v5734_v58 = vmul.f32 %v5733_v13, %v12245_v29  ;;  %v5839_v32 = vmul.f32 %v5838_v5, %v12255_v3  ;;  %v5723_v28 = vmul.f32 %v5722_v41, %v12245_v29  ;;  %v5683_v14 = vmul.f32 %v5682_v33, %v12249_v50 }
 0x906   : > { %v5694_v23 = vmul.f32 %v5693_v2, %v12249_v50  ;;  %v5654_v12 = vmul.f32 %v5653_v19, %v12251_v31  ;;  %v5851_v38 = vadd.f32 0.112945676, %v5850_v0  ;;  %v12306_v30 = vmul.f32 0.70710677, %v12294_v55 }
 0x907   : > { %v5735_v10 = vadd.f32 1.0, %v5734_v58  ;;  %v5643_v9 = vmul.f32 %v5642_v60, %v12251_v31  ;;  %v5840_v22 = vadd.f32 0.05243302, %v5839_v32  ;;  %v5724_v29 = vadd.f32 1.1283791, %v5723_v28 }
 0x908   : > { %v12301_v16 = vadd.f32 1.0, %v5694_v23  ;;  %v5581_v40 = vpop.f32.mrf.mxu3  ;;  %v12313_v48 = vadd.f32 1.0, %v5654_v12  ;;  %v5684_v56 = vadd.f32 1.1283791, %v5683_v14  ;;  %v5852_v50 = vmul.f32 %v5851_v38, %v12255_v3 }
 0x909   : > { %6924 = vrcp.f32 %v5735_v10  ;;  %v12311_v34 = vadd.f32 %v5581_v40, %v12210_v24  ;;  %v5745_v20 = vand.u32 2147483647, %v5735_v10  ;;  %v5793_v8 = vmul.f32 %v12306_v30, %v12306_v30 }
 0x90a   : > { %6926 = vrcp.f32 %v12301_v16  ;;  %v5747_v6 = vand.u32 2147483648, %v5735_v10  ;;  %v5644_v31 = vadd.f32 1.1283791, %v5643_v9  ;;  %v5705_v13 = vand.u32 2147483647, %v12301_v16 }
 0x90b   : > { %v12319_v62 = vmul.f32 0.70710677, %v12311_v34  ;;  %6928 = vrcp.f32 %v12313_v48  ;;  %v5707_v51 = vand.u32 2147483648, %v12301_v16  ;;  %v12325_v5 = vmul.f32 %v5840_v22, %v12255_v3 }
 0x90c   : > { %v5853_v61 = vadd.f32 0.4994258, %v5852_v50  ;;  %v5725_v58 = vmul.f32 %v5724_v29, %v12226_v18  ;;  %vm5741_vm4 = vweird.f32 %v5735_v10  ;;  %vm12330_vm6 = vcmp.eq.f32.partialorder %v5745_v20, 8.507059e+37 }
 0x90d   : > { %v5953_v2 = vmul.f32 %v12319_v62, %v12319_v62  ;;  %v5685_v0 = vmul.f32 %v5684_v56, %v12230_v26  ;;  %vm5701_vm11 = vweird.f32 %v12301_v16  ;;  %v5748_v28 = vor.u32 1.1754944e-38, %v5747_v6 }
 0x90e   : > { %v5645_v12 = vmul.f32 %v5644_v31, %v12233_v63  ;;  %vm12340_vm1 = vcmp.eq.f32.partialorder %v5705_v13, 8.507059e+37  ;;  %v5708_v38 = vor.u32 1.1754944e-38, %v5707_v51  ;;  %v5854_v9 = vmul.f32 %v5853_v61, %v12255_v3 }
 0x90f   : > { %v6925_v46 = vpop.eup %6924  ;;  %v12337_v60 = vmin.f32 %v5953_v2, 16.0  ;;  %v12348_v50 = vmin.f32 %v5793_v8, 16.0  ;;  %v5665_v51 = vand.u32 2147483647, %v12313_v48  ;;  %vm5661_vm9 = vweird.f32 %v12313_v48 }
 0x910   : > { %v6927_v41 = vpop.eup %6926  ;;  %v5737_v33 = vmul.f32 %v6925_v46, %v5735_v10  ;;  %vm5742_vm2 = vweird.f32 %v6925_v46  ;;  %v5583_v20 = vpop.f32.mrf.mxu3 }
 0x911   : > { %v5697_v23 = vmul.f32 %v6927_v41, %v12301_v16  ;;  %v6929_v40 = vpop.eup %6928  ;;  %v5955_v26 = vmul.f32 2.1237322e-06, %v12337_v60  ;;  %v5966_v22 = vmul.f32 3.8918573e-05, %v12337_v60  ;;  %vm5702_vm3 = vweird.f32 %v6927_v41  ;;  %vm5743_vm13 = vmor %vm5741_vm4, %vm5742_vm2 }
 0x912   : > { %v5738_v32 = vsub.f32 1.0, %v5737_v33  ;;  %v5657_v63 = vmul.f32 %v6929_v40, %v12313_v48  ;;  %v5667_v33 = vand.u32 2147483648, %v12313_v48  ;;  %v12358_v8 = vadd.f32 %v5583_v20, %v12210_v24  ;;  %vm5703_vm7 = vmor %vm5701_vm11, %vm5702_vm3 }
 0x913   : > { %v5698_v14 = vsub.f32 1.0, %v5697_v23  ;;  %v5956_v6 = vadd.f32 0.00028619796, %v5955_v26  ;;  %v5967_v31 = vadd.f32 0.001143296, %v5966_v22  ;;  %v12353_v23 = vadd.f32 1.0, %v5854_v9 }
 0x914   : > { %v5739_v29 = vmul.f32 %v6925_v46, %v5738_v32  ;;  %v5658_v2 = vsub.f32 1.0, %v5657_v63  ;;  %vm5662_vm8 = vweird.f32 %v6929_v40  ;;  %vm5666_vm12 = vcmp.eq.f32.partialorder %v5665_v51, 8.507059e+37 }
 0x915   : > { %v5699_v56 = vmul.f32 %v6927_v41, %v5698_v14  ;;  %v5957_v32 = vmul.f32 %v5956_v6, %v12337_v60  ;;  %v5968_v14 = vmul.f32 %v5967_v31, %v12337_v60  ;;  %6930 = vrcp.f32 %v12353_v23  ;;  %vm5663_vm10 = vmor %vm5661_vm9, %vm5662_vm8 }
 0x916   : > { %v5740_v13 = vadd.f32 %v6925_v46, %v5739_v29  ;;  %v5659_v29 = vmul.f32 %v6929_v40, %v5658_v2  ;;  %vm5861_vm15 = vweird.f32 %v12353_v23 }
 0x917   : > { %v5700_v61 = vadd.f32 %v6927_v41, %v5699_v56  ;;  %v5958_v9 = vadd.f32 0.0036580483, %v5957_v32  ;;  %v5969_v56 = vadd.f32 0.014752088, %v5968_v14  ;;  %v5842_v14 = vadd.f32 0.18741608, %v12325_v5 }
 0x918   : > { %v5744_v26 = vsel %vm5743_vm13, %v6925_v46, %v5740_v13  ;;  %v5660_v20 = vadd.f32 %v6929_v40, %v5659_v29  ;;  %v5601_v5 = vmul.f32 0.5, %v12219_v11 }
 0x919   : > { %v5749_v10 = vsel %vm12330_vm6, %v5748_v28, %v5744_v26  ;;  %v5704_v22 = vsel %vm5703_vm7, %v6927_v41, %v5700_v61  ;;  %v5970_v16 = vmul.f32 %v5969_v56, %v12337_v60  ;;  %v5668_v41 = vor.u32 1.1754944e-38, %v5667_v33 }
 0x91a   : > { %v5750_v63 = vmul.f32 %v5749_v10, %v5725_v58  ;;  %v5709_v6 = vsel %vm12340_vm1, %v5708_v38, %v5704_v22  ;;  %v5959_v19 = vmul.f32 %v5958_v9, %v12337_v60  ;;  %v12372_v28 = vmul.f32 0.70710677, %v12358_v8 }
 0x91b   : > { %v5710_v31 = vmul.f32 %v5709_v6, %v5685_v0  ;;  %v5664_v18 = vsel %vm5663_vm10, %v6929_v40, %v5660_v20  ;;  %v5971_v38 = vadd.f32 0.112945676, %v5970_v16  ;;  %v5603_v0 = vmul.f32 0.5, %v12213_v37  ;;  %v6931_v10 = vpop.eup %6930 }
 0x91c   : > { %v6735_v46 = vclamps-f32 %v5750_v63, 1.0  ;;  %v5669_v48 = vsel %vm5666_vm12, %v5668_v41, %v5664_v18  ;;  %v5602_v61 = vmul.f32 0.5, %v12216_v43  ;;  %v5795_v26 = vmul.f32 2.1237322e-06, %v12348_v50 }
 0x91d   : > { %v6734_v58 = vclamps-f32 %v5710_v31, 1.0  ;;  %v5670_v32 = vmul.f32 %v5669_v48, %v5645_v12  ;;  %v5972_v51 = vmul.f32 %v5971_v38, %v12337_v60  ;;  %v5960_v22 = vadd.f32 0.05243302, %v5959_v19 }
 0x91e   : > { %v6275_v13 = vadd.f32 1.0, %v6735_v46  ;;  %v5993_v40 = vmul.f32 %v12372_v28, %v12372_v28  ;;  %v5857_v43 = vmul.f32 %v6931_v10, %v12353_v23  ;;  %v5843_v56 = vmul.f32 %v5842_v14, %v12255_v3 }
 0x91f   : > { %v6274_v2 = vadd.f32 1.0, %v6734_v58  ;;  %v6733_v37 = vclamps-f32 %v5670_v32, 1.0  ;;  %v5973_v9 = vadd.f32 0.4994258, %v5972_v51  ;;  %v5806_v63 = vmul.f32 3.8918573e-05, %v12348_v50 }
 0x920   : > { %v6291_v33 = vmul.f32 %v6275_v13, %v5603_v0  ;;  %v5858_v31 = vsub.f32 1.0, %v5857_v43  ;;  %v5796_v20 = vadd.f32 0.00028619796, %v5795_v26  ;;  %v5961_v16 = vmul.f32 %v5960_v22, %v12337_v60 }
 0x921   : > { %v6290_v29 = vmul.f32 %v6274_v2, %v5602_v61  ;;  %v6273_v12 = vadd.f32 1.0, %v6733_v37  ;;  %v5974_v6 = vmul.f32 %v5973_v9, %v12337_v60  ;;  %v12389_v46 = vmin.f32 %v5993_v40, 16.0 }
 0x922   : > { %6325 = vrot.lane.b32.xlu1 %v6291_v33, %s6999_s22  ;;  %v5859_v58 = vmul.f32 %v6931_v10, %v5858_v31  ;;  %v5867_v18 = vand.u32 2147483648, %v12353_v23  ;;  %v5844_v11 = vadd.f32 1.1283791, %v5843_v56  ;;  %vm5862_vm14 = vweird.f32 %v6931_v10 }
 0x923   : > { %6323 = vrot.lane.b32.xlu0 %v6290_v29, %s6999_s22  ;;  %v6289_v41 = vmul.f32 %v6273_v12, %v5601_v5  ;;  %v12391_v19 = vadd.f32 1.0, %v5974_v6  ;;  %v5865_v3 = vand.u32 2147483647, %v12353_v23  ;;  %v5807_v38 = vadd.f32 0.001143296, %v5806_v63  ;;  %vm5863_vm0 = vmor %vm5861_vm15, %vm5862_vm14 }
 0x924   : > { %v5797_v0 = vmul.f32 %v5796_v20, %v12348_v50  ;;  %v12400_v13 = vadd.f32 %v12198_v44, %v12210_v24  ;;  %v5962_v48 = vadd.f32 0.18741608, %v5961_v16  ;;  %v6006_v61 = vmul.f32 3.8918573e-05, %v12389_v46 }
 0x925   : > { %6321 = vrot.lane.b32.xlu2 %v6289_v41, %s6999_s22  ;;  %6932 = vrcp.f32 %v12391_v19  ;;  %v5860_v2 = vadd.f32 %v6931_v10, %v5859_v58  ;;  %v5868_v32 = vor.u32 1.1754944e-38, %v5867_v18  ;;  %v5808_v14 = vmul.f32 %v5807_v38, %v12348_v50 }
 0x926   : > { %v5845_v51 = vmul.f32 %v5844_v11, %v12238_v36  ;;  %vm5866_vm5 = vcmp.eq.f32.partialorder %v5865_v3, 8.507059e+37  ;;  %v5798_v22 = vadd.f32 0.0036580483, %v5797_v0  ;;  %v12407_v44 = vmul.f32 0.70710677, %v12400_v13 }
 0x927   : > { %v5864_v33 = vsel %vm5863_vm0, %v6931_v10, %v5860_v2  ;;  %v5809_v40 = vadd.f32 0.014752088, %v5808_v14  ;;  %v5963_v29 = vmul.f32 %v5962_v48, %v12337_v60  ;;  %v6007_v37 = vadd.f32 0.001143296, %v6006_v61 }
 0x928   : > { %v5869_v26 = vsel %vm5866_vm5, %v5868_v32, %v5864_v33  ;;  %v5753_v5 = vmul.f32 %v12407_v44, %v12407_v44  ;;  %v5799_v12 = vmul.f32 %v5798_v22, %v12348_v50  ;;  %v5606_v20 = vmul.f32 0.5, %v12222_v27 }
 0x929   : > { %v5870_v9 = vmul.f32 %v5869_v26, %v5845_v51  ;;  %v5810_v23 = vmul.f32 %v5809_v40, %v12348_v50  ;;  %v5964_v6 = vadd.f32 1.1283791, %v5963_v29  ;;  %v6008_v60 = vmul.f32 %v6007_v37, %v12389_v46 }
 0x92a   : > { %v12415_v63 = vmin.f32 %v5753_v5, 16.0  ;;  %v5985_v16 = vand.u32 2147483647, %v12391_v19  ;;  %v5987_v41 = vand.u32 2147483648, %v12391_v19  ;;  %vm5981_vm6 = vweird.f32 %v12391_v19 }
 0x92b   : > { %v6933_v43 = vpop.eup %6932  ;;  %v6738_v10 = vclamps-f32 %v5870_v9, 1.0  ;;  %v5811_v56 = vadd.f32 0.112945676, %v5810_v23  ;;  %v5800_v61 = vadd.f32 0.05243302, %v5799_v12  ;;  %v12430_v51 = vadd.f32 %v12289_v25, %v12210_v24 }
 0x92c   : > { %v5977_v36 = vmul.f32 %v6933_v43, %v12391_v19  ;;  %vm5982_vm4 = vweird.f32 %v6933_v43  ;;  %v5755_v38 = vmul.f32 2.1237322e-06, %v12415_v63  ;;  %v5766_v0 = vmul.f32 3.8918573e-05, %v12415_v63 }
 0x92d   : > { %v6278_v58 = vadd.f32 1.0, %v6738_v10  ;;  %v5812_v3 = vmul.f32 %v5811_v56, %v12348_v50  ;;  %v5965_v33 = vmul.f32 %v5964_v6, %v12319_v62  ;;  %vm5983_vm11 = vmor %vm5981_vm6, %vm5982_vm4  ;;  %v5988_v26 = vor.u32 1.1754944e-38, %v5987_v41 }
 0x92e   : > { %v5978_v31 = vsub.f32 1.0, %v5977_v36  ;;  %v5756_v14 = vadd.f32 0.00028619796, %v5755_v38  ;;  %v5767_v19 = vadd.f32 0.001143296, %v5766_v0  ;;  %vm5986_vm1 = vcmp.eq.f32.partialorder %v5985_v16, 8.507059e+37 }
 0x92f   : > { %v6294_v27 = vmul.f32 %v6278_v58, %v5606_v20  ;;  %v5813_v32 = vadd.f32 0.4994258, %v5812_v3  ;;  %v5801_v62 = vmul.f32 %v5800_v61, %v12348_v50  ;;  %v12445_v10 = vmul.f32 0.70710677, %v12430_v51 }
 0x930   : > { %v5979_v18 = vmul.f32 %v6933_v43, %v5978_v31  ;;  %v5586_v11 = vpop.f32.mrf.mxu3  ;;  %v5757_v37 = vmul.f32 %v5756_v14, %v12415_v63  ;;  %v5768_v36 = vmul.f32 %v5767_v19, %v12415_v63  ;;  %v6009_v56 = vadd.f32 0.014752088, %v6008_v60 }
 0x931   : > { %v12426_v48 = vadd.f32 %v5586_v11, %v12210_v24  ;;  %6331 = vrot.lane.b32.xlu1 %v6294_v27, %s6999_s22  ;;  %v5814_v29 = vmul.f32 %v5813_v32, %v12348_v50  ;;  %v5609_v31 = vmul.f32 0.5, %v12311_v34  ;;  %v5802_v16 = vadd.f32 0.18741608, %v5801_v62 }
 0x932   : > { %v5980_v2 = vadd.f32 %v6933_v43, %v5979_v18  ;;  %v5758_v6 = vadd.f32 0.0036580483, %v5757_v37  ;;  %v5769_v18 = vadd.f32 0.014752088, %v5768_v36  ;;  %v5913_v11 = vmul.f32 %v12445_v10, %v12445_v10 }
 0x933   : > { %v12435_v22 = vmul.f32 0.70710677, %v12426_v48  ;;  %v5815_v5 = vadd.f32 1.0, %v5814_v29  ;;  %v6010_v0 = vmul.f32 %v6009_v56, %v12389_v46  ;;  %v5803_v61 = vmul.f32 %v5802_v16, %v12348_v50 }
 0x934   : > { %v5984_v40 = vsel %vm5983_vm11, %v6933_v43, %v5980_v2  ;;  %v5759_v60 = vmul.f32 %v5758_v6, %v12415_v63  ;;  %v5770_v27 = vmul.f32 %v5769_v18, %v12415_v63 }
 0x935   : > { %v5989_v9 = vsel %vm5986_vm1, %v5988_v26, %v5984_v40  ;;  %v6033_v25 = vmul.f32 %v12435_v22, %v12435_v22  ;;  %6934 = vrcp.f32 %v5815_v5  ;;  %v6011_v40 = vadd.f32 0.112945676, %v6010_v0 }
 0x936   : > { %v5990_v23 = vmul.f32 %v5989_v9, %v5965_v33  ;;  %v5771_v14 = vadd.f32 0.112945676, %v5770_v27  ;;  %v12459_v33 = vmin.f32 %v5913_v11, 16.0  ;;  %v5760_v29 = vadd.f32 0.05243302, %v5759_v60 }
 0x937   : > { %v12447_v12 = vmin.f32 %v6033_v25, 16.0  ;;  %v5804_v25 = vadd.f32 1.1283791, %v5803_v61  ;;  %v5827_v36 = vand.u32 2147483648, %v5815_v5  ;;  %v12471_v11 = vadd.f32 %v12263_v7, %v12210_v24 }
 0x938   : > { %v6741_v43 = vclamps-f32 %v5990_v23, 1.0  ;;  %v5772_v37 = vmul.f32 %v5771_v14, %v12415_v63  ;;  %v5825_v23 = vand.u32 2147483647, %v5815_v5  ;;  %v5926_v56 = vmul.f32 3.8918573e-05, %v12459_v33 }
 0x939   : > { %v6046_v20 = vmul.f32 3.8918573e-05, %v12447_v12  ;;  %v6035_v58 = vmul.f32 2.1237322e-06, %v12447_v12  ;;  %v5761_v16 = vmul.f32 %v5760_v29, %v12415_v63  ;;  %vm5821_vm3 = vweird.f32 %v5815_v5 }
 0x93a   : > { %v6281_v41 = vadd.f32 1.0, %v6741_v43  ;;  %v5773_v43 = vadd.f32 0.4994258, %v5772_v37  ;;  %v5927_v18 = vadd.f32 0.001143296, %v5926_v56  ;;  %vm5826_vm7 = vcmp.eq.f32.partialorder %v5825_v23, 8.507059e+37 }
 0x93b   : > { %v6047_v3 = vadd.f32 0.001143296, %v6046_v20  ;;  %v6935_v2 = vpop.eup %6934  ;;  %v6036_v32 = vadd.f32 0.00028619796, %v6035_v58  ;;  %v5915_v20 = vmul.f32 2.1237322e-06, %v12459_v33  ;;  %v5588_v58 = vpop.f32.mrf.mxu3 }
 0x93c   : > { %v6297_v38 = vmul.f32 %v6281_v41, %v5609_v31  ;;  %v5817_v19 = vmul.f32 %v6935_v2, %v5815_v5  ;;  %vm5822_vm2 = vweird.f32 %v6935_v2  ;;  %v5774_v41 = vmul.f32 %v5773_v43, %v12415_v63 }
 0x93d   : > { %v6048_v34 = vmul.f32 %v6047_v3, %v12447_v12  ;;  %v6037_v50 = vmul.f32 %v6036_v32, %v12447_v12  ;;  %vm5823_vm13 = vmor %vm5821_vm3, %vm5822_vm2  ;;  %v5828_v60 = vor.u32 1.1754944e-38, %v5827_v36  ;;  %v12484_v37 = vmul.f32 0.70710677, %v12471_v11 }
 0x93e   : > { %6337 = vrot.lane.b32.xlu1 %v6297_v38, %s6999_s22  ;;  %v5818_v62 = vsub.f32 1.0, %v5817_v19  ;;  %v5805_v38 = vmul.f32 %v5804_v25, %v12306_v30  ;;  %v12475_v27 = vadd.f32 1.0, %v5774_v41  ;;  %v5762_v19 = vadd.f32 0.18741608, %v5761_v16 }
 0x93f   : > { %v6049_v26 = vadd.f32 0.014752088, %v6048_v34  ;;  %v12478_v34 = vadd.f32 %v5588_v58, %v12210_v24  ;;  %v6038_v61 = vadd.f32 0.0036580483, %v6037_v50  ;;  %v5928_v30 = vmul.f32 %v5927_v18, %v12459_v33 }
 0x940   : > { %v5819_v31 = vmul.f32 %v6935_v2, %v5818_v62  ;;  %6936 = vrcp.f32 %v12475_v27  ;;  %v6012_v25 = vmul.f32 %v6011_v40, %v12389_v46  ;;  %v5763_v43 = vmul.f32 %v5762_v19, %v12415_v63 }
 0x941   : > { %v6050_v9 = vmul.f32 %v6049_v26, %v12447_v12  ;;  %v5916_v26 = vadd.f32 0.00028619796, %v5915_v20  ;;  %v12489_v62 = vmul.f32 0.70710677, %v12478_v34  ;;  %v5605_v40 = vmul.f32 0.5, %v12294_v55 }
 0x942   : > { %v5820_v0 = vadd.f32 %v6935_v2, %v5819_v31  ;;  %v5873_v31 = vmul.f32 %v12484_v37, %v12484_v37  ;;  %v6013_v41 = vadd.f32 0.4994258, %v6012_v25  ;;  %vm5781_vm9 = vweird.f32 %v12475_v27 }
 0x943   : > { %v6051_v6 = vadd.f32 0.112945676, %v6050_v9  ;;  %v5995_v9 = vmul.f32 2.1237322e-06, %v12389_v46  ;;  %v5917_v36 = vmul.f32 %v5916_v26, %v12459_v33  ;;  %v6073_v56 = vmul.f32 %v12489_v62, %v12489_v62 }
 0x944   : > { %v5824_v14 = vsel %vm5823_vm13, %v6935_v2, %v5820_v0  ;;  %v6039_v2 = vmul.f32 %v6038_v61, %v12447_v12  ;;  %v5764_v61 = vadd.f32 1.1283791, %v5763_v43  ;;  %v5785_v26 = vand.u32 2147483647, %v12475_v27 }
 0x945   : > { %v6052_v3 = vmul.f32 %v6051_v6, %v12447_v12  ;;  %v5829_v7 = vsel %vm5826_vm7, %v5828_v60, %v5824_v14  ;;  %v5929_v6 = vadd.f32 0.014752088, %v5928_v30  ;;  %v5996_v16 = vadd.f32 0.00028619796, %v5995_v9 }
 0x946   : > { %v5830_v29 = vmul.f32 %v5829_v7, %v5805_v38  ;;  %v6937_v20 = vpop.eup %6936  ;;  %v12502_v18 = vmin.f32 %v6073_v56, 16.0  ;;  %v5918_v38 = vadd.f32 0.0036580483, %v5917_v36  ;;  %v12509_v19 = vmin.f32 %v5873_v31, 16.0 }
 0x947   : > { %v6053_v32 = vadd.f32 0.4994258, %v6052_v3  ;;  %v6040_v3 = vadd.f32 0.05243302, %v6039_v2  ;;  %v5777_v63 = vmul.f32 %v6937_v20, %v12475_v27  ;;  %v5930_v0 = vmul.f32 %v5929_v6, %v12459_v33 }
 0x948   : > { %v6737_v50 = vclamps-f32 %v5830_v29, 1.0  ;;  %v6086_v55 = vmul.f32 3.8918573e-05, %v12502_v18  ;;  %v6014_v30 = vmul.f32 %v6013_v41, %v12389_v46  ;;  %vm5782_vm8 = vweird.f32 %v6937_v20 }
 0x949   : > { %v6054_v5 = vmul.f32 %v6053_v32, %v12447_v12  ;;  %v6075_v32 = vmul.f32 2.1237322e-06, %v12502_v18  ;;  %v5778_v14 = vsub.f32 1.0, %v5777_v63  ;;  %v5931_v7 = vadd.f32 0.112945676, %v5930_v0  ;;  %vm5783_vm12 = vmor %vm5781_vm9, %vm5782_vm8 }
 0x94a   : > { %v6277_v58 = vadd.f32 1.0, %v6737_v50  ;;  %v6087_v9 = vadd.f32 0.001143296, %v6086_v55  ;;  %v5919_v50 = vmul.f32 %v5918_v38, %v12459_v33  ;;  %v5765_v43 = vmul.f32 %v5764_v61, %v12407_v44 }
 0x94b   : > { %v12492_v23 = vadd.f32 1.0, %v6054_v5  ;;  %v5787_v5 = vand.u32 2147483648, %v12475_v27  ;;  %v6076_v29 = vadd.f32 0.00028619796, %v6075_v32  ;;  %v5779_v2 = vmul.f32 %v6937_v20, %v5778_v14 }
 0x94c   : > { %v6293_v60 = vmul.f32 %v6277_v58, %v5605_v40  ;;  %v5932_v36 = vmul.f32 %v5931_v7, %v12459_v33  ;;  %v6088_v6 = vmul.f32 %v6087_v9, %v12502_v18  ;;  %vm5786_vm10 = vcmp.eq.f32.partialorder %v5785_v26, 8.507059e+37 }
 0x94d   : > { %6938 = vrcp.f32 %v12492_v23  ;;  %v6077_v56 = vmul.f32 %v6076_v29, %v12502_v18  ;;  %v5780_v40 = vadd.f32 %v6937_v20, %v5779_v2  ;;  %v5875_v41 = vmul.f32 2.1237322e-06, %v12509_v19 }
 0x94e   : > { %6329 = vrot.lane.b32.xlu0 %v6293_v60, %s6999_s22  ;;  %v5933_v31 = vadd.f32 0.4994258, %v5932_v36  ;;  %v5788_v63 = vor.u32 1.1754944e-38, %v5787_v5  ;;  %v6089_v0 = vadd.f32 0.014752088, %v6088_v6  ;;  %v5997_v32 = vmul.f32 %v5996_v16, %v12389_v46 }
 0x94f   : > { %v6078_v38 = vadd.f32 0.0036580483, %v6077_v56  ;;  %v5784_v60 = vsel %vm5783_vm12, %v6937_v20, %v5780_v40  ;;  %v5920_v44 = vadd.f32 0.05243302, %v5919_v50  ;;  %v5886_v61 = vmul.f32 3.8918573e-05, %v12509_v19 }
 0x950   : > { %v5934_v27 = vmul.f32 %v5933_v31, %v12459_v33  ;;  %v6041_v55 = vmul.f32 %v6040_v3, %v12447_v12  ;;  %v5789_v14 = vsel %vm5786_vm10, %v5788_v63, %v5784_v60  ;;  %v6090_v26 = vmul.f32 %v6089_v0, %v12502_v18 }
 0x951   : > { %v5790_v7 = vmul.f32 %v5789_v14, %v5765_v43  ;;  %v5876_v9 = vadd.f32 0.00028619796, %v5875_v41  ;;  %v12532_v5 = vadd.f32 1.0, %v6014_v30  ;;  %v6079_v20 = vmul.f32 %v6078_v38, %v12502_v18 }
 0x952   : > { %v12530_v29 = vadd.f32 1.0, %v5934_v27  ;;  %v6091_v50 = vadd.f32 0.112945676, %v6090_v26  ;;  %v5921_v56 = vmul.f32 %v5920_v44, %v12459_v33  ;;  %v5887_v16 = vadd.f32 0.001143296, %v5886_v61 }
 0x953   : > { %v12514_v25 = vpop.eup %6938  ;;  %v6736_v36 = vclamps-f32 %v5790_v7, 1.0  ;;  %v5998_v3 = vadd.f32 0.0036580483, %v5997_v32  ;;  %v6042_v6 = vadd.f32 0.18741608, %v6041_v55  ;;  %v5604_v43 = vmul.f32 0.5, %v12400_v13 }
 0x954   : > { %v6057_v58 = vmul.f32 %v12514_v25, %v12492_v23  ;;  %6940 = vrcp.f32 %v12530_v29  ;;  %v6092_v40 = vmul.f32 %v6091_v50, %v12502_v18  ;;  %v5877_v30 = vmul.f32 %v5876_v9, %v12509_v19 }
 0x955   : > { %v6276_v31 = vadd.f32 1.0, %v6736_v36  ;;  %6942 = vrcp.f32 %v12532_v5  ;;  %v5922_v0 = vadd.f32 0.18741608, %v5921_v56  ;;  %v5888_v60 = vmul.f32 %v5887_v16, %v12509_v19 }
 0x956   : > { %v6058_v2 = vsub.f32 1.0, %v6057_v58  ;;  %v6080_v58 = vadd.f32 0.05243302, %v6079_v20  ;;  %v6093_v63 = vadd.f32 0.4994258, %v6092_v40  ;;  %v5999_v44 = vmul.f32 %v5998_v3, %v12389_v46 }
 0x957   : > { %v6292_v38 = vmul.f32 %v6276_v31, %v5604_v43  ;;  %v6043_v27 = vmul.f32 %v6042_v6, %v12447_v12  ;;  %vm6062_vm14 = vweird.f32 %v12514_v25  ;;  %v6067_v32 = vand.u32 2147483648, %v12492_v23 }
 0x958   : > { %v6059_v41 = vmul.f32 %v12514_v25, %v6058_v2  ;;  %v6094_v61 = vmul.f32 %v6093_v63, %v12502_v18  ;;  %v5878_v55 = vadd.f32 0.0036580483, %v5877_v30  ;;  %v5889_v14 = vadd.f32 0.014752088, %v5888_v60 }
 0x959   : > { %6327 = vrot.lane.b32.xlu2 %v6292_v38, %s6999_s22  ;;  %v6081_v7 = vmul.f32 %v6080_v58, %v12502_v18  ;;  %v5923_v12 = vmul.f32 %v5922_v0, %v12459_v33  ;;  %v6000_v50 = vadd.f32 0.05243302, %v5999_v44  ;;  %vm6061_vm15 = vweird.f32 %v12492_v23 }
 0x95a   : > { %v6941_v13 = vpop.eup %6940  ;;  %v6060_v26 = vadd.f32 %v12514_v25, %v6059_v41  ;;  %v12551_v9 = vadd.f32 1.0, %v6094_v61  ;;  %v5890_v20 = vmul.f32 %v5889_v14, %v12509_v19  ;;  %v6065_v36 = vand.u32 2147483647, %v12492_v23  ;;  %vm12563_vm0 = vmor %vm6061_vm15, %vm6062_vm14 }
 0x95b   : > { %v5937_v2 = vmul.f32 %v6941_v13, %v12530_v29  ;;  %v12559_v56 = vpop.eup %6942  ;;  %v6044_v16 = vadd.f32 1.1283791, %v6043_v27  ;;  %v6068_v6 = vor.u32 1.1754944e-38, %v6067_v32  ;;  %v5879_v40 = vmul.f32 %v5878_v55, %v12509_v19 }
 0x95c   : > { %6944 = vrcp.f32 %v12551_v9  ;;  %v6064_v43 = vsel %vm12563_vm0, %v12514_v25, %v6060_v26  ;;  %v6082_v23 = vadd.f32 0.18741608, %v6081_v7  ;;  %v5947_v31 = vand.u32 2147483648, %v12530_v29 }
 0x95d   : > { %v5938_v33 = vsub.f32 1.0, %v5937_v2  ;;  %v5891_v30 = vadd.f32 0.112945676, %v5890_v20  ;;  %v5924_v41 = vadd.f32 1.1283791, %v5923_v12  ;;  %vm5942_vm5 = vweird.f32 %v6941_v13 }
 0x95e   : > { %v5945_v63 = vand.u32 2147483647, %v12530_v29  ;;  %v6001_v38 = vmul.f32 %v6000_v50, %v12389_v46  ;;  %v6017_v0 = vmul.f32 %v12559_v56, %v12532_v5  ;;  %vm6066_vm4 = vcmp.eq.f32.partialorder %v6065_v36, 8.507059e+37 }
 0x95f   : > { %v5939_v58 = vmul.f32 %v6941_v13, %v5938_v33  ;;  %v5892_v60 = vmul.f32 %v5891_v30, %v12509_v19  ;;  %v6069_v44 = vsel %vm6066_vm4, %v6068_v6, %v6064_v43  ;;  %vm5941_vm6 = vweird.f32 %v12530_v29 }
 0x960   : > { %v5880_v25 = vadd.f32 0.05243302, %v5879_v40  ;;  %v6045_v32 = vmul.f32 %v6044_v16, %v12435_v22  ;;  %v6083_v55 = vmul.f32 %v6082_v23, %v12502_v18  ;;  %vm5943_vm11 = vmor %vm5941_vm6, %vm5942_vm5  ;;  %v5948_v14 = vor.u32 1.1754944e-38, %v5947_v31 }
 0x961   : > { %v5940_v27 = vadd.f32 %v6941_v13, %v5939_v58  ;;  %v5893_v26 = vadd.f32 0.4994258, %v5892_v60  ;;  %v5925_v2 = vmul.f32 %v5924_v41, %v12445_v10  ;;  %vm5946_vm1 = vcmp.eq.f32.partialorder %v5945_v63, 8.507059e+37  ;;  %v5591_v63 = vpop.f32.mrf.mxu3 }
 0x962   : > { %v6945_v61 = vpop.eup %6944  ;;  %v6070_v20 = vmul.f32 %v6069_v44, %v6045_v32  ;;  %v6002_v29 = vadd.f32 0.18741608, %v6001_v38  ;;  %v5881_v22 = vmul.f32 %v5880_v25, %v12509_v19  ;;  %v6018_v16 = vsub.f32 1.0, %v6017_v0 }
 0x963   : > { %v6097_v7 = vmul.f32 %v6945_v61, %v12551_v9  ;;  %v5944_v12 = vsel %vm5943_vm11, %v6941_v13, %v5940_v27  ;;  %v5894_v36 = vmul.f32 %v5893_v26, %v12509_v19  ;;  %v6084_v18 = vadd.f32 1.1283791, %v6083_v55 }
 0x964   : > { %v5949_v50 = vsel %vm5946_vm1, %v5948_v14, %v5944_v12  ;;  %v6107_v33 = vand.u32 2147483648, %v12551_v9  ;;  %vm6102_vm2 = vweird.f32 %v6945_v61  ;;  %v6105_v10 = vand.u32 2147483647, %v12551_v9 }
 0x965   : > { %v6098_v3 = vsub.f32 1.0, %v6097_v7  ;;  %v5950_v6 = vmul.f32 %v5949_v50, %v5925_v2  ;;  %v12585_v40 = vadd.f32 1.0, %v5894_v36  ;;  %v6743_v23 = vclamps-f32 %v6070_v20, 1.0 }
 0x966   : > { %v5608_v31 = vmul.f32 0.5, %v12430_v51  ;;  %vm6101_vm3 = vweird.f32 %v12551_v9  ;;  %v5882_v58 = vadd.f32 0.18741608, %v5881_v22  ;;  %v6003_v38 = vmul.f32 %v6002_v29, %v12389_v46 }
 0x967   : > { %v6099_v43 = vmul.f32 %v6945_v61, %v6098_v3  ;;  %v6740_v13 = vclamps-f32 %v5950_v6, 1.0  ;;  %6946 = vrcp.f32 %v12585_v40  ;;  %v6019_v0 = vmul.f32 %v12559_v56, %v6018_v16  ;;  %vm6103_vm13 = vmor %vm6101_vm3, %vm6102_vm2 }
 0x968   : > { %v6108_v60 = vor.u32 1.1754944e-38, %v6107_v33  ;;  %v12594_v44 = vadd.f32 %v5591_v63, %v12210_v24  ;;  %v6085_v27 = vmul.f32 %v6084_v18, %v12489_v62  ;;  %vm6106_vm7 = vcmp.eq.f32.partialorder %v6105_v10, 8.507059e+37 }
 0x969   : > { %v6100_v30 = vadd.f32 %v6945_v61, %v6099_v43  ;;  %v6280_v41 = vadd.f32 1.0, %v6740_v13  ;;  %v6283_v55 = vadd.f32 1.0, %v6743_v23  ;;  %v5883_v46 = vmul.f32 %v5882_v58, %v12509_v19 }
 0x96a   : > { %v12598_v9 = vmul.f32 0.70710677, %v12594_v44  ;;  %v6004_v7 = vadd.f32 1.1283791, %v6003_v38  ;;  %v6020_v2 = vadd.f32 %v12559_v56, %v6019_v0  ;;  %vm6022_vm8 = vweird.f32 %v12559_v56 }
 0x96b   : > { %v6104_v51 = vsel %vm6103_vm13, %v6945_v61, %v6100_v30  ;;  %v6296_v25 = vmul.f32 %v6280_v41, %v5608_v31  ;;  %vm6021_vm9 = vweird.f32 %v12532_v5  ;;  %v5611_v61 = vmul.f32 0.5, %v12426_v48 }
 0x96c   : > { %v6109_v32 = vsel %vm6106_vm7, %v6108_v60, %v6104_v51  ;;  %v6113_v62 = vmul.f32 %v12598_v9, %v12598_v9  ;;  %v6025_v50 = vand.u32 2147483647, %v12532_v5  ;;  %v6027_v19 = vand.u32 2147483648, %v12532_v5  ;;  %vm12614_vm10 = vmor %vm6021_vm9, %vm6022_vm8 }
 0x96d   : > { %v6110_v14 = vmul.f32 %v6109_v32, %v6085_v27  ;;  %6335 = vrot.lane.b32.xlu0 %v6296_v25, %s6999_s22  ;;  %v6947_v26 = vpop.eup %6946  ;;  %v5612_v36 = vmul.f32 0.5, %v12478_v34  ;;  %v6299_v6 = vmul.f32 %v6283_v55, %v5611_v61  ;;  %v5884_v16 = vadd.f32 1.1283791, %v5883_v46 }
 0x96e   : > { %v5897_v20 = vmul.f32 %v6947_v26, %v12585_v40  ;;  %v12612_v29 = vmin.f32 %v6113_v62, 16.0  ;;  %v6024_v48 = vsel %vm12614_vm10, %v12559_v56, %v6020_v2  ;;  %v5907_v33 = vand.u32 2147483648, %v12585_v40 }
 0x96f   : > { %v6744_v12 = vclamps-f32 %v6110_v14, 1.0  ;;  %vm5902_vm12 = vweird.f32 %v6947_v26  ;;  %v5905_v13 = vand.u32 2147483647, %v12585_v40  ;;  %v6028_v23 = vor.u32 1.1754944e-38, %v6027_v19 }
 0x970   : > { %v5898_v18 = vsub.f32 1.0, %v5897_v20  ;;  %v6115_v5 = vmul.f32 2.1237322e-06, %v12612_v29  ;;  %v6126_v34 = vmul.f32 3.8918573e-05, %v12612_v29  ;;  %vm6026_vm14 = vcmp.eq.f32.partialorder %v6025_v50, 8.507059e+37 }
 0x971   : > { %v6284_v22 = vadd.f32 1.0, %v6744_v12  ;;  %vm5901_vm15 = vweird.f32 %v12585_v40  ;;  %v6029_v56 = vsel %vm6026_vm14, %v6028_v23, %v6024_v48  ;;  %v5908_v58 = vor.u32 1.1754944e-38, %v5907_v33 }
 0x972   : > { %v5899_v10 = vmul.f32 %v6947_v26, %v5898_v18  ;;  %v6116_v31 = vadd.f32 0.00028619796, %v6115_v5  ;;  %v6127_v30 = vadd.f32 0.001143296, %v6126_v34  ;;  %vm5903_vm0 = vmor %vm5901_vm15, %vm5902_vm12  ;;  %v6005_v0 = vmul.f32 %v6004_v7, %v12372_v28  ;;  %v5593_v28 = vpop.f32.mrf.mxu3 }
 0x973   : > { %v6300_v43 = vmul.f32 %v6284_v22, %v5612_v36  ;;  %v5885_v60 = vmul.f32 %v5884_v16, %v12484_v37  ;;  %vm5906_vm5 = vcmp.eq.f32.partialorder %v5905_v13, 8.507059e+37  ;;  %v5607_v12 = vmul.f32 0.5, %v12471_v11 }
 0x974   : > { %v5900_v41 = vadd.f32 %v6947_v26, %v5899_v10  ;;  %v6117_v63 = vmul.f32 %v6116_v31, %v12612_v29  ;;  %v6128_v38 = vmul.f32 %v6127_v30, %v12612_v29  ;;  %v6030_v32 = vmul.f32 %v6029_v56, %v6005_v0 }
 0x975   : > { %6341 = vrot.lane.b32.xlu0 %v6299_v6, %s6999_s22  ;;  %6343 = vrot.lane.b32.xlu1 %v6300_v43, %s6999_s22  ;;  %v5610_v11 = vmul.f32 0.5, %v12358_v8  ;;  %vm6401_vm8 = vcmask 257216  }
 0x976   : > { %v5904_v27 = vsel %vm5903_vm0, %v6947_v26, %v5900_v41  ;;  %v6118_v25 = vadd.f32 0.0036580483, %v6117_v63  ;;  %v6129_v40 = vadd.f32 0.014752088, %v6128_v38  ;;  %v6742_v61 = vclamps-f32 %v6030_v32, 1.0 }
 0x977   : > { %v5909_v51 = vsel %vm5906_vm5, %v5908_v58, %v5904_v27  ;;  %v12637_v26 = vadd.f32 %v5593_v28, %v12210_v24 }
 0x978   : > { %v5910_v55 = vmul.f32 %v5909_v51, %v5885_v60  ;;  %v6130_v14 = vmul.f32 %v6129_v40, %v12612_v29  ;;  %v6119_v2 = vmul.f32 %v6118_v25, %v12612_v29  ;;  %v6282_v36 = vadd.f32 1.0, %v6742_v61 }
 0x979   : > { %v12641_v3 = vmul.f32 0.70710677, %v12637_v26 }
 0x97a   : > { %v6739_v46 = vclamps-f32 %v5910_v55, 1.0  ;;  %v6131_v62 = vadd.f32 0.112945676, %v6130_v14  ;;  %v6120_v50 = vadd.f32 0.05243302, %v6119_v2  ;;  %v6298_v48 = vmul.f32 %v6282_v36, %v5610_v11 }
 0x97b   : > { %v6153_v22 = vmul.f32 %v12641_v3, %v12641_v3 }
 0x97c   : > { %v6279_v20 = vadd.f32 1.0, %v6739_v46  ;;  %v6132_v37 = vmul.f32 %v6131_v62, %v12612_v29  ;;  %v6121_v16 = vmul.f32 %v6120_v50, %v12612_v29 }
 0x97d   : > { %v6154_v33 = vmin.f32 %v6153_v22, 16.0 }
 0x97e   : > { %v6295_v7 = vmul.f32 %v6279_v20, %v5607_v12  ;;  %v6133_v19 = vadd.f32 0.4994258, %v6132_v37  ;;  %v6122_v43 = vadd.f32 0.18741608, %v6121_v16 }
 0x97f   : > { %v6155_v5 = vmul.f32 2.1237322e-06, %v6154_v33  ;;  %v6166_v34 = vmul.f32 3.8918573e-05, %v6154_v33 }
 0x980   : > { %6333 = vrot.lane.b32.xlu2 %v6295_v7, %s6999_s22  ;;  %v6134_v6 = vmul.f32 %v6133_v19, %v12612_v29  ;;  %v6123_v8 = vmul.f32 %v6122_v43, %v12612_v29  ;;  %v5596_v32 = vpop.f32.mrf.mxu3 }
 0x981   : > { %v6156_v10 = vadd.f32 0.00028619796, %v6155_v5  ;;  %v6167_v13 = vadd.f32 0.001143296, %v6166_v34  ;;  %v12651_v46 = vadd.f32 %v5596_v32, %v12210_v24 }
 0x982   : > { %v6135_v18 = vadd.f32 1.0, %v6134_v6  ;;  %v6124_v0 = vadd.f32 1.1283791, %v6123_v8 }
 0x983   : > { %v6157_v23 = vmul.f32 %v6156_v10, %v6154_v33  ;;  %v6168_v31 = vmul.f32 %v6167_v13, %v6154_v33  ;;  %v12655_v28 = vmul.f32 0.70710677, %v12651_v46 }
 0x984   : > { %6948 = vrcp.f32 %v6135_v18  ;;  %v6147_v60 = vand.u32 2147483648, %v6135_v18  ;;  %v6145_v51 = vand.u32 2147483647, %v6135_v18  ;;  %vm6141_vm6 = vweird.f32 %v6135_v18 }
 0x985   : > { %v6169_v56 = vadd.f32 0.014752088, %v6168_v31  ;;  %v6158_v58 = vadd.f32 0.0036580483, %v6157_v23  ;;  %v6125_v2 = vmul.f32 %v6124_v0, %v12598_v9  ;;  %v6193_v50 = vmul.f32 %v12655_v28, %v12655_v28 }
 0x986   : > { %v6148_v29 = vor.u32 1.1754944e-38, %v6147_v60  ;;  %vm6146_vm1 = vcmp.eq.f32.partialorder %v6145_v51, 8.507059e+37  ;;  %v5613_v9 = vmul.f32 0.5, %v12594_v44 }
 0x987   : > { %v6170_v38 = vmul.f32 %v6169_v56, %v6154_v33  ;;  %v6159_v40 = vmul.f32 %v6158_v58, %v6154_v33  ;;  %v12659_v11 = vmin.f32 %v6193_v50, 16.0 }
 0x988   : > { %6339 = vrot.lane.b32.xlu2 %v6298_v48, %s6999_s22 }
 0x989   : > { %v6171_v25 = vadd.f32 0.112945676, %v6170_v38  ;;  %v6160_v20 = vadd.f32 0.05243302, %v6159_v40  ;;  %v6195_v16 = vmul.f32 2.1237322e-06, %v12659_v11  ;;  %v5598_v40 = vpop.f32.mrf.mxu3 }
 0x98a   : > { %v6949_v30 = vpop.eup %6948  ;;  %v6206_v48 = vmul.f32 3.8918573e-05, %v12659_v11 }
 0x98b   : > { %v6137_v41 = vmul.f32 %v6949_v30, %v6135_v18  ;;  %vm6142_vm4 = vweird.f32 %v6949_v30  ;;  %v6172_v14 = vmul.f32 %v6171_v25, %v6154_v33  ;;  %v6161_v6 = vmul.f32 %v6160_v20, %v6154_v33  ;;  %v6322_v25 = vpop.permute.xlu2 %6321 }
 0x98c   : > { %vm6143_vm11 = vmor %vm6141_vm6, %vm6142_vm4  ;;  %v6196_v34 = vadd.f32 0.00028619796, %v6195_v16  ;;  %v6207_v43 = vadd.f32 0.001143296, %v6206_v48 }
 0x98d   : > { %v6138_v63 = vsub.f32 1.0, %v6137_v41  ;;  %v6173_v61 = vadd.f32 0.4994258, %v6172_v14  ;;  %v6162_v5 = vadd.f32 0.18741608, %v6161_v6  ;;  %v12672_v14 = vadd.f32 %v5598_v40, %v12210_v24 }
 0x98e   : > { %v6197_v10 = vmul.f32 %v6196_v34, %v12659_v11  ;;  %v6208_v23 = vmul.f32 %v6207_v43, %v12659_v11 }
 0x98f   : > { %v6139_v27 = vmul.f32 %v6949_v30, %v6138_v63  ;;  %v6174_v7 = vmul.f32 %v6173_v61, %v6154_v33  ;;  %v6163_v31 = vmul.f32 %v6162_v5, %v6154_v33 }
 0x990   : > { %v6198_v44 = vadd.f32 0.0036580483, %v6197_v10  ;;  %v6209_v8 = vadd.f32 0.014752088, %v6208_v23 }
 0x991   : > { %v6140_v55 = vadd.f32 %v6949_v30, %v6139_v27  ;;  %v6175_v36 = vadd.f32 1.0, %v6174_v7  ;;  %v6164_v63 = vadd.f32 1.1283791, %v6163_v31  ;;  %v12676_v7 = vmul.f32 0.70710677, %v12672_v14 }
 0x992   : > { %v6210_v58 = vmul.f32 %v6209_v8, %v12659_v11  ;;  %v6199_v60 = vmul.f32 %v6198_v44, %v12659_v11 }
 0x993   : > { %v6144_v62 = vsel %vm6143_vm11, %v6949_v30, %v6140_v55  ;;  %6950 = vrcp.f32 %v6175_v36  ;;  %v6187_v56 = vand.u32 2147483648, %v6175_v36  ;;  %v6185_v0 = vand.u32 2147483647, %v6175_v36 }
 0x994   : > { %v6149_v12 = vsel %vm6146_vm1, %v6148_v29, %v6144_v62  ;;  %v6211_v27 = vadd.f32 0.112945676, %v6210_v58  ;;  %vm6181_vm3 = vweird.f32 %v6175_v36  ;;  %v6369_v55 = vadd.f32 %v6322_v25, %v13990_v1 }
 0x995   : > { %v6150_v37 = vmul.f32 %v6149_v12, %v6125_v2  ;;  %v6188_v33 = vor.u32 1.1754944e-38, %v6187_v56  ;;  %v6165_v29 = vmul.f32 %v6164_v63, %v12641_v3  ;;  %vm6186_vm7 = vcmp.eq.f32.partialorder %v6185_v0, 8.507059e+37 }
 0x996   : > { %v6212_v32 = vmul.f32 %v6211_v27, %v12659_v11  ;;  %v6200_v61 = vadd.f32 0.05243302, %v6199_v60  ;;  %v6385_v20 = vpack.c.bf16 %v6369_v55, %v6369_v55  ;;  %v6233_v24 = vmul.f32 %v12676_v7, %v12676_v7 }
 0x997   : > { %v6745_v19 = vclamps-f32 %v6150_v37, 1.0 }
 0x998   : > { %v6213_v12 = vadd.f32 0.4994258, %v6212_v32  ;;  %6402 = vst.msk [vmem:[%s9037_s18] sm:$0xf] %vm6401_vm8, %v6385_v20  ;;  %v6201_v3 = vmul.f32 %v6200_v61, %v12659_v11 }
 0x999   : > { %v6285_v22 = vadd.f32 1.0, %v6745_v19  ;;  %v6951_v13 = vpop.eup %6950 }
 0x99a   : > { %v6177_v30 = vmul.f32 %v6951_v13, %v6175_v36  ;;  %vm6182_vm2 = vweird.f32 %v6951_v13  ;;  %v6214_v50 = vmul.f32 %v6213_v12, %v12659_v11  ;;  %v5614_v36 = vmul.f32 0.5, %v12637_v26 }
 0x99b   : > { %v6301_v18 = vmul.f32 %v6285_v22, %v5613_v9  ;;  %vm6183_vm13 = vmor %vm6181_vm3, %vm6182_vm2  ;;  %v12685_v9 = vmin.f32 %v6233_v24, 16.0  ;;  %v6202_v48 = vadd.f32 0.18741608, %v6201_v3 }
 0x99c   : > { %v6178_v41 = vsub.f32 1.0, %v6177_v30  ;;  %v6215_v19 = vadd.f32 1.0, %v6214_v50 }
 0x99d   : > { %6345 = vrot.lane.b32.xlu2 %v6301_v18, %s6999_s22  ;;  %v6235_v16 = vmul.f32 2.1237322e-06, %v12685_v9  ;;  %v6246_v18 = vmul.f32 3.8918573e-05, %v12685_v9  ;;  %v6203_v26 = vmul.f32 %v6202_v48, %v12659_v11 }
 0x99e   : > { %v6179_v38 = vmul.f32 %v6951_v13, %v6178_v41  ;;  %6952 = vrcp.f32 %v6215_v19  ;;  %v6225_v56 = vand.u32 2147483647, %v6215_v19  ;;  %v6227_v58 = vand.u32 2147483648, %v6215_v19 }
 0x99f   : > { %v6236_v5 = vadd.f32 0.00028619796, %v6235_v16  ;;  %v6247_v34 = vadd.f32 0.001143296, %v6246_v18  ;;  %v6204_v41 = vadd.f32 1.1283791, %v6203_v26  ;;  %vm6221_vm10 = vweird.f32 %v6215_v19 }
 0x9a0   : > { %v6180_v51 = vadd.f32 %v6951_v13, %v6179_v38  ;;  %vm6226_vm14 = vcmp.eq.f32.partialorder %v6225_v56, 8.507059e+37  ;;  %v6228_v40 = vor.u32 1.1754944e-38, %v6227_v58 }
 0x9a1   : > { %v6237_v43 = vmul.f32 %v6236_v5, %v12685_v9  ;;  %v6248_v10 = vmul.f32 %v6247_v34, %v12685_v9  ;;  %v6205_v25 = vmul.f32 %v6204_v41, %v12655_v28 }
 0x9a2   : > { %v6184_v2 = vsel %vm6183_vm13, %v6951_v13, %v6180_v51 }
 0x9a3   : > { %v6189_v62 = vsel %vm6186_vm7, %v6188_v33, %v6184_v2  ;;  %v6238_v31 = vadd.f32 0.0036580483, %v6237_v43  ;;  %v6249_v30 = vadd.f32 0.014752088, %v6248_v10  ;;  %v6326_v2 = vpop.permute.xlu1 %6325 }
 0x9a4   : > { %v6190_v37 = vmul.f32 %v6189_v62, %v6165_v29  ;;  %v6953_v13 = vpop.eup %6952  ;;  %v6324_v62 = vpop.permute.xlu0 %6323  ;;  %v6371_v12 = vadd.f32 %v6326_v2, %v13989_v59 }
 0x9a5   : > { %v6217_v23 = vmul.f32 %v6953_v13, %v6215_v19  ;;  %v6250_v8 = vmul.f32 %v6249_v30, %v12685_v9  ;;  %vm6222_vm9 = vweird.f32 %v6953_v13  ;;  %v6239_v38 = vmul.f32 %v6238_v31, %v12685_v9 }
 0x9a6   : > { %v6746_v1 = vclamps-f32 %v6190_v37, 1.0  ;;  %vm6223_vm12 = vmor %vm6221_vm10, %vm6222_vm9  ;;  %v6370_v20 = vadd.f32 %v6324_v62, %v13991_v45  ;;  %v6387_v28 = vpack.c.bf16 %v6371_v12, %v6371_v12  ;;  %v5615_v19 = vmul.f32 0.5, %v12651_v46 }
 0x9a7   : > { %v6218_v44 = vsub.f32 1.0, %v6217_v23  ;;  %v6251_v0 = vadd.f32 0.112945676, %v6250_v8  ;;  %v6240_v32 = vadd.f32 0.05243302, %v6239_v38  ;;  %v5616_v38 = vmul.f32 0.5, %v12672_v14 }
 0x9a8   : > { %v6286_v6 = vadd.f32 1.0, %v6746_v1  ;;  %v6386_v50 = vpack.c.bf16 %v6370_v20, %v6370_v20  ;;  %6404 = vst.msk [vmem:[%s9037_s18 + $0x8] sm:$0xf] %vm6401_vm8, %v6387_v28 }
 0x9a9   : > { %v6219_v63 = vmul.f32 %v6953_v13, %v6218_v44  ;;  %v6252_v51 = vmul.f32 %v6251_v0, %v12685_v9  ;;  %v6241_v24 = vmul.f32 %v6240_v32, %v12685_v9 }
 0x9aa   : > { %v6302_v22 = vmul.f32 %v6286_v6, %v5614_v36  ;;  %6403 = vst.msk [vmem:[%s9037_s18 + $0x4] sm:$0xf] %vm6401_vm8, %v6386_v50 }
 0x9ab   : > { %v6220_v27 = vadd.f32 %v6953_v13, %v6219_v63  ;;  %v6253_v55 = vadd.f32 0.4994258, %v6252_v51  ;;  %v6242_v45 = vadd.f32 0.18741608, %v6241_v24  ;;  %v6332_v6 = vpop.permute.xlu1 %6331 }
 0x9ac   : > { %6347 = vrot.lane.b32.xlu0 %v6302_v22, %s6999_s22  ;;  %v6374_v16 = vadd.f32 %v6332_v6, %v13992_v15 }
 0x9ad   : > { %v6224_v33 = vsel %vm6223_vm12, %v6953_v13, %v6220_v27  ;;  %v6254_v37 = vmul.f32 %v6253_v55, %v12685_v9  ;;  %v6243_v46 = vmul.f32 %v6242_v45, %v12685_v9 }
 0x9ae   : > { %v6229_v61 = vsel %vm6226_vm14, %v6228_v40, %v6224_v33  ;;  %v6390_v48 = vpack.c.bf16 %v6374_v16, %v6374_v16 }
 0x9af   : > { %v6255_v3 = vadd.f32 1.0, %v6254_v37  ;;  %v6244_v13 = vadd.f32 1.1283791, %v6243_v46 }
 0x9b0   : > { %6407 = vst.msk [vmem:[%s9037_s18 + $0x14] sm:$0xf] %vm6401_vm8, %v6390_v48 }
 0x9b1   : > { %6954 = vrcp.f32 %v6255_v3  ;;  %v6267_v26 = vand.u32 2147483648, %v6255_v3  ;;  %vm6261_vm0 = vweird.f32 %v6255_v3  ;;  %v6245_v8 = vmul.f32 %v6244_v13, %v12676_v7 }
 0x9b3   : > { %v6328_v60 = vpop.permute.xlu2 %6327  ;;  %v6338_v23 = vpop.permute.xlu1 %6337  ;;  %v6268_v9 = vor.u32 1.1754944e-38, %v6267_v26 }
 0x9b4   : > { %v6372_v11 = vadd.f32 %v6328_v60, %v13994_v54  ;;  %v6230_v54 = vmul.f32 %v6229_v61, %v6205_v25  ;;  %v6377_v31 = vadd.f32 %v6338_v23, %v14006_v17 }
 0x9b6   : > { %v6388_v29 = vpack.c.bf16 %v6372_v11, %v6372_v11  ;;  %v6747_v1 = vclamps-f32 %v6230_v54, 1.0  ;;  %v6393_v44 = vpack.c.bf16 %v6377_v31, %v6377_v31 }
 0x9b7   : > { %v6955_v34 = vpop.eup %6954 }
 0x9b8   : > { %6405 = vst.msk [vmem:[%s9037_s18 + $0xc] sm:$0xf] %vm6401_vm8, %v6388_v29  ;;  %v6287_v36 = vadd.f32 1.0, %v6747_v1  ;;  %v6257_v43 = vmul.f32 %v6955_v34, %v6255_v3  ;;  %vm6262_vm15 = vweird.f32 %v6955_v34 }
 0x9b9   : > { %vm6263_vm5 = vmor %vm6261_vm0, %vm6262_vm15  ;;  %6410 = vst.msk [vmem:[%s9037_s18 + $0x20] sm:$0xf] %vm6401_vm8, %v6393_v44 }
 0x9ba   : > { %v6303_v59 = vmul.f32 %v6287_v36, %v5615_v19  ;;  %v6258_v10 = vsub.f32 1.0, %v6257_v43 }
 0x9bc   : > { %6349 = vrot.lane.b32.xlu1 %v6303_v59, %s6999_s22  ;;  %v6259_v15 = vmul.f32 %v6955_v34, %v6258_v10 }
 0x9be   : > { %v6260_v30 = vadd.f32 %v6955_v34, %v6259_v15 }
 0x9c0   : > { %v6330_v22 = vpop.permute.xlu0 %6329  ;;  %v6264_v41 = vsel %vm6263_vm5, %v6955_v34, %v6260_v30 }
 0x9c1   : > { %v6373_v18 = vadd.f32 %v6330_v22, %v13997_v21  ;;  %v6265_v21 = vand.u32 2147483647, %v6255_v3 }
 0x9c3   : > { %v6389_v5 = vpack.c.bf16 %v6373_v18, %v6373_v18  ;;  %vm6266_vm4 = vcmp.eq.f32.partialorder %v6265_v21, 8.507059e+37 }
 0x9c4   : > { %v6269_v56 = vsel %vm6266_vm4, %v6268_v9, %v6264_v41 }
 0x9c5   : > { %6406 = vst.msk [vmem:[%s9037_s18 + $0x10] sm:$0xf] %vm6401_vm8, %v6389_v5  ;;  %v6270_v58 = vmul.f32 %v6269_v56, %v6245_v8 }
 0x9c7   : > { %v6748_v63 = vclamps-f32 %v6270_v58, 1.0 }
 0x9c9   : > { %v6288_v0 = vadd.f32 1.0, %v6748_v63 }
 0x9cb   : > { %v6304_v27 = vmul.f32 %v6288_v0, %v5616_v38 }
 0x9cd   : > { %6351 = vrot.lane.b32.xlu2 %v6304_v27, %s6999_s22 }
 0x9da   : > { %v6334_v17 = vpop.permute.xlu2 %6333 }
 0x9db   : > { %v6375_v60 = vadd.f32 %v6334_v17, %v14007_v53 }
 0x9dd   : > { %v6391_v51 = vpack.c.bf16 %v6375_v60, %v6375_v60 }
 0x9df   : > { %v6336_v11 = vpop.permute.xlu0 %6335  ;;  %6408 = vst.msk [vmem:[%s9037_s18 + $0x18] sm:$0xf] %vm6401_vm8, %v6391_v51 }
 0x9e0   : > { %v6376_v7 = vadd.f32 %v6336_v11, %v14008_v52 }
 0x9e2   : > { %v6392_v25 = vpack.c.bf16 %v6376_v7, %v6376_v7  ;;  %v6340_v40 = vpop.permute.xlu2 %6339 }
 0x9e3   : > { %v6378_v14 = vadd.f32 %v6340_v40, %v14017_v57 }
 0x9e4   : > { %6409 = vst.msk [vmem:[%s9037_s18 + $0x1c] sm:$0xf] %vm6401_vm8, %v6392_v25 }
 0x9e5   : > { %v6394_v33 = vpack.c.bf16 %v6378_v14, %v6378_v14 }
 0x9e7   : > { %v6342_v53 = vpop.permute.xlu0 %6341  ;;  %v6344_v32 = vpop.permute.xlu1 %6343  ;;  %6411 = vst.msk [vmem:[%s9037_s18 + $0x24] sm:$0xf] %vm6401_vm8, %v6394_v33 }
 0x9e8   : > { %v6379_v55 = vadd.f32 %v6342_v53, %v14025_v35  ;;  %v6380_v29 = vadd.f32 %v6344_v32, %v14018_v4 }
 0x9ea   : > { %v6395_v2 = vpack.c.bf16 %v6379_v55, %v6379_v55  ;;  %v6396_v62 = vpack.c.bf16 %v6380_v29, %v6380_v29 }
 0x9ec   : > { %6412 = vst.msk [vmem:[%s9037_s18 + $0x28] sm:$0xf] %vm6401_vm8, %v6395_v2 }
 0x9ed   : > { %6413 = vst.msk [vmem:[%s9037_s18 + $0x2c] sm:$0xf] %vm6401_vm8, %v6396_v62 }
 0x9f7   : > { %v6346_v52 = vpop.permute.xlu2 %6345 }
 0x9f8   : > { %v6381_v57 = vadd.f32 %v6346_v52, %v14036_v42 }
 0x9fa   : > { %v6397_v61 = vpack.c.bf16 %v6381_v57, %v6381_v57 }
 0x9fc   : > { %6414 = vst.msk [vmem:[%s9037_s18 + $0x30] sm:$0xf] %vm6401_vm8, %v6397_v61 }
 0xa1e   : > { %v6348_v12 = vpop.permute.xlu0 %6347 }
 0xa1f   : > { %v6382_v20 = vadd.f32 %v6348_v12, %v14039_v39 }
 0xa21   : > { %v6398_v35 = vpack.c.bf16 %v6382_v20, %v6382_v20 }
 0xa23   : > { %6415 = vst.msk [vmem:[%s9037_s18 + $0x34] sm:$0xf] %vm6401_vm8, %v6398_v35 }
 0xa27   : > { %v6352_v4 = vpop.permute.xlu2 %6351 }
 0xa28   : > { %v6384_v54 = vadd.f32 %v6352_v4, %v14049_v49 }
 0xa2a   : > { %v6400_v37 = vpack.c.bf16 %v6384_v54, %v6384_v54 }
 0xa2c   : > { %6417 = vst.msk [vmem:[%s9037_s18 + $0x3c] sm:$0xf] %vm6401_vm8, %v6400_v37 }
 0xa2e   : > { %v6350_v28 = vpop.permute.xlu1 %6349 }
 0xa2f   : > { %v6383_v50 = vadd.f32 %v6350_v28, %v14032_v47 }
 0xa31   : > { %v6399_v1 = vpack.c.bf16 %v6383_v50, %v6383_v50 }
 0xa33   : > { %6416 = vst.msk [vmem:[%s9037_s18 + $0x38] sm:$0xf] %vm6401_vm8, %v6399_v1 }
 0xa34 PF: > { %s13_s14 = sadd.s32 1, %s6995_s14   ;;  %s14214_s12 = smov %s6991_s13 }
 0xa35   : > { %p10_p5 = scmp.ge.s32.totalorder %s13_s14, 4   ;;  %s14215_s13 = smov %s14217_s15 }
 0xa37   :  { %12 = sbr.rel (!%p10_p5) target bundleno = 2 (0x2), region = 66 }

</bundles_post_ra>
